<compile_context>
chip_gen: v6e
topology: v6e:2x2x1
jax: 0.10.0
libtpu: 0.0.40
codegen_flags: <defaults>
</compile_context>

<pallas_src>
import functools
import math

import jax
import jax.numpy as jnp
from jax.experimental import pallas as pl
from jax.experimental.pallas import tpu as pltpu

# ------------------------- problem sizes (small) -----------------------------
BATCH = 2
NFEATURE_DIM = 1            # node (LLR) channels; =1 so nhop reshape -> 1 global factor
HOP_ORDER = 4               # check-node degree
NEDGE_TYPE = 3
CODE_LEN = 16
CHECK_LEN = 8
VAR_DEG = 2                 # variable-node degree (width of nn_idx_f2v / efeature_f2v)
FILTERS = [64, 64, 64, 128, 256, 256, 128, 64, 64]
NEDGE = [NEDGE_TYPE, 1]     # edge types per factor graph: [LDPC graph, high-order graph]
WITH_RESIDUAL = True
NLAYERS = len(FILTERS) - 1  # 8 message-passing layers
# aggregator = 'max' (the module default) is what the in-kernel reduction implements.


# --------------------- packed per-layer weight layout ------------------------
def _layer_slices(cp, c):
    """Row offsets of each sub-matrix inside the packed per-layer weight
    [7*cp + 8*c, c].  Sub-blocks, in order:
      vf0_e   [cp, c]  per-edge-type variable->factor conv (LDPC graph)
      vf1     [cp, c]  variable->factor conv (high-order graph)
      fupd0_h [cp, c], fupd0_m [c, c]   factor update split over concat([h_f0, msg0])
      fupd1_h [cp, c], fupd1_m [c, c]   factor update split over concat([h_f1, msg1])
      fv0_e   [c, c]   per-edge-type factor->variable conv (LDPC graph)
      fv1     [c, c]   factor->variable conv (high-order graph)
      vupd_h  [cp, c], vupd_m0 [c, c], vupd_m1 [c, c]   variable update split
    """
    names_rows = (
        [(f"vf0_{e}", cp) for e in range(NEDGE[0])]
        + [("vf1", cp), ("fupd0_h", cp), ("fupd0_m", c),
           ("fupd1_h", cp), ("fupd1_m", c)]
        + [(f"fv0_{e}", c) for e in range(NEDGE[0])]
        + [("fv1", c), ("vupd_h", cp), ("vupd_m0", c), ("vupd_m1", c)]
    )
    out, off = {}, 0
    for name, rows in names_rows:
        out[name] = (off, rows)
        off += rows
    return out, off


# ----------------------------- fused Pallas kernel ----------------------------
def _fused_fgnn_kernel(*refs, treedef, num_data):
    """Whole FactorNN forward (embeddings, all message-passing layers, output
    head, residual, slice) for one batch element, fully VMEM-resident."""
    node_ref, hop_ref, nhop_ref, av2f_ref, af2v_ref = refs[:num_data]
    out_ref = refs[-1]
    params = jax.tree_util.tree_unflatten(treedef, refs[num_data:-1])

    def mm(x, w):
        # bf16 MXU matmul, f32 accumulation; epilogues stay f32.
        return jnp.dot(x.astype(jnp.bfloat16), w.astype(jnp.bfloat16),
                       preferred_element_type=jnp.float32)

    def relu(x):
        return jnp.maximum(x, 0.0)

    n_var, n_fac = CODE_LEN, CHECK_LEN
    k_v2f, k_f2v, n_et = HOP_ORDER, VAR_DEG, NEDGE[0]

    node = node_ref[0]                       # [n_var, 1]               f32
    hop = hop_ref[0]                         # [n_fac, hop_order]       f32
    nhop = nhop_ref[0]                       # [1, n_var]               f32
    a_v2f = av2f_ref[0]                      # [K*n_fac, E*n_var]       bf16
    a_f2v = af2v_ref[0]                      # [K'*n_var, E*n_fac]      bf16

    # ---- input embeddings (channels-last, channels on the lane axis) -------
    h_v = relu(node * params['embed_v']['W'][...] + params['embed_v']['b'][...])        # [N, 64]
    h_f0 = relu(mm(hop, params['embed_f0']['W'][...]) + params['embed_f0']['b'][...])   # [F, 64]
    h_f1 = relu(mm(nhop, params['embed_f1']['W'][...]) + params['embed_f1']['b'][...])  # [1, 64]

    # ---- message-passing layers (unrolled; all weights stay in VMEM) -------
    for layer in range(NLAYERS):
        cp, c = FILTERS[layer], FILTERS[layer + 1]
        sl, _ = _layer_slices(cp, c)
        w_ref = params['layers'][layer]['W']     # [7*cp + 8*c, c] bf16 (packed)
        b_ref = params['layers'][layer]['b']     # [3, 1, c] f32 biases

        def wblk(name, _w=w_ref, _sl=sl):
            off, rows = _sl[name]
            return _w[off:off + rows, :]

        hb_v = h_v.astype(jnp.bfloat16)          # cast once per layer
        hb_f0 = h_f0.astype(jnp.bfloat16)
        hb_f1 = h_f1.astype(jnp.bfloat16)

        # variable -> factor messages, LDPC check graph ("project-then-gather"):
        # per-edge-type projections first, then one MXU call against the
        # etype-weighted one-hot gather matrix gives every neighbor-slot row.
        p = jnp.concatenate([mm(hb_v, wblk(f'vf0_{e}')) for e in range(n_et)],
                            axis=0)                               # [E*N, c]
        s = mm(a_v2f, p)                                          # [K*F, c]
        msg0 = s[0:n_fac]
        for k in range(1, k_v2f):                                 # 'max' aggregator
            msg0 = jnp.maximum(msg0, s[k * n_fac:(k + 1) * n_fac])   # [F, c]

        # variable -> factor, high-order graph: the single factor sees every
        # variable with unit edge weight -> plain max over variables.
        msg1 = jnp.max(mm(hb_v, wblk('vf1')), axis=0, keepdims=True)  # [1, c]

        # factor updates: W @ concat([h_f, msg]) == W_h @ h_f + W_m @ msg.
        h_f0 = relu(mm(hb_f0, wblk('fupd0_h')) + mm(msg0, wblk('fupd0_m')) + b_ref[0])
        h_f1 = relu(mm(hb_f1, wblk('fupd1_h')) + mm(msg1, wblk('fupd1_m')) + b_ref[1])
        hb_f0 = h_f0.astype(jnp.bfloat16)
        hb_f1 = h_f1.astype(jnp.bfloat16)

        # factor -> variable messages, LDPC check graph (project-then-gather).
        p2 = jnp.concatenate([mm(hb_f0, wblk(f'fv0_{e}')) for e in range(n_et)],
                             axis=0)                              # [E*F, c]
        s2 = mm(a_f2v, p2)                                        # [K'*N, c]
        mv0 = s2[0:n_var]
        for k in range(1, k_f2v):
            mv0 = jnp.maximum(mv0, s2[k * n_var:(k + 1) * n_var])    # [N, c]

        # factor -> variable, high-order graph: unit-weight single neighbor
        # (factor 0); its message is identical for every variable, so keep it
        # as one row and let the final add broadcast it.
        mv1_row = mm(hb_f1, wblk('fv1'))                             # [1, c]

        # variable update: W @ concat([h_v, mv0, mv1]) as three split matmuls.
        h_v = relu(mm(hb_v, wblk('vupd_h')) + mm(mv0, wblk('vupd_m0'))
                   + mm(mv1_row, wblk('vupd_m1')) + b_ref[2])        # [N, c]

    # ---- output head (1 channel), residual add, final info-bit slice -------
    logit = jnp.sum(h_v * params['out']['W'][...], axis=1, keepdims=True)
    logit = logit + params['out']['b'][...]                          # [N, 1]
    if WITH_RESIDUAL:
        logit = logit + node                                         # nfeature_dim == 1
    out_ref[0] = logit[0:CODE_LEN - CHECK_LEN, :]


# ------------------------------ XLA-side glue ---------------------------------
def _emodel_apply(p, x):
    """Sequential(Conv2d(hop+1, 64, 1), ReLU, Conv2d(64, nedge_type, 1)) on NCHW x."""
    h = jnp.einsum('bchw,oc->bohw', x, p['W1']) + p['b1'][None, :, None, None]
    h = jnp.maximum(h, 0.0)
    return jnp.einsum('bchw,oc->bohw', h, p['W2']) + p['b2'][None, :, None, None]


def _build_agg(etype, nn_idx, n_src):
    """Fold the neighbor gather + edge-type weighting into one bf16 matrix.

    etype: [B, E, M, K] edge weights; nn_idx: [B, M, K] neighbor indices into
    the n_src source nodes.  Returns A: [B, K*M, E*n_src] with
    A[b, k*M + m, e*n_src + s] = etype[b, e, m, k] * (s == nn_idx[b, m, k]),
    so that (A @ concat_e(src @ W_e)) produces every per-slot, edge-type-summed
    message in a single MXU call inside the fused kernel ("project-then-gather")."""
    bsz, e, m, k = etype.shape
    onehot = jax.nn.one_hot(nn_idx, n_src, dtype=jnp.float32)       # [B, M, K, S]
    a = etype[..., None] * onehot[:, None, :, :, :]                 # [B, E, M, K, S]
    a = jnp.transpose(a, (0, 3, 2, 1, 4)).reshape(bsz, k * m, e * n_src)
    return a.astype(jnp.bfloat16)


def _const_index(*_, ndim):
    return (0,) * ndim


def ldpc_forward(params, node_feature, hop_feature, nn_idx_f2v, nn_idx_v2f,
                 efeature_f2v, efeature_v2f):
    bsz = node_feature.shape[0]

    # Tiny edge-type MLPs and the one-hot aggregation-matrix prep stay in XLA
    # (a handful of ops on <1 KB tensors); everything heavy runs in the single
    # fused Pallas kernel below.
    etype_f2v = _emodel_apply(params['emodel_f2v'], efeature_f2v)    # [B, E, code, dv]
    etype_v2f = _emodel_apply(params['emodel_v2f'], efeature_v2f)    # [B, E, check, hop]

    a_v2f = _build_agg(etype_v2f, nn_idx_v2f, CODE_LEN)              # [B, hop*check, E*code]
    a_f2v = _build_agg(etype_f2v, nn_idx_f2v, CHECK_LEN)             # [B, dv*code, E*check]

    # channels-last views of the node / factor inputs
    node_cl = node_feature[:, 0, :, :]                               # [B, code, 1]
    hop_cl = jnp.transpose(hop_feature[..., 0], (0, 2, 1))           # [B, check, hop]
    nhop_cl = node_feature.reshape(bsz, 1, CODE_LEN)                 # [B, 1, code]

    leaves, treedef = jax.tree_util.tree_flatten(params['main'])
    kernel = functools.partial(_fused_fgnn_kernel, treedef=treedef, num_data=5)

    data_specs = [
        pl.BlockSpec((1, CODE_LEN, 1), lambda b: (b, 0, 0)),
        pl.BlockSpec((1, CHECK_LEN, HOP_ORDER), lambda b: (b, 0, 0)),
        pl.BlockSpec((1, 1, CODE_LEN), lambda b: (b, 0, 0)),
        pl.BlockSpec((1,) + a_v2f.shape[1:], lambda b: (b, 0, 0)),
        pl.BlockSpec((1,) + a_f2v.shape[1:], lambda b: (b, 0, 0)),
    ]
    # Weights use a constant index_map, so they are DMA'd into VMEM once and
    # stay resident across the whole (parallel) batch grid.
    weight_specs = [
        pl.BlockSpec(leaf.shape, functools.partial(_const_index, ndim=leaf.ndim))
        for leaf in leaves
    ]

    out = pl.pallas_call(
        kernel,
        out_shape=jax.ShapeDtypeStruct((bsz, CODE_LEN - CHECK_LEN, 1), jnp.float32),
        grid=(bsz,),
        in_specs=data_specs + weight_specs,
        out_specs=pl.BlockSpec((1, CODE_LEN - CHECK_LEN, 1), lambda b: (b, 0, 0)),
        compiler_params=pltpu.CompilerParams(
            dimension_semantics=("parallel",),      # batch across TCs on v7x
            vmem_limit_bytes=32 * 1024 * 1024),     # ~16 MiB needed; safe on v5e/v6e/v7x
    )(node_cl, hop_cl, nhop_cl, a_v2f, a_f2v, *leaves)

    # reference: squeeze (+unsqueeze for batch==1), then slice the info bits;
    # the kernel already emitted only the first (code_len - check_len) rows.
    return out[..., 0]


# ------------------------ deterministic parameters ----------------------------
class KeyGen:
    def __init__(self, seed):
        self._key = jax.random.PRNGKey(seed)

    def __call__(self):
        self._key, sub = jax.random.split(self._key)
        return sub


def init_params(seed=42):
    kg = KeyGen(seed)

    def rnd(shape, fan_in):
        return jax.random.normal(kg(), shape, jnp.float32) / math.sqrt(fan_in)

    def pack_layer(cp, c):
        sl, total = _layer_slices(cp, c)
        blocks = []
        for name, (_, rows) in sl.items():
            if name.startswith('vf'):
                fan = cp
            elif name.startswith('fupd'):
                fan = cp + c
            elif name.startswith('fv'):
                fan = c
            else:                                   # vupd_*
                fan = cp + 2 * c
            blocks.append(rnd((rows, c), fan))
        w = jnp.concatenate(blocks, axis=0).astype(jnp.bfloat16)
        assert w.shape == (total, c)
        # biases: [fupd0, fupd1, vupd] (zeros; message convs are bias-free).
        return {'W': w, 'b': jnp.zeros((3, 1, c), jnp.float32)}

    def emodel_p():
        return {'W1': rnd((64, HOP_ORDER + 1), HOP_ORDER + 1),
                'b1': jnp.zeros((64,), jnp.float32),
                'W2': rnd((NEDGE_TYPE, 64), 64),
                'b2': jnp.zeros((NEDGE_TYPE,), jnp.float32)}

    params = {
        'emodel_f2v': emodel_p(),
        'emodel_v2f': emodel_p(),
        'main': {
            'embed_v': {'W': rnd((1, FILTERS[0]), NFEATURE_DIM),
                        'b': jnp.zeros((1, FILTERS[0]), jnp.float32)},
            'embed_f0': {'W': rnd((HOP_ORDER * NFEATURE_DIM, FILTERS[0]),
                                  HOP_ORDER * NFEATURE_DIM).astype(jnp.bfloat16),
                         'b': jnp.zeros((1, FILTERS[0]), jnp.float32)},
            'embed_f1': {'W': rnd((CODE_LEN * NFEATURE_DIM, FILTERS[0]),
                                  CODE_LEN * NFEATURE_DIM).astype(jnp.bfloat16),
                         'b': jnp.zeros((1, FILTERS[0]), jnp.float32)},
            'layers': [pack_layer(FILTERS[i], FILTERS[i + 1]) for i in range(NLAYERS)],
            'out': {'W': rnd((1, FILTERS[-1]), FILTERS[-1]),
                    'b': jnp.zeros((1, 1), jnp.float32)},
        },
    }
    # nhop_regressor (Linear/BatchNorm stack) is initialized in __init__ but never
    # used in forward() -> intentionally omitted.
    return params


# --------------------------------- main ---------------------------------------
if __name__ == "__main__":
    params = init_params(seed=42)

    key = jax.random.PRNGKey(0)
    ks = jax.random.split(key, 6)
    node_feature = jax.random.normal(ks[0], (BATCH, NFEATURE_DIM, CODE_LEN, 1), jnp.float32)
    hop_feature = jax.random.normal(ks[1], (BATCH, HOP_ORDER * NFEATURE_DIM, CHECK_LEN, 1), jnp.float32)
    nn_idx_f2v = jax.random.randint(ks[2], (BATCH, CODE_LEN, VAR_DEG), 0, CHECK_LEN, jnp.int32)
    nn_idx_v2f = jax.random.randint(ks[3], (BATCH, CHECK_LEN, HOP_ORDER), 0, CODE_LEN, jnp.int32)
    efeature_f2v = jax.random.normal(ks[4], (BATCH, HOP_ORDER + 1, CODE_LEN, VAR_DEG), jnp.float32)
    efeature_v2f = jax.random.normal(ks[5], (BATCH, HOP_ORDER + 1, CHECK_LEN, HOP_ORDER), jnp.float32)

    fwd = jax.jit(ldpc_forward)
    out = fwd(params, node_feature, hop_feature, nn_idx_f2v, nn_idx_v2f,
              efeature_f2v, efeature_v2f)
    out = jax.block_until_ready(out)
    assert out.shape == (BATCH, CODE_LEN - CHECK_LEN), out.shape
    assert bool(jnp.all(jnp.isfinite(out)))
    print("KERNEL_OK")
</pallas_src>

<mosaic_0001>
module attributes {stable_mosaic.version = 11 : i64} {
  func.func @_fused_fgnn_kernel(%arg0: i32, %arg1: memref<1x16x1xf32, #tpu.memory_space<vmem>>, %arg2: memref<1x8x4xf32, #tpu.memory_space<vmem>>, %arg3: memref<1x1x16xf32, #tpu.memory_space<vmem>>, %arg4: memref<1x32x48xbf16, #tpu.memory_space<vmem>>, %arg5: memref<1x32x24xbf16, #tpu.memory_space<vmem>>, %arg6: memref<4x64xbf16, #tpu.memory_space<vmem>>, %arg7: memref<1x64xf32, #tpu.memory_space<vmem>>, %arg8: memref<16x64xbf16, #tpu.memory_space<vmem>>, %arg9: memref<1x64xf32, #tpu.memory_space<vmem>>, %arg10: memref<1x64xf32, #tpu.memory_space<vmem>>, %arg11: memref<1x64xf32, #tpu.memory_space<vmem>>, %arg12: memref<960x64xbf16, #tpu.memory_space<vmem>>, %arg13: memref<3x1x64xf32, #tpu.memory_space<vmem>>, %arg14: memref<960x64xbf16, #tpu.memory_space<vmem>>, %arg15: memref<3x1x64xf32, #tpu.memory_space<vmem>>, %arg16: memref<1472x128xbf16, #tpu.memory_space<vmem>>, %arg17: memref<3x1x128xf32, #tpu.memory_space<vmem>>, %arg18: memref<2944x256xbf16, #tpu.memory_space<vmem>>, %arg19: memref<3x1x256xf32, #tpu.memory_space<vmem>>, %arg20: memref<3840x256xbf16, #tpu.memory_space<vmem>>, %arg21: memref<3x1x256xf32, #tpu.memory_space<vmem>>, %arg22: memref<2816x128xbf16, #tpu.memory_space<vmem>>, %arg23: memref<3x1x128xf32, #tpu.memory_space<vmem>>, %arg24: memref<1408x64xbf16, #tpu.memory_space<vmem>>, %arg25: memref<3x1x64xf32, #tpu.memory_space<vmem>>, %arg26: memref<960x64xbf16, #tpu.memory_space<vmem>>, %arg27: memref<3x1x64xf32, #tpu.memory_space<vmem>>, %arg28: memref<1x64xf32, #tpu.memory_space<vmem>>, %arg29: memref<1x1xf32, #tpu.memory_space<vmem>>, %arg30: memref<1x8x1xf32, #tpu.memory_space<vmem>>) attributes {dimension_semantics = [#tpu.dimension_semantics<parallel>], iteration_bounds = array<i64: 2>, scalar_prefetch = 0 : i64, scratch_operands = 0 : i64, tpu.core_type = #tpu.core_type<tc>, window_params = [{transform_indices = @transform_0, window_bounds = array<i64: 1, 16, 1>}, {transform_indices = @transform_1, window_bounds = array<i64: 1, 8, 4>}, {transform_indices = @transform_2, window_bounds = array<i64: 1, 1, 16>}, {transform_indices = @transform_3, window_bounds = array<i64: 1, 32, 48>}, {transform_indices = @transform_4, window_bounds = array<i64: 1, 32, 24>}, {pipeline_mode = #tpu.pipeline_mode<synchronous>, transform_indices = @transform_5, window_bounds = array<i64: 4, 64>}, {pipeline_mode = #tpu.pipeline_mode<synchronous>, transform_indices = @transform_6, window_bounds = array<i64: 1, 64>}, {pipeline_mode = #tpu.pipeline_mode<synchronous>, transform_indices = @transform_7, window_bounds = array<i64: 16, 64>}, {pipeline_mode = #tpu.pipeline_mode<synchronous>, transform_indices = @transform_8, window_bounds = array<i64: 1, 64>}, {pipeline_mode = #tpu.pipeline_mode<synchronous>, transform_indices = @transform_9, window_bounds = array<i64: 1, 64>}, {pipeline_mode = #tpu.pipeline_mode<synchronous>, transform_indices = @transform_10, window_bounds = array<i64: 1, 64>}, {pipeline_mode = #tpu.pipeline_mode<synchronous>, transform_indices = @transform_11, window_bounds = array<i64: 960, 64>}, {pipeline_mode = #tpu.pipeline_mode<synchronous>, transform_indices = @transform_12, window_bounds = array<i64: 3, 1, 64>}, {pipeline_mode = #tpu.pipeline_mode<synchronous>, transform_indices = @transform_13, window_bounds = array<i64: 960, 64>}, {pipeline_mode = #tpu.pipeline_mode<synchronous>, transform_indices = @transform_14, window_bounds = array<i64: 3, 1, 64>}, {pipeline_mode = #tpu.pipeline_mode<synchronous>, transform_indices = @transform_15, window_bounds = array<i64: 1472, 128>}, {pipeline_mode = #tpu.pipeline_mode<synchronous>, transform_indices = @transform_16, window_bounds = array<i64: 3, 1, 128>}, {pipeline_mode = #tpu.pipeline_mode<synchronous>, transform_indices = @transform_17, window_bounds = array<i64: 2944, 256>}, {pipeline_mode = #tpu.pipeline_mode<synchronous>, transform_indices = @transform_18, window_bounds = array<i64: 3, 1, 256>}, {pipeline_mode = #tpu.pipeline_mode<synchronous>, transform_indices = @transform_19, window_bounds = array<i64: 3840, 256>}, {pipeline_mode = #tpu.pipeline_mode<synchronous>, transform_indices = @transform_20, window_bounds = array<i64: 3, 1, 256>}, {pipeline_mode = #tpu.pipeline_mode<synchronous>, transform_indices = @transform_21, window_bounds = array<i64: 2816, 128>}, {pipeline_mode = #tpu.pipeline_mode<synchronous>, transform_indices = @transform_22, window_bounds = array<i64: 3, 1, 128>}, {pipeline_mode = #tpu.pipeline_mode<synchronous>, transform_indices = @transform_23, window_bounds = array<i64: 1408, 64>}, {pipeline_mode = #tpu.pipeline_mode<synchronous>, transform_indices = @transform_24, window_bounds = array<i64: 3, 1, 64>}, {pipeline_mode = #tpu.pipeline_mode<synchronous>, transform_indices = @transform_25, window_bounds = array<i64: 960, 64>}, {pipeline_mode = #tpu.pipeline_mode<synchronous>, transform_indices = @transform_26, window_bounds = array<i64: 3, 1, 64>}, {pipeline_mode = #tpu.pipeline_mode<synchronous>, transform_indices = @transform_27, window_bounds = array<i64: 1, 64>}, {pipeline_mode = #tpu.pipeline_mode<synchronous>, transform_indices = @transform_28, window_bounds = array<i64: 1, 1>}, {transform_indices = @transform_29, window_bounds = array<i64: 1, 8, 1>}]} {
    %c0 = arith.constant 0 : index
    %c0_0 = arith.constant 0 : index
    %c0_1 = arith.constant 0 : index
    %0 = vector.load %arg1[%c0, %c0_0, %c0_1] : memref<1x16x1xf32, #tpu.memory_space<vmem>>, vector<1x16x1xf32>
    %1 = vector.shape_cast %0 : vector<1x16x1xf32> to vector<16x1xf32>
    %c0_2 = arith.constant 0 : index
    %c0_3 = arith.constant 0 : index
    %c0_4 = arith.constant 0 : index
    %2 = vector.load %arg2[%c0_2, %c0_3, %c0_4] : memref<1x8x4xf32, #tpu.memory_space<vmem>>, vector<1x8x4xf32>
    %3 = vector.shape_cast %2 : vector<1x8x4xf32> to vector<8x4xf32>
    %c0_5 = arith.constant 0 : index
    %c0_6 = arith.constant 0 : index
    %c0_7 = arith.constant 0 : index
    %4 = vector.load %arg3[%c0_5, %c0_6, %c0_7] : memref<1x1x16xf32, #tpu.memory_space<vmem>>, vector<1x1x16xf32>
    %5 = vector.shape_cast %4 : vector<1x1x16xf32> to vector<1x16xf32>
    %c0_8 = arith.constant 0 : index
    %c0_9 = arith.constant 0 : index
    %c0_10 = arith.constant 0 : index
    %6 = vector.load %arg4[%c0_8, %c0_9, %c0_10] : memref<1x32x48xbf16, #tpu.memory_space<vmem>>, vector<1x32x48xbf16>
    %7 = vector.shape_cast %6 : vector<1x32x48xbf16> to vector<32x48xbf16>
    %c0_11 = arith.constant 0 : index
    %c0_12 = arith.constant 0 : index
    %c0_13 = arith.constant 0 : index
    %8 = vector.load %arg5[%c0_11, %c0_12, %c0_13] : memref<1x32x24xbf16, #tpu.memory_space<vmem>>, vector<1x32x24xbf16>
    %9 = vector.shape_cast %8 : vector<1x32x24xbf16> to vector<32x24xbf16>
    %c0_14 = arith.constant 0 : index
    %c0_15 = arith.constant 0 : index
    %10 = vector.load %arg10[%c0_14, %c0_15] : memref<1x64xf32, #tpu.memory_space<vmem>>, vector<1x64xf32>
    %11 = vector.broadcast %1 : vector<16x1xf32> to vector<16x64xf32>
    %12 = vector.broadcast %10 : vector<1x64xf32> to vector<16x64xf32>
    %13 = arith.mulf %11, %12 : vector<16x64xf32>
    %c0_16 = arith.constant 0 : index
    %c0_17 = arith.constant 0 : index
    %14 = vector.load %arg11[%c0_16, %c0_17] : memref<1x64xf32, #tpu.memory_space<vmem>>, vector<1x64xf32>
    %15 = vector.broadcast %14 : vector<1x64xf32> to vector<16x64xf32>
    %16 = arith.addf %13, %15 : vector<16x64xf32>
    %cst = arith.constant 0.000000e+00 : f32
    %17 = vector.broadcast %cst : f32 to vector<16x64xf32>
    %18 = arith.maximumf %16, %17 : vector<16x64xf32>
    %c0_18 = arith.constant 0 : index
    %c0_19 = arith.constant 0 : index
    %19 = vector.load %arg6[%c0_18, %c0_19] : memref<4x64xbf16, #tpu.memory_space<vmem>>, vector<4x64xbf16>
    %20 = arith.truncf %3 : vector<8x4xf32> to vector<8x4xbf16>
    %cst_20 = arith.constant dense<0.000000e+00> : vector<8x64xf32>
    %21 = tpu.matmul %20, %19, %cst_20 {dimension_numbers = #tpu.dot_dimension_numbers<[1], [0], [0], [1], [0, 0, 1, 1], [], []>} : vector<8x4xbf16>, vector<4x64xbf16>, vector<8x64xf32> -> vector<8x64xf32>
    %c0_21 = arith.constant 0 : index
    %c0_22 = arith.constant 0 : index
    %22 = vector.load %arg7[%c0_21, %c0_22] : memref<1x64xf32, #tpu.memory_space<vmem>>, vector<1x64xf32>
    %23 = vector.broadcast %22 : vector<1x64xf32> to vector<8x64xf32>
    %24 = arith.addf %21, %23 : vector<8x64xf32>
    %cst_23 = arith.constant 0.000000e+00 : f32
    %25 = vector.broadcast %cst_23 : f32 to vector<8x64xf32>
    %26 = arith.maximumf %24, %25 : vector<8x64xf32>
    %c0_24 = arith.constant 0 : index
    %c0_25 = arith.constant 0 : index
    %27 = vector.load %arg8[%c0_24, %c0_25] : memref<16x64xbf16, #tpu.memory_space<vmem>>, vector<16x64xbf16>
    %28 = arith.truncf %5 : vector<1x16xf32> to vector<1x16xbf16>
    %cst_26 = arith.constant dense<0.000000e+00> : vector<1x64xf32>
    %29 = tpu.matmul %28, %27, %cst_26 {dimension_numbers = #tpu.dot_dimension_numbers<[1], [0], [0], [1], [0, 0, 1, 1], [], []>} : vector<1x16xbf16>, vector<16x64xbf16>, vector<1x64xf32> -> vector<1x64xf32>
    %c0_27 = arith.constant 0 : index
    %c0_28 = arith.constant 0 : index
    %30 = vector.load %arg9[%c0_27, %c0_28] : memref<1x64xf32, #tpu.memory_space<vmem>>, vector<1x64xf32>
    %31 = arith.addf %29, %30 : vector<1x64xf32>
    %cst_29 = arith.constant 0.000000e+00 : f32
    %32 = vector.broadcast %cst_29 : f32 to vector<1x64xf32>
    %33 = arith.maximumf %31, %32 : vector<1x64xf32>
    %34 = arith.truncf %18 : vector<16x64xf32> to vector<16x64xbf16>
    %35 = arith.truncf %26 : vector<8x64xf32> to vector<8x64xbf16>
    %36 = arith.truncf %33 : vector<1x64xf32> to vector<1x64xbf16>
    %c0_30 = arith.constant 0 : index
    %c0_31 = arith.constant 0 : index
    %37 = vector.load %arg12[%c0_30, %c0_31] : memref<960x64xbf16, #tpu.memory_space<vmem>>, vector<64x64xbf16>
    %cst_32 = arith.constant dense<0.000000e+00> : vector<16x64xf32>
    %38 = tpu.matmul %34, %37, %cst_32 {dimension_numbers = #tpu.dot_dimension_numbers<[1], [0], [0], [1], [0, 0, 1, 1], [], []>} : vector<16x64xbf16>, vector<64x64xbf16>, vector<16x64xf32> -> vector<16x64xf32>
    %c64 = arith.constant 64 : index
    %c0_33 = arith.constant 0 : index
    %39 = vector.load %arg12[%c64, %c0_33] : memref<960x64xbf16, #tpu.memory_space<vmem>>, vector<64x64xbf16>
    %cst_34 = arith.constant dense<0.000000e+00> : vector<16x64xf32>
    %40 = tpu.matmul %34, %39, %cst_34 {dimension_numbers = #tpu.dot_dimension_numbers<[1], [0], [0], [1], [0, 0, 1, 1], [], []>} : vector<16x64xbf16>, vector<64x64xbf16>, vector<16x64xf32> -> vector<16x64xf32>
    %c128 = arith.constant 128 : index
    %c0_35 = arith.constant 0 : index
    %41 = vector.load %arg12[%c128, %c0_35] : memref<960x64xbf16, #tpu.memory_space<vmem>>, vector<64x64xbf16>
    %cst_36 = arith.constant dense<0.000000e+00> : vector<16x64xf32>
    %42 = tpu.matmul %34, %41, %cst_36 {dimension_numbers = #tpu.dot_dimension_numbers<[1], [0], [0], [1], [0, 0, 1, 1], [], []>} : vector<16x64xbf16>, vector<64x64xbf16>, vector<16x64xf32> -> vector<16x64xf32>
    %43 = tpu.concatenate %38, %40, %42 in 0 : vector<16x64xf32>, vector<16x64xf32>, vector<16x64xf32> -> vector<48x64xf32>
    %44 = arith.truncf %43 : vector<48x64xf32> to vector<48x64xbf16>
    %cst_37 = arith.constant dense<0.000000e+00> : vector<32x64xf32>
    %45 = tpu.matmul %7, %44, %cst_37 {dimension_numbers = #tpu.dot_dimension_numbers<[1], [0], [0], [1], [0, 0, 1, 1], [], []>} : vector<32x48xbf16>, vector<48x64xbf16>, vector<32x64xf32> -> vector<32x64xf32>
    %46 = vector.extract_strided_slice %45 {offsets = [0, 0], sizes = [8, 64], strides = [1, 1]} : vector<32x64xf32> to vector<8x64xf32>
    %47 = vector.extract_strided_slice %45 {offsets = [8, 0], sizes = [8, 64], strides = [1, 1]} : vector<32x64xf32> to vector<8x64xf32>
    %48 = arith.maximumf %46, %47 : vector<8x64xf32>
    %49 = vector.extract_strided_slice %45 {offsets = [16, 0], sizes = [8, 64], strides = [1, 1]} : vector<32x64xf32> to vector<8x64xf32>
    %50 = arith.maximumf %48, %49 : vector<8x64xf32>
    %51 = vector.extract_strided_slice %45 {offsets = [24, 0], sizes = [8, 64], strides = [1, 1]} : vector<32x64xf32> to vector<8x64xf32>
    %52 = arith.maximumf %50, %51 : vector<8x64xf32>
    %c192 = arith.constant 192 : index
    %c0_38 = arith.constant 0 : index
    %53 = vector.load %arg12[%c192, %c0_38] : memref<960x64xbf16, #tpu.memory_space<vmem>>, vector<64x64xbf16>
    %cst_39 = arith.constant dense<0.000000e+00> : vector<16x64xf32>
    %54 = tpu.matmul %34, %53, %cst_39 {dimension_numbers = #tpu.dot_dimension_numbers<[1], [0], [0], [1], [0, 0, 1, 1], [], []>} : vector<16x64xbf16>, vector<64x64xbf16>, vector<16x64xf32> -> vector<16x64xf32>
    %cst_40 = arith.constant dense<0xFF800000> : vector<64xf32>
    %55 = vector.multi_reduction <maximumf>, %54, %cst_40 [0] : vector<16x64xf32> to vector<64xf32>
    %56 = vector.shape_cast %55 : vector<64xf32> to vector<1x64xf32>
    %c256 = arith.constant 256 : index
    %c0_41 = arith.constant 0 : index
    %57 = vector.load %arg12[%c256, %c0_41] : memref<960x64xbf16, #tpu.memory_space<vmem>>, vector<64x64xbf16>
    %cst_42 = arith.constant dense<0.000000e+00> : vector<8x64xf32>
    %58 = tpu.matmul %35, %57, %cst_42 {dimension_numbers = #tpu.dot_dimension_numbers<[1], [0], [0], [1], [0, 0, 1, 1], [], []>} : vector<8x64xbf16>, vector<64x64xbf16>, vector<8x64xf32> -> vector<8x64xf32>
    %c320 = arith.constant 320 : index
    %c0_43 = arith.constant 0 : index
    %59 = vector.load %arg12[%c320, %c0_43] : memref<960x64xbf16, #tpu.memory_space<vmem>>, vector<64x64xbf16>
    %60 = arith.truncf %52 : vector<8x64xf32> to vector<8x64xbf16>
    %cst_44 = arith.constant dense<0.000000e+00> : vector<8x64xf32>
    %61 = tpu.matmul %60, %59, %cst_44 {dimension_numbers = #tpu.dot_dimension_numbers<[1], [0], [0], [1], [0, 0, 1, 1], [], []>} : vector<8x64xbf16>, vector<64x64xbf16>, vector<8x64xf32> -> vector<8x64xf32>
    %62 = arith.addf %58, %61 : vector<8x64xf32>
    %c0_45 = arith.constant 0 : index
    %c0_46 = arith.constant 0 : index
    %c0_47 = arith.constant 0 : index
    %63 = vector.load %arg13[%c0_45, %c0_46, %c0_47] : memref<3x1x64xf32, #tpu.memory_space<vmem>>, vector<1x1x64xf32>
    %64 = vector.shape_cast %63 : vector<1x1x64xf32> to vector<1x64xf32>
    %65 = vector.broadcast %64 : vector<1x64xf32> to vector<8x64xf32>
    %66 = arith.addf %62, %65 : vector<8x64xf32>
    %cst_48 = arith.constant 0.000000e+00 : f32
    %67 = vector.broadcast %cst_48 : f32 to vector<8x64xf32>
    %68 = arith.maximumf %66, %67 : vector<8x64xf32>
    %c384 = arith.constant 384 : index
    %c0_49 = arith.constant 0 : index
    %69 = vector.load %arg12[%c384, %c0_49] : memref<960x64xbf16, #tpu.memory_space<vmem>>, vector<64x64xbf16>
    %cst_50 = arith.constant dense<0.000000e+00> : vector<1x64xf32>
    %70 = tpu.matmul %36, %69, %cst_50 {dimension_numbers = #tpu.dot_dimension_numbers<[1], [0], [0], [1], [0, 0, 1, 1], [], []>} : vector<1x64xbf16>, vector<64x64xbf16>, vector<1x64xf32> -> vector<1x64xf32>
    %c448 = arith.constant 448 : index
    %c0_51 = arith.constant 0 : index
    %71 = vector.load %arg12[%c448, %c0_51] : memref<960x64xbf16, #tpu.memory_space<vmem>>, vector<64x64xbf16>
    %72 = arith.truncf %56 : vector<1x64xf32> to vector<1x64xbf16>
    %cst_52 = arith.constant dense<0.000000e+00> : vector<1x64xf32>
    %73 = tpu.matmul %72, %71, %cst_52 {dimension_numbers = #tpu.dot_dimension_numbers<[1], [0], [0], [1], [0, 0, 1, 1], [], []>} : vector<1x64xbf16>, vector<64x64xbf16>, vector<1x64xf32> -> vector<1x64xf32>
    %74 = arith.addf %70, %73 : vector<1x64xf32>
    %c1 = arith.constant 1 : index
    %c0_53 = arith.constant 0 : index
    %c0_54 = arith.constant 0 : index
    %75 = vector.load %arg13[%c1, %c0_53, %c0_54] : memref<3x1x64xf32, #tpu.memory_space<vmem>>, vector<1x1x64xf32>
    %76 = vector.shape_cast %75 : vector<1x1x64xf32> to vector<1x64xf32>
    %77 = arith.addf %74, %76 : vector<1x64xf32>
    %cst_55 = arith.constant 0.000000e+00 : f32
    %78 = vector.broadcast %cst_55 : f32 to vector<1x64xf32>
    %79 = arith.maximumf %77, %78 : vector<1x64xf32>
    %80 = arith.truncf %68 : vector<8x64xf32> to vector<8x64xbf16>
    %81 = arith.truncf %79 : vector<1x64xf32> to vector<1x64xbf16>
    %c512 = arith.constant 512 : index
    %c0_56 = arith.constant 0 : index
    %82 = vector.load %arg12[%c512, %c0_56] : memref<960x64xbf16, #tpu.memory_space<vmem>>, vector<64x64xbf16>
    %cst_57 = arith.constant dense<0.000000e+00> : vector<8x64xf32>
    %83 = tpu.matmul %80, %82, %cst_57 {dimension_numbers = #tpu.dot_dimension_numbers<[1], [0], [0], [1], [0, 0, 1, 1], [], []>} : vector<8x64xbf16>, vector<64x64xbf16>, vector<8x64xf32> -> vector<8x64xf32>
    %c576 = arith.constant 576 : index
    %c0_58 = arith.constant 0 : index
    %84 = vector.load %arg12[%c576, %c0_58] : memref<960x64xbf16, #tpu.memory_space<vmem>>, vector<64x64xbf16>
    %cst_59 = arith.constant dense<0.000000e+00> : vector<8x64xf32>
    %85 = tpu.matmul %80, %84, %cst_59 {dimension_numbers = #tpu.dot_dimension_numbers<[1], [0], [0], [1], [0, 0, 1, 1], [], []>} : vector<8x64xbf16>, vector<64x64xbf16>, vector<8x64xf32> -> vector<8x64xf32>
    %c640 = arith.constant 640 : index
    %c0_60 = arith.constant 0 : index
    %86 = vector.load %arg12[%c640, %c0_60] : memref<960x64xbf16, #tpu.memory_space<vmem>>, vector<64x64xbf16>
    %cst_61 = arith.constant dense<0.000000e+00> : vector<8x64xf32>
    %87 = tpu.matmul %80, %86, %cst_61 {dimension_numbers = #tpu.dot_dimension_numbers<[1], [0], [0], [1], [0, 0, 1, 1], [], []>} : vector<8x64xbf16>, vector<64x64xbf16>, vector<8x64xf32> -> vector<8x64xf32>
    %88 = tpu.concatenate %83, %85, %87 in 0 : vector<8x64xf32>, vector<8x64xf32>, vector<8x64xf32> -> vector<24x64xf32>
    %89 = arith.truncf %88 : vector<24x64xf32> to vector<24x64xbf16>
    %cst_62 = arith.constant dense<0.000000e+00> : vector<32x64xf32>
    %90 = tpu.matmul %9, %89, %cst_62 {dimension_numbers = #tpu.dot_dimension_numbers<[1], [0], [0], [1], [0, 0, 1, 1], [], []>} : vector<32x24xbf16>, vector<24x64xbf16>, vector<32x64xf32> -> vector<32x64xf32>
    %91 = vector.extract_strided_slice %90 {offsets = [0, 0], sizes = [16, 64], strides = [1, 1]} : vector<32x64xf32> to vector<16x64xf32>
    %92 = vector.extract_strided_slice %90 {offsets = [16, 0], sizes = [16, 64], strides = [1, 1]} : vector<32x64xf32> to vector<16x64xf32>
    %93 = arith.maximumf %91, %92 : vector<16x64xf32>
    %c704 = arith.constant 704 : index
    %c0_63 = arith.constant 0 : index
    %94 = vector.load %arg12[%c704, %c0_63] : memref<960x64xbf16, #tpu.memory_space<vmem>>, vector<64x64xbf16>
    %cst_64 = arith.constant dense<0.000000e+00> : vector<1x64xf32>
    %95 = tpu.matmul %81, %94, %cst_64 {dimension_numbers = #tpu.dot_dimension_numbers<[1], [0], [0], [1], [0, 0, 1, 1], [], []>} : vector<1x64xbf16>, vector<64x64xbf16>, vector<1x64xf32> -> vector<1x64xf32>
    %c768 = arith.constant 768 : index
    %c0_65 = arith.constant 0 : index
    %96 = vector.load %arg12[%c768, %c0_65] : memref<960x64xbf16, #tpu.memory_space<vmem>>, vector<64x64xbf16>
    %cst_66 = arith.constant dense<0.000000e+00> : vector<16x64xf32>
    %97 = tpu.matmul %34, %96, %cst_66 {dimension_numbers = #tpu.dot_dimension_numbers<[1], [0], [0], [1], [0, 0, 1, 1], [], []>} : vector<16x64xbf16>, vector<64x64xbf16>, vector<16x64xf32> -> vector<16x64xf32>
    %c832 = arith.constant 832 : index
    %c0_67 = arith.constant 0 : index
    %98 = vector.load %arg12[%c832, %c0_67] : memref<960x64xbf16, #tpu.memory_space<vmem>>, vector<64x64xbf16>
    %99 = arith.truncf %93 : vector<16x64xf32> to vector<16x64xbf16>
    %cst_68 = arith.constant dense<0.000000e+00> : vector<16x64xf32>
    %100 = tpu.matmul %99, %98, %cst_68 {dimension_numbers = #tpu.dot_dimension_numbers<[1], [0], [0], [1], [0, 0, 1, 1], [], []>} : vector<16x64xbf16>, vector<64x64xbf16>, vector<16x64xf32> -> vector<16x64xf32>
    %101 = arith.addf %97, %100 : vector<16x64xf32>
    %c896 = arith.constant 896 : index
    %c0_69 = arith.constant 0 : index
    %102 = vector.load %arg12[%c896, %c0_69] : memref<960x64xbf16, #tpu.memory_space<vmem>>, vector<64x64xbf16>
    %103 = arith.truncf %95 : vector<1x64xf32> to vector<1x64xbf16>
    %cst_70 = arith.constant dense<0.000000e+00> : vector<1x64xf32>
    %104 = tpu.matmul %103, %102, %cst_70 {dimension_numbers = #tpu.dot_dimension_numbers<[1], [0], [0], [1], [0, 0, 1, 1], [], []>} : vector<1x64xbf16>, vector<64x64xbf16>, vector<1x64xf32> -> vector<1x64xf32>
    %105 = vector.broadcast %104 : vector<1x64xf32> to vector<16x64xf32>
    %106 = arith.addf %101, %105 : vector<16x64xf32>
    %c2 = arith.constant 2 : index
    %c0_71 = arith.constant 0 : index
    %c0_72 = arith.constant 0 : index
    %107 = vector.load %arg13[%c2, %c0_71, %c0_72] : memref<3x1x64xf32, #tpu.memory_space<vmem>>, vector<1x1x64xf32>
    %108 = vector.shape_cast %107 : vector<1x1x64xf32> to vector<1x64xf32>
    %109 = vector.broadcast %108 : vector<1x64xf32> to vector<16x64xf32>
    %110 = arith.addf %106, %109 : vector<16x64xf32>
    %cst_73 = arith.constant 0.000000e+00 : f32
    %111 = vector.broadcast %cst_73 : f32 to vector<16x64xf32>
    %112 = arith.maximumf %110, %111 : vector<16x64xf32>
    %113 = arith.truncf %112 : vector<16x64xf32> to vector<16x64xbf16>
    %114 = arith.truncf %68 : vector<8x64xf32> to vector<8x64xbf16>
    %115 = arith.truncf %79 : vector<1x64xf32> to vector<1x64xbf16>
    %c0_74 = arith.constant 0 : index
    %c0_75 = arith.constant 0 : index
    %116 = vector.load %arg14[%c0_74, %c0_75] : memref<960x64xbf16, #tpu.memory_space<vmem>>, vector<64x64xbf16>
    %cst_76 = arith.constant dense<0.000000e+00> : vector<16x64xf32>
    %117 = tpu.matmul %113, %116, %cst_76 {dimension_numbers = #tpu.dot_dimension_numbers<[1], [0], [0], [1], [0, 0, 1, 1], [], []>} : vector<16x64xbf16>, vector<64x64xbf16>, vector<16x64xf32> -> vector<16x64xf32>
    %c64_77 = arith.constant 64 : index
    %c0_78 = arith.constant 0 : index
    %118 = vector.load %arg14[%c64_77, %c0_78] : memref<960x64xbf16, #tpu.memory_space<vmem>>, vector<64x64xbf16>
    %cst_79 = arith.constant dense<0.000000e+00> : vector<16x64xf32>
    %119 = tpu.matmul %113, %118, %cst_79 {dimension_numbers = #tpu.dot_dimension_numbers<[1], [0], [0], [1], [0, 0, 1, 1], [], []>} : vector<16x64xbf16>, vector<64x64xbf16>, vector<16x64xf32> -> vector<16x64xf32>
    %c128_80 = arith.constant 128 : index
    %c0_81 = arith.constant 0 : index
    %120 = vector.load %arg14[%c128_80, %c0_81] : memref<960x64xbf16, #tpu.memory_space<vmem>>, vector<64x64xbf16>
    %cst_82 = arith.constant dense<0.000000e+00> : vector<16x64xf32>
    %121 = tpu.matmul %113, %120, %cst_82 {dimension_numbers = #tpu.dot_dimension_numbers<[1], [0], [0], [1], [0, 0, 1, 1], [], []>} : vector<16x64xbf16>, vector<64x64xbf16>, vector<16x64xf32> -> vector<16x64xf32>
    %122 = tpu.concatenate %117, %119, %121 in 0 : vector<16x64xf32>, vector<16x64xf32>, vector<16x64xf32> -> vector<48x64xf32>
    %123 = arith.truncf %122 : vector<48x64xf32> to vector<48x64xbf16>
    %cst_83 = arith.constant dense<0.000000e+00> : vector<32x64xf32>
    %124 = tpu.matmul %7, %123, %cst_83 {dimension_numbers = #tpu.dot_dimension_numbers<[1], [0], [0], [1], [0, 0, 1, 1], [], []>} : vector<32x48xbf16>, vector<48x64xbf16>, vector<32x64xf32> -> vector<32x64xf32>
    %125 = vector.extract_strided_slice %124 {offsets = [0, 0], sizes = [8, 64], strides = [1, 1]} : vector<32x64xf32> to vector<8x64xf32>
    %126 = vector.extract_strided_slice %124 {offsets = [8, 0], sizes = [8, 64], strides = [1, 1]} : vector<32x64xf32> to vector<8x64xf32>
    %127 = arith.maximumf %125, %126 : vector<8x64xf32>
    %128 = vector.extract_strided_slice %124 {offsets = [16, 0], sizes = [8, 64], strides = [1, 1]} : vector<32x64xf32> to vector<8x64xf32>
    %129 = arith.maximumf %127, %128 : vector<8x64xf32>
    %130 = vector.extract_strided_slice %124 {offsets = [24, 0], sizes = [8, 64], strides = [1, 1]} : vector<32x64xf32> to vector<8x64xf32>
    %131 = arith.maximumf %129, %130 : vector<8x64xf32>
    %c192_84 = arith.constant 192 : index
    %c0_85 = arith.constant 0 : index
    %132 = vector.load %arg14[%c192_84, %c0_85] : memref<960x64xbf16, #tpu.memory_space<vmem>>, vector<64x64xbf16>
    %cst_86 = arith.constant dense<0.000000e+00> : vector<16x64xf32>
    %133 = tpu.matmul %113, %132, %cst_86 {dimension_numbers = #tpu.dot_dimension_numbers<[1], [0], [0], [1], [0, 0, 1, 1], [], []>} : vector<16x64xbf16>, vector<64x64xbf16>, vector<16x64xf32> -> vector<16x64xf32>
    %cst_87 = arith.constant dense<0xFF800000> : vector<64xf32>
    %134 = vector.multi_reduction <maximumf>, %133, %cst_87 [0] : vector<16x64xf32> to vector<64xf32>
    %135 = vector.shape_cast %134 : vector<64xf32> to vector<1x64xf32>
    %c256_88 = arith.constant 256 : index
    %c0_89 = arith.constant 0 : index
    %136 = vector.load %arg14[%c256_88, %c0_89] : memref<960x64xbf16, #tpu.memory_space<vmem>>, vector<64x64xbf16>
    %cst_90 = arith.constant dense<0.000000e+00> : vector<8x64xf32>
    %137 = tpu.matmul %114, %136, %cst_90 {dimension_numbers = #tpu.dot_dimension_numbers<[1], [0], [0], [1], [0, 0, 1, 1], [], []>} : vector<8x64xbf16>, vector<64x64xbf16>, vector<8x64xf32> -> vector<8x64xf32>
    %c320_91 = arith.constant 320 : index
    %c0_92 = arith.constant 0 : index
    %138 = vector.load %arg14[%c320_91, %c0_92] : memref<960x64xbf16, #tpu.memory_space<vmem>>, vector<64x64xbf16>
    %139 = arith.truncf %131 : vector<8x64xf32> to vector<8x64xbf16>
    %cst_93 = arith.constant dense<0.000000e+00> : vector<8x64xf32>
    %140 = tpu.matmul %139, %138, %cst_93 {dimension_numbers = #tpu.dot_dimension_numbers<[1], [0], [0], [1], [0, 0, 1, 1], [], []>} : vector<8x64xbf16>, vector<64x64xbf16>, vector<8x64xf32> -> vector<8x64xf32>
    %141 = arith.addf %137, %140 : vector<8x64xf32>
    %c0_94 = arith.constant 0 : index
    %c0_95 = arith.constant 0 : index
    %c0_96 = arith.constant 0 : index
    %142 = vector.load %arg15[%c0_94, %c0_95, %c0_96] : memref<3x1x64xf32, #tpu.memory_space<vmem>>, vector<1x1x64xf32>
    %143 = vector.shape_cast %142 : vector<1x1x64xf32> to vector<1x64xf32>
    %144 = vector.broadcast %143 : vector<1x64xf32> to vector<8x64xf32>
    %145 = arith.addf %141, %144 : vector<8x64xf32>
    %cst_97 = arith.constant 0.000000e+00 : f32
    %146 = vector.broadcast %cst_97 : f32 to vector<8x64xf32>
    %147 = arith.maximumf %145, %146 : vector<8x64xf32>
    %c384_98 = arith.constant 384 : index
    %c0_99 = arith.constant 0 : index
    %148 = vector.load %arg14[%c384_98, %c0_99] : memref<960x64xbf16, #tpu.memory_space<vmem>>, vector<64x64xbf16>
    %cst_100 = arith.constant dense<0.000000e+00> : vector<1x64xf32>
    %149 = tpu.matmul %115, %148, %cst_100 {dimension_numbers = #tpu.dot_dimension_numbers<[1], [0], [0], [1], [0, 0, 1, 1], [], []>} : vector<1x64xbf16>, vector<64x64xbf16>, vector<1x64xf32> -> vector<1x64xf32>
    %c448_101 = arith.constant 448 : index
    %c0_102 = arith.constant 0 : index
    %150 = vector.load %arg14[%c448_101, %c0_102] : memref<960x64xbf16, #tpu.memory_space<vmem>>, vector<64x64xbf16>
    %151 = arith.truncf %135 : vector<1x64xf32> to vector<1x64xbf16>
    %cst_103 = arith.constant dense<0.000000e+00> : vector<1x64xf32>
    %152 = tpu.matmul %151, %150, %cst_103 {dimension_numbers = #tpu.dot_dimension_numbers<[1], [0], [0], [1], [0, 0, 1, 1], [], []>} : vector<1x64xbf16>, vector<64x64xbf16>, vector<1x64xf32> -> vector<1x64xf32>
    %153 = arith.addf %149, %152 : vector<1x64xf32>
    %c1_104 = arith.constant 1 : index
    %c0_105 = arith.constant 0 : index
    %c0_106 = arith.constant 0 : index
    %154 = vector.load %arg15[%c1_104, %c0_105, %c0_106] : memref<3x1x64xf32, #tpu.memory_space<vmem>>, vector<1x1x64xf32>
    %155 = vector.shape_cast %154 : vector<1x1x64xf32> to vector<1x64xf32>
    %156 = arith.addf %153, %155 : vector<1x64xf32>
    %cst_107 = arith.constant 0.000000e+00 : f32
    %157 = vector.broadcast %cst_107 : f32 to vector<1x64xf32>
    %158 = arith.maximumf %156, %157 : vector<1x64xf32>
    %159 = arith.truncf %147 : vector<8x64xf32> to vector<8x64xbf16>
    %160 = arith.truncf %158 : vector<1x64xf32> to vector<1x64xbf16>
    %c512_108 = arith.constant 512 : index
    %c0_109 = arith.constant 0 : index
    %161 = vector.load %arg14[%c512_108, %c0_109] : memref<960x64xbf16, #tpu.memory_space<vmem>>, vector<64x64xbf16>
    %cst_110 = arith.constant dense<0.000000e+00> : vector<8x64xf32>
    %162 = tpu.matmul %159, %161, %cst_110 {dimension_numbers = #tpu.dot_dimension_numbers<[1], [0], [0], [1], [0, 0, 1, 1], [], []>} : vector<8x64xbf16>, vector<64x64xbf16>, vector<8x64xf32> -> vector<8x64xf32>
    %c576_111 = arith.constant 576 : index
    %c0_112 = arith.constant 0 : index
    %163 = vector.load %arg14[%c576_111, %c0_112] : memref<960x64xbf16, #tpu.memory_space<vmem>>, vector<64x64xbf16>
    %cst_113 = arith.constant dense<0.000000e+00> : vector<8x64xf32>
    %164 = tpu.matmul %159, %163, %cst_113 {dimension_numbers = #tpu.dot_dimension_numbers<[1], [0], [0], [1], [0, 0, 1, 1], [], []>} : vector<8x64xbf16>, vector<64x64xbf16>, vector<8x64xf32> -> vector<8x64xf32>
    %c640_114 = arith.constant 640 : index
    %c0_115 = arith.constant 0 : index
    %165 = vector.load %arg14[%c640_114, %c0_115] : memref<960x64xbf16, #tpu.memory_space<vmem>>, vector<64x64xbf16>
    %cst_116 = arith.constant dense<0.000000e+00> : vector<8x64xf32>
    %166 = tpu.matmul %159, %165, %cst_116 {dimension_numbers = #tpu.dot_dimension_numbers<[1], [0], [0], [1], [0, 0, 1, 1], [], []>} : vector<8x64xbf16>, vector<64x64xbf16>, vector<8x64xf32> -> vector<8x64xf32>
    %167 = tpu.concatenate %162, %164, %166 in 0 : vector<8x64xf32>, vector<8x64xf32>, vector<8x64xf32> -> vector<24x64xf32>
    %168 = arith.truncf %167 : vector<24x64xf32> to vector<24x64xbf16>
    %cst_117 = arith.constant dense<0.000000e+00> : vector<32x64xf32>
    %169 = tpu.matmul %9, %168, %cst_117 {dimension_numbers = #tpu.dot_dimension_numbers<[1], [0], [0], [1], [0, 0, 1, 1], [], []>} : vector<32x24xbf16>, vector<24x64xbf16>, vector<32x64xf32> -> vector<32x64xf32>
    %170 = vector.extract_strided_slice %169 {offsets = [0, 0], sizes = [16, 64], strides = [1, 1]} : vector<32x64xf32> to vector<16x64xf32>
    %171 = vector.extract_strided_slice %169 {offsets = [16, 0], sizes = [16, 64], strides = [1, 1]} : vector<32x64xf32> to vector<16x64xf32>
    %172 = arith.maximumf %170, %171 : vector<16x64xf32>
    %c704_118 = arith.constant 704 : index
    %c0_119 = arith.constant 0 : index
    %173 = vector.load %arg14[%c704_118, %c0_119] : memref<960x64xbf16, #tpu.memory_space<vmem>>, vector<64x64xbf16>
    %cst_120 = arith.constant dense<0.000000e+00> : vector<1x64xf32>
    %174 = tpu.matmul %160, %173, %cst_120 {dimension_numbers = #tpu.dot_dimension_numbers<[1], [0], [0], [1], [0, 0, 1, 1], [], []>} : vector<1x64xbf16>, vector<64x64xbf16>, vector<1x64xf32> -> vector<1x64xf32>
    %c768_121 = arith.constant 768 : index
    %c0_122 = arith.constant 0 : index
    %175 = vector.load %arg14[%c768_121, %c0_122] : memref<960x64xbf16, #tpu.memory_space<vmem>>, vector<64x64xbf16>
    %cst_123 = arith.constant dense<0.000000e+00> : vector<16x64xf32>
    %176 = tpu.matmul %113, %175, %cst_123 {dimension_numbers = #tpu.dot_dimension_numbers<[1], [0], [0], [1], [0, 0, 1, 1], [], []>} : vector<16x64xbf16>, vector<64x64xbf16>, vector<16x64xf32> -> vector<16x64xf32>
    %c832_124 = arith.constant 832 : index
    %c0_125 = arith.constant 0 : index
    %177 = vector.load %arg14[%c832_124, %c0_125] : memref<960x64xbf16, #tpu.memory_space<vmem>>, vector<64x64xbf16>
    %178 = arith.truncf %172 : vector<16x64xf32> to vector<16x64xbf16>
    %cst_126 = arith.constant dense<0.000000e+00> : vector<16x64xf32>
    %179 = tpu.matmul %178, %177, %cst_126 {dimension_numbers = #tpu.dot_dimension_numbers<[1], [0], [0], [1], [0, 0, 1, 1], [], []>} : vector<16x64xbf16>, vector<64x64xbf16>, vector<16x64xf32> -> vector<16x64xf32>
    %180 = arith.addf %176, %179 : vector<16x64xf32>
    %c896_127 = arith.constant 896 : index
    %c0_128 = arith.constant 0 : index
    %181 = vector.load %arg14[%c896_127, %c0_128] : memref<960x64xbf16, #tpu.memory_space<vmem>>, vector<64x64xbf16>
    %182 = arith.truncf %174 : vector<1x64xf32> to vector<1x64xbf16>
    %cst_129 = arith.constant dense<0.000000e+00> : vector<1x64xf32>
    %183 = tpu.matmul %182, %181, %cst_129 {dimension_numbers = #tpu.dot_dimension_numbers<[1], [0], [0], [1], [0, 0, 1, 1], [], []>} : vector<1x64xbf16>, vector<64x64xbf16>, vector<1x64xf32> -> vector<1x64xf32>
    %184 = vector.broadcast %183 : vector<1x64xf32> to vector<16x64xf32>
    %185 = arith.addf %180, %184 : vector<16x64xf32>
    %c2_130 = arith.constant 2 : index
    %c0_131 = arith.constant 0 : index
    %c0_132 = arith.constant 0 : index
    %186 = vector.load %arg15[%c2_130, %c0_131, %c0_132] : memref<3x1x64xf32, #tpu.memory_space<vmem>>, vector<1x1x64xf32>
    %187 = vector.shape_cast %186 : vector<1x1x64xf32> to vector<1x64xf32>
    %188 = vector.broadcast %187 : vector<1x64xf32> to vector<16x64xf32>
    %189 = arith.addf %185, %188 : vector<16x64xf32>
    %cst_133 = arith.constant 0.000000e+00 : f32
    %190 = vector.broadcast %cst_133 : f32 to vector<16x64xf32>
    %191 = arith.maximumf %189, %190 : vector<16x64xf32>
    %192 = arith.truncf %191 : vector<16x64xf32> to vector<16x64xbf16>
    %193 = arith.truncf %147 : vector<8x64xf32> to vector<8x64xbf16>
    %194 = arith.truncf %158 : vector<1x64xf32> to vector<1x64xbf16>
    %c0_134 = arith.constant 0 : index
    %c0_135 = arith.constant 0 : index
    %195 = vector.load %arg16[%c0_134, %c0_135] : memref<1472x128xbf16, #tpu.memory_space<vmem>>, vector<64x128xbf16>
    %cst_136 = arith.constant dense<0.000000e+00> : vector<16x128xf32>
    %196 = tpu.matmul %192, %195, %cst_136 {dimension_numbers = #tpu.dot_dimension_numbers<[1], [0], [0], [1], [0, 0, 1, 1], [], []>} : vector<16x64xbf16>, vector<64x128xbf16>, vector<16x128xf32> -> vector<16x128xf32>
    %c64_137 = arith.constant 64 : index
    %c0_138 = arith.constant 0 : index
    %197 = vector.load %arg16[%c64_137, %c0_138] : memref<1472x128xbf16, #tpu.memory_space<vmem>>, vector<64x128xbf16>
    %cst_139 = arith.constant dense<0.000000e+00> : vector<16x128xf32>
    %198 = tpu.matmul %192, %197, %cst_139 {dimension_numbers = #tpu.dot_dimension_numbers<[1], [0], [0], [1], [0, 0, 1, 1], [], []>} : vector<16x64xbf16>, vector<64x128xbf16>, vector<16x128xf32> -> vector<16x128xf32>
    %c128_140 = arith.constant 128 : index
    %c0_141 = arith.constant 0 : index
    %199 = vector.load %arg16[%c128_140, %c0_141] : memref<1472x128xbf16, #tpu.memory_space<vmem>>, vector<64x128xbf16>
    %cst_142 = arith.constant dense<0.000000e+00> : vector<16x128xf32>
    %200 = tpu.matmul %192, %199, %cst_142 {dimension_numbers = #tpu.dot_dimension_numbers<[1], [0], [0], [1], [0, 0, 1, 1], [], []>} : vector<16x64xbf16>, vector<64x128xbf16>, vector<16x128xf32> -> vector<16x128xf32>
    %201 = tpu.concatenate %196, %198, %200 in 0 : vector<16x128xf32>, vector<16x128xf32>, vector<16x128xf32> -> vector<48x128xf32>
    %202 = arith.truncf %201 : vector<48x128xf32> to vector<48x128xbf16>
    %cst_143 = arith.constant dense<0.000000e+00> : vector<32x128xf32>
    %203 = tpu.matmul %7, %202, %cst_143 {dimension_numbers = #tpu.dot_dimension_numbers<[1], [0], [0], [1], [0, 0, 1, 1], [], []>} : vector<32x48xbf16>, vector<48x128xbf16>, vector<32x128xf32> -> vector<32x128xf32>
    %204 = vector.extract_strided_slice %203 {offsets = [0, 0], sizes = [8, 128], strides = [1, 1]} : vector<32x128xf32> to vector<8x128xf32>
    %205 = vector.extract_strided_slice %203 {offsets = [8, 0], sizes = [8, 128], strides = [1, 1]} : vector<32x128xf32> to vector<8x128xf32>
    %206 = arith.maximumf %204, %205 : vector<8x128xf32>
    %207 = vector.extract_strided_slice %203 {offsets = [16, 0], sizes = [8, 128], strides = [1, 1]} : vector<32x128xf32> to vector<8x128xf32>
    %208 = arith.maximumf %206, %207 : vector<8x128xf32>
    %209 = vector.extract_strided_slice %203 {offsets = [24, 0], sizes = [8, 128], strides = [1, 1]} : vector<32x128xf32> to vector<8x128xf32>
    %210 = arith.maximumf %208, %209 : vector<8x128xf32>
    %c192_144 = arith.constant 192 : index
    %c0_145 = arith.constant 0 : index
    %211 = vector.load %arg16[%c192_144, %c0_145] : memref<1472x128xbf16, #tpu.memory_space<vmem>>, vector<64x128xbf16>
    %cst_146 = arith.constant dense<0.000000e+00> : vector<16x128xf32>
    %212 = tpu.matmul %192, %211, %cst_146 {dimension_numbers = #tpu.dot_dimension_numbers<[1], [0], [0], [1], [0, 0, 1, 1], [], []>} : vector<16x64xbf16>, vector<64x128xbf16>, vector<16x128xf32> -> vector<16x128xf32>
    %cst_147 = arith.constant dense<0xFF800000> : vector<128xf32>
    %213 = vector.multi_reduction <maximumf>, %212, %cst_147 [0] : vector<16x128xf32> to vector<128xf32>
    %214 = vector.shape_cast %213 : vector<128xf32> to vector<1x128xf32>
    %c256_148 = arith.constant 256 : index
    %c0_149 = arith.constant 0 : index
    %215 = vector.load %arg16[%c256_148, %c0_149] : memref<1472x128xbf16, #tpu.memory_space<vmem>>, vector<64x128xbf16>
    %cst_150 = arith.constant dense<0.000000e+00> : vector<8x128xf32>
    %216 = tpu.matmul %193, %215, %cst_150 {dimension_numbers = #tpu.dot_dimension_numbers<[1], [0], [0], [1], [0, 0, 1, 1], [], []>} : vector<8x64xbf16>, vector<64x128xbf16>, vector<8x128xf32> -> vector<8x128xf32>
    %c320_151 = arith.constant 320 : index
    %c0_152 = arith.constant 0 : index
    %217 = vector.load %arg16[%c320_151, %c0_152] : memref<1472x128xbf16, #tpu.memory_space<vmem>>, vector<128x128xbf16>
    %218 = arith.truncf %210 : vector<8x128xf32> to vector<8x128xbf16>
    %cst_153 = arith.constant dense<0.000000e+00> : vector<8x128xf32>
    %219 = tpu.matmul %218, %217, %cst_153 {dimension_numbers = #tpu.dot_dimension_numbers<[1], [0], [0], [1], [0, 0, 1, 1], [], []>} : vector<8x128xbf16>, vector<128x128xbf16>, vector<8x128xf32> -> vector<8x128xf32>
    %220 = arith.addf %216, %219 : vector<8x128xf32>
    %c0_154 = arith.constant 0 : index
    %c0_155 = arith.constant 0 : index
    %c0_156 = arith.constant 0 : index
    %221 = vector.load %arg17[%c0_154, %c0_155, %c0_156] : memref<3x1x128xf32, #tpu.memory_space<vmem>>, vector<1x1x128xf32>
    %222 = vector.shape_cast %221 : vector<1x1x128xf32> to vector<1x128xf32>
    %223 = vector.broadcast %222 : vector<1x128xf32> to vector<8x128xf32>
    %224 = arith.addf %220, %223 : vector<8x128xf32>
    %cst_157 = arith.constant 0.000000e+00 : f32
    %225 = vector.broadcast %cst_157 : f32 to vector<8x128xf32>
    %226 = arith.maximumf %224, %225 : vector<8x128xf32>
    %c448_158 = arith.constant 448 : index
    %c0_159 = arith.constant 0 : index
    %227 = vector.load %arg16[%c448_158, %c0_159] : memref<1472x128xbf16, #tpu.memory_space<vmem>>, vector<64x128xbf16>
    %cst_160 = arith.constant dense<0.000000e+00> : vector<1x128xf32>
    %228 = tpu.matmul %194, %227, %cst_160 {dimension_numbers = #tpu.dot_dimension_numbers<[1], [0], [0], [1], [0, 0, 1, 1], [], []>} : vector<1x64xbf16>, vector<64x128xbf16>, vector<1x128xf32> -> vector<1x128xf32>
    %c512_161 = arith.constant 512 : index
    %c0_162 = arith.constant 0 : index
    %229 = vector.load %arg16[%c512_161, %c0_162] : memref<1472x128xbf16, #tpu.memory_space<vmem>>, vector<128x128xbf16>
    %230 = arith.truncf %214 : vector<1x128xf32> to vector<1x128xbf16>
    %cst_163 = arith.constant dense<0.000000e+00> : vector<1x128xf32>
    %231 = tpu.matmul %230, %229, %cst_163 {dimension_numbers = #tpu.dot_dimension_numbers<[1], [0], [0], [1], [0, 0, 1, 1], [], []>} : vector<1x128xbf16>, vector<128x128xbf16>, vector<1x128xf32> -> vector<1x128xf32>
    %232 = arith.addf %228, %231 : vector<1x128xf32>
    %c1_164 = arith.constant 1 : index
    %c0_165 = arith.constant 0 : index
    %c0_166 = arith.constant 0 : index
    %233 = vector.load %arg17[%c1_164, %c0_165, %c0_166] : memref<3x1x128xf32, #tpu.memory_space<vmem>>, vector<1x1x128xf32>
    %234 = vector.shape_cast %233 : vector<1x1x128xf32> to vector<1x128xf32>
    %235 = arith.addf %232, %234 : vector<1x128xf32>
    %cst_167 = arith.constant 0.000000e+00 : f32
    %236 = vector.broadcast %cst_167 : f32 to vector<1x128xf32>
    %237 = arith.maximumf %235, %236 : vector<1x128xf32>
    %238 = arith.truncf %226 : vector<8x128xf32> to vector<8x128xbf16>
    %239 = arith.truncf %237 : vector<1x128xf32> to vector<1x128xbf16>
    %c640_168 = arith.constant 640 : index
    %c0_169 = arith.constant 0 : index
    %240 = vector.load %arg16[%c640_168, %c0_169] : memref<1472x128xbf16, #tpu.memory_space<vmem>>, vector<128x128xbf16>
    %cst_170 = arith.constant dense<0.000000e+00> : vector<8x128xf32>
    %241 = tpu.matmul %238, %240, %cst_170 {dimension_numbers = #tpu.dot_dimension_numbers<[1], [0], [0], [1], [0, 0, 1, 1], [], []>} : vector<8x128xbf16>, vector<128x128xbf16>, vector<8x128xf32> -> vector<8x128xf32>
    %c768_171 = arith.constant 768 : index
    %c0_172 = arith.constant 0 : index
    %242 = vector.load %arg16[%c768_171, %c0_172] : memref<1472x128xbf16, #tpu.memory_space<vmem>>, vector<128x128xbf16>
    %cst_173 = arith.constant dense<0.000000e+00> : vector<8x128xf32>
    %243 = tpu.matmul %238, %242, %cst_173 {dimension_numbers = #tpu.dot_dimension_numbers<[1], [0], [0], [1], [0, 0, 1, 1], [], []>} : vector<8x128xbf16>, vector<128x128xbf16>, vector<8x128xf32> -> vector<8x128xf32>
    %c896_174 = arith.constant 896 : index
    %c0_175 = arith.constant 0 : index
    %244 = vector.load %arg16[%c896_174, %c0_175] : memref<1472x128xbf16, #tpu.memory_space<vmem>>, vector<128x128xbf16>
    %cst_176 = arith.constant dense<0.000000e+00> : vector<8x128xf32>
    %245 = tpu.matmul %238, %244, %cst_176 {dimension_numbers = #tpu.dot_dimension_numbers<[1], [0], [0], [1], [0, 0, 1, 1], [], []>} : vector<8x128xbf16>, vector<128x128xbf16>, vector<8x128xf32> -> vector<8x128xf32>
    %246 = tpu.concatenate %241, %243, %245 in 0 : vector<8x128xf32>, vector<8x128xf32>, vector<8x128xf32> -> vector<24x128xf32>
    %247 = arith.truncf %246 : vector<24x128xf32> to vector<24x128xbf16>
    %cst_177 = arith.constant dense<0.000000e+00> : vector<32x128xf32>
    %248 = tpu.matmul %9, %247, %cst_177 {dimension_numbers = #tpu.dot_dimension_numbers<[1], [0], [0], [1], [0, 0, 1, 1], [], []>} : vector<32x24xbf16>, vector<24x128xbf16>, vector<32x128xf32> -> vector<32x128xf32>
    %249 = vector.extract_strided_slice %248 {offsets = [0, 0], sizes = [16, 128], strides = [1, 1]} : vector<32x128xf32> to vector<16x128xf32>
    %250 = vector.extract_strided_slice %248 {offsets = [16, 0], sizes = [16, 128], strides = [1, 1]} : vector<32x128xf32> to vector<16x128xf32>
    %251 = arith.maximumf %249, %250 : vector<16x128xf32>
    %c1024 = arith.constant 1024 : index
    %c0_178 = arith.constant 0 : index
    %252 = vector.load %arg16[%c1024, %c0_178] : memref<1472x128xbf16, #tpu.memory_space<vmem>>, vector<128x128xbf16>
    %cst_179 = arith.constant dense<0.000000e+00> : vector<1x128xf32>
    %253 = tpu.matmul %239, %252, %cst_179 {dimension_numbers = #tpu.dot_dimension_numbers<[1], [0], [0], [1], [0, 0, 1, 1], [], []>} : vector<1x128xbf16>, vector<128x128xbf16>, vector<1x128xf32> -> vector<1x128xf32>
    %c1152 = arith.constant 1152 : index
    %c0_180 = arith.constant 0 : index
    %254 = vector.load %arg16[%c1152, %c0_180] : memref<1472x128xbf16, #tpu.memory_space<vmem>>, vector<64x128xbf16>
    %cst_181 = arith.constant dense<0.000000e+00> : vector<16x128xf32>
    %255 = tpu.matmul %192, %254, %cst_181 {dimension_numbers = #tpu.dot_dimension_numbers<[1], [0], [0], [1], [0, 0, 1, 1], [], []>} : vector<16x64xbf16>, vector<64x128xbf16>, vector<16x128xf32> -> vector<16x128xf32>
    %c1216 = arith.constant 1216 : index
    %c0_182 = arith.constant 0 : index
    %256 = vector.load %arg16[%c1216, %c0_182] : memref<1472x128xbf16, #tpu.memory_space<vmem>>, vector<128x128xbf16>
    %257 = arith.truncf %251 : vector<16x128xf32> to vector<16x128xbf16>
    %cst_183 = arith.constant dense<0.000000e+00> : vector<16x128xf32>
    %258 = tpu.matmul %257, %256, %cst_183 {dimension_numbers = #tpu.dot_dimension_numbers<[1], [0], [0], [1], [0, 0, 1, 1], [], []>} : vector<16x128xbf16>, vector<128x128xbf16>, vector<16x128xf32> -> vector<16x128xf32>
    %259 = arith.addf %255, %258 : vector<16x128xf32>
    %c1344 = arith.constant 1344 : index
    %c0_184 = arith.constant 0 : index
    %260 = vector.load %arg16[%c1344, %c0_184] : memref<1472x128xbf16, #tpu.memory_space<vmem>>, vector<128x128xbf16>
    %261 = arith.truncf %253 : vector<1x128xf32> to vector<1x128xbf16>
    %cst_185 = arith.constant dense<0.000000e+00> : vector<1x128xf32>
    %262 = tpu.matmul %261, %260, %cst_185 {dimension_numbers = #tpu.dot_dimension_numbers<[1], [0], [0], [1], [0, 0, 1, 1], [], []>} : vector<1x128xbf16>, vector<128x128xbf16>, vector<1x128xf32> -> vector<1x128xf32>
    %263 = vector.broadcast %262 : vector<1x128xf32> to vector<16x128xf32>
    %264 = arith.addf %259, %263 : vector<16x128xf32>
    %c2_186 = arith.constant 2 : index
    %c0_187 = arith.constant 0 : index
    %c0_188 = arith.constant 0 : index
    %265 = vector.load %arg17[%c2_186, %c0_187, %c0_188] : memref<3x1x128xf32, #tpu.memory_space<vmem>>, vector<1x1x128xf32>
    %266 = vector.shape_cast %265 : vector<1x1x128xf32> to vector<1x128xf32>
    %267 = vector.broadcast %266 : vector<1x128xf32> to vector<16x128xf32>
    %268 = arith.addf %264, %267 : vector<16x128xf32>
    %cst_189 = arith.constant 0.000000e+00 : f32
    %269 = vector.broadcast %cst_189 : f32 to vector<16x128xf32>
    %270 = arith.maximumf %268, %269 : vector<16x128xf32>
    %271 = arith.truncf %270 : vector<16x128xf32> to vector<16x128xbf16>
    %272 = arith.truncf %226 : vector<8x128xf32> to vector<8x128xbf16>
    %273 = arith.truncf %237 : vector<1x128xf32> to vector<1x128xbf16>
    %c0_190 = arith.constant 0 : index
    %c0_191 = arith.constant 0 : index
    %274 = vector.load %arg18[%c0_190, %c0_191] : memref<2944x256xbf16, #tpu.memory_space<vmem>>, vector<128x256xbf16>
    %cst_192 = arith.constant dense<0.000000e+00> : vector<16x256xf32>
    %275 = tpu.matmul %271, %274, %cst_192 {dimension_numbers = #tpu.dot_dimension_numbers<[1], [0], [0], [1], [0, 0, 1, 1], [], []>} : vector<16x128xbf16>, vector<128x256xbf16>, vector<16x256xf32> -> vector<16x256xf32>
    %c128_193 = arith.constant 128 : index
    %c0_194 = arith.constant 0 : index
    %276 = vector.load %arg18[%c128_193, %c0_194] : memref<2944x256xbf16, #tpu.memory_space<vmem>>, vector<128x256xbf16>
    %cst_195 = arith.constant dense<0.000000e+00> : vector<16x256xf32>
    %277 = tpu.matmul %271, %276, %cst_195 {dimension_numbers = #tpu.dot_dimension_numbers<[1], [0], [0], [1], [0, 0, 1, 1], [], []>} : vector<16x128xbf16>, vector<128x256xbf16>, vector<16x256xf32> -> vector<16x256xf32>
    %c256_196 = arith.constant 256 : index
    %c0_197 = arith.constant 0 : index
    %278 = vector.load %arg18[%c256_196, %c0_197] : memref<2944x256xbf16, #tpu.memory_space<vmem>>, vector<128x256xbf16>
    %cst_198 = arith.constant dense<0.000000e+00> : vector<16x256xf32>
    %279 = tpu.matmul %271, %278, %cst_198 {dimension_numbers = #tpu.dot_dimension_numbers<[1], [0], [0], [1], [0, 0, 1, 1], [], []>} : vector<16x128xbf16>, vector<128x256xbf16>, vector<16x256xf32> -> vector<16x256xf32>
    %280 = tpu.concatenate %275, %277, %279 in 0 : vector<16x256xf32>, vector<16x256xf32>, vector<16x256xf32> -> vector<48x256xf32>
    %281 = arith.truncf %280 : vector<48x256xf32> to vector<48x256xbf16>
    %cst_199 = arith.constant dense<0.000000e+00> : vector<32x256xf32>
    %282 = tpu.matmul %7, %281, %cst_199 {dimension_numbers = #tpu.dot_dimension_numbers<[1], [0], [0], [1], [0, 0, 1, 1], [], []>} : vector<32x48xbf16>, vector<48x256xbf16>, vector<32x256xf32> -> vector<32x256xf32>
    %283 = vector.extract_strided_slice %282 {offsets = [0, 0], sizes = [8, 256], strides = [1, 1]} : vector<32x256xf32> to vector<8x256xf32>
    %284 = vector.extract_strided_slice %282 {offsets = [8, 0], sizes = [8, 256], strides = [1, 1]} : vector<32x256xf32> to vector<8x256xf32>
    %285 = arith.maximumf %283, %284 : vector<8x256xf32>
    %286 = vector.extract_strided_slice %282 {offsets = [16, 0], sizes = [8, 256], strides = [1, 1]} : vector<32x256xf32> to vector<8x256xf32>
    %287 = arith.maximumf %285, %286 : vector<8x256xf32>
    %288 = vector.extract_strided_slice %282 {offsets = [24, 0], sizes = [8, 256], strides = [1, 1]} : vector<32x256xf32> to vector<8x256xf32>
    %289 = arith.maximumf %287, %288 : vector<8x256xf32>
    %c384_200 = arith.constant 384 : index
    %c0_201 = arith.constant 0 : index
    %290 = vector.load %arg18[%c384_200, %c0_201] : memref<2944x256xbf16, #tpu.memory_space<vmem>>, vector<128x256xbf16>
    %cst_202 = arith.constant dense<0.000000e+00> : vector<16x256xf32>
    %291 = tpu.matmul %271, %290, %cst_202 {dimension_numbers = #tpu.dot_dimension_numbers<[1], [0], [0], [1], [0, 0, 1, 1], [], []>} : vector<16x128xbf16>, vector<128x256xbf16>, vector<16x256xf32> -> vector<16x256xf32>
    %cst_203 = arith.constant dense<0xFF800000> : vector<256xf32>
    %292 = vector.multi_reduction <maximumf>, %291, %cst_203 [0] : vector<16x256xf32> to vector<256xf32>
    %293 = vector.shape_cast %292 : vector<256xf32> to vector<1x256xf32>
    %c512_204 = arith.constant 512 : index
    %c0_205 = arith.constant 0 : index
    %294 = vector.load %arg18[%c512_204, %c0_205] : memref<2944x256xbf16, #tpu.memory_space<vmem>>, vector<128x256xbf16>
    %cst_206 = arith.constant dense<0.000000e+00> : vector<8x256xf32>
    %295 = tpu.matmul %272, %294, %cst_206 {dimension_numbers = #tpu.dot_dimension_numbers<[1], [0], [0], [1], [0, 0, 1, 1], [], []>} : vector<8x128xbf16>, vector<128x256xbf16>, vector<8x256xf32> -> vector<8x256xf32>
    %c640_207 = arith.constant 640 : index
    %c0_208 = arith.constant 0 : index
    %296 = vector.load %arg18[%c640_207, %c0_208] : memref<2944x256xbf16, #tpu.memory_space<vmem>>, vector<256x256xbf16>
    %297 = arith.truncf %289 : vector<8x256xf32> to vector<8x256xbf16>
    %cst_209 = arith.constant dense<0.000000e+00> : vector<8x256xf32>
    %298 = tpu.matmul %297, %296, %cst_209 {dimension_numbers = #tpu.dot_dimension_numbers<[1], [0], [0], [1], [0, 0, 1, 1], [], []>} : vector<8x256xbf16>, vector<256x256xbf16>, vector<8x256xf32> -> vector<8x256xf32>
    %299 = arith.addf %295, %298 : vector<8x256xf32>
    %c0_210 = arith.constant 0 : index
    %c0_211 = arith.constant 0 : index
    %c0_212 = arith.constant 0 : index
    %300 = vector.load %arg19[%c0_210, %c0_211, %c0_212] : memref<3x1x256xf32, #tpu.memory_space<vmem>>, vector<1x1x256xf32>
    %301 = vector.shape_cast %300 : vector<1x1x256xf32> to vector<1x256xf32>
    %302 = vector.broadcast %301 : vector<1x256xf32> to vector<8x256xf32>
    %303 = arith.addf %299, %302 : vector<8x256xf32>
    %cst_213 = arith.constant 0.000000e+00 : f32
    %304 = vector.broadcast %cst_213 : f32 to vector<8x256xf32>
    %305 = arith.maximumf %303, %304 : vector<8x256xf32>
    %c896_214 = arith.constant 896 : index
    %c0_215 = arith.constant 0 : index
    %306 = vector.load %arg18[%c896_214, %c0_215] : memref<2944x256xbf16, #tpu.memory_space<vmem>>, vector<128x256xbf16>
    %cst_216 = arith.constant dense<0.000000e+00> : vector<1x256xf32>
    %307 = tpu.matmul %273, %306, %cst_216 {dimension_numbers = #tpu.dot_dimension_numbers<[1], [0], [0], [1], [0, 0, 1, 1], [], []>} : vector<1x128xbf16>, vector<128x256xbf16>, vector<1x256xf32> -> vector<1x256xf32>
    %c1024_217 = arith.constant 1024 : index
    %c0_218 = arith.constant 0 : index
    %308 = vector.load %arg18[%c1024_217, %c0_218] : memref<2944x256xbf16, #tpu.memory_space<vmem>>, vector<256x256xbf16>
    %309 = arith.truncf %293 : vector<1x256xf32> to vector<1x256xbf16>
    %cst_219 = arith.constant dense<0.000000e+00> : vector<1x256xf32>
    %310 = tpu.matmul %309, %308, %cst_219 {dimension_numbers = #tpu.dot_dimension_numbers<[1], [0], [0], [1], [0, 0, 1, 1], [], []>} : vector<1x256xbf16>, vector<256x256xbf16>, vector<1x256xf32> -> vector<1x256xf32>
    %311 = arith.addf %307, %310 : vector<1x256xf32>
    %c1_220 = arith.constant 1 : index
    %c0_221 = arith.constant 0 : index
    %c0_222 = arith.constant 0 : index
    %312 = vector.load %arg19[%c1_220, %c0_221, %c0_222] : memref<3x1x256xf32, #tpu.memory_space<vmem>>, vector<1x1x256xf32>
    %313 = vector.shape_cast %312 : vector<1x1x256xf32> to vector<1x256xf32>
    %314 = arith.addf %311, %313 : vector<1x256xf32>
    %cst_223 = arith.constant 0.000000e+00 : f32
    %315 = vector.broadcast %cst_223 : f32 to vector<1x256xf32>
    %316 = arith.maximumf %314, %315 : vector<1x256xf32>
    %317 = arith.truncf %305 : vector<8x256xf32> to vector<8x256xbf16>
    %318 = arith.truncf %316 : vector<1x256xf32> to vector<1x256xbf16>
    %c1280 = arith.constant 1280 : index
    %c0_224 = arith.constant 0 : index
    %319 = vector.load %arg18[%c1280, %c0_224] : memref<2944x256xbf16, #tpu.memory_space<vmem>>, vector<256x256xbf16>
    %cst_225 = arith.constant dense<0.000000e+00> : vector<8x256xf32>
    %320 = tpu.matmul %317, %319, %cst_225 {dimension_numbers = #tpu.dot_dimension_numbers<[1], [0], [0], [1], [0, 0, 1, 1], [], []>} : vector<8x256xbf16>, vector<256x256xbf16>, vector<8x256xf32> -> vector<8x256xf32>
    %c1536 = arith.constant 1536 : index
    %c0_226 = arith.constant 0 : index
    %321 = vector.load %arg18[%c1536, %c0_226] : memref<2944x256xbf16, #tpu.memory_space<vmem>>, vector<256x256xbf16>
    %cst_227 = arith.constant dense<0.000000e+00> : vector<8x256xf32>
    %322 = tpu.matmul %317, %321, %cst_227 {dimension_numbers = #tpu.dot_dimension_numbers<[1], [0], [0], [1], [0, 0, 1, 1], [], []>} : vector<8x256xbf16>, vector<256x256xbf16>, vector<8x256xf32> -> vector<8x256xf32>
    %c1792 = arith.constant 1792 : index
    %c0_228 = arith.constant 0 : index
    %323 = vector.load %arg18[%c1792, %c0_228] : memref<2944x256xbf16, #tpu.memory_space<vmem>>, vector<256x256xbf16>
    %cst_229 = arith.constant dense<0.000000e+00> : vector<8x256xf32>
    %324 = tpu.matmul %317, %323, %cst_229 {dimension_numbers = #tpu.dot_dimension_numbers<[1], [0], [0], [1], [0, 0, 1, 1], [], []>} : vector<8x256xbf16>, vector<256x256xbf16>, vector<8x256xf32> -> vector<8x256xf32>
    %325 = tpu.concatenate %320, %322, %324 in 0 : vector<8x256xf32>, vector<8x256xf32>, vector<8x256xf32> -> vector<24x256xf32>
    %326 = arith.truncf %325 : vector<24x256xf32> to vector<24x256xbf16>
    %cst_230 = arith.constant dense<0.000000e+00> : vector<32x256xf32>
    %327 = tpu.matmul %9, %326, %cst_230 {dimension_numbers = #tpu.dot_dimension_numbers<[1], [0], [0], [1], [0, 0, 1, 1], [], []>} : vector<32x24xbf16>, vector<24x256xbf16>, vector<32x256xf32> -> vector<32x256xf32>
    %328 = vector.extract_strided_slice %327 {offsets = [0, 0], sizes = [16, 256], strides = [1, 1]} : vector<32x256xf32> to vector<16x256xf32>
    %329 = vector.extract_strided_slice %327 {offsets = [16, 0], sizes = [16, 256], strides = [1, 1]} : vector<32x256xf32> to vector<16x256xf32>
    %330 = arith.maximumf %328, %329 : vector<16x256xf32>
    %c2048 = arith.constant 2048 : index
    %c0_231 = arith.constant 0 : index
    %331 = vector.load %arg18[%c2048, %c0_231] : memref<2944x256xbf16, #tpu.memory_space<vmem>>, vector<256x256xbf16>
    %cst_232 = arith.constant dense<0.000000e+00> : vector<1x256xf32>
    %332 = tpu.matmul %318, %331, %cst_232 {dimension_numbers = #tpu.dot_dimension_numbers<[1], [0], [0], [1], [0, 0, 1, 1], [], []>} : vector<1x256xbf16>, vector<256x256xbf16>, vector<1x256xf32> -> vector<1x256xf32>
    %c2304 = arith.constant 2304 : index
    %c0_233 = arith.constant 0 : index
    %333 = vector.load %arg18[%c2304, %c0_233] : memref<2944x256xbf16, #tpu.memory_space<vmem>>, vector<128x256xbf16>
    %cst_234 = arith.constant dense<0.000000e+00> : vector<16x256xf32>
    %334 = tpu.matmul %271, %333, %cst_234 {dimension_numbers = #tpu.dot_dimension_numbers<[1], [0], [0], [1], [0, 0, 1, 1], [], []>} : vector<16x128xbf16>, vector<128x256xbf16>, vector<16x256xf32> -> vector<16x256xf32>
    %c2432 = arith.constant 2432 : index
    %c0_235 = arith.constant 0 : index
    %335 = vector.load %arg18[%c2432, %c0_235] : memref<2944x256xbf16, #tpu.memory_space<vmem>>, vector<256x256xbf16>
    %336 = arith.truncf %330 : vector<16x256xf32> to vector<16x256xbf16>
    %cst_236 = arith.constant dense<0.000000e+00> : vector<16x256xf32>
    %337 = tpu.matmul %336, %335, %cst_236 {dimension_numbers = #tpu.dot_dimension_numbers<[1], [0], [0], [1], [0, 0, 1, 1], [], []>} : vector<16x256xbf16>, vector<256x256xbf16>, vector<16x256xf32> -> vector<16x256xf32>
    %338 = arith.addf %334, %337 : vector<16x256xf32>
    %c2688 = arith.constant 2688 : index
    %c0_237 = arith.constant 0 : index
    %339 = vector.load %arg18[%c2688, %c0_237] : memref<2944x256xbf16, #tpu.memory_space<vmem>>, vector<256x256xbf16>
    %340 = arith.truncf %332 : vector<1x256xf32> to vector<1x256xbf16>
    %cst_238 = arith.constant dense<0.000000e+00> : vector<1x256xf32>
    %341 = tpu.matmul %340, %339, %cst_238 {dimension_numbers = #tpu.dot_dimension_numbers<[1], [0], [0], [1], [0, 0, 1, 1], [], []>} : vector<1x256xbf16>, vector<256x256xbf16>, vector<1x256xf32> -> vector<1x256xf32>
    %342 = vector.broadcast %341 : vector<1x256xf32> to vector<16x256xf32>
    %343 = arith.addf %338, %342 : vector<16x256xf32>
    %c2_239 = arith.constant 2 : index
    %c0_240 = arith.constant 0 : index
    %c0_241 = arith.constant 0 : index
    %344 = vector.load %arg19[%c2_239, %c0_240, %c0_241] : memref<3x1x256xf32, #tpu.memory_space<vmem>>, vector<1x1x256xf32>
    %345 = vector.shape_cast %344 : vector<1x1x256xf32> to vector<1x256xf32>
    %346 = vector.broadcast %345 : vector<1x256xf32> to vector<16x256xf32>
    %347 = arith.addf %343, %346 : vector<16x256xf32>
    %cst_242 = arith.constant 0.000000e+00 : f32
    %348 = vector.broadcast %cst_242 : f32 to vector<16x256xf32>
    %349 = arith.maximumf %347, %348 : vector<16x256xf32>
    %350 = arith.truncf %349 : vector<16x256xf32> to vector<16x256xbf16>
    %351 = arith.truncf %305 : vector<8x256xf32> to vector<8x256xbf16>
    %352 = arith.truncf %316 : vector<1x256xf32> to vector<1x256xbf16>
    %c0_243 = arith.constant 0 : index
    %c0_244 = arith.constant 0 : index
    %353 = vector.load %arg20[%c0_243, %c0_244] : memref<3840x256xbf16, #tpu.memory_space<vmem>>, vector<256x256xbf16>
    %cst_245 = arith.constant dense<0.000000e+00> : vector<16x256xf32>
    %354 = tpu.matmul %350, %353, %cst_245 {dimension_numbers = #tpu.dot_dimension_numbers<[1], [0], [0], [1], [0, 0, 1, 1], [], []>} : vector<16x256xbf16>, vector<256x256xbf16>, vector<16x256xf32> -> vector<16x256xf32>
    %c256_246 = arith.constant 256 : index
    %c0_247 = arith.constant 0 : index
    %355 = vector.load %arg20[%c256_246, %c0_247] : memref<3840x256xbf16, #tpu.memory_space<vmem>>, vector<256x256xbf16>
    %cst_248 = arith.constant dense<0.000000e+00> : vector<16x256xf32>
    %356 = tpu.matmul %350, %355, %cst_248 {dimension_numbers = #tpu.dot_dimension_numbers<[1], [0], [0], [1], [0, 0, 1, 1], [], []>} : vector<16x256xbf16>, vector<256x256xbf16>, vector<16x256xf32> -> vector<16x256xf32>
    %c512_249 = arith.constant 512 : index
    %c0_250 = arith.constant 0 : index
    %357 = vector.load %arg20[%c512_249, %c0_250] : memref<3840x256xbf16, #tpu.memory_space<vmem>>, vector<256x256xbf16>
    %cst_251 = arith.constant dense<0.000000e+00> : vector<16x256xf32>
    %358 = tpu.matmul %350, %357, %cst_251 {dimension_numbers = #tpu.dot_dimension_numbers<[1], [0], [0], [1], [0, 0, 1, 1], [], []>} : vector<16x256xbf16>, vector<256x256xbf16>, vector<16x256xf32> -> vector<16x256xf32>
    %359 = tpu.concatenate %354, %356, %358 in 0 : vector<16x256xf32>, vector<16x256xf32>, vector<16x256xf32> -> vector<48x256xf32>
    %360 = arith.truncf %359 : vector<48x256xf32> to vector<48x256xbf16>
    %cst_252 = arith.constant dense<0.000000e+00> : vector<32x256xf32>
    %361 = tpu.matmul %7, %360, %cst_252 {dimension_numbers = #tpu.dot_dimension_numbers<[1], [0], [0], [1], [0, 0, 1, 1], [], []>} : vector<32x48xbf16>, vector<48x256xbf16>, vector<32x256xf32> -> vector<32x256xf32>
    %362 = vector.extract_strided_slice %361 {offsets = [0, 0], sizes = [8, 256], strides = [1, 1]} : vector<32x256xf32> to vector<8x256xf32>
    %363 = vector.extract_strided_slice %361 {offsets = [8, 0], sizes = [8, 256], strides = [1, 1]} : vector<32x256xf32> to vector<8x256xf32>
    %364 = arith.maximumf %362, %363 : vector<8x256xf32>
    %365 = vector.extract_strided_slice %361 {offsets = [16, 0], sizes = [8, 256], strides = [1, 1]} : vector<32x256xf32> to vector<8x256xf32>
    %366 = arith.maximumf %364, %365 : vector<8x256xf32>
    %367 = vector.extract_strided_slice %361 {offsets = [24, 0], sizes = [8, 256], strides = [1, 1]} : vector<32x256xf32> to vector<8x256xf32>
    %368 = arith.maximumf %366, %367 : vector<8x256xf32>
    %c768_253 = arith.constant 768 : index
    %c0_254 = arith.constant 0 : index
    %369 = vector.load %arg20[%c768_253, %c0_254] : memref<3840x256xbf16, #tpu.memory_space<vmem>>, vector<256x256xbf16>
    %cst_255 = arith.constant dense<0.000000e+00> : vector<16x256xf32>
    %370 = tpu.matmul %350, %369, %cst_255 {dimension_numbers = #tpu.dot_dimension_numbers<[1], [0], [0], [1], [0, 0, 1, 1], [], []>} : vector<16x256xbf16>, vector<256x256xbf16>, vector<16x256xf32> -> vector<16x256xf32>
    %cst_256 = arith.constant dense<0xFF800000> : vector<256xf32>
    %371 = vector.multi_reduction <maximumf>, %370, %cst_256 [0] : vector<16x256xf32> to vector<256xf32>
    %372 = vector.shape_cast %371 : vector<256xf32> to vector<1x256xf32>
    %c1024_257 = arith.constant 1024 : index
    %c0_258 = arith.constant 0 : index
    %373 = vector.load %arg20[%c1024_257, %c0_258] : memref<3840x256xbf16, #tpu.memory_space<vmem>>, vector<256x256xbf16>
    %cst_259 = arith.constant dense<0.000000e+00> : vector<8x256xf32>
    %374 = tpu.matmul %351, %373, %cst_259 {dimension_numbers = #tpu.dot_dimension_numbers<[1], [0], [0], [1], [0, 0, 1, 1], [], []>} : vector<8x256xbf16>, vector<256x256xbf16>, vector<8x256xf32> -> vector<8x256xf32>
    %c1280_260 = arith.constant 1280 : index
    %c0_261 = arith.constant 0 : index
    %375 = vector.load %arg20[%c1280_260, %c0_261] : memref<3840x256xbf16, #tpu.memory_space<vmem>>, vector<256x256xbf16>
    %376 = arith.truncf %368 : vector<8x256xf32> to vector<8x256xbf16>
    %cst_262 = arith.constant dense<0.000000e+00> : vector<8x256xf32>
    %377 = tpu.matmul %376, %375, %cst_262 {dimension_numbers = #tpu.dot_dimension_numbers<[1], [0], [0], [1], [0, 0, 1, 1], [], []>} : vector<8x256xbf16>, vector<256x256xbf16>, vector<8x256xf32> -> vector<8x256xf32>
    %378 = arith.addf %374, %377 : vector<8x256xf32>
    %c0_263 = arith.constant 0 : index
    %c0_264 = arith.constant 0 : index
    %c0_265 = arith.constant 0 : index
    %379 = vector.load %arg21[%c0_263, %c0_264, %c0_265] : memref<3x1x256xf32, #tpu.memory_space<vmem>>, vector<1x1x256xf32>
    %380 = vector.shape_cast %379 : vector<1x1x256xf32> to vector<1x256xf32>
    %381 = vector.broadcast %380 : vector<1x256xf32> to vector<8x256xf32>
    %382 = arith.addf %378, %381 : vector<8x256xf32>
    %cst_266 = arith.constant 0.000000e+00 : f32
    %383 = vector.broadcast %cst_266 : f32 to vector<8x256xf32>
    %384 = arith.maximumf %382, %383 : vector<8x256xf32>
    %c1536_267 = arith.constant 1536 : index
    %c0_268 = arith.constant 0 : index
    %385 = vector.load %arg20[%c1536_267, %c0_268] : memref<3840x256xbf16, #tpu.memory_space<vmem>>, vector<256x256xbf16>
    %cst_269 = arith.constant dense<0.000000e+00> : vector<1x256xf32>
    %386 = tpu.matmul %352, %385, %cst_269 {dimension_numbers = #tpu.dot_dimension_numbers<[1], [0], [0], [1], [0, 0, 1, 1], [], []>} : vector<1x256xbf16>, vector<256x256xbf16>, vector<1x256xf32> -> vector<1x256xf32>
    %c1792_270 = arith.constant 1792 : index
    %c0_271 = arith.constant 0 : index
    %387 = vector.load %arg20[%c1792_270, %c0_271] : memref<3840x256xbf16, #tpu.memory_space<vmem>>, vector<256x256xbf16>
    %388 = arith.truncf %372 : vector<1x256xf32> to vector<1x256xbf16>
    %cst_272 = arith.constant dense<0.000000e+00> : vector<1x256xf32>
    %389 = tpu.matmul %388, %387, %cst_272 {dimension_numbers = #tpu.dot_dimension_numbers<[1], [0], [0], [1], [0, 0, 1, 1], [], []>} : vector<1x256xbf16>, vector<256x256xbf16>, vector<1x256xf32> -> vector<1x256xf32>
    %390 = arith.addf %386, %389 : vector<1x256xf32>
    %c1_273 = arith.constant 1 : index
    %c0_274 = arith.constant 0 : index
    %c0_275 = arith.constant 0 : index
    %391 = vector.load %arg21[%c1_273, %c0_274, %c0_275] : memref<3x1x256xf32, #tpu.memory_space<vmem>>, vector<1x1x256xf32>
    %392 = vector.shape_cast %391 : vector<1x1x256xf32> to vector<1x256xf32>
    %393 = arith.addf %390, %392 : vector<1x256xf32>
    %cst_276 = arith.constant 0.000000e+00 : f32
    %394 = vector.broadcast %cst_276 : f32 to vector<1x256xf32>
    %395 = arith.maximumf %393, %394 : vector<1x256xf32>
    %396 = arith.truncf %384 : vector<8x256xf32> to vector<8x256xbf16>
    %397 = arith.truncf %395 : vector<1x256xf32> to vector<1x256xbf16>
    %c2048_277 = arith.constant 2048 : index
    %c0_278 = arith.constant 0 : index
    %398 = vector.load %arg20[%c2048_277, %c0_278] : memref<3840x256xbf16, #tpu.memory_space<vmem>>, vector<256x256xbf16>
    %cst_279 = arith.constant dense<0.000000e+00> : vector<8x256xf32>
    %399 = tpu.matmul %396, %398, %cst_279 {dimension_numbers = #tpu.dot_dimension_numbers<[1], [0], [0], [1], [0, 0, 1, 1], [], []>} : vector<8x256xbf16>, vector<256x256xbf16>, vector<8x256xf32> -> vector<8x256xf32>
    %c2304_280 = arith.constant 2304 : index
    %c0_281 = arith.constant 0 : index
    %400 = vector.load %arg20[%c2304_280, %c0_281] : memref<3840x256xbf16, #tpu.memory_space<vmem>>, vector<256x256xbf16>
    %cst_282 = arith.constant dense<0.000000e+00> : vector<8x256xf32>
    %401 = tpu.matmul %396, %400, %cst_282 {dimension_numbers = #tpu.dot_dimension_numbers<[1], [0], [0], [1], [0, 0, 1, 1], [], []>} : vector<8x256xbf16>, vector<256x256xbf16>, vector<8x256xf32> -> vector<8x256xf32>
    %c2560 = arith.constant 2560 : index
    %c0_283 = arith.constant 0 : index
    %402 = vector.load %arg20[%c2560, %c0_283] : memref<3840x256xbf16, #tpu.memory_space<vmem>>, vector<256x256xbf16>
    %cst_284 = arith.constant dense<0.000000e+00> : vector<8x256xf32>
    %403 = tpu.matmul %396, %402, %cst_284 {dimension_numbers = #tpu.dot_dimension_numbers<[1], [0], [0], [1], [0, 0, 1, 1], [], []>} : vector<8x256xbf16>, vector<256x256xbf16>, vector<8x256xf32> -> vector<8x256xf32>
    %404 = tpu.concatenate %399, %401, %403 in 0 : vector<8x256xf32>, vector<8x256xf32>, vector<8x256xf32> -> vector<24x256xf32>
    %405 = arith.truncf %404 : vector<24x256xf32> to vector<24x256xbf16>
    %cst_285 = arith.constant dense<0.000000e+00> : vector<32x256xf32>
    %406 = tpu.matmul %9, %405, %cst_285 {dimension_numbers = #tpu.dot_dimension_numbers<[1], [0], [0], [1], [0, 0, 1, 1], [], []>} : vector<32x24xbf16>, vector<24x256xbf16>, vector<32x256xf32> -> vector<32x256xf32>
    %407 = vector.extract_strided_slice %406 {offsets = [0, 0], sizes = [16, 256], strides = [1, 1]} : vector<32x256xf32> to vector<16x256xf32>
    %408 = vector.extract_strided_slice %406 {offsets = [16, 0], sizes = [16, 256], strides = [1, 1]} : vector<32x256xf32> to vector<16x256xf32>
    %409 = arith.maximumf %407, %408 : vector<16x256xf32>
    %c2816 = arith.constant 2816 : index
    %c0_286 = arith.constant 0 : index
    %410 = vector.load %arg20[%c2816, %c0_286] : memref<3840x256xbf16, #tpu.memory_space<vmem>>, vector<256x256xbf16>
    %cst_287 = arith.constant dense<0.000000e+00> : vector<1x256xf32>
    %411 = tpu.matmul %397, %410, %cst_287 {dimension_numbers = #tpu.dot_dimension_numbers<[1], [0], [0], [1], [0, 0, 1, 1], [], []>} : vector<1x256xbf16>, vector<256x256xbf16>, vector<1x256xf32> -> vector<1x256xf32>
    %c3072 = arith.constant 3072 : index
    %c0_288 = arith.constant 0 : index
    %412 = vector.load %arg20[%c3072, %c0_288] : memref<3840x256xbf16, #tpu.memory_space<vmem>>, vector<256x256xbf16>
    %cst_289 = arith.constant dense<0.000000e+00> : vector<16x256xf32>
    %413 = tpu.matmul %350, %412, %cst_289 {dimension_numbers = #tpu.dot_dimension_numbers<[1], [0], [0], [1], [0, 0, 1, 1], [], []>} : vector<16x256xbf16>, vector<256x256xbf16>, vector<16x256xf32> -> vector<16x256xf32>
    %c3328 = arith.constant 3328 : index
    %c0_290 = arith.constant 0 : index
    %414 = vector.load %arg20[%c3328, %c0_290] : memref<3840x256xbf16, #tpu.memory_space<vmem>>, vector<256x256xbf16>
    %415 = arith.truncf %409 : vector<16x256xf32> to vector<16x256xbf16>
    %cst_291 = arith.constant dense<0.000000e+00> : vector<16x256xf32>
    %416 = tpu.matmul %415, %414, %cst_291 {dimension_numbers = #tpu.dot_dimension_numbers<[1], [0], [0], [1], [0, 0, 1, 1], [], []>} : vector<16x256xbf16>, vector<256x256xbf16>, vector<16x256xf32> -> vector<16x256xf32>
    %417 = arith.addf %413, %416 : vector<16x256xf32>
    %c3584 = arith.constant 3584 : index
    %c0_292 = arith.constant 0 : index
    %418 = vector.load %arg20[%c3584, %c0_292] : memref<3840x256xbf16, #tpu.memory_space<vmem>>, vector<256x256xbf16>
    %419 = arith.truncf %411 : vector<1x256xf32> to vector<1x256xbf16>
    %cst_293 = arith.constant dense<0.000000e+00> : vector<1x256xf32>
    %420 = tpu.matmul %419, %418, %cst_293 {dimension_numbers = #tpu.dot_dimension_numbers<[1], [0], [0], [1], [0, 0, 1, 1], [], []>} : vector<1x256xbf16>, vector<256x256xbf16>, vector<1x256xf32> -> vector<1x256xf32>
    %421 = vector.broadcast %420 : vector<1x256xf32> to vector<16x256xf32>
    %422 = arith.addf %417, %421 : vector<16x256xf32>
    %c2_294 = arith.constant 2 : index
    %c0_295 = arith.constant 0 : index
    %c0_296 = arith.constant 0 : index
    %423 = vector.load %arg21[%c2_294, %c0_295, %c0_296] : memref<3x1x256xf32, #tpu.memory_space<vmem>>, vector<1x1x256xf32>
    %424 = vector.shape_cast %423 : vector<1x1x256xf32> to vector<1x256xf32>
    %425 = vector.broadcast %424 : vector<1x256xf32> to vector<16x256xf32>
    %426 = arith.addf %422, %425 : vector<16x256xf32>
    %cst_297 = arith.constant 0.000000e+00 : f32
    %427 = vector.broadcast %cst_297 : f32 to vector<16x256xf32>
    %428 = arith.maximumf %426, %427 : vector<16x256xf32>
    %429 = arith.truncf %428 : vector<16x256xf32> to vector<16x256xbf16>
    %430 = arith.truncf %384 : vector<8x256xf32> to vector<8x256xbf16>
    %431 = arith.truncf %395 : vector<1x256xf32> to vector<1x256xbf16>
    %c0_298 = arith.constant 0 : index
    %c0_299 = arith.constant 0 : index
    %432 = vector.load %arg22[%c0_298, %c0_299] : memref<2816x128xbf16, #tpu.memory_space<vmem>>, vector<256x128xbf16>
    %cst_300 = arith.constant dense<0.000000e+00> : vector<16x128xf32>
    %433 = tpu.matmul %429, %432, %cst_300 {dimension_numbers = #tpu.dot_dimension_numbers<[1], [0], [0], [1], [0, 0, 1, 1], [], []>} : vector<16x256xbf16>, vector<256x128xbf16>, vector<16x128xf32> -> vector<16x128xf32>
    %c256_301 = arith.constant 256 : index
    %c0_302 = arith.constant 0 : index
    %434 = vector.load %arg22[%c256_301, %c0_302] : memref<2816x128xbf16, #tpu.memory_space<vmem>>, vector<256x128xbf16>
    %cst_303 = arith.constant dense<0.000000e+00> : vector<16x128xf32>
    %435 = tpu.matmul %429, %434, %cst_303 {dimension_numbers = #tpu.dot_dimension_numbers<[1], [0], [0], [1], [0, 0, 1, 1], [], []>} : vector<16x256xbf16>, vector<256x128xbf16>, vector<16x128xf32> -> vector<16x128xf32>
    %c512_304 = arith.constant 512 : index
    %c0_305 = arith.constant 0 : index
    %436 = vector.load %arg22[%c512_304, %c0_305] : memref<2816x128xbf16, #tpu.memory_space<vmem>>, vector<256x128xbf16>
    %cst_306 = arith.constant dense<0.000000e+00> : vector<16x128xf32>
    %437 = tpu.matmul %429, %436, %cst_306 {dimension_numbers = #tpu.dot_dimension_numbers<[1], [0], [0], [1], [0, 0, 1, 1], [], []>} : vector<16x256xbf16>, vector<256x128xbf16>, vector<16x128xf32> -> vector<16x128xf32>
    %438 = tpu.concatenate %433, %435, %437 in 0 : vector<16x128xf32>, vector<16x128xf32>, vector<16x128xf32> -> vector<48x128xf32>
    %439 = arith.truncf %438 : vector<48x128xf32> to vector<48x128xbf16>
    %cst_307 = arith.constant dense<0.000000e+00> : vector<32x128xf32>
    %440 = tpu.matmul %7, %439, %cst_307 {dimension_numbers = #tpu.dot_dimension_numbers<[1], [0], [0], [1], [0, 0, 1, 1], [], []>} : vector<32x48xbf16>, vector<48x128xbf16>, vector<32x128xf32> -> vector<32x128xf32>
    %441 = vector.extract_strided_slice %440 {offsets = [0, 0], sizes = [8, 128], strides = [1, 1]} : vector<32x128xf32> to vector<8x128xf32>
    %442 = vector.extract_strided_slice %440 {offsets = [8, 0], sizes = [8, 128], strides = [1, 1]} : vector<32x128xf32> to vector<8x128xf32>
    %443 = arith.maximumf %441, %442 : vector<8x128xf32>
    %444 = vector.extract_strided_slice %440 {offsets = [16, 0], sizes = [8, 128], strides = [1, 1]} : vector<32x128xf32> to vector<8x128xf32>
    %445 = arith.maximumf %443, %444 : vector<8x128xf32>
    %446 = vector.extract_strided_slice %440 {offsets = [24, 0], sizes = [8, 128], strides = [1, 1]} : vector<32x128xf32> to vector<8x128xf32>
    %447 = arith.maximumf %445, %446 : vector<8x128xf32>
    %c768_308 = arith.constant 768 : index
    %c0_309 = arith.constant 0 : index
    %448 = vector.load %arg22[%c768_308, %c0_309] : memref<2816x128xbf16, #tpu.memory_space<vmem>>, vector<256x128xbf16>
    %cst_310 = arith.constant dense<0.000000e+00> : vector<16x128xf32>
    %449 = tpu.matmul %429, %448, %cst_310 {dimension_numbers = #tpu.dot_dimension_numbers<[1], [0], [0], [1], [0, 0, 1, 1], [], []>} : vector<16x256xbf16>, vector<256x128xbf16>, vector<16x128xf32> -> vector<16x128xf32>
    %cst_311 = arith.constant dense<0xFF800000> : vector<128xf32>
    %450 = vector.multi_reduction <maximumf>, %449, %cst_311 [0] : vector<16x128xf32> to vector<128xf32>
    %451 = vector.shape_cast %450 : vector<128xf32> to vector<1x128xf32>
    %c1024_312 = arith.constant 1024 : index
    %c0_313 = arith.constant 0 : index
    %452 = vector.load %arg22[%c1024_312, %c0_313] : memref<2816x128xbf16, #tpu.memory_space<vmem>>, vector<256x128xbf16>
    %cst_314 = arith.constant dense<0.000000e+00> : vector<8x128xf32>
    %453 = tpu.matmul %430, %452, %cst_314 {dimension_numbers = #tpu.dot_dimension_numbers<[1], [0], [0], [1], [0, 0, 1, 1], [], []>} : vector<8x256xbf16>, vector<256x128xbf16>, vector<8x128xf32> -> vector<8x128xf32>
    %c1280_315 = arith.constant 1280 : index
    %c0_316 = arith.constant 0 : index
    %454 = vector.load %arg22[%c1280_315, %c0_316] : memref<2816x128xbf16, #tpu.memory_space<vmem>>, vector<128x128xbf16>
    %455 = arith.truncf %447 : vector<8x128xf32> to vector<8x128xbf16>
    %cst_317 = arith.constant dense<0.000000e+00> : vector<8x128xf32>
    %456 = tpu.matmul %455, %454, %cst_317 {dimension_numbers = #tpu.dot_dimension_numbers<[1], [0], [0], [1], [0, 0, 1, 1], [], []>} : vector<8x128xbf16>, vector<128x128xbf16>, vector<8x128xf32> -> vector<8x128xf32>
    %457 = arith.addf %453, %456 : vector<8x128xf32>
    %c0_318 = arith.constant 0 : index
    %c0_319 = arith.constant 0 : index
    %c0_320 = arith.constant 0 : index
    %458 = vector.load %arg23[%c0_318, %c0_319, %c0_320] : memref<3x1x128xf32, #tpu.memory_space<vmem>>, vector<1x1x128xf32>
    %459 = vector.shape_cast %458 : vector<1x1x128xf32> to vector<1x128xf32>
    %460 = vector.broadcast %459 : vector<1x128xf32> to vector<8x128xf32>
    %461 = arith.addf %457, %460 : vector<8x128xf32>
    %cst_321 = arith.constant 0.000000e+00 : f32
    %462 = vector.broadcast %cst_321 : f32 to vector<8x128xf32>
    %463 = arith.maximumf %461, %462 : vector<8x128xf32>
    %c1408 = arith.constant 1408 : index
    %c0_322 = arith.constant 0 : index
    %464 = vector.load %arg22[%c1408, %c0_322] : memref<2816x128xbf16, #tpu.memory_space<vmem>>, vector<256x128xbf16>
    %cst_323 = arith.constant dense<0.000000e+00> : vector<1x128xf32>
    %465 = tpu.matmul %431, %464, %cst_323 {dimension_numbers = #tpu.dot_dimension_numbers<[1], [0], [0], [1], [0, 0, 1, 1], [], []>} : vector<1x256xbf16>, vector<256x128xbf16>, vector<1x128xf32> -> vector<1x128xf32>
    %c1664 = arith.constant 1664 : index
    %c0_324 = arith.constant 0 : index
    %466 = vector.load %arg22[%c1664, %c0_324] : memref<2816x128xbf16, #tpu.memory_space<vmem>>, vector<128x128xbf16>
    %467 = arith.truncf %451 : vector<1x128xf32> to vector<1x128xbf16>
    %cst_325 = arith.constant dense<0.000000e+00> : vector<1x128xf32>
    %468 = tpu.matmul %467, %466, %cst_325 {dimension_numbers = #tpu.dot_dimension_numbers<[1], [0], [0], [1], [0, 0, 1, 1], [], []>} : vector<1x128xbf16>, vector<128x128xbf16>, vector<1x128xf32> -> vector<1x128xf32>
    %469 = arith.addf %465, %468 : vector<1x128xf32>
    %c1_326 = arith.constant 1 : index
    %c0_327 = arith.constant 0 : index
    %c0_328 = arith.constant 0 : index
    %470 = vector.load %arg23[%c1_326, %c0_327, %c0_328] : memref<3x1x128xf32, #tpu.memory_space<vmem>>, vector<1x1x128xf32>
    %471 = vector.shape_cast %470 : vector<1x1x128xf32> to vector<1x128xf32>
    %472 = arith.addf %469, %471 : vector<1x128xf32>
    %cst_329 = arith.constant 0.000000e+00 : f32
    %473 = vector.broadcast %cst_329 : f32 to vector<1x128xf32>
    %474 = arith.maximumf %472, %473 : vector<1x128xf32>
    %475 = arith.truncf %463 : vector<8x128xf32> to vector<8x128xbf16>
    %476 = arith.truncf %474 : vector<1x128xf32> to vector<1x128xbf16>
    %c1792_330 = arith.constant 1792 : index
    %c0_331 = arith.constant 0 : index
    %477 = vector.load %arg22[%c1792_330, %c0_331] : memref<2816x128xbf16, #tpu.memory_space<vmem>>, vector<128x128xbf16>
    %cst_332 = arith.constant dense<0.000000e+00> : vector<8x128xf32>
    %478 = tpu.matmul %475, %477, %cst_332 {dimension_numbers = #tpu.dot_dimension_numbers<[1], [0], [0], [1], [0, 0, 1, 1], [], []>} : vector<8x128xbf16>, vector<128x128xbf16>, vector<8x128xf32> -> vector<8x128xf32>
    %c1920 = arith.constant 1920 : index
    %c0_333 = arith.constant 0 : index
    %479 = vector.load %arg22[%c1920, %c0_333] : memref<2816x128xbf16, #tpu.memory_space<vmem>>, vector<128x128xbf16>
    %cst_334 = arith.constant dense<0.000000e+00> : vector<8x128xf32>
    %480 = tpu.matmul %475, %479, %cst_334 {dimension_numbers = #tpu.dot_dimension_numbers<[1], [0], [0], [1], [0, 0, 1, 1], [], []>} : vector<8x128xbf16>, vector<128x128xbf16>, vector<8x128xf32> -> vector<8x128xf32>
    %c2048_335 = arith.constant 2048 : index
    %c0_336 = arith.constant 0 : index
    %481 = vector.load %arg22[%c2048_335, %c0_336] : memref<2816x128xbf16, #tpu.memory_space<vmem>>, vector<128x128xbf16>
    %cst_337 = arith.constant dense<0.000000e+00> : vector<8x128xf32>
    %482 = tpu.matmul %475, %481, %cst_337 {dimension_numbers = #tpu.dot_dimension_numbers<[1], [0], [0], [1], [0, 0, 1, 1], [], []>} : vector<8x128xbf16>, vector<128x128xbf16>, vector<8x128xf32> -> vector<8x128xf32>
    %483 = tpu.concatenate %478, %480, %482 in 0 : vector<8x128xf32>, vector<8x128xf32>, vector<8x128xf32> -> vector<24x128xf32>
    %484 = arith.truncf %483 : vector<24x128xf32> to vector<24x128xbf16>
    %cst_338 = arith.constant dense<0.000000e+00> : vector<32x128xf32>
    %485 = tpu.matmul %9, %484, %cst_338 {dimension_numbers = #tpu.dot_dimension_numbers<[1], [0], [0], [1], [0, 0, 1, 1], [], []>} : vector<32x24xbf16>, vector<24x128xbf16>, vector<32x128xf32> -> vector<32x128xf32>
    %486 = vector.extract_strided_slice %485 {offsets = [0, 0], sizes = [16, 128], strides = [1, 1]} : vector<32x128xf32> to vector<16x128xf32>
    %487 = vector.extract_strided_slice %485 {offsets = [16, 0], sizes = [16, 128], strides = [1, 1]} : vector<32x128xf32> to vector<16x128xf32>
    %488 = arith.maximumf %486, %487 : vector<16x128xf32>
    %c2176 = arith.constant 2176 : index
    %c0_339 = arith.constant 0 : index
    %489 = vector.load %arg22[%c2176, %c0_339] : memref<2816x128xbf16, #tpu.memory_space<vmem>>, vector<128x128xbf16>
    %cst_340 = arith.constant dense<0.000000e+00> : vector<1x128xf32>
    %490 = tpu.matmul %476, %489, %cst_340 {dimension_numbers = #tpu.dot_dimension_numbers<[1], [0], [0], [1], [0, 0, 1, 1], [], []>} : vector<1x128xbf16>, vector<128x128xbf16>, vector<1x128xf32> -> vector<1x128xf32>
    %c2304_341 = arith.constant 2304 : index
    %c0_342 = arith.constant 0 : index
    %491 = vector.load %arg22[%c2304_341, %c0_342] : memref<2816x128xbf16, #tpu.memory_space<vmem>>, vector<256x128xbf16>
    %cst_343 = arith.constant dense<0.000000e+00> : vector<16x128xf32>
    %492 = tpu.matmul %429, %491, %cst_343 {dimension_numbers = #tpu.dot_dimension_numbers<[1], [0], [0], [1], [0, 0, 1, 1], [], []>} : vector<16x256xbf16>, vector<256x128xbf16>, vector<16x128xf32> -> vector<16x128xf32>
    %c2560_344 = arith.constant 2560 : index
    %c0_345 = arith.constant 0 : index
    %493 = vector.load %arg22[%c2560_344, %c0_345] : memref<2816x128xbf16, #tpu.memory_space<vmem>>, vector<128x128xbf16>
    %494 = arith.truncf %488 : vector<16x128xf32> to vector<16x128xbf16>
    %cst_346 = arith.constant dense<0.000000e+00> : vector<16x128xf32>
    %495 = tpu.matmul %494, %493, %cst_346 {dimension_numbers = #tpu.dot_dimension_numbers<[1], [0], [0], [1], [0, 0, 1, 1], [], []>} : vector<16x128xbf16>, vector<128x128xbf16>, vector<16x128xf32> -> vector<16x128xf32>
    %496 = arith.addf %492, %495 : vector<16x128xf32>
    %c2688_347 = arith.constant 2688 : index
    %c0_348 = arith.constant 0 : index
    %497 = vector.load %arg22[%c2688_347, %c0_348] : memref<2816x128xbf16, #tpu.memory_space<vmem>>, vector<128x128xbf16>
    %498 = arith.truncf %490 : vector<1x128xf32> to vector<1x128xbf16>
    %cst_349 = arith.constant dense<0.000000e+00> : vector<1x128xf32>
    %499 = tpu.matmul %498, %497, %cst_349 {dimension_numbers = #tpu.dot_dimension_numbers<[1], [0], [0], [1], [0, 0, 1, 1], [], []>} : vector<1x128xbf16>, vector<128x128xbf16>, vector<1x128xf32> -> vector<1x128xf32>
    %500 = vector.broadcast %499 : vector<1x128xf32> to vector<16x128xf32>
    %501 = arith.addf %496, %500 : vector<16x128xf32>
    %c2_350 = arith.constant 2 : index
    %c0_351 = arith.constant 0 : index
    %c0_352 = arith.constant 0 : index
    %502 = vector.load %arg23[%c2_350, %c0_351, %c0_352] : memref<3x1x128xf32, #tpu.memory_space<vmem>>, vector<1x1x128xf32>
    %503 = vector.shape_cast %502 : vector<1x1x128xf32> to vector<1x128xf32>
    %504 = vector.broadcast %503 : vector<1x128xf32> to vector<16x128xf32>
    %505 = arith.addf %501, %504 : vector<16x128xf32>
    %cst_353 = arith.constant 0.000000e+00 : f32
    %506 = vector.broadcast %cst_353 : f32 to vector<16x128xf32>
    %507 = arith.maximumf %505, %506 : vector<16x128xf32>
    %508 = arith.truncf %507 : vector<16x128xf32> to vector<16x128xbf16>
    %509 = arith.truncf %463 : vector<8x128xf32> to vector<8x128xbf16>
    %510 = arith.truncf %474 : vector<1x128xf32> to vector<1x128xbf16>
    %c0_354 = arith.constant 0 : index
    %c0_355 = arith.constant 0 : index
    %511 = vector.load %arg24[%c0_354, %c0_355] : memref<1408x64xbf16, #tpu.memory_space<vmem>>, vector<128x64xbf16>
    %cst_356 = arith.constant dense<0.000000e+00> : vector<16x64xf32>
    %512 = tpu.matmul %508, %511, %cst_356 {dimension_numbers = #tpu.dot_dimension_numbers<[1], [0], [0], [1], [0, 0, 1, 1], [], []>} : vector<16x128xbf16>, vector<128x64xbf16>, vector<16x64xf32> -> vector<16x64xf32>
    %c128_357 = arith.constant 128 : index
    %c0_358 = arith.constant 0 : index
    %513 = vector.load %arg24[%c128_357, %c0_358] : memref<1408x64xbf16, #tpu.memory_space<vmem>>, vector<128x64xbf16>
    %cst_359 = arith.constant dense<0.000000e+00> : vector<16x64xf32>
    %514 = tpu.matmul %508, %513, %cst_359 {dimension_numbers = #tpu.dot_dimension_numbers<[1], [0], [0], [1], [0, 0, 1, 1], [], []>} : vector<16x128xbf16>, vector<128x64xbf16>, vector<16x64xf32> -> vector<16x64xf32>
    %c256_360 = arith.constant 256 : index
    %c0_361 = arith.constant 0 : index
    %515 = vector.load %arg24[%c256_360, %c0_361] : memref<1408x64xbf16, #tpu.memory_space<vmem>>, vector<128x64xbf16>
    %cst_362 = arith.constant dense<0.000000e+00> : vector<16x64xf32>
    %516 = tpu.matmul %508, %515, %cst_362 {dimension_numbers = #tpu.dot_dimension_numbers<[1], [0], [0], [1], [0, 0, 1, 1], [], []>} : vector<16x128xbf16>, vector<128x64xbf16>, vector<16x64xf32> -> vector<16x64xf32>
    %517 = tpu.concatenate %512, %514, %516 in 0 : vector<16x64xf32>, vector<16x64xf32>, vector<16x64xf32> -> vector<48x64xf32>
    %518 = arith.truncf %517 : vector<48x64xf32> to vector<48x64xbf16>
    %cst_363 = arith.constant dense<0.000000e+00> : vector<32x64xf32>
    %519 = tpu.matmul %7, %518, %cst_363 {dimension_numbers = #tpu.dot_dimension_numbers<[1], [0], [0], [1], [0, 0, 1, 1], [], []>} : vector<32x48xbf16>, vector<48x64xbf16>, vector<32x64xf32> -> vector<32x64xf32>
    %520 = vector.extract_strided_slice %519 {offsets = [0, 0], sizes = [8, 64], strides = [1, 1]} : vector<32x64xf32> to vector<8x64xf32>
    %521 = vector.extract_strided_slice %519 {offsets = [8, 0], sizes = [8, 64], strides = [1, 1]} : vector<32x64xf32> to vector<8x64xf32>
    %522 = arith.maximumf %520, %521 : vector<8x64xf32>
    %523 = vector.extract_strided_slice %519 {offsets = [16, 0], sizes = [8, 64], strides = [1, 1]} : vector<32x64xf32> to vector<8x64xf32>
    %524 = arith.maximumf %522, %523 : vector<8x64xf32>
    %525 = vector.extract_strided_slice %519 {offsets = [24, 0], sizes = [8, 64], strides = [1, 1]} : vector<32x64xf32> to vector<8x64xf32>
    %526 = arith.maximumf %524, %525 : vector<8x64xf32>
    %c384_364 = arith.constant 384 : index
    %c0_365 = arith.constant 0 : index
    %527 = vector.load %arg24[%c384_364, %c0_365] : memref<1408x64xbf16, #tpu.memory_space<vmem>>, vector<128x64xbf16>
    %cst_366 = arith.constant dense<0.000000e+00> : vector<16x64xf32>
    %528 = tpu.matmul %508, %527, %cst_366 {dimension_numbers = #tpu.dot_dimension_numbers<[1], [0], [0], [1], [0, 0, 1, 1], [], []>} : vector<16x128xbf16>, vector<128x64xbf16>, vector<16x64xf32> -> vector<16x64xf32>
    %cst_367 = arith.constant dense<0xFF800000> : vector<64xf32>
    %529 = vector.multi_reduction <maximumf>, %528, %cst_367 [0] : vector<16x64xf32> to vector<64xf32>
    %530 = vector.shape_cast %529 : vector<64xf32> to vector<1x64xf32>
    %c512_368 = arith.constant 512 : index
    %c0_369 = arith.constant 0 : index
    %531 = vector.load %arg24[%c512_368, %c0_369] : memref<1408x64xbf16, #tpu.memory_space<vmem>>, vector<128x64xbf16>
    %cst_370 = arith.constant dense<0.000000e+00> : vector<8x64xf32>
    %532 = tpu.matmul %509, %531, %cst_370 {dimension_numbers = #tpu.dot_dimension_numbers<[1], [0], [0], [1], [0, 0, 1, 1], [], []>} : vector<8x128xbf16>, vector<128x64xbf16>, vector<8x64xf32> -> vector<8x64xf32>
    %c640_371 = arith.constant 640 : index
    %c0_372 = arith.constant 0 : index
    %533 = vector.load %arg24[%c640_371, %c0_372] : memref<1408x64xbf16, #tpu.memory_space<vmem>>, vector<64x64xbf16>
    %534 = arith.truncf %526 : vector<8x64xf32> to vector<8x64xbf16>
    %cst_373 = arith.constant dense<0.000000e+00> : vector<8x64xf32>
    %535 = tpu.matmul %534, %533, %cst_373 {dimension_numbers = #tpu.dot_dimension_numbers<[1], [0], [0], [1], [0, 0, 1, 1], [], []>} : vector<8x64xbf16>, vector<64x64xbf16>, vector<8x64xf32> -> vector<8x64xf32>
    %536 = arith.addf %532, %535 : vector<8x64xf32>
    %c0_374 = arith.constant 0 : index
    %c0_375 = arith.constant 0 : index
    %c0_376 = arith.constant 0 : index
    %537 = vector.load %arg25[%c0_374, %c0_375, %c0_376] : memref<3x1x64xf32, #tpu.memory_space<vmem>>, vector<1x1x64xf32>
    %538 = vector.shape_cast %537 : vector<1x1x64xf32> to vector<1x64xf32>
    %539 = vector.broadcast %538 : vector<1x64xf32> to vector<8x64xf32>
    %540 = arith.addf %536, %539 : vector<8x64xf32>
    %cst_377 = arith.constant 0.000000e+00 : f32
    %541 = vector.broadcast %cst_377 : f32 to vector<8x64xf32>
    %542 = arith.maximumf %540, %541 : vector<8x64xf32>
    %c704_378 = arith.constant 704 : index
    %c0_379 = arith.constant 0 : index
    %543 = vector.load %arg24[%c704_378, %c0_379] : memref<1408x64xbf16, #tpu.memory_space<vmem>>, vector<128x64xbf16>
    %cst_380 = arith.constant dense<0.000000e+00> : vector<1x64xf32>
    %544 = tpu.matmul %510, %543, %cst_380 {dimension_numbers = #tpu.dot_dimension_numbers<[1], [0], [0], [1], [0, 0, 1, 1], [], []>} : vector<1x128xbf16>, vector<128x64xbf16>, vector<1x64xf32> -> vector<1x64xf32>
    %c832_381 = arith.constant 832 : index
    %c0_382 = arith.constant 0 : index
    %545 = vector.load %arg24[%c832_381, %c0_382] : memref<1408x64xbf16, #tpu.memory_space<vmem>>, vector<64x64xbf16>
    %546 = arith.truncf %530 : vector<1x64xf32> to vector<1x64xbf16>
    %cst_383 = arith.constant dense<0.000000e+00> : vector<1x64xf32>
    %547 = tpu.matmul %546, %545, %cst_383 {dimension_numbers = #tpu.dot_dimension_numbers<[1], [0], [0], [1], [0, 0, 1, 1], [], []>} : vector<1x64xbf16>, vector<64x64xbf16>, vector<1x64xf32> -> vector<1x64xf32>
    %548 = arith.addf %544, %547 : vector<1x64xf32>
    %c1_384 = arith.constant 1 : index
    %c0_385 = arith.constant 0 : index
    %c0_386 = arith.constant 0 : index
    %549 = vector.load %arg25[%c1_384, %c0_385, %c0_386] : memref<3x1x64xf32, #tpu.memory_space<vmem>>, vector<1x1x64xf32>
    %550 = vector.shape_cast %549 : vector<1x1x64xf32> to vector<1x64xf32>
    %551 = arith.addf %548, %550 : vector<1x64xf32>
    %cst_387 = arith.constant 0.000000e+00 : f32
    %552 = vector.broadcast %cst_387 : f32 to vector<1x64xf32>
    %553 = arith.maximumf %551, %552 : vector<1x64xf32>
    %554 = arith.truncf %542 : vector<8x64xf32> to vector<8x64xbf16>
    %555 = arith.truncf %553 : vector<1x64xf32> to vector<1x64xbf16>
    %c896_388 = arith.constant 896 : index
    %c0_389 = arith.constant 0 : index
    %556 = vector.load %arg24[%c896_388, %c0_389] : memref<1408x64xbf16, #tpu.memory_space<vmem>>, vector<64x64xbf16>
    %cst_390 = arith.constant dense<0.000000e+00> : vector<8x64xf32>
    %557 = tpu.matmul %554, %556, %cst_390 {dimension_numbers = #tpu.dot_dimension_numbers<[1], [0], [0], [1], [0, 0, 1, 1], [], []>} : vector<8x64xbf16>, vector<64x64xbf16>, vector<8x64xf32> -> vector<8x64xf32>
    %c960 = arith.constant 960 : index
    %c0_391 = arith.constant 0 : index
    %558 = vector.load %arg24[%c960, %c0_391] : memref<1408x64xbf16, #tpu.memory_space<vmem>>, vector<64x64xbf16>
    %cst_392 = arith.constant dense<0.000000e+00> : vector<8x64xf32>
    %559 = tpu.matmul %554, %558, %cst_392 {dimension_numbers = #tpu.dot_dimension_numbers<[1], [0], [0], [1], [0, 0, 1, 1], [], []>} : vector<8x64xbf16>, vector<64x64xbf16>, vector<8x64xf32> -> vector<8x64xf32>
    %c1024_393 = arith.constant 1024 : index
    %c0_394 = arith.constant 0 : index
    %560 = vector.load %arg24[%c1024_393, %c0_394] : memref<1408x64xbf16, #tpu.memory_space<vmem>>, vector<64x64xbf16>
    %cst_395 = arith.constant dense<0.000000e+00> : vector<8x64xf32>
    %561 = tpu.matmul %554, %560, %cst_395 {dimension_numbers = #tpu.dot_dimension_numbers<[1], [0], [0], [1], [0, 0, 1, 1], [], []>} : vector<8x64xbf16>, vector<64x64xbf16>, vector<8x64xf32> -> vector<8x64xf32>
    %562 = tpu.concatenate %557, %559, %561 in 0 : vector<8x64xf32>, vector<8x64xf32>, vector<8x64xf32> -> vector<24x64xf32>
    %563 = arith.truncf %562 : vector<24x64xf32> to vector<24x64xbf16>
    %cst_396 = arith.constant dense<0.000000e+00> : vector<32x64xf32>
    %564 = tpu.matmul %9, %563, %cst_396 {dimension_numbers = #tpu.dot_dimension_numbers<[1], [0], [0], [1], [0, 0, 1, 1], [], []>} : vector<32x24xbf16>, vector<24x64xbf16>, vector<32x64xf32> -> vector<32x64xf32>
    %565 = vector.extract_strided_slice %564 {offsets = [0, 0], sizes = [16, 64], strides = [1, 1]} : vector<32x64xf32> to vector<16x64xf32>
    %566 = vector.extract_strided_slice %564 {offsets = [16, 0], sizes = [16, 64], strides = [1, 1]} : vector<32x64xf32> to vector<16x64xf32>
    %567 = arith.maximumf %565, %566 : vector<16x64xf32>
    %c1088 = arith.constant 1088 : index
    %c0_397 = arith.constant 0 : index
    %568 = vector.load %arg24[%c1088, %c0_397] : memref<1408x64xbf16, #tpu.memory_space<vmem>>, vector<64x64xbf16>
    %cst_398 = arith.constant dense<0.000000e+00> : vector<1x64xf32>
    %569 = tpu.matmul %555, %568, %cst_398 {dimension_numbers = #tpu.dot_dimension_numbers<[1], [0], [0], [1], [0, 0, 1, 1], [], []>} : vector<1x64xbf16>, vector<64x64xbf16>, vector<1x64xf32> -> vector<1x64xf32>
    %c1152_399 = arith.constant 1152 : index
    %c0_400 = arith.constant 0 : index
    %570 = vector.load %arg24[%c1152_399, %c0_400] : memref<1408x64xbf16, #tpu.memory_space<vmem>>, vector<128x64xbf16>
    %cst_401 = arith.constant dense<0.000000e+00> : vector<16x64xf32>
    %571 = tpu.matmul %508, %570, %cst_401 {dimension_numbers = #tpu.dot_dimension_numbers<[1], [0], [0], [1], [0, 0, 1, 1], [], []>} : vector<16x128xbf16>, vector<128x64xbf16>, vector<16x64xf32> -> vector<16x64xf32>
    %c1280_402 = arith.constant 1280 : index
    %c0_403 = arith.constant 0 : index
    %572 = vector.load %arg24[%c1280_402, %c0_403] : memref<1408x64xbf16, #tpu.memory_space<vmem>>, vector<64x64xbf16>
    %573 = arith.truncf %567 : vector<16x64xf32> to vector<16x64xbf16>
    %cst_404 = arith.constant dense<0.000000e+00> : vector<16x64xf32>
    %574 = tpu.matmul %573, %572, %cst_404 {dimension_numbers = #tpu.dot_dimension_numbers<[1], [0], [0], [1], [0, 0, 1, 1], [], []>} : vector<16x64xbf16>, vector<64x64xbf16>, vector<16x64xf32> -> vector<16x64xf32>
    %575 = arith.addf %571, %574 : vector<16x64xf32>
    %c1344_405 = arith.constant 1344 : index
    %c0_406 = arith.constant 0 : index
    %576 = vector.load %arg24[%c1344_405, %c0_406] : memref<1408x64xbf16, #tpu.memory_space<vmem>>, vector<64x64xbf16>
    %577 = arith.truncf %569 : vector<1x64xf32> to vector<1x64xbf16>
    %cst_407 = arith.constant dense<0.000000e+00> : vector<1x64xf32>
    %578 = tpu.matmul %577, %576, %cst_407 {dimension_numbers = #tpu.dot_dimension_numbers<[1], [0], [0], [1], [0, 0, 1, 1], [], []>} : vector<1x64xbf16>, vector<64x64xbf16>, vector<1x64xf32> -> vector<1x64xf32>
    %579 = vector.broadcast %578 : vector<1x64xf32> to vector<16x64xf32>
    %580 = arith.addf %575, %579 : vector<16x64xf32>
    %c2_408 = arith.constant 2 : index
    %c0_409 = arith.constant 0 : index
    %c0_410 = arith.constant 0 : index
    %581 = vector.load %arg25[%c2_408, %c0_409, %c0_410] : memref<3x1x64xf32, #tpu.memory_space<vmem>>, vector<1x1x64xf32>
    %582 = vector.shape_cast %581 : vector<1x1x64xf32> to vector<1x64xf32>
    %583 = vector.broadcast %582 : vector<1x64xf32> to vector<16x64xf32>
    %584 = arith.addf %580, %583 : vector<16x64xf32>
    %cst_411 = arith.constant 0.000000e+00 : f32
    %585 = vector.broadcast %cst_411 : f32 to vector<16x64xf32>
    %586 = arith.maximumf %584, %585 : vector<16x64xf32>
    %587 = arith.truncf %586 : vector<16x64xf32> to vector<16x64xbf16>
    %588 = arith.truncf %542 : vector<8x64xf32> to vector<8x64xbf16>
    %589 = arith.truncf %553 : vector<1x64xf32> to vector<1x64xbf16>
    %c0_412 = arith.constant 0 : index
    %c0_413 = arith.constant 0 : index
    %590 = vector.load %arg26[%c0_412, %c0_413] : memref<960x64xbf16, #tpu.memory_space<vmem>>, vector<64x64xbf16>
    %cst_414 = arith.constant dense<0.000000e+00> : vector<16x64xf32>
    %591 = tpu.matmul %587, %590, %cst_414 {dimension_numbers = #tpu.dot_dimension_numbers<[1], [0], [0], [1], [0, 0, 1, 1], [], []>} : vector<16x64xbf16>, vector<64x64xbf16>, vector<16x64xf32> -> vector<16x64xf32>
    %c64_415 = arith.constant 64 : index
    %c0_416 = arith.constant 0 : index
    %592 = vector.load %arg26[%c64_415, %c0_416] : memref<960x64xbf16, #tpu.memory_space<vmem>>, vector<64x64xbf16>
    %cst_417 = arith.constant dense<0.000000e+00> : vector<16x64xf32>
    %593 = tpu.matmul %587, %592, %cst_417 {dimension_numbers = #tpu.dot_dimension_numbers<[1], [0], [0], [1], [0, 0, 1, 1], [], []>} : vector<16x64xbf16>, vector<64x64xbf16>, vector<16x64xf32> -> vector<16x64xf32>
    %c128_418 = arith.constant 128 : index
    %c0_419 = arith.constant 0 : index
    %594 = vector.load %arg26[%c128_418, %c0_419] : memref<960x64xbf16, #tpu.memory_space<vmem>>, vector<64x64xbf16>
    %cst_420 = arith.constant dense<0.000000e+00> : vector<16x64xf32>
    %595 = tpu.matmul %587, %594, %cst_420 {dimension_numbers = #tpu.dot_dimension_numbers<[1], [0], [0], [1], [0, 0, 1, 1], [], []>} : vector<16x64xbf16>, vector<64x64xbf16>, vector<16x64xf32> -> vector<16x64xf32>
    %596 = tpu.concatenate %591, %593, %595 in 0 : vector<16x64xf32>, vector<16x64xf32>, vector<16x64xf32> -> vector<48x64xf32>
    %597 = arith.truncf %596 : vector<48x64xf32> to vector<48x64xbf16>
    %cst_421 = arith.constant dense<0.000000e+00> : vector<32x64xf32>
    %598 = tpu.matmul %7, %597, %cst_421 {dimension_numbers = #tpu.dot_dimension_numbers<[1], [0], [0], [1], [0, 0, 1, 1], [], []>} : vector<32x48xbf16>, vector<48x64xbf16>, vector<32x64xf32> -> vector<32x64xf32>
    %599 = vector.extract_strided_slice %598 {offsets = [0, 0], sizes = [8, 64], strides = [1, 1]} : vector<32x64xf32> to vector<8x64xf32>
    %600 = vector.extract_strided_slice %598 {offsets = [8, 0], sizes = [8, 64], strides = [1, 1]} : vector<32x64xf32> to vector<8x64xf32>
    %601 = arith.maximumf %599, %600 : vector<8x64xf32>
    %602 = vector.extract_strided_slice %598 {offsets = [16, 0], sizes = [8, 64], strides = [1, 1]} : vector<32x64xf32> to vector<8x64xf32>
    %603 = arith.maximumf %601, %602 : vector<8x64xf32>
    %604 = vector.extract_strided_slice %598 {offsets = [24, 0], sizes = [8, 64], strides = [1, 1]} : vector<32x64xf32> to vector<8x64xf32>
    %605 = arith.maximumf %603, %604 : vector<8x64xf32>
    %c192_422 = arith.constant 192 : index
    %c0_423 = arith.constant 0 : index
    %606 = vector.load %arg26[%c192_422, %c0_423] : memref<960x64xbf16, #tpu.memory_space<vmem>>, vector<64x64xbf16>
    %cst_424 = arith.constant dense<0.000000e+00> : vector<16x64xf32>
    %607 = tpu.matmul %587, %606, %cst_424 {dimension_numbers = #tpu.dot_dimension_numbers<[1], [0], [0], [1], [0, 0, 1, 1], [], []>} : vector<16x64xbf16>, vector<64x64xbf16>, vector<16x64xf32> -> vector<16x64xf32>
    %cst_425 = arith.constant dense<0xFF800000> : vector<64xf32>
    %608 = vector.multi_reduction <maximumf>, %607, %cst_425 [0] : vector<16x64xf32> to vector<64xf32>
    %609 = vector.shape_cast %608 : vector<64xf32> to vector<1x64xf32>
    %c256_426 = arith.constant 256 : index
    %c0_427 = arith.constant 0 : index
    %610 = vector.load %arg26[%c256_426, %c0_427] : memref<960x64xbf16, #tpu.memory_space<vmem>>, vector<64x64xbf16>
    %cst_428 = arith.constant dense<0.000000e+00> : vector<8x64xf32>
    %611 = tpu.matmul %588, %610, %cst_428 {dimension_numbers = #tpu.dot_dimension_numbers<[1], [0], [0], [1], [0, 0, 1, 1], [], []>} : vector<8x64xbf16>, vector<64x64xbf16>, vector<8x64xf32> -> vector<8x64xf32>
    %c320_429 = arith.constant 320 : index
    %c0_430 = arith.constant 0 : index
    %612 = vector.load %arg26[%c320_429, %c0_430] : memref<960x64xbf16, #tpu.memory_space<vmem>>, vector<64x64xbf16>
    %613 = arith.truncf %605 : vector<8x64xf32> to vector<8x64xbf16>
    %cst_431 = arith.constant dense<0.000000e+00> : vector<8x64xf32>
    %614 = tpu.matmul %613, %612, %cst_431 {dimension_numbers = #tpu.dot_dimension_numbers<[1], [0], [0], [1], [0, 0, 1, 1], [], []>} : vector<8x64xbf16>, vector<64x64xbf16>, vector<8x64xf32> -> vector<8x64xf32>
    %615 = arith.addf %611, %614 : vector<8x64xf32>
    %c0_432 = arith.constant 0 : index
    %c0_433 = arith.constant 0 : index
    %c0_434 = arith.constant 0 : index
    %616 = vector.load %arg27[%c0_432, %c0_433, %c0_434] : memref<3x1x64xf32, #tpu.memory_space<vmem>>, vector<1x1x64xf32>
    %617 = vector.shape_cast %616 : vector<1x1x64xf32> to vector<1x64xf32>
    %618 = vector.broadcast %617 : vector<1x64xf32> to vector<8x64xf32>
    %619 = arith.addf %615, %618 : vector<8x64xf32>
    %cst_435 = arith.constant 0.000000e+00 : f32
    %620 = vector.broadcast %cst_435 : f32 to vector<8x64xf32>
    %621 = arith.maximumf %619, %620 : vector<8x64xf32>
    %c384_436 = arith.constant 384 : index
    %c0_437 = arith.constant 0 : index
    %622 = vector.load %arg26[%c384_436, %c0_437] : memref<960x64xbf16, #tpu.memory_space<vmem>>, vector<64x64xbf16>
    %cst_438 = arith.constant dense<0.000000e+00> : vector<1x64xf32>
    %623 = tpu.matmul %589, %622, %cst_438 {dimension_numbers = #tpu.dot_dimension_numbers<[1], [0], [0], [1], [0, 0, 1, 1], [], []>} : vector<1x64xbf16>, vector<64x64xbf16>, vector<1x64xf32> -> vector<1x64xf32>
    %c448_439 = arith.constant 448 : index
    %c0_440 = arith.constant 0 : index
    %624 = vector.load %arg26[%c448_439, %c0_440] : memref<960x64xbf16, #tpu.memory_space<vmem>>, vector<64x64xbf16>
    %625 = arith.truncf %609 : vector<1x64xf32> to vector<1x64xbf16>
    %cst_441 = arith.constant dense<0.000000e+00> : vector<1x64xf32>
    %626 = tpu.matmul %625, %624, %cst_441 {dimension_numbers = #tpu.dot_dimension_numbers<[1], [0], [0], [1], [0, 0, 1, 1], [], []>} : vector<1x64xbf16>, vector<64x64xbf16>, vector<1x64xf32> -> vector<1x64xf32>
    %627 = arith.addf %623, %626 : vector<1x64xf32>
    %c1_442 = arith.constant 1 : index
    %c0_443 = arith.constant 0 : index
    %c0_444 = arith.constant 0 : index
    %628 = vector.load %arg27[%c1_442, %c0_443, %c0_444] : memref<3x1x64xf32, #tpu.memory_space<vmem>>, vector<1x1x64xf32>
    %629 = vector.shape_cast %628 : vector<1x1x64xf32> to vector<1x64xf32>
    %630 = arith.addf %627, %629 : vector<1x64xf32>
    %cst_445 = arith.constant 0.000000e+00 : f32
    %631 = vector.broadcast %cst_445 : f32 to vector<1x64xf32>
    %632 = arith.maximumf %630, %631 : vector<1x64xf32>
    %633 = arith.truncf %621 : vector<8x64xf32> to vector<8x64xbf16>
    %634 = arith.truncf %632 : vector<1x64xf32> to vector<1x64xbf16>
    %c512_446 = arith.constant 512 : index
    %c0_447 = arith.constant 0 : index
    %635 = vector.load %arg26[%c512_446, %c0_447] : memref<960x64xbf16, #tpu.memory_space<vmem>>, vector<64x64xbf16>
    %cst_448 = arith.constant dense<0.000000e+00> : vector<8x64xf32>
    %636 = tpu.matmul %633, %635, %cst_448 {dimension_numbers = #tpu.dot_dimension_numbers<[1], [0], [0], [1], [0, 0, 1, 1], [], []>} : vector<8x64xbf16>, vector<64x64xbf16>, vector<8x64xf32> -> vector<8x64xf32>
    %c576_449 = arith.constant 576 : index
    %c0_450 = arith.constant 0 : index
    %637 = vector.load %arg26[%c576_449, %c0_450] : memref<960x64xbf16, #tpu.memory_space<vmem>>, vector<64x64xbf16>
    %cst_451 = arith.constant dense<0.000000e+00> : vector<8x64xf32>
    %638 = tpu.matmul %633, %637, %cst_451 {dimension_numbers = #tpu.dot_dimension_numbers<[1], [0], [0], [1], [0, 0, 1, 1], [], []>} : vector<8x64xbf16>, vector<64x64xbf16>, vector<8x64xf32> -> vector<8x64xf32>
    %c640_452 = arith.constant 640 : index
    %c0_453 = arith.constant 0 : index
    %639 = vector.load %arg26[%c640_452, %c0_453] : memref<960x64xbf16, #tpu.memory_space<vmem>>, vector<64x64xbf16>
    %cst_454 = arith.constant dense<0.000000e+00> : vector<8x64xf32>
    %640 = tpu.matmul %633, %639, %cst_454 {dimension_numbers = #tpu.dot_dimension_numbers<[1], [0], [0], [1], [0, 0, 1, 1], [], []>} : vector<8x64xbf16>, vector<64x64xbf16>, vector<8x64xf32> -> vector<8x64xf32>
    %641 = tpu.concatenate %636, %638, %640 in 0 : vector<8x64xf32>, vector<8x64xf32>, vector<8x64xf32> -> vector<24x64xf32>
    %642 = arith.truncf %641 : vector<24x64xf32> to vector<24x64xbf16>
    %cst_455 = arith.constant dense<0.000000e+00> : vector<32x64xf32>
    %643 = tpu.matmul %9, %642, %cst_455 {dimension_numbers = #tpu.dot_dimension_numbers<[1], [0], [0], [1], [0, 0, 1, 1], [], []>} : vector<32x24xbf16>, vector<24x64xbf16>, vector<32x64xf32> -> vector<32x64xf32>
    %644 = vector.extract_strided_slice %643 {offsets = [0, 0], sizes = [16, 64], strides = [1, 1]} : vector<32x64xf32> to vector<16x64xf32>
    %645 = vector.extract_strided_slice %643 {offsets = [16, 0], sizes = [16, 64], strides = [1, 1]} : vector<32x64xf32> to vector<16x64xf32>
    %646 = arith.maximumf %644, %645 : vector<16x64xf32>
    %c704_456 = arith.constant 704 : index
    %c0_457 = arith.constant 0 : index
    %647 = vector.load %arg26[%c704_456, %c0_457] : memref<960x64xbf16, #tpu.memory_space<vmem>>, vector<64x64xbf16>
    %cst_458 = arith.constant dense<0.000000e+00> : vector<1x64xf32>
    %648 = tpu.matmul %634, %647, %cst_458 {dimension_numbers = #tpu.dot_dimension_numbers<[1], [0], [0], [1], [0, 0, 1, 1], [], []>} : vector<1x64xbf16>, vector<64x64xbf16>, vector<1x64xf32> -> vector<1x64xf32>
    %c768_459 = arith.constant 768 : index
    %c0_460 = arith.constant 0 : index
    %649 = vector.load %arg26[%c768_459, %c0_460] : memref<960x64xbf16, #tpu.memory_space<vmem>>, vector<64x64xbf16>
    %cst_461 = arith.constant dense<0.000000e+00> : vector<16x64xf32>
    %650 = tpu.matmul %587, %649, %cst_461 {dimension_numbers = #tpu.dot_dimension_numbers<[1], [0], [0], [1], [0, 0, 1, 1], [], []>} : vector<16x64xbf16>, vector<64x64xbf16>, vector<16x64xf32> -> vector<16x64xf32>
    %c832_462 = arith.constant 832 : index
    %c0_463 = arith.constant 0 : index
    %651 = vector.load %arg26[%c832_462, %c0_463] : memref<960x64xbf16, #tpu.memory_space<vmem>>, vector<64x64xbf16>
    %652 = arith.truncf %646 : vector<16x64xf32> to vector<16x64xbf16>
    %cst_464 = arith.constant dense<0.000000e+00> : vector<16x64xf32>
    %653 = tpu.matmul %652, %651, %cst_464 {dimension_numbers = #tpu.dot_dimension_numbers<[1], [0], [0], [1], [0, 0, 1, 1], [], []>} : vector<16x64xbf16>, vector<64x64xbf16>, vector<16x64xf32> -> vector<16x64xf32>
    %654 = arith.addf %650, %653 : vector<16x64xf32>
    %c896_465 = arith.constant 896 : index
    %c0_466 = arith.constant 0 : index
    %655 = vector.load %arg26[%c896_465, %c0_466] : memref<960x64xbf16, #tpu.memory_space<vmem>>, vector<64x64xbf16>
    %656 = arith.truncf %648 : vector<1x64xf32> to vector<1x64xbf16>
    %cst_467 = arith.constant dense<0.000000e+00> : vector<1x64xf32>
    %657 = tpu.matmul %656, %655, %cst_467 {dimension_numbers = #tpu.dot_dimension_numbers<[1], [0], [0], [1], [0, 0, 1, 1], [], []>} : vector<1x64xbf16>, vector<64x64xbf16>, vector<1x64xf32> -> vector<1x64xf32>
    %658 = vector.broadcast %657 : vector<1x64xf32> to vector<16x64xf32>
    %659 = arith.addf %654, %658 : vector<16x64xf32>
    %c2_468 = arith.constant 2 : index
    %c0_469 = arith.constant 0 : index
    %c0_470 = arith.constant 0 : index
    %660 = vector.load %arg27[%c2_468, %c0_469, %c0_470] : memref<3x1x64xf32, #tpu.memory_space<vmem>>, vector<1x1x64xf32>
    %661 = vector.shape_cast %660 : vector<1x1x64xf32> to vector<1x64xf32>
    %662 = vector.broadcast %661 : vector<1x64xf32> to vector<16x64xf32>
    %663 = arith.addf %659, %662 : vector<16x64xf32>
    %cst_471 = arith.constant 0.000000e+00 : f32
    %664 = vector.broadcast %cst_471 : f32 to vector<16x64xf32>
    %665 = arith.maximumf %663, %664 : vector<16x64xf32>
    %c0_472 = arith.constant 0 : index
    %c0_473 = arith.constant 0 : index
    %666 = vector.load %arg28[%c0_472, %c0_473] : memref<1x64xf32, #tpu.memory_space<vmem>>, vector<1x64xf32>
    %667 = vector.broadcast %666 : vector<1x64xf32> to vector<16x64xf32>
    %668 = arith.mulf %665, %667 : vector<16x64xf32>
    %cst_474 = arith.constant dense<0.000000e+00> : vector<16xf32>
    %669 = vector.multi_reduction <add>, %668, %cst_474 [1] : vector<16x64xf32> to vector<16xf32>
    %670 = vector.shape_cast %669 : vector<16xf32> to vector<16x1xf32>
    %c0_475 = arith.constant 0 : index
    %c0_476 = arith.constant 0 : index
    %671 = vector.load %arg29[%c0_475, %c0_476] : memref<1x1xf32, #tpu.memory_space<vmem>>, vector<1x1xf32>
    %672 = vector.broadcast %671 : vector<1x1xf32> to vector<16x1xf32>
    %673 = arith.addf %670, %672 : vector<16x1xf32>
    %674 = arith.addf %673, %1 : vector<16x1xf32>
    %675 = vector.extract_strided_slice %674 {offsets = [0, 0], sizes = [8, 1], strides = [1, 1]} : vector<16x1xf32> to vector<8x1xf32>
    %c0_477 = arith.constant 0 : index
    %c0_478 = arith.constant 0 : index
    %c0_479 = arith.constant 0 : index
    %676 = vector.load %arg30[%c0_477, %c0_478, %c0_479] : memref<1x8x1xf32, #tpu.memory_space<vmem>>, vector<1x8x1xf32>
    %677 = vector.shape_cast %676 : vector<1x8x1xf32> to vector<8x1xf32>
    %678 = vector.shape_cast %675 : vector<8x1xf32> to vector<1x8x1xf32>
    tpu.vector_store %arg30[%c0_477, %c0_478, %c0_479], %678 {strides = array<i32>} : memref<1x8x1xf32, #tpu.memory_space<vmem>>, vector<1x8x1xf32>,
    return
  }
  func.func @transform_0(%arg0: i32) -> (i32, i32, i32) {
    %c0_i32 = arith.constant 0 : i32
    %c0_i32_0 = arith.constant 0 : i32
    %c0_i32_1 = arith.constant 0 : i32
    return %arg0, %c0_i32, %c0_i32_0 : i32, i32, i32
  }
  func.func @transform_1(%arg0: i32) -> (i32, i32, i32) {
    %c0_i32 = arith.constant 0 : i32
    %c0_i32_0 = arith.constant 0 : i32
    %c0_i32_1 = arith.constant 0 : i32
    return %arg0, %c0_i32, %c0_i32_0 : i32, i32, i32
  }
  func.func @transform_2(%arg0: i32) -> (i32, i32, i32) {
    %c0_i32 = arith.constant 0 : i32
    %c0_i32_0 = arith.constant 0 : i32
    %c0_i32_1 = arith.constant 0 : i32
    return %arg0, %c0_i32, %c0_i32_0 : i32, i32, i32
  }
  func.func @transform_3(%arg0: i32) -> (i32, i32, i32) {
    %c0_i32 = arith.constant 0 : i32
    %c0_i32_0 = arith.constant 0 : i32
    %c0_i32_1 = arith.constant 0 : i32
    return %arg0, %c0_i32, %c0_i32_0 : i32, i32, i32
  }
  func.func @transform_4(%arg0: i32) -> (i32, i32, i32) {
    %c0_i32 = arith.constant 0 : i32
    %c0_i32_0 = arith.constant 0 : i32
    %c0_i32_1 = arith.constant 0 : i32
    return %arg0, %c0_i32, %c0_i32_0 : i32, i32, i32
  }
  func.func @transform_5(%arg0: i32) -> (i32, i32) {
    %c0_i32 = arith.constant 0 : i32
    %c0_i32_0 = arith.constant 0 : i32
    %c0_i32_1 = arith.constant 0 : i32
    return %c0_i32, %c0_i32_0 : i32, i32
  }
  func.func @transform_6(%arg0: i32) -> (i32, i32) {
    %c0_i32 = arith.constant 0 : i32
    %c0_i32_0 = arith.constant 0 : i32
    %c0_i32_1 = arith.constant 0 : i32
    return %c0_i32, %c0_i32_0 : i32, i32
  }
  func.func @transform_7(%arg0: i32) -> (i32, i32) {
    %c0_i32 = arith.constant 0 : i32
    %c0_i32_0 = arith.constant 0 : i32
    %c0_i32_1 = arith.constant 0 : i32
    return %c0_i32, %c0_i32_0 : i32, i32
  }
  func.func @transform_8(%arg0: i32) -> (i32, i32) {
    %c0_i32 = arith.constant 0 : i32
    %c0_i32_0 = arith.constant 0 : i32
    %c0_i32_1 = arith.constant 0 : i32
    return %c0_i32, %c0_i32_0 : i32, i32
  }
  func.func @transform_9(%arg0: i32) -> (i32, i32) {
    %c0_i32 = arith.constant 0 : i32
    %c0_i32_0 = arith.constant 0 : i32
    %c0_i32_1 = arith.constant 0 : i32
    return %c0_i32, %c0_i32_0 : i32, i32
  }
  func.func @transform_10(%arg0: i32) -> (i32, i32) {
    %c0_i32 = arith.constant 0 : i32
    %c0_i32_0 = arith.constant 0 : i32
    %c0_i32_1 = arith.constant 0 : i32
    return %c0_i32, %c0_i32_0 : i32, i32
  }
  func.func @transform_11(%arg0: i32) -> (i32, i32) {
    %c0_i32 = arith.constant 0 : i32
    %c0_i32_0 = arith.constant 0 : i32
    %c0_i32_1 = arith.constant 0 : i32
    return %c0_i32, %c0_i32_0 : i32, i32
  }
  func.func @transform_12(%arg0: i32) -> (i32, i32, i32) {
    %c0_i32 = arith.constant 0 : i32
    %c0_i32_0 = arith.constant 0 : i32
    %c0_i32_1 = arith.constant 0 : i32
    %c0_i32_2 = arith.constant 0 : i32
    return %c0_i32, %c0_i32_0, %c0_i32_1 : i32, i32, i32
  }
  func.func @transform_13(%arg0: i32) -> (i32, i32) {
    %c0_i32 = arith.constant 0 : i32
    %c0_i32_0 = arith.constant 0 : i32
    %c0_i32_1 = arith.constant 0 : i32
    return %c0_i32, %c0_i32_0 : i32, i32
  }
  func.func @transform_14(%arg0: i32) -> (i32, i32, i32) {
    %c0_i32 = arith.constant 0 : i32
    %c0_i32_0 = arith.constant 0 : i32
    %c0_i32_1 = arith.constant 0 : i32
    %c0_i32_2 = arith.constant 0 : i32
    return %c0_i32, %c0_i32_0, %c0_i32_1 : i32, i32, i32
  }
  func.func @transform_15(%arg0: i32) -> (i32, i32) {
    %c0_i32 = arith.constant 0 : i32
    %c0_i32_0 = arith.constant 0 : i32
    %c0_i32_1 = arith.constant 0 : i32
    return %c0_i32, %c0_i32_0 : i32, i32
  }
  func.func @transform_16(%arg0: i32) -> (i32, i32, i32) {
    %c0_i32 = arith.constant 0 : i32
    %c0_i32_0 = arith.constant 0 : i32
    %c0_i32_1 = arith.constant 0 : i32
    %c0_i32_2 = arith.constant 0 : i32
    return %c0_i32, %c0_i32_0, %c0_i32_1 : i32, i32, i32
  }
  func.func @transform_17(%arg0: i32) -> (i32, i32) {
    %c0_i32 = arith.constant 0 : i32
    %c0_i32_0 = arith.constant 0 : i32
    %c0_i32_1 = arith.constant 0 : i32
    return %c0_i32, %c0_i32_0 : i32, i32
  }
  func.func @transform_18(%arg0: i32) -> (i32, i32, i32) {
    %c0_i32 = arith.constant 0 : i32
    %c0_i32_0 = arith.constant 0 : i32
    %c0_i32_1 = arith.constant 0 : i32
    %c0_i32_2 = arith.constant 0 : i32
    return %c0_i32, %c0_i32_0, %c0_i32_1 : i32, i32, i32
  }
  func.func @transform_19(%arg0: i32) -> (i32, i32) {
    %c0_i32 = arith.constant 0 : i32
    %c0_i32_0 = arith.constant 0 : i32
    %c0_i32_1 = arith.constant 0 : i32
    return %c0_i32, %c0_i32_0 : i32, i32
  }
  func.func @transform_20(%arg0: i32) -> (i32, i32, i32) {
    %c0_i32 = arith.constant 0 : i32
    %c0_i32_0 = arith.constant 0 : i32
    %c0_i32_1 = arith.constant 0 : i32
    %c0_i32_2 = arith.constant 0 : i32
    return %c0_i32, %c0_i32_0, %c0_i32_1 : i32, i32, i32
  }
  func.func @transform_21(%arg0: i32) -> (i32, i32) {
    %c0_i32 = arith.constant 0 : i32
    %c0_i32_0 = arith.constant 0 : i32
    %c0_i32_1 = arith.constant 0 : i32
    return %c0_i32, %c0_i32_0 : i32, i32
  }
  func.func @transform_22(%arg0: i32) -> (i32, i32, i32) {
    %c0_i32 = arith.constant 0 : i32
    %c0_i32_0 = arith.constant 0 : i32
    %c0_i32_1 = arith.constant 0 : i32
    %c0_i32_2 = arith.constant 0 : i32
    return %c0_i32, %c0_i32_0, %c0_i32_1 : i32, i32, i32
  }
  func.func @transform_23(%arg0: i32) -> (i32, i32) {
    %c0_i32 = arith.constant 0 : i32
    %c0_i32_0 = arith.constant 0 : i32
    %c0_i32_1 = arith.constant 0 : i32
    return %c0_i32, %c0_i32_0 : i32, i32
  }
  func.func @transform_24(%arg0: i32) -> (i32, i32, i32) {
    %c0_i32 = arith.constant 0 : i32
    %c0_i32_0 = arith.constant 0 : i32
    %c0_i32_1 = arith.constant 0 : i32
    %c0_i32_2 = arith.constant 0 : i32
    return %c0_i32, %c0_i32_0, %c0_i32_1 : i32, i32, i32
  }
  func.func @transform_25(%arg0: i32) -> (i32, i32) {
    %c0_i32 = arith.constant 0 : i32
    %c0_i32_0 = arith.constant 0 : i32
    %c0_i32_1 = arith.constant 0 : i32
    return %c0_i32, %c0_i32_0 : i32, i32
  }
  func.func @transform_26(%arg0: i32) -> (i32, i32, i32) {
    %c0_i32 = arith.constant 0 : i32
    %c0_i32_0 = arith.constant 0 : i32
    %c0_i32_1 = arith.constant 0 : i32
    %c0_i32_2 = arith.constant 0 : i32
    return %c0_i32, %c0_i32_0, %c0_i32_1 : i32, i32, i32
  }
  func.func @transform_27(%arg0: i32) -> (i32, i32) {
    %c0_i32 = arith.constant 0 : i32
    %c0_i32_0 = arith.constant 0 : i32
    %c0_i32_1 = arith.constant 0 : i32
    return %c0_i32, %c0_i32_0 : i32, i32
  }
  func.func @transform_28(%arg0: i32) -> (i32, i32) {
    %c0_i32 = arith.constant 0 : i32
    %c0_i32_0 = arith.constant 0 : i32
    %c0_i32_1 = arith.constant 0 : i32
    return %c0_i32, %c0_i32_0 : i32, i32
  }
  func.func @transform_29(%arg0: i32) -> (i32, i32, i32) {
    %c0_i32 = arith.constant 0 : i32
    %c0_i32_0 = arith.constant 0 : i32
    %c0_i32_1 = arith.constant 0 : i32
    return %arg0, %c0_i32, %c0_i32_0 : i32, i32, i32
  }
}

</mosaic_0001>

<bundles_post_ra>
// kernel: ldpc_forward.1
= control target key start
LH: loop header
LB: loop body
LE: loop exit
PB: predicated region body
PF: predicated region fallthrough
CT: control target
= control target key end

     0   :  { %s22710_s6 = smov 1   ;;  %s22711_s10 = smov 2   ;;  %s24835_s0 = inlined_call_operand.smem [shape: u32[30], index: -1, kind: input, shape index: {}] }
   0x1   :  { %s22757_s5 = sld [smem:[%s24835_s0]]   ;;  %s22712_s14 = smov 3  }
   0x2   :  { %s22762_s9 = sld [smem:[%s24835_s0 + %s22710_s6]]   ;;  %s22713_s18 = smov 4  }
   0x3   :  { %s22767_s13 = sld [smem:[%s24835_s0 + %s22711_s10]]   ;;  %s22714_s22 = smov 5  }
   0x4   :  { %s22772_s17 = sld [smem:[%s24835_s0 + %s22712_s14]]   ;;  %s22715_s26 = smov 6  }
   0x5   :  { %s22777_s21 = sld [smem:[%s24835_s0 + %s22713_s18]]   ;;  %s22716_s30 = smov 7  }
   0x6   :  { %s22782_s25 = sld [smem:[%s24835_s0 + %s22714_s22]]   ;;  %s22717_s4 = smov 8  }
   0x7   :  { %s22787_s29 = sld [smem:[%s24835_s0 + %s22715_s26]]   ;;  %s22718_s10 = smov 9  }
   0x8   :  { %s22792_s3 = sld [smem:[%s24835_s0 + %s22716_s30]]   ;;  %s22719_s15 = smov 10  }
   0x9   :  { %s22797_s8 = sld [smem:[%s24835_s0 + %s22717_s4]]   ;;  %s22720_s20 = smov 11  }
   0xa   :  { %s22802_s14 = sld [smem:[%s24835_s0 + %s22718_s10]]   ;;  %s22721_s26 = smov 12  }
   0xb   :  { %s22807_s19 = sld [smem:[%s24835_s0 + %s22719_s15]]   ;;  %s22722_s1 = smov 13  }
   0xc   :  { %s22812_s24 = sld [smem:[%s24835_s0 + %s22720_s20]]   ;;  %s22723_s7 = smov 14  }
   0xd   :  { %s22817_s30 = sld [smem:[%s24835_s0 + %s22721_s26]]   ;;  %s22724_s15 = smov 15  }
   0xe   :  { %s22822_s6 = sld [smem:[%s24835_s0 + %s22722_s1]]   ;;  %s22725_s22 = smov 16  }
   0xf   :  { %24850 = sst [smem:[#allocation10_spill]] %s22797_s8  ;;  %s22726_s28 = smov 17  }
  0x10   :  { %s22827_s12 = sld [smem:[%s24835_s0 + %s22723_s7]]   ;;  %s22727_s7 = smov 18  }
  0x11   :  { %s22832_s20 = sld [smem:[%s24835_s0 + %s22724_s15]]   ;;  %s22728_s15 = smov 19  }
  0x12   :  { %s22837_s27 = sld [smem:[%s24835_s0 + %s22725_s22]]   ;;  %s22729_s22 = smov 20  }
  0x13   :  { %24851 = sst [smem:[#allocation11_spill]] %s22817_s30  ;;  %s22738_s1 = smov 29  }
  0x14   :  { %24852 = sst [smem:[#allocation12_spill]] %s22822_s6 }
  0x15   :  { %s22842_s4 = sld [smem:[%s24835_s0 + %s22726_s28]]   ;;  %s22730_s28 = smov 21  }
  0x16   :  { %24853 = sst [smem:[#allocation13_spill]] %s22827_s12 }
  0x17   :  { %s22847_s12 = sld [smem:[%s24835_s0 + %s22727_s7]]   ;;  %s22731_s7 = smov 22  }
  0x18   :  { %24854 = sst [smem:[#allocation14_spill]] %s22837_s27 }
  0x19   :  { %s22852_s6 = sld [smem:[%s24835_s0 + %s22728_s15]]   ;;  %s22732_s15 = smov 23  }
  0x1a   :  { %s22857_s27 = sld [smem:[%s24835_s0 + %s22729_s22]]   ;;  %s22733_s22 = smov 24  }
  0x1b   :  { %s22862_s30 = sld [smem:[%s24835_s0 + %s22730_s28]]   ;;  %s22734_s28 = smov 25  }
  0x1c   :  { %s22882_s8 = sld [smem:[%s24835_s0 + %s22734_s28]]  }
  0x1d   :  { %24855 = sst [smem:[#allocation15_spill]] %s22847_s12 }
  0x1e   :  { %s22867_s12 = sld [smem:[%s24835_s0 + %s22731_s7]]   ;;  %s22735_s7 = smov 26  }
  0x1f   :  { %24856 = sst [smem:[#allocation16_spill]] %s22852_s6 }
  0x20   :  { %24857 = sst [smem:[#allocation17_spill]] %s22857_s27 }
  0x21   :  { %s22872_s6 = sld [smem:[%s24835_s0 + %s22732_s15]]   ;;  %s22736_s15 = smov 27  }
  0x22   :  { %s22877_s27 = sld [smem:[%s24835_s0 + %s22733_s22]]   ;;  %s22737_s22 = smov 28  }
  0x23   :  { %24861 = sst [smem:[#allocation21_spill]] %s22882_s8 }
  0x24   :  { %24858 = sst [smem:[#allocation18_spill]] %s22867_s12 }
  0x25   :  { %s22887_s12 = sld [smem:[%s24835_s0 + %s22735_s7]]  }
  0x26   :  { %s22900_s8 = sld [smem:[%s24835_s0 + %s22738_s1]]  }
  0x27   :  { %24859 = sst [smem:[#allocation19_spill]] %s22872_s6 }
  0x28   :  { %24860 = sst [smem:[#allocation20_spill]] %s22877_s27 }
  0x29   :  { %s22892_s6 = sld [smem:[%s24835_s0 + %s22736_s15]]  }
  0x2a   :  { %s17137_s27 = sld [smem:[%s24835_s0 + %s22737_s22]]  }
  0x30   :  { %v64_v0 = vstv %s17137_s27 }
  0x31   :  { %65 = vst [vmem:[#allocation2] sm:$0x1] %v64_v0 }
  0x32   :  { %66 = vsyncpa [#allocation4], 0 }
  0x33   :  { %67 = vsyncpa [#allocation6], 0  ;;  %s22902_s7 = smov 0  }
  0x34 LB: > { %s22739_s10 = smov [#allocation5]   ;;  %s22908_s15 = sadd.s32 4294967295, %s22708_s7   ;;  %s22708_s7 = sphi %s22902_s7, %s73_s7  }
  0x35   : > { %s796_s11 = sshll.u32 %s22739_s10, 4  ;;  %p17141_p0 = scmp.ge.s32.totalorder %s22708_s7, 1  ;;  %s797_s11 = int_to_ptr.vmem [resolvable:$true] %s796_s11 }
  0x36   : > { %p738_p1 = scmp.lt.s32.totalorder %s22708_s7, 3  ;;  %p20728_p2 = scmp.eq.s32.totalorder %s22908_s15, 0 }
  0x37   : > { %s22740_s27 = smov [#allocation3]   ;;  %s22741_s22 = smov [#allocation7]  }
  0x38   : > { %p22913_p3 = pnand %p17141_p0, %p738_p1  ;;  %s780_s16 = sshll.u32 %s22740_s27, 4  ;;  %s22919_s16 = int_to_ptr.vmem [resolvable:$true] %s780_s16 }
  0x39   : > { %s22927_s23 = sshll.u32 %s22741_s22, 4  ;;  %s22627_s26 = scalar_lea.vmem %s797_s11, 47104  ;;  %s819_s23 = int_to_ptr.vmem [resolvable:$true] %s22927_s23 }
  0x3a   : > { %p20718_p4 = pneg %p22913_p3  ;;  %p22628_p7 = scmp.ne.s32.totalorder %s797_s11, %s22627_s26 }
  0x3b   : > { %p22635_p10 = scmp.lt.s32.totalorder %s797_s11, %s797_s11  ;;  %p22636_p11 = scmp.lt.s32.totalorder %s22627_s26, %s22627_s26 }
  0x3c   : > { %p22923_p5 = pnand %p20728_p2, %p20718_p4 }
  0x3d   : > { %p22637_p12 = por %p22636_p11, %p22635_p10 }
  0x3e   : > { %p22618_p6 = pneg %p22923_p5 }
  0x40   : > { %p22630_p8 = pnand %p22628_p7, %p22618_p6 }
  0x42   : > { %p22631_p9 = pneg %p22630_p8 }
  0x44   : > { %p22638_p13 = pnand %p22637_p12, %p22631_p9 }
  0x46   : > { %22641 = shalt.err (!%p22638_p13)
}
  0x47   : > { %s22742_s1 = smov 128   ;;  %s22743_s28 = smov 8  }
  0x48   : > { %20724 = dma.hbm_to_vmem [thread:$0]  (!%p22923_p5), %s22842_s4, 47104, %s797_s11, [#allocation6], %s22742_s1, %s22742_s1, %s22743_s28  }
  0x49   : > { %s22653_s2 = scalar_lea.vmem %s22919_s16, 11776  ;;  %p22661_p7 = scmp.lt.s32.totalorder %s22919_s16, %s22919_s16 }
  0x4a   : > { %p22654_p0 = scmp.ne.s32.totalorder %s22919_s16, %s22653_s2  ;;  %p22662_p8 = scmp.lt.s32.totalorder %s22653_s2, %s22653_s2 }
  0x4c   : > { %p22656_p1 = pnand %p22654_p0, %p22618_p6  ;;  %p22663_p9 = por %p22662_p8, %p22661_p7 }
  0x4e   : > { %p22657_p4 = pneg %p22656_p1 }
  0x50   : > { %p22664_p10 = pnand %p22663_p9, %p22657_p4 }
  0x52   : > { %22667 = shalt.err (!%p22664_p10)
}
  0x53   : > { %s22744_s10 = smov 64   ;;  %s22745_s27 = smov 4  }
  0x54   : > { %20721 = dma.hbm_to_vmem [thread:$0]  (!%p22923_p5), %s22832_s20, 11776, %s22919_s16, [#allocation4], %s22744_s10, %s22744_s10, %s22745_s27  }
  0x55   : > { %s22679_s11 = scalar_lea.vmem %s819_s23, 22528  ;;  %p22687_p0 = scmp.lt.s32.totalorder %s819_s23, %s819_s23 }
  0x56   : > { %p22680_p11 = scmp.ne.s32.totalorder %s819_s23, %s22679_s11  ;;  %p22688_p1 = scmp.lt.s32.totalorder %s22679_s11, %s22679_s11 }
  0x58   : > { %p22682_p12 = pnand %p22680_p11, %p22618_p6  ;;  %p22689_p4 = por %p22688_p1, %p22687_p0 }
  0x5a   : > { %p22683_p13 = pneg %p22682_p12 }
  0x5c   : > { %p22690_p7 = pnand %p22689_p4, %p22683_p13 }
  0x5e   : > { %22693 = shalt.err (!%p22690_p7)
}
  0x5f   : > { %20727 = dma.hbm_to_vmem [thread:$0]  (!%p22923_p5), %s22862_s30, 22528, %s819_s23, [#allocation6], %s22744_s10, %s22744_s10, %s22745_s27  }
  0x60   : > { %892 = sbr.rel (%p22913_p3) target bundleno = 11030 (0x2b16), region = 136 }
  0x65   : > { %22699 = dma.done.wait (%p20728_p2), [#allocation4], 11776  }
  0x66   : > { %22701 = vsyncadd (%p20728_p2), [#allocation4], 4294955520 }
  0x67   : > { %22703 = dma.done.wait (%p20728_p2), [#allocation6], 69632  }
  0x68   : > { %22705 = vsyncadd (%p20728_p2), [#allocation6], 4294897664  ;;  %p992_p5 = scmp.lt.s32.totalorder %s22908_s15, 1  ;;  %v22746_v1 = vmov 0   ;;  %v22747_v2 = vmov 0.0   ;;  %vm22748_vm0 = vmmov 0  }
  0x69   : > { %20781 = vset.pattern.permute.xlu0 %v22746_v1  ;;  %19400 = vmatprep.subr.bf16.mxu0 %v22747_v2  ;;  %vm1074_vm1 = vcmask 1041408   ;;  %v1061_v5 = vld [vmem:[%s22782_s25] sm:$0x3]  ;;  %vm1070_vm2 = vcmask 31744   ;;  %v20787_v10 = vld [vmem:[%s22812_s24 + $0x18] sm:$0xff]   ;;  %vm1129_vm3 = vcmask 130048  }
  0x6a   : > { %s24878_s15 = smov (!%p992_p5, %s22908_s15), 1  ;;  %19402 = vmatprep.mubr.msk.bf16.mxu0 %vm22748_vm0, %v22747_v2  ;;  %19406 = vmatprep.subr.bf16.mxu1 %v22747_v2  ;;  %v1076_v6 = vsel %vm1074_vm1, %v1061_v5, 0  ;;  %v20786_v9 = vld [vmem:[%s22792_s3] sm:$0xff]   ;;  %v20788_v13 = vld [vmem:[%s22812_s24 + $0x38] sm:$0xff]   ;;  %v20789_v14 = vld [vmem:[%s22812_s24 + $0x10] sm:$0xff]   ;;  %vm1209_vm4 = vcmask 523264  }
  0x6b   : > { %19408 = vmatprep.mubr.msk.bf16.mxu1 %vm22748_vm0, %v22747_v2  ;;  %s18678_s0 = sshll.u32 %s24878_s15, 4  ;;  %s24847_s22 = sshll.u32 %s24878_s15, 3  ;;  %19401 = vmatpush3.bf16.msra.mxu0 %v1076_v6  ;;  %v20790_v15 = vld [vmem:[%s22812_s24 + $0x30] sm:$0xff]   ;;  %v20791_v16 = vld [vmem:[%s22812_s24 + $0x8] sm:$0xff]   ;;  %v20793_v18 = vld [vmem:[%s22812_s24] sm:$0xff]   ;;  %vm1413_vm5 = vcmask 392192  }
  0x6c   : > { %s22978_s16 = scalar_lea.vmem %s22757_s5, %s18678_s0  ;;  %s22981_s18 = scalar_lea.vmem %s22772_s17, %s18678_s0  ;;  %19412 = vmatprep.subr.bf16.mxu0 %v22747_v2  ;;  %19407 = vmatpush3.bf16.msra.mxu1 %v20786_v9  ;;  %v20792_v17 = vld [vmem:[%s22812_s24 + $0x28] sm:$0xff]   ;;  %v20794_v19 = vld [vmem:[%s22812_s24 + $0x20] sm:$0xff]   ;;  %v20795_v29 = vld [vmem:[%s22812_s24 + $0x58] sm:$0xff]   ;;  %vm2102_vm6 = vcmask 195584   ;;  %vm2109_vm7 = vcmask 1043456   ;;  %vm16979_vm8 = vcmask 7168  }
  0x6d   : > { %s22985_s23 = scalar_lea.vmem %s22777_s21, %s18678_s0  ;;  %v1019_v3 = vld [vmem:[%s22978_s16] sm:$0xff]  ;;  %s1000_s26 = scalar_lea.vmem %s22762_s9, %s24847_s22  ;;  %v1020_v4 = vld [vmem:[%s22978_s16 + $0x8] sm:$0xff]  ;;  %19424 = vmatprep.subr.bf16.mxu1 %v22747_v2  ;;  %v20796_v32 = vld [vmem:[%s22812_s24 + $0x50] sm:$0xff]  }
  0x6e   : > { %1034 = vperm.xlu0 %20781, %v1019_v3   ;;  %s1003_s1 = scalar_lea.vmem %s22767_s13, %s24878_s15  ;;  %v1021_v7 = vld [vmem:[%s1000_s26] sm:$0xff]  ;;  %v20797_v33 = vld [vmem:[%s22812_s24 + $0x48] sm:$0xff]   ;;  %v20799_v60 = vld [vmem:[%s22812_s24 + $0x78] sm:$0xff]   ;;  %s24864_s28 = sld [smem:[#allocation10_spill]] }
  0x6f   : > { %v1062_v8 = vpack.c.bf16 %v1021_v7, %v1021_v7  ;;  %v1022_v11 = vld [vmem:[%s1003_s1] sm:$0x1]  ;;  %v20783_v59 = vld [vmem:[%s22981_s18 + $0x8] sm:$0xff]   ;;  %v20800_v61 = vld [vmem:[%s22812_s24 + $0x70] sm:$0xff]   ;;  %s24865_s2 = sld [smem:[#allocation11_spill]] }
  0x70   : > { %v1121_v12 = vpack.c.bf16 %v1022_v11, %v1022_v11  ;;  %v17158_v20 = vld [vmem:[%s22802_s14] ss:$0 sm:$0xff]  ;;  %v20801_v62 = vld [vmem:[%s22812_s24 + $0x68] sm:$0xff]   ;;  %v20803_v0 = vld [vmem:[%s22812_s24 + $0x98] sm:$0xff]   ;;  %s24866_s10 = sld [smem:[#allocation12_spill]] }
  0x71   : > { %19403 = vmatmul.mubr.msk.bf16.vlgmr.msra.gmra.mxu0 %vm1070_vm2, %v1062_v8  ;;  %v17159_v21 = vld [vmem:[%s22807_s19] ss:$0 sm:$0xff]  ;;  %v20804_v3 = vld [vmem:[%s22812_s24 + $0x90] sm:$0xff]   ;;  %v20805_v5 = vld [vmem:[%s22812_s24 + $0x88] sm:$0xff]   ;;  %s24867_s27 = sld [smem:[#allocation13_spill]] }
  0x72   : > { %1039 = vperm.xlu0 %20781, %v1020_v4   ;;  %19413 = vmatpush3.bf16.msra.mxu0 %v20787_v10  ;;  %v20798_v34 = vld [vmem:[%s22812_s24 + $0x40] sm:$0xff]   ;;  %v20807_v9 = vld [vmem:[%s22812_s24 + $0xd8] sm:$0xff]   ;;  %v20808_v11 = vld [vmem:[%s22812_s24 + $0xd0] sm:$0xff]   ;;  %s24868_s11 = sld [smem:[#allocation14_spill]] }
  0x73   : > { %19420 = vmatprep.mubr.msk.bf16.mxu0 %vm22748_vm0, %v22747_v2  ;;  %19409 = vmatmul.mubr.msk.bf16.vlgmr.msra.gmra.mxu1 %vm1129_vm3, %v1121_v12  ;;  %v20782_v43 = vld [vmem:[%s22981_s18] sm:$0xff]   ;;  %s24869_s0 = sld [smem:[#allocation15_spill]] }
  0x74   : > { %19414 = vmatprep.subr.bf16.mxu0 %v22747_v2  ;;  %19425 = vmatpush3.bf16.msra.mxu1 %v20788_v13  ;;  %v20802_v63 = vld [vmem:[%s22812_s24 + $0x60] sm:$0xff]   ;;  %v20809_v13 = vld [vmem:[%s22812_s24 + $0xc8] sm:$0xff]   ;;  %s24870_s26 = sld [smem:[#allocation16_spill]] }
  0x75   : > { %19432 = vmatprep.mubr.msk.bf16.mxu1 %vm22748_vm0, %v22747_v2  ;;  %19426 = vmatprep.subr.bf16.mxu1 %v22747_v2  ;;  %v17160_v4 = vld [vmem:[%s22787_s29] ss:$0 sm:$0xff]  ;;  %s24871_s1 = sld [smem:[#allocation17_spill]] }
  0x76   : > { %19415 = vmatpush3.bf16.msra.mxu0 %v20789_v14  ;;  %v20806_v7 = vld [vmem:[%s22812_s24 + $0x80] sm:$0xff]   ;;  %s24873_s22 = sld [smem:[#allocation19_spill]] }
  0x77   : > { %19416 = vmatprep.subr.bf16.mxu0 %v22747_v2  ;;  %v1122_v12 = vld [vmem:[%s24864_s28] sm:$0x1]  ;;  %s24872_s28 = sld [smem:[#allocation18_spill]] }
  0x78   : > { %19427 = vmatpush3.bf16.msra.mxu1 %v20790_v15  ;;  %v20810_v15 = vld [vmem:[%s22812_s24 + $0xc0] sm:$0xff]  }
  0x79   : > { %19428 = vmatprep.subr.bf16.mxu1 %v22747_v2 }
  0x7a   : > { %19417 = vmatpush3.bf16.msra.mxu0 %v20791_v16 }
  0x7b   : > { %19418 = vmatprep.subr.bf16.mxu0 %v22747_v2 }
  0x7c   : > { %19429 = vmatpush3.bf16.msra.mxu1 %v20792_v17 }
  0x7d   : > { %19430 = vmatprep.subr.bf16.mxu1 %v22747_v2 }
  0x7e   : > { %19419 = vmatpush3.bf16.msra.mxu0 %v20793_v18  ;;  %v20811_v18 = vld [vmem:[%s22812_s24 + $0xb8] sm:$0xff]  }
  0x7f   : > { %19436 = vmatprep.subr.bf16.mxu0 %v22747_v2 }
  0x80   : > { %19431 = vmatpush3.bf16.msra.mxu1 %v20794_v19  ;;  %v20812_v19 = vld [vmem:[%s22812_s24 + $0xb0] sm:$0xff]  }
  0xe9   : > { %v1035_v22 = vpop.permute.xlu0 %1034 }
  0xea   : > { %v1048_v23 = vmul.f32 %v17158_v20, %v1035_v22  ;;  %v20820_v22 = vld [vmem:[%s22812_s24 + $0x138] sm:$0xff]  }
  0xec   : > { %v1057_v24 = vadd.f32 %v17159_v21, %v1048_v23  ;;  %v20822_v23 = vld [vmem:[%s22812_s24 + $0x130] sm:$0xff]  }
  0xed   : > { %v1040_v25 = vpop.permute.xlu0 %1039 }
  0xee   : > { %v1059_v26 = vmax.f32 %v1057_v24, 0.0  ;;  %v1049_v27 = vmul.f32 %v17158_v20, %v1040_v25  ;;  %v20813_v20 = vld [vmem:[%s22812_s24 + $0xa8] sm:$0xff]  }
  0xf0   : > { %v1058_v28 = vadd.f32 %v17159_v21, %v1049_v27  ;;  %v20814_v21 = vld [vmem:[%s22812_s24 + $0xa0] sm:$0xff]  }
  0xf2   : > { %v1060_v30 = vmax.f32 %v1058_v28, 0.0 }
  0xf4   : > { %v23020_v31 = vpack.c.bf16 %v1060_v30, %v1059_v26  ;;  %v20815_v30 = vld [vmem:[%s22812_s24 + $0xf8] sm:$0xff]  }
  0xf6   : > { %19421 = vmatmul.mubr.msk.bf16.vlgmr.msra.gmra.mxu0 %vm1209_vm4, %v23020_v31  ;;  %19433 = vmatmul.mubr.msk.bf16.vlgmr.msra.gmra.mxu1 %vm1209_vm4, %v23020_v31 }
  0xf7   : > { %19437 = vmatpush3.bf16.msra.mxu0 %v20795_v29  ;;  %19444 = vmatprep.mubr.msk.bf16.mxu0 %vm22748_vm0, %v22747_v2 }
  0xf8   : > { %19438 = vmatprep.subr.bf16.mxu0 %v22747_v2  ;;  %19454 = vmatprep.mubr.msk.bf16.mxu1 %vm1413_vm5, %v20782_v43 }
  0xfb   : > { %19439 = vmatpush3.bf16.msra.mxu0 %v20796_v32 }
  0xfc   : > { %19440 = vmatprep.subr.bf16.mxu0 %v22747_v2 }
  0xff   : > { %19441 = vmatpush3.bf16.msra.mxu0 %v20797_v33 }
 0x100   : > { %19442 = vmatprep.subr.bf16.mxu0 %v22747_v2 }
 0x103   : > { %19443 = vmatpush3.bf16.msra.mxu0 %v20798_v34  ;;  %v20816_v34 = vld [vmem:[%s22812_s24 + $0xf0] sm:$0xff]  }
 0x104   : > { %19470 = vmatprep.subr.bf16.mxu0 %v22747_v2 }
 0x106   : > { %19445 = vmatmul.mubr.msk.bf16.vlgmr.msra.gmra.mxu0 %vm1209_vm4, %v23020_v31 }
 0x107   : > { %19478 = vmatprep.mubr.msk.bf16.mxu0 %vm22748_vm0, %v22747_v2  ;;  %19471 = vmatpush3.bf16.msra.mxu0 %v20811_v18 }
 0x108   : > { %19472 = vmatprep.subr.bf16.mxu0 %v22747_v2 }
 0x10b   : > { %19473 = vmatpush3.bf16.msra.mxu0 %v20812_v19  ;;  %v20832_v19 = vld [vmem:[%s22812_s24 + $0x170] sm:$0xff]  }
 0x10c   : > { %19474 = vmatprep.subr.bf16.mxu0 %v22747_v2 }
 0x10f   : > { %19475 = vmatpush3.bf16.msra.mxu0 %v20813_v20 }
 0x110   : > { %19476 = vmatprep.subr.bf16.mxu0 %v22747_v2 }
 0x113   : > { %19477 = vmatpush3.bf16.msra.mxu0 %v20814_v21 }
 0x114   : > { %19494 = vmatprep.subr.bf16.mxu0 %v22747_v2 }
 0x131   : > { %v1112_v35 = vpop.f32.mrf.mxu0 }
 0x132   : > { %v1113_v6 = vadd.f32 %v17160_v4, %v1112_v35  ;;  %v17198_v4 = vld [vmem:[%s24865_s2] ss:$0 sm:$0xff] }
 0x133   : > { %v19404_v36 = vpop.f32.mrf.mxu0  ;;  %v23039_v37 = vpop.f32.mrf.mxu1 }
 0x134   : > { %v1118_v8 = vmax.f32 %v1113_v6, 0.0  ;;  %v1168_v14 = vadd.f32 %v23039_v37, %v1122_v12  ;;  %v20817_v37 = vld [vmem:[%s22812_s24 + $0xe8] sm:$0xff]  }
 0x135   : > { %v1115_v38 = vpop.f32.mrf.mxu0  ;;  %v19410_v39 = vpop.f32.mrf.mxu1 }
 0x136   : > { %v1175_v10 = vpack.c.bf16 %v1118_v8, %v1118_v8  ;;  %v1173_v16 = vmax.f32 %v1168_v14, 0.0  ;;  %v20829_v14 = vld [vmem:[%s22812_s24 + $0x148] sm:$0xff]  }
 0x137   : > { %v19405_v40 = vpop.f32.mrf.mxu0  ;;  %v1170_v41 = vpop.f32.mrf.mxu1 }
 0x138   : > { %v1176_v17 = vpack.c.bf16 %v1173_v16, %v1173_v16  ;;  %v20831_v16 = vld [vmem:[%s22812_s24 + $0x178] sm:$0xff]  }
 0x139   : > { %v19411_v42 = vpop.f32.mrf.mxu1 }
 0x1b6   : > { %v1247_v44 = vpop.f32.mrf.mxu0  ;;  %v1320_v45 = vpop.f32.mrf.mxu1 }
 0x1b8   : > { %v19422_v46 = vpop.f32.mrf.mxu0  ;;  %v19434_v47 = vpop.f32.mrf.mxu1 }
 0x1ba   : > { %v1250_v48 = vpop.f32.mrf.mxu0  ;;  %v1323_v49 = vpop.f32.mrf.mxu1 }
 0x1bb   : > { %v1401_v57 = vpack.c.bf16 %v1323_v49, %v1320_v45  ;;  %v1400_v58 = vpack.c.bf16 %v1250_v48, %v1247_v44  ;;  %v20818_v44 = vld [vmem:[%s22812_s24 + $0xe0] sm:$0xff]  }
 0x1bc   : > { %v19423_v50 = vpop.f32.mrf.mxu0  ;;  %v19435_v51 = vpop.f32.mrf.mxu1 }
 0x1bd   : > { %v20819_v50 = vld [vmem:[%s22812_s24 + $0x118] sm:$0xff]  }
 0x1c6   : > { %v1393_v52 = vpop.f32.mrf.mxu0 }
 0x1c8   : > { %v19446_v53 = vpop.f32.mrf.mxu0 }
 0x1ca   : > { %v1396_v54 = vpop.f32.mrf.mxu0 }
 0x1cb   : > { %v1402_v55 = vpack.c.bf16 %v1396_v54, %v1393_v52 }
 0x1cc   : > { %v19447_v56 = vpop.f32.mrf.mxu0 }
 0x1cd   : > { %19448 = vmatprep.subr.bf16.mxu1 %v1402_v55 }
 0x1ce   : > { %19449 = vmatpush3.bf16.msra.mxu1 %v1402_v55  ;;  %v20821_v55 = vld [vmem:[%s22812_s24 + $0x110] sm:$0xff]  }
 0x1cf   : > { %19450 = vmatprep.subr.bf16.mxu1 %v1401_v57 }
 0x1d2   : > { %19451 = vmatpush3.bf16.msra.mxu1 %v1401_v57 }
 0x1d3   : > { %19452 = vmatprep.subr.bf16.mxu1 %v1400_v58 }
 0x1d6   : > { %19453 = vmatpush3.bf16.msra.mxu1 %v1400_v58 }
 0x1d7   : > { %19458 = vmatprep.subr.bf16.mxu1 %v22747_v2 }
 0x1d9   : > { %19455 = vmatmul.mubr.msk.bf16.vlgmr.msra.gmra.mxu1 %vm1413_vm5, %v20783_v59 }
 0x1da   : > { %19459 = vmatpush3.bf16.msra.mxu1 %v20799_v60  ;;  %19466 = vmatprep.mubr.msk.bf16.mxu1 %vm22748_vm0, %v22747_v2 }
 0x1db   : > { %19460 = vmatprep.subr.bf16.mxu1 %v22747_v2 }
 0x1de   : > { %19461 = vmatpush3.bf16.msra.mxu1 %v20800_v61  ;;  %v20823_v61 = vld [vmem:[%s22812_s24 + $0x108] sm:$0xff]  }
 0x1df   : > { %19462 = vmatprep.subr.bf16.mxu1 %v22747_v2 }
 0x1e2   : > { %19463 = vmatpush3.bf16.msra.mxu1 %v20801_v62  ;;  %v20824_v62 = vld [vmem:[%s22812_s24 + $0x128] sm:$0xff]  }
 0x1e3   : > { %19464 = vmatprep.subr.bf16.mxu1 %v22747_v2 }
 0x1e6   : > { %19465 = vmatpush3.bf16.msra.mxu1 %v20802_v63  ;;  %v20825_v63 = vld [vmem:[%s22812_s24 + $0x100] sm:$0xff]  }
 0x1e7   : > { %19482 = vmatprep.subr.bf16.mxu1 %v22747_v2 }
 0x1e9   : > { %19467 = vmatmul.mubr.msk.bf16.vlgmr.msra.gmra.mxu1 %vm1209_vm4, %v23020_v31 }
 0x1ea   : > { %19483 = vmatpush3.bf16.msra.mxu1 %v20803_v0  ;;  %19490 = vmatprep.mubr.msk.bf16.mxu1 %vm22748_vm0, %v22747_v2  ;;  %v20826_v0 = vld [vmem:[%s22812_s24 + $0x120] sm:$0xff]  }
 0x1eb   : > { %19484 = vmatprep.subr.bf16.mxu1 %v22747_v2 }
 0x1ee   : > { %19485 = vmatpush3.bf16.msra.mxu1 %v20804_v3 }
 0x1ef   : > { %19486 = vmatprep.subr.bf16.mxu1 %v22747_v2 }
 0x1f2   : > { %19487 = vmatpush3.bf16.msra.mxu1 %v20805_v5 }
 0x1f3   : > { %19488 = vmatprep.subr.bf16.mxu1 %v22747_v2 }
 0x1f6   : > { %19489 = vmatpush3.bf16.msra.mxu1 %v20806_v7 }
 0x1f7   : > { %19506 = vmatprep.subr.bf16.mxu1 %v22747_v2 }
 0x1f9   : > { %19491 = vmatmul.mubr.msk.bf16.vlgmr.msra.gmra.mxu1 %vm1209_vm4, %v1175_v10 }
 0x1fa   : > { %19507 = vmatpush3.bf16.msra.mxu1 %v20807_v9  ;;  %19514 = vmatprep.mubr.msk.bf16.mxu1 %vm22748_vm0, %v22747_v2 }
 0x1fb   : > { %19508 = vmatprep.subr.bf16.mxu1 %v22747_v2 }
 0x1fe   : > { %19509 = vmatpush3.bf16.msra.mxu1 %v20808_v11  ;;  %v20827_v11 = vld [vmem:[%s22812_s24 + $0x158] sm:$0xff]  }
 0x1ff   : > { %19510 = vmatprep.subr.bf16.mxu1 %v22747_v2 }
 0x202   : > { %19511 = vmatpush3.bf16.msra.mxu1 %v20809_v13  ;;  %v20828_v13 = vld [vmem:[%s22812_s24 + $0x150] sm:$0xff]  }
 0x203   : > { %19512 = vmatprep.subr.bf16.mxu1 %v22747_v2 }
 0x206   : > { %19513 = vmatpush3.bf16.msra.mxu1 %v20810_v15  ;;  %v20830_v15 = vld [vmem:[%s22812_s24 + $0x140] sm:$0xff]  }
 0x207   : > { %19530 = vmatprep.subr.bf16.mxu1 %v22747_v2 }
 0x209   : > { %19515 = vmatmul.mubr.msk.bf16.vlgmr.msra.gmra.mxu1 %vm1209_vm4, %v1176_v17 }
 0x20a   : > { %19538 = vmatprep.mubr.msk.bf16.mxu1 %vm22748_vm0, %v22747_v2  ;;  %19531 = vmatpush3.bf16.msra.mxu1 %v20820_v22  ;;  %v17209_v22 = vld [vmem:[%s24865_s2 + $0x1] sm:$0x1] }
 0x20b   : > { %19532 = vmatprep.subr.bf16.mxu1 %v22747_v2 }
 0x20e   : > { %19533 = vmatpush3.bf16.msra.mxu1 %v20822_v23 }
 0x20f   : > { %19534 = vmatprep.subr.bf16.mxu1 %v22747_v2 }
 0x212   : > { %19535 = vmatpush3.bf16.msra.mxu1 %v20824_v62 }
 0x213   : > { %19536 = vmatprep.subr.bf16.mxu1 %v22747_v2 }
 0x216   : > { %19537 = vmatpush3.bf16.msra.mxu1 %v20826_v0 }
 0x299   : > { %v19456_v24 = vpop.f32.mrf.mxu1 }
 0x29b   : > { %v1454_v25 = vpop.f32.mrf.mxu1 }
 0x29d   : > { %v19457_v26 = vpop.f32.mrf.mxu1 }
 0x29f   : > { %v1457_v27 = vpop.f32.mrf.mxu1 }
 0x2a0   : > { %v1469_v28 = vmax.f32 %v1454_v25, %v1457_v27 }
 0x2a2   : > { %v1470_v29 = vmax.f32 %v1469_v28, %v19456_v24  ;;  %v20833_v24 = vld [vmem:[%s22812_s24 + $0x168] sm:$0xff]   ;;  %v20835_v28 = vld [vmem:[%s22812_s24 + $0x198] sm:$0xff]  }
 0x2a4   : > { %v1471_v32 = vmax.f32 %v1470_v29, %v19457_v26  ;;  %v20834_v26 = vld [vmem:[%s22812_s24 + $0x160] sm:$0xff]  }
 0x2a6   : > { %v1570_v33 = vpack.c.bf16 %v1471_v32, %v1471_v32  ;;  %v20837_v32 = vld [vmem:[%s22812_s24 + $0x188] sm:$0xff]  }
 0x2a8   : > { %19479 = vmatmul.mubr.msk.bf16.vlgmr.msra.gmra.mxu0 %vm1209_vm4, %v1570_v33  ;;  %v20838_v33 = vld [vmem:[%s22812_s24 + $0x180] sm:$0xff]  }
 0x2a9   : > { %v1538_v35 = vpop.f32.mrf.mxu1  ;;  %19495 = vmatpush3.bf16.msra.mxu0 %v20815_v30  ;;  %19502 = vmatprep.mubr.msk.bf16.mxu0 %vm22748_vm0, %v22747_v2  ;;  %v20836_v30 = vld [vmem:[%s22812_s24 + $0x190] sm:$0xff]  }
 0x2aa   : > { %19496 = vmatprep.subr.bf16.mxu0 %v22747_v2  ;;  %v1545_v39 = vsel %vm1209_vm4, %v1538_v35, -inf }
 0x2ab   : > { %v19468_v36 = vpop.f32.mrf.mxu1 }
 0x2ad   : > { %v1541_v38 = vpop.f32.mrf.mxu1  ;;  %19497 = vmatpush3.bf16.msra.mxu0 %v20816_v34  ;;  %v23173_v34 = vld [vmem:[%s22985_s23] sm:$0xff]  }
 0x2ae   : > { %v1546_v40 = vsel %vm1209_vm4, %v1541_v38, -inf  ;;  %19498 = vmatprep.subr.bf16.mxu0 %v22747_v2 }
 0x2af   : > { %v1547_v41 = vmax.f32 %v1545_v39, %v1546_v40  ;;  %v19469_v42 = vpop.f32.mrf.mxu1 }
 0x2b1   : > { %v1548_v43 = vrot.slane %v1547_v41, 4  ;;  %19499 = vmatpush3.bf16.msra.mxu0 %v20817_v37 }
 0x2b2   : > { %19500 = vmatprep.subr.bf16.mxu0 %v22747_v2 }
 0x2b3   : > { %v1549_v45 = vmax.f32 %v1547_v41, %v1548_v43 }
 0x2b5   : > { %v1550_v46 = vrot.slane %v1549_v45, 2  ;;  %19501 = vmatpush3.bf16.msra.mxu0 %v20818_v44 }
 0x2b6   : > { %19518 = vmatprep.subr.bf16.mxu0 %v22747_v2 }
 0x2b7   : > { %v1551_v47 = vmax.f32 %v1549_v45, %v1550_v46 }
 0x2b9   : > { %v1552_v48 = vrot.slane %v1551_v47, 1  ;;  %v1699_v49 = vpop.f32.mrf.mxu1 }
 0x2bb   : > { %v1553_v51 = vmax.f32 %v1551_v47, %v1552_v48  ;;  %v19492_v52 = vpop.f32.mrf.mxu1 }
 0x2bd   : > { %v1730_v53 = vpack.c.bf16 %v1553_v51, %v1553_v51  ;;  %v1702_v54 = vpop.f32.mrf.mxu1  ;;  %v20840_v51 = vld [vmem:[%s22812_s24 + $0x1b0] sm:$0xff]  }
 0x2bf   : > { %v19493_v56 = vpop.f32.mrf.mxu1  ;;  %19503 = vmatmul.mubr.msk.bf16.vlgmr.msra.gmra.mxu0 %vm1209_vm4, %v1730_v53 }
 0x2c0   : > { %19519 = vmatpush3.bf16.msra.mxu0 %v20819_v50  ;;  %19526 = vmatprep.mubr.msk.bf16.mxu0 %vm22748_vm0, %v22747_v2  ;;  %v20839_v50 = vld [vmem:[%s22812_s24 + $0x1b8] sm:$0xff]  }
 0x2c1   : > { %19520 = vmatprep.subr.bf16.mxu0 %v22747_v2 }
 0x2c4   : > { %19521 = vmatpush3.bf16.msra.mxu0 %v20821_v55 }
 0x2c5   : > { %19522 = vmatprep.subr.bf16.mxu0 %v22747_v2 }
 0x2c8   : > { %19523 = vmatpush3.bf16.msra.mxu0 %v20823_v61  ;;  %v20842_v61 = vld [vmem:[%s22812_s24 + $0x1a0] sm:$0xff]  }
 0x2c9   : > { %v1859_v57 = vpop.f32.mrf.mxu1  ;;  %19524 = vmatprep.subr.bf16.mxu0 %v22747_v2 }
 0x2cb   : > { %v19516_v58 = vpop.f32.mrf.mxu1 }
 0x2cc   : > { %19525 = vmatpush3.bf16.msra.mxu0 %v20825_v63 }
 0x2cd   : > { %v1862_v59 = vpop.f32.mrf.mxu1  ;;  %19542 = vmatprep.subr.bf16.mxu0 %v22747_v2 }
 0x2cf   : > { %v19517_v60 = vpop.f32.mrf.mxu1 }
 0x2d0   : > { %v20841_v60 = vld [vmem:[%s22812_s24 + $0x1a8] sm:$0xff]  }
 0x368   : > { %v1632_v3 = vpop.f32.mrf.mxu0 }
 0x369   : > { %v1700_v5 = vadd.f32 %v1699_v49, %v1632_v3  ;;  %v23180_v49 = vld [vmem:[%s22985_s23 + $0x8] sm:$0xff]  }
 0x36a   : > { %v19480_v6 = vpop.f32.mrf.mxu0 }
 0x36b   : > { %v1712_v7 = vadd.f32 %v17198_v4, %v1700_v5  ;;  %v20843_v6 = vld [vmem:[%s22812_s24 + $0x1d8] sm:$0xff]  }
 0x36c   : > { %v1635_v8 = vpop.f32.mrf.mxu0 }
 0x36d   : > { %v1713_v9 = vmax.f32 %v1712_v7, 0.0  ;;  %v20844_v8 = vld [vmem:[%s22812_s24 + $0x1d0] sm:$0xff]  }
 0x36e   : > { %v19481_v10 = vpop.f32.mrf.mxu0 }
 0x36f   : > { %v23126_v12 = vpack.c.bf16 %v1713_v9, %v1713_v9  ;;  %v20845_v9 = vld [vmem:[%s22812_s24 + $0x1c8] sm:$0xff]   ;;  %v20846_v10 = vld [vmem:[%s22812_s24 + $0x1c0] sm:$0xff]  }
 0x371   : > { %19527 = vmatmul.mubr.msk.bf16.vlgmr.msra.gmra.mxu0 %vm1209_vm4, %v23126_v12  ;;  %19539 = vmatmul.mubr.msk.bf16.vlgmr.msra.gmra.mxu1 %vm1209_vm4, %v23126_v12 }
 0x372   : > { %19543 = vmatpush3.bf16.msra.mxu0 %v20827_v11  ;;  %19550 = vmatprep.mubr.msk.bf16.mxu0 %vm22748_vm0, %v22747_v2 }
 0x373   : > { %19544 = vmatprep.subr.bf16.mxu0 %v22747_v2  ;;  %19558 = vmatprep.mubr.msk.bf16.mxu1 %vm2102_vm6, %v23173_v34 }
 0x376   : > { %19545 = vmatpush3.bf16.msra.mxu0 %v20828_v13  ;;  %v20847_v13 = vld [vmem:[%s24866_s10 + $0x18] sm:$0xff]  }
 0x377   : > { %19546 = vmatprep.subr.bf16.mxu0 %v22747_v2 }
 0x37a   : > { %19547 = vmatpush3.bf16.msra.mxu0 %v20829_v14  ;;  %v20848_v14 = vld [vmem:[%s24866_s10 + $0x38] sm:$0xff]  }
 0x37b   : > { %19548 = vmatprep.subr.bf16.mxu0 %v22747_v2 }
 0x37e   : > { %19549 = vmatpush3.bf16.msra.mxu0 %v20830_v15  ;;  %v20849_v15 = vld [vmem:[%s24866_s10 + $0x10] sm:$0xff]  }
 0x37f   : > { %v1792_v17 = vpop.f32.mrf.mxu0  ;;  %19562 = vmatprep.subr.bf16.mxu0 %v22747_v2 }
 0x380   : > { %v1860_v20 = vadd.f32 %v1859_v57, %v1792_v17  ;;  %v20851_v17 = vld [vmem:[%s24866_s10 + $0x8] sm:$0xff]  }
 0x381   : > { %19551 = vmatmul.mubr.msk.bf16.vlgmr.msra.gmra.mxu0 %vm1209_vm4, %v23126_v12  ;;  %v19504_v18 = vpop.f32.mrf.mxu0 }
 0x382   : > { %19563 = vmatpush3.bf16.msra.mxu0 %v20831_v16  ;;  %19570 = vmatprep.mubr.msk.bf16.mxu0 %vm22748_vm0, %v22747_v2  ;;  %v1867_v25 = vadd.f32 %v17209_v22, %v1860_v20  ;;  %v20850_v16 = vld [vmem:[%s24866_s10 + $0x30] sm:$0xff]   ;;  %v20852_v18 = vld [vmem:[%s24866_s10 + $0x28] sm:$0xff]   ;;  %v20854_v20 = vld [vmem:[%s24866_s10 + $0x20] sm:$0xff]  }
 0x383   : > { %v1795_v21 = vpop.f32.mrf.mxu0  ;;  %19564 = vmatprep.subr.bf16.mxu0 %v22747_v2 }
 0x384   : > { %v1868_v27 = vmax.f32 %v1867_v25, 0.0 }
 0x385   : > { %v19505_v23 = vpop.f32.mrf.mxu0 }
 0x386   : > { %19565 = vmatpush3.bf16.msra.mxu0 %v20832_v19  ;;  %v23154_v29 = vpack.c.bf16 %v1868_v27, %v1868_v27  ;;  %v20853_v19 = vld [vmem:[%s24866_s10] sm:$0xff]  }
 0x387   : > { %19566 = vmatprep.subr.bf16.mxu0 %v22747_v2 }
 0x38a   : > { %19567 = vmatpush3.bf16.msra.mxu0 %v20833_v24  ;;  %v2465_v24 = vlaneseq }
 0x38b   : > { %19568 = vmatprep.subr.bf16.mxu0 %v22747_v2 }
 0x38e   : > { %19569 = vmatpush3.bf16.msra.mxu0 %v20834_v26  ;;  %v23228_v26 = vshrl.u32 %v2465_v24, 7 }
 0x38f   : > { %19586 = vmatprep.subr.bf16.mxu0 %v22747_v2 }
 0x390   : > { %v23231_v27 = vsub.s32 0, %v23228_v26 }
 0x391   : > { %19571 = vmatmul.mubr.msk.bf16.vlgmr.msra.gmra.mxu0 %vm1209_vm4, %v23154_v29 }
 0x392   : > { %19587 = vmatpush3.bf16.msra.mxu0 %v20835_v28  ;;  %19594 = vmatprep.mubr.msk.bf16.mxu0 %vm22748_vm0, %v22747_v2 }
 0x393   : > { %19588 = vmatprep.subr.bf16.mxu0 %v22747_v2 }
 0x396   : > { %19589 = vmatpush3.bf16.msra.mxu0 %v20836_v30 }
 0x397   : > { %19590 = vmatprep.subr.bf16.mxu0 %v22747_v2 }
 0x39a   : > { %19591 = vmatpush3.bf16.msra.mxu0 %v20837_v32 }
 0x39b   : > { %19592 = vmatprep.subr.bf16.mxu0 %v22747_v2 }
 0x39e   : > { %19593 = vmatpush3.bf16.msra.mxu0 %v20838_v33 }
 0x39f   : > { %19610 = vmatprep.subr.bf16.mxu0 %v22747_v2 }
 0x3a1   : > { %19595 = vmatmul.mubr.msk.bf16.vlgmr.msra.gmra.mxu0 %vm1209_vm4, %v23020_v31 }
 0x3a2   : > { %19618 = vmatprep.mubr.msk.bf16.mxu0 %vm22748_vm0, %v22747_v2  ;;  %19611 = vmatpush3.bf16.msra.mxu0 %v20847_v13 }
 0x3a3   : > { %19612 = vmatprep.subr.bf16.mxu0 %v22747_v2 }
 0x3a6   : > { %19613 = vmatpush3.bf16.msra.mxu0 %v20849_v15 }
 0x3a7   : > { %19614 = vmatprep.subr.bf16.mxu0 %v22747_v2 }
 0x3aa   : > { %19615 = vmatpush3.bf16.msra.mxu0 %v20851_v17 }
 0x3ab   : > { %19616 = vmatprep.subr.bf16.mxu0 %v22747_v2 }
 0x3ae   : > { %19617 = vmatpush3.bf16.msra.mxu0 %v20853_v19 }
 0x3af   : > { %19634 = vmatprep.subr.bf16.mxu0 %v22747_v2 }
 0x431   : > { %v1940_v35 = vpop.f32.mrf.mxu0  ;;  %v2012_v36 = vpop.f32.mrf.mxu1 }
 0x432   : > { %v2090_v45 = vpack.c.bf16 %v2012_v36, %v1940_v35  ;;  %v17250_v35 = vld [vmem:[%s24865_s2 + $0x2] ss:$0 sm:$0xff] }
 0x433   : > { %v19528_v37 = vpop.f32.mrf.mxu0  ;;  %v19540_v38 = vpop.f32.mrf.mxu1 }
 0x435   : > { %v1943_v39 = vpop.f32.mrf.mxu0  ;;  %v2015_v40 = vpop.f32.mrf.mxu1 }
 0x437   : > { %v19529_v41 = vpop.f32.mrf.mxu0  ;;  %v19541_v42 = vpop.f32.mrf.mxu1 }
 0x441   : > { %v2084_v31 = vpop.f32.mrf.mxu0 }
 0x442   : > { %v2091_v43 = vpack.c.bf16 %v2084_v31, %v2084_v31 }
 0x443   : > { %v19552_v44 = vpop.f32.mrf.mxu0 }
 0x444   : > { %v2111_v46 = vsel %vm2109_vm7, %v2091_v43, 0  ;;  %20700 = vmatprep.subr.msk.bf16.mxu1 %vm2109_vm7, %v2091_v43  ;;  %v20855_v44 = vld [vmem:[%s24866_s10 + $0x58] sm:$0xff]  }
 0x445   : > { %v2087_v47 = vpop.f32.mrf.mxu0  ;;  %19555 = vmatpush3.bf16.msra.mxu1 %v2111_v46  ;;  %v20856_v46 = vld [vmem:[%s24866_s10 + $0x50] sm:$0xff]  }
 0x446   : > { %19556 = vmatprep.subr.bf16.mxu1 %v2090_v45  ;;  %v23249_v47 = vld [vmem:[%s22981_s18] sm:$0xff]  }
 0x447   : > { %v19553_v48 = vpop.f32.mrf.mxu0 }
 0x448   : > { %v20857_v48 = vld [vmem:[%s24866_s10 + $0x48] sm:$0xff]  }
 0x449   : > { %19557 = vmatpush3.bf16.msra.mxu1 %v2090_v45 }
 0x44a   : > { %19574 = vmatprep.subr.bf16.mxu1 %v22747_v2 }
 0x44c   : > { %19559 = vmatmul.mubr.msk.bf16.vlgmr.msra.gmra.mxu1 %vm2102_vm6, %v23180_v49 }
 0x44d   : > { %19575 = vmatpush3.bf16.msra.mxu1 %v20839_v50  ;;  %19582 = vmatprep.mubr.msk.bf16.mxu1 %vm22748_vm0, %v22747_v2  ;;  %v20858_v50 = vld [vmem:[%s24866_s10 + $0x40] sm:$0xff]  }
 0x44e   : > { %19576 = vmatprep.subr.bf16.mxu1 %v22747_v2 }
 0x451   : > { %v2233_v52 = vpop.f32.mrf.mxu0  ;;  %19577 = vmatpush3.bf16.msra.mxu1 %v20840_v51  ;;  %v20859_v51 = vld [vmem:[%s24866_s10 + $0x78] sm:$0xff]  }
 0x452   : > { %19578 = vmatprep.subr.bf16.mxu1 %v22747_v2  ;;  %v2397_v11 = vpack.c.bf16 %v2233_v52, %v2233_v52  ;;  %v20860_v52 = vld [vmem:[%s24866_s10 + $0x70] sm:$0xff]  }
 0x453   : > { %v19572_v53 = vpop.f32.mrf.mxu0 }
 0x454   : > { %v20861_v53 = vld [vmem:[%s24866_s10 + $0x68] sm:$0xff]  }
 0x455   : > { %v2236_v54 = vpop.f32.mrf.mxu0  ;;  %19579 = vmatpush3.bf16.msra.mxu1 %v20841_v60  ;;  %v20868_v60 = vld [vmem:[%s24866_s10 + $0xd0] sm:$0xff]  }
 0x456   : > { %19580 = vmatprep.subr.bf16.mxu1 %v22747_v2  ;;  %v20862_v54 = vld [vmem:[%s24866_s10 + $0x60] sm:$0xff]  }
 0x457   : > { %v19573_v55 = vpop.f32.mrf.mxu0 }
 0x458   : > { %v20863_v55 = vld [vmem:[%s24866_s10 + $0x98] sm:$0xff]  }
 0x459   : > { %19581 = vmatpush3.bf16.msra.mxu1 %v20842_v61  ;;  %v20869_v61 = vld [vmem:[%s24866_s10 + $0xc8] sm:$0xff]  }
 0x45a   : > { %19598 = vmatprep.subr.bf16.mxu1 %v22747_v2 }
 0x461   : > { %v23191_v56 = vpop.f32.mrf.mxu0 }
 0x463   : > { %v19596_v57 = vpop.f32.mrf.mxu0 }
 0x464   : > { %v20865_v57 = vld [vmem:[%s24866_s10 + $0x88] sm:$0xff]  }
 0x465   : > { %v23193_v58 = vpop.f32.mrf.mxu0 }
 0x467   : > { %v19597_v59 = vpop.f32.mrf.mxu0 }
 0x468   : > { %v20867_v59 = vld [vmem:[%s24866_s10 + $0xd8] sm:$0xff]  }
 0x50c   : > { %v19560_v62 = vpop.f32.mrf.mxu1 }
 0x50e   : > { %v2147_v63 = vpop.f32.mrf.mxu1 }
 0x50f   : > { %v2162_v4 = vmax.f32 %v2147_v63, %v19560_v62  ;;  %v20870_v62 = vld [vmem:[%s24866_s10 + $0xc0] sm:$0xff]  }
 0x510   : > { %v19561_v0 = vpop.f32.mrf.mxu1 }
 0x512   : > { %v2150_v3 = vpop.f32.mrf.mxu1 }
 0x513   : > { %v2163_v5 = vmax.f32 %v2150_v3, %v19561_v0 }
 0x515   : > { %v2255_v7 = vpack.c.bf16 %v2163_v5, %v2162_v4 }
 0x517   : > { %19583 = vmatmul.mubr.msk.bf16.vlgmr.msra.gmra.mxu1 %vm1209_vm4, %v2255_v7 }
 0x518   : > { %19599 = vmatpush3.bf16.msra.mxu1 %v20843_v6  ;;  %19606 = vmatprep.mubr.msk.bf16.mxu1 %vm22748_vm0, %v22747_v2 }
 0x519   : > { %19600 = vmatprep.subr.bf16.mxu1 %v22747_v2 }
 0x51c   : > { %19601 = vmatpush3.bf16.msra.mxu1 %v20844_v8 }
 0x51d   : > { %19602 = vmatprep.subr.bf16.mxu1 %v22747_v2 }
 0x520   : > { %19603 = vmatpush3.bf16.msra.mxu1 %v20845_v9 }
 0x521   : > { %19604 = vmatprep.subr.bf16.mxu1 %v22747_v2 }
 0x524   : > { %19605 = vmatpush3.bf16.msra.mxu1 %v20846_v10 }
 0x525   : > { %19622 = vmatprep.subr.bf16.mxu1 %v22747_v2 }
 0x527   : > { %19607 = vmatmul.mubr.msk.bf16.vlgmr.msra.gmra.mxu1 %vm1209_vm4, %v2397_v11 }
 0x528   : > { %19630 = vmatprep.mubr.msk.bf16.mxu1 %vm22748_vm0, %v22747_v2  ;;  %19623 = vmatpush3.bf16.msra.mxu1 %v20848_v14 }
 0x529   : > { %19624 = vmatprep.subr.bf16.mxu1 %v22747_v2 }
 0x52c   : > { %19625 = vmatpush3.bf16.msra.mxu1 %v20850_v16  ;;  %v20871_v16 = vld [vmem:[%s24866_s10 + $0xb8] sm:$0xff]  }
 0x52d   : > { %19626 = vmatprep.subr.bf16.mxu1 %v22747_v2 }
 0x530   : > { %19627 = vmatpush3.bf16.msra.mxu1 %v20852_v18  ;;  %v23301_v18 = vld [vmem:[%s22981_s18 + $0x8] sm:$0xff]  }
 0x531   : > { %19628 = vmatprep.subr.bf16.mxu1 %v22747_v2 }
 0x534   : > { %19629 = vmatpush3.bf16.msra.mxu1 %v20854_v20 }
 0x5d7   : > { %v2317_v21 = vpop.f32.mrf.mxu1 }
 0x5d8   : > { %v2383_v30 = vadd.f32 %v23191_v56, %v2317_v21  ;;  %v20864_v56 = vld [vmem:[%s24866_s10 + $0x90] sm:$0xff]  }
 0x5d9   : > { %v19584_v22 = vpop.f32.mrf.mxu1 }
 0x5db   : > { %v2320_v23 = vpop.f32.mrf.mxu1 }
 0x5dc   : > { %v2386_v32 = vadd.f32 %v23193_v58, %v2320_v23  ;;  %v20866_v58 = vld [vmem:[%s24866_s10 + $0x80] sm:$0xff]  }
 0x5dd   : > { %v19585_v25 = vpop.f32.mrf.mxu1 }
 0x5e7   : > { %v2459_v28 = vpop.f32.mrf.mxu1 }
 0x5e8   : > { %v2468_v33 = vrot.slane %v2459_v28, %v23231_v27 }
 0x5e9   : > { %v19608_v36 = vpop.f32.mrf.mxu1 }
 0x5ea   : > { %v2469_v37 = vadd.f32 %v2468_v33, %v2383_v30  ;;  %v2470_v38 = vadd.f32 %v2468_v33, %v2386_v32 }
 0x5eb   : > { %v2462_v39 = vpop.f32.mrf.mxu1 }
 0x5ec   : > { %v2479_v40 = vadd.f32 %v17250_v35, %v2469_v37  ;;  %v2480_v41 = vadd.f32 %v17250_v35, %v2470_v38  ;;  %v20872_v37 = vld [vmem:[%s24866_s10 + $0xb0] sm:$0xff]   ;;  %v20873_v38 = vld [vmem:[%s24866_s10 + $0xa8] sm:$0xff]   ;;  %v20874_v39 = vld [vmem:[%s24866_s10 + $0xa0] sm:$0xff]  }
 0x5ed   : > { %v19609_v42 = vpop.f32.mrf.mxu1 }
 0x5ee   : > { %v2481_v31 = vmax.f32 %v2479_v40, 0.0  ;;  %v2482_v43 = vmax.f32 %v2480_v41, 0.0  ;;  %v20880_v40 = vld [vmem:[%s24866_s10 + $0x138] sm:$0xff]   ;;  %v20882_v41 = vld [vmem:[%s24866_s10 + $0x130] sm:$0xff]  }
 0x5f0   : > { %v23238_v45 = vpack.c.bf16 %v2482_v43, %v2481_v31 }
 0x5f2   : > { %19619 = vmatmul.mubr.msk.bf16.vlgmr.msra.gmra.mxu0 %vm1209_vm4, %v23238_v45  ;;  %19631 = vmatmul.mubr.msk.bf16.vlgmr.msra.gmra.mxu1 %vm1209_vm4, %v23238_v45 }
 0x5f3   : > { %19635 = vmatpush3.bf16.msra.mxu0 %v20855_v44  ;;  %19642 = vmatprep.mubr.msk.bf16.mxu0 %vm22748_vm0, %v22747_v2 }
 0x5f4   : > { %19636 = vmatprep.subr.bf16.mxu0 %v22747_v2  ;;  %19652 = vmatprep.mubr.msk.bf16.mxu1 %vm1413_vm5, %v23249_v47 }
 0x5f7   : > { %19637 = vmatpush3.bf16.msra.mxu0 %v20856_v46 }
 0x5f8   : > { %19638 = vmatprep.subr.bf16.mxu0 %v22747_v2 }
 0x5fb   : > { %19639 = vmatpush3.bf16.msra.mxu0 %v20857_v48 }
 0x5fc   : > { %19640 = vmatprep.subr.bf16.mxu0 %v22747_v2 }
 0x5ff   : > { %19641 = vmatpush3.bf16.msra.mxu0 %v20858_v50 }
 0x600   : > { %19656 = vmatprep.subr.bf16.mxu0 %v22747_v2 }
 0x602   : > { %19643 = vmatmul.mubr.msk.bf16.vlgmr.msra.gmra.mxu0 %vm1209_vm4, %v23238_v45 }
 0x603   : > { %19657 = vmatpush3.bf16.msra.mxu0 %v20859_v51  ;;  %19664 = vmatprep.mubr.msk.bf16.mxu0 %vm22748_vm0, %v22747_v2 }
 0x604   : > { %19658 = vmatprep.subr.bf16.mxu0 %v22747_v2 }
 0x607   : > { %19659 = vmatpush3.bf16.msra.mxu0 %v20860_v52 }
 0x608   : > { %19660 = vmatprep.subr.bf16.mxu0 %v22747_v2 }
 0x60b   : > { %19661 = vmatpush3.bf16.msra.mxu0 %v20861_v53  ;;  %v20875_v53 = vld [vmem:[%s24866_s10 + $0xf8] sm:$0xff]  }
 0x60c   : > { %19662 = vmatprep.subr.bf16.mxu0 %v22747_v2 }
 0x60f   : > { %19663 = vmatpush3.bf16.msra.mxu0 %v20862_v54 }
 0x610   : > { %19680 = vmatprep.subr.bf16.mxu0 %v22747_v2 }
 0x612   : > { %19665 = vmatmul.mubr.msk.bf16.vlgmr.msra.gmra.mxu0 %vm1209_vm4, %v23238_v45 }
 0x613   : > { %19681 = vmatpush3.bf16.msra.mxu0 %v20863_v55  ;;  %19688 = vmatprep.mubr.msk.bf16.mxu0 %vm22748_vm0, %v22747_v2 }
 0x614   : > { %19682 = vmatprep.subr.bf16.mxu0 %v22747_v2 }
 0x617   : > { %19683 = vmatpush3.bf16.msra.mxu0 %v20864_v56  ;;  %v20876_v56 = vld [vmem:[%s24866_s10 + $0xf0] sm:$0xff]  }
 0x618   : > { %19684 = vmatprep.subr.bf16.mxu0 %v22747_v2 }
 0x61b   : > { %19685 = vmatpush3.bf16.msra.mxu0 %v20865_v57 }
 0x61c   : > { %19686 = vmatprep.subr.bf16.mxu0 %v22747_v2 }
 0x61f   : > { %19687 = vmatpush3.bf16.msra.mxu0 %v20866_v58  ;;  %v20877_v58 = vld [vmem:[%s24866_s10 + $0xe8] sm:$0xff]  }
 0x620   : > { %19704 = vmatprep.subr.bf16.mxu0 %v22747_v2 }
 0x622   : > { %19689 = vmatmul.mubr.msk.bf16.vlgmr.msra.gmra.mxu0 %vm1209_vm4, %v23126_v12 }
 0x623   : > { %19705 = vmatpush3.bf16.msra.mxu0 %v20867_v59  ;;  %19712 = vmatprep.mubr.msk.bf16.mxu0 %vm22748_vm0, %v22747_v2 }
 0x624   : > { %19706 = vmatprep.subr.bf16.mxu0 %v22747_v2 }
 0x627   : > { %19707 = vmatpush3.bf16.msra.mxu0 %v20868_v60  ;;  %v20878_v60 = vld [vmem:[%s24866_s10 + $0xe0] sm:$0xff]  }
 0x628   : > { %19708 = vmatprep.subr.bf16.mxu0 %v22747_v2 }
 0x62b   : > { %19709 = vmatpush3.bf16.msra.mxu0 %v20869_v61 }
 0x62c   : > { %19710 = vmatprep.subr.bf16.mxu0 %v22747_v2 }
 0x62f   : > { %19711 = vmatpush3.bf16.msra.mxu0 %v20870_v62  ;;  %v20879_v62 = vld [vmem:[%s24866_s10 + $0x118] sm:$0xff]  }
 0x630   : > { %19728 = vmatprep.subr.bf16.mxu0 %v22747_v2 }
 0x632   : > { %19713 = vmatmul.mubr.msk.bf16.vlgmr.msra.gmra.mxu0 %vm1209_vm4, %v23154_v29 }
 0x633   : > { %19736 = vmatprep.mubr.msk.bf16.mxu0 %vm22748_vm0, %v22747_v2  ;;  %19729 = vmatpush3.bf16.msra.mxu0 %v20880_v40  ;;  %v20898_v40 = vld [vmem:[%s24866_s10 + $0x180] sm:$0xff]  }
 0x634   : > { %19730 = vmatprep.subr.bf16.mxu0 %v22747_v2 }
 0x637   : > { %19731 = vmatpush3.bf16.msra.mxu0 %v20882_v41 }
 0x638   : > { %19732 = vmatprep.subr.bf16.mxu0 %v22747_v2 }
 0x6b2   : > { %v2553_v12 = vpop.f32.mrf.mxu0  ;;  %v2626_v63 = vpop.f32.mrf.mxu1 }
 0x6b4   : > { %v19620_v0 = vpop.f32.mrf.mxu0  ;;  %v19632_v3 = vpop.f32.mrf.mxu1 }
 0x6b5   : > { %v20883_v0 = vld [vmem:[%s24866_s10 + $0x108] sm:$0xff]  }
 0x6b6   : > { %v2556_v4 = vpop.f32.mrf.mxu0  ;;  %v2629_v5 = vpop.f32.mrf.mxu1  ;;  %v20884_v3 = vld [vmem:[%s24866_s10 + $0x128] sm:$0xff]  }
 0x6b7   : > { %v2707_v14 = vpack.c.bf16 %v2629_v5, %v2626_v63  ;;  %v2706_v29 = vpack.c.bf16 %v2556_v4, %v2553_v12  ;;  %v20881_v63 = vld [vmem:[%s24866_s10 + $0x110] sm:$0xff]   ;;  %19733 = vmatpush3.bf16.msra.mxu0 %v20884_v3  ;;  %v20885_v4 = vld [vmem:[%s24866_s10 + $0x100] sm:$0xff]   ;;  %v20901_v3 = vld [vmem:[%s24866_s10 + $0x1a8] sm:$0xff]  }
 0x6b8   : > { %v19621_v6 = vpop.f32.mrf.mxu0  ;;  %v19633_v7 = vpop.f32.mrf.mxu1  ;;  %19734 = vmatprep.subr.bf16.mxu0 %v22747_v2  ;;  %v20886_v5 = vld [vmem:[%s24866_s10 + $0x120] sm:$0xff]  }
 0x6b9   : > { %v17283_v7 = vld [vmem:[%s24867_s27] ss:$0 sm:$0xff] }
 0x6bb   : > { %19735 = vmatpush3.bf16.msra.mxu0 %v20886_v5 }
 0x6c2   : > { %v2699_v8 = vpop.f32.mrf.mxu0 }
 0x6c4   : > { %v19644_v9 = vpop.f32.mrf.mxu0 }
 0x6c6   : > { %v2702_v10 = vpop.f32.mrf.mxu0 }
 0x6c7   : > { %v2708_v11 = vpack.c.bf16 %v2702_v10, %v2699_v8 }
 0x6c8   : > { %v19645_v13 = vpop.f32.mrf.mxu0 }
 0x6c9   : > { %19646 = vmatprep.subr.bf16.mxu1 %v2708_v11 }
 0x6ca   : > { %19647 = vmatpush3.bf16.msra.mxu1 %v2708_v11 }
 0x6cb   : > { %19648 = vmatprep.subr.bf16.mxu1 %v2707_v14 }
 0x6ce   : > { %19649 = vmatpush3.bf16.msra.mxu1 %v2707_v14 }
 0x6cf   : > { %19650 = vmatprep.subr.bf16.mxu1 %v2706_v29 }
 0x6d2   : > { %19651 = vmatpush3.bf16.msra.mxu1 %v2706_v29  ;;  %v2827_v15 = vpop.f32.mrf.mxu0  ;;  %v20887_v29 = vld [vmem:[%s24866_s10 + $0x158] sm:$0xff]  }
 0x6d3   : > { %19668 = vmatprep.subr.bf16.mxu1 %v22747_v2  ;;  %v2834_v20 = vsel %vm1209_vm4, %v2827_v15, -inf }
 0x6d4   : > { %v19666_v17 = vpop.f32.mrf.mxu0 }
 0x6d5   : > { %19653 = vmatmul.mubr.msk.bf16.vlgmr.msra.gmra.mxu1 %vm1413_vm5, %v23301_v18  ;;  %v20889_v17 = vld [vmem:[%s24866_s10 + $0x148] sm:$0xff]  }
 0x6d6   : > { %v2830_v19 = vpop.f32.mrf.mxu0  ;;  %19669 = vmatpush3.bf16.msra.mxu1 %v20871_v16  ;;  %19676 = vmatprep.mubr.msk.bf16.mxu1 %vm22748_vm0, %v22747_v2  ;;  %v20888_v16 = vld [vmem:[%s24866_s10 + $0x150] sm:$0xff]  }
 0x6d7   : > { %v2835_v21 = vsel %vm1209_vm4, %v2830_v19, -inf  ;;  %19670 = vmatprep.subr.bf16.mxu1 %v22747_v2 }
 0x6d8   : > { %v2836_v22 = vmax.f32 %v2834_v20, %v2835_v21  ;;  %v19667_v23 = vpop.f32.mrf.mxu0  ;;  %v20890_v21 = vld [vmem:[%s24866_s10 + $0x140] sm:$0xff]  }
 0x6da   : > { %19671 = vmatpush3.bf16.msra.mxu1 %v20872_v37  ;;  %v2837_v44 = vrot.slane %v2836_v22, 4  ;;  %v20895_v37 = vld [vmem:[%s24866_s10 + $0x198] sm:$0xff]  }
 0x6db   : > { %19672 = vmatprep.subr.bf16.mxu1 %v22747_v2 }
 0x6dc   : > { %v2838_v50 = vmax.f32 %v2836_v22, %v2837_v44 }
 0x6de   : > { %19673 = vmatpush3.bf16.msra.mxu1 %v20873_v38  ;;  %v2839_v54 = vrot.slane %v2838_v50, 2 }
 0x6df   : > { %19674 = vmatprep.subr.bf16.mxu1 %v22747_v2 }
 0x6e0   : > { %v2840_v57 = vmax.f32 %v2838_v50, %v2839_v54 }
 0x6e2   : > { %v23310_v24 = vpop.f32.mrf.mxu0  ;;  %19675 = vmatpush3.bf16.msra.mxu1 %v20874_v39  ;;  %v2841_v59 = vrot.slane %v2840_v57, 1  ;;  %v20897_v39 = vld [vmem:[%s24866_s10 + $0x188] sm:$0xff]  }
 0x6e3   : > { %19692 = vmatprep.subr.bf16.mxu1 %v22747_v2 }
 0x6e4   : > { %v19690_v25 = vpop.f32.mrf.mxu0  ;;  %v2842_v61 = vmax.f32 %v2840_v57, %v2841_v59  ;;  %v20899_v57 = vld [vmem:[%s24866_s10 + $0x1b8] sm:$0xff]  }
 0x6e6   : > { %v2988_v28 = vpop.f32.mrf.mxu0  ;;  %v3016_v12 = vpack.c.bf16 %v2842_v61, %v2842_v61 }
 0x6e7   : > { %v17294_v28 = vld [vmem:[%s24867_s27 + $0x1] sm:$0x1] }
 0x6e8   : > { %v19691_v30 = vpop.f32.mrf.mxu0 }
 0x6e9   : > { %v20893_v30 = vld [vmem:[%s24866_s10 + $0x168] sm:$0xff]  }
 0x6f2   : > { %v23312_v32 = vpop.f32.mrf.mxu0 }
 0x6f4   : > { %v19714_v33 = vpop.f32.mrf.mxu0 }
 0x6f6   : > { %v3145_v35 = vpop.f32.mrf.mxu0 }
 0x6f7   : > { %v20894_v35 = vld [vmem:[%s24866_s10 + $0x160] sm:$0xff]  }
 0x6f8   : > { %v19715_v36 = vpop.f32.mrf.mxu0 }
 0x795   : > { %v19654_v42 = vpop.f32.mrf.mxu1 }
 0x797   : > { %v2743_v31 = vpop.f32.mrf.mxu1 }
 0x799   : > { %v19655_v43 = vpop.f32.mrf.mxu1 }
 0x79b   : > { %v2746_v46 = vpop.f32.mrf.mxu1 }
 0x79c   : > { %v2758_v48 = vmax.f32 %v2743_v31, %v2746_v46 }
 0x79e   : > { %v2759_v51 = vmax.f32 %v2758_v48, %v19654_v42 }
 0x7a0   : > { %v2760_v52 = vmax.f32 %v2759_v51, %v19655_v43 }
 0x7a2   : > { %v2859_v55 = vpack.c.bf16 %v2760_v52, %v2760_v52 }
 0x7a4   : > { %19677 = vmatmul.mubr.msk.bf16.vlgmr.msra.gmra.mxu1 %vm1209_vm4, %v2859_v55 }
 0x7a5   : > { %19693 = vmatpush3.bf16.msra.mxu1 %v20875_v53  ;;  %19700 = vmatprep.mubr.msk.bf16.mxu1 %vm22748_vm0, %v22747_v2 }
 0x7a6   : > { %19694 = vmatprep.subr.bf16.mxu1 %v22747_v2 }
 0x7a9   : > { %19695 = vmatpush3.bf16.msra.mxu1 %v20876_v56 }
 0x7aa   : > { %19696 = vmatprep.subr.bf16.mxu1 %v22747_v2 }
 0x7ad   : > { %19697 = vmatpush3.bf16.msra.mxu1 %v20877_v58  ;;  %v20900_v58 = vld [vmem:[%s24866_s10 + $0x1b0] sm:$0xff]  }
 0x7ae   : > { %19698 = vmatprep.subr.bf16.mxu1 %v22747_v2 }
 0x7b1   : > { %19699 = vmatpush3.bf16.msra.mxu1 %v20878_v60 }
 0x7b2   : > { %19716 = vmatprep.subr.bf16.mxu1 %v22747_v2 }
 0x7b4   : > { %19701 = vmatmul.mubr.msk.bf16.vlgmr.msra.gmra.mxu1 %vm1209_vm4, %v3016_v12 }
 0x7b5   : > { %19717 = vmatpush3.bf16.msra.mxu1 %v20879_v62  ;;  %19724 = vmatprep.mubr.msk.bf16.mxu1 %vm22748_vm0, %v22747_v2 }
 0x7b6   : > { %19718 = vmatprep.subr.bf16.mxu1 %v22747_v2 }
 0x7b9   : > { %19719 = vmatpush3.bf16.msra.mxu1 %v20881_v63 }
 0x7ba   : > { %19720 = vmatprep.subr.bf16.mxu1 %v22747_v2 }
 0x7bd   : > { %19721 = vmatpush3.bf16.msra.mxu1 %v20883_v0 }
 0x7be   : > { %19722 = vmatprep.subr.bf16.mxu1 %v22747_v2 }
 0x7c1   : > { %19723 = vmatpush3.bf16.msra.mxu1 %v20885_v4  ;;  %v20902_v4 = vld [vmem:[%s24866_s10 + $0x1a0] sm:$0xff]  }
 0x7c2   : > { %19740 = vmatprep.subr.bf16.mxu1 %v22747_v2 }
 0x864   : > { %v2921_v6 = vpop.f32.mrf.mxu1 }
 0x865   : > { %v2986_v8 = vadd.f32 %v23310_v24, %v2921_v6  ;;  %v20891_v24 = vld [vmem:[%s24866_s10 + $0x178] sm:$0xff]  }
 0x866   : > { %v19678_v9 = vpop.f32.mrf.mxu1 }
 0x867   : > { %v2998_v10 = vadd.f32 %v17283_v7, %v2986_v8 }
 0x868   : > { %v2924_v11 = vpop.f32.mrf.mxu1 }
 0x869   : > { %v2999_v13 = vmax.f32 %v2998_v10, 0.0  ;;  %v20903_v11 = vld [vmem:[%s24866_s10 + $0x1d8] sm:$0xff]  }
 0x86a   : > { %v19679_v14 = vpop.f32.mrf.mxu1 }
 0x86b   : > { %v23352_v15 = vpack.c.bf16 %v2999_v13, %v2999_v13  ;;  %v20904_v14 = vld [vmem:[%s24866_s10 + $0x1d0] sm:$0xff]  }
 0x86d   : > { %19725 = vmatmul.mubr.msk.bf16.vlgmr.msra.gmra.mxu1 %vm1209_vm4, %v23352_v15  ;;  %19737 = vmatmul.mubr.msk.bf16.vlgmr.msra.gmra.mxu0 %vm1209_vm4, %v23352_v15 }
 0x86e   : > { %19741 = vmatpush3.bf16.msra.mxu1 %v20887_v29  ;;  %19748 = vmatprep.mubr.msk.bf16.mxu1 %vm22748_vm0, %v22747_v2  ;;  %v20905_v29 = vld [vmem:[%s24866_s10 + $0x1c8] sm:$0xff]  }
 0x86f   : > { %19742 = vmatprep.subr.bf16.mxu1 %v22747_v2  ;;  %19756 = vmatprep.mubr.msk.bf16.mxu0 %vm2102_vm6, %v23173_v34  ;;  %v20892_v34 = vld [vmem:[%s24866_s10 + $0x170] sm:$0xff]  }
 0x872   : > { %19743 = vmatpush3.bf16.msra.mxu1 %v20888_v16  ;;  %v20906_v16 = vld [vmem:[%s24866_s10 + $0x1c0] sm:$0xff]  }
 0x873   : > { %19744 = vmatprep.subr.bf16.mxu1 %v22747_v2 }
 0x874   : > { %v3078_v19 = vpop.f32.mrf.mxu1 }
 0x875   : > { %v3143_v25 = vadd.f32 %v23312_v32, %v3078_v19  ;;  %v20896_v32 = vld [vmem:[%s24866_s10 + $0x190] sm:$0xff]   ;;  %v20907_v19 = vld [vmem:[#allocation3 + $0x18] sm:$0xff]  }
 0x876   : > { %v19702_v20 = vpop.f32.mrf.mxu1  ;;  %19745 = vmatpush3.bf16.msra.mxu1 %v20889_v17 }
 0x877   : > { %19746 = vmatprep.subr.bf16.mxu1 %v22747_v2  ;;  %v3150_v33 = vadd.f32 %v17294_v28, %v3143_v25  ;;  %v20908_v20 = vld [vmem:[#allocation3 + $0x38] sm:$0xff]   ;;  %v20914_v25 = vld [vmem:[#allocation3 + $0x20] sm:$0xff]  }
 0x878   : > { %v3081_v22 = vpop.f32.mrf.mxu1 }
 0x879   : > { %v3151_v36 = vmax.f32 %v3150_v33, 0.0  ;;  %v20910_v22 = vld [vmem:[#allocation3 + $0x30] sm:$0xff]  }
 0x87a   : > { %v19703_v23 = vpop.f32.mrf.mxu1  ;;  %19747 = vmatpush3.bf16.msra.mxu1 %v20890_v21  ;;  %v20909_v21 = vld [vmem:[#allocation3 + $0x10] sm:$0xff]  }
 0x87b   : > { %19760 = vmatprep.subr.bf16.mxu1 %v22747_v2  ;;  %v23383_v38 = vpack.c.bf16 %v3151_v36, %v3151_v36  ;;  %v20911_v23 = vld [vmem:[#allocation3 + $0x8] sm:$0xff]  }
 0x87d   : > { %19749 = vmatmul.mubr.msk.bf16.vlgmr.msra.gmra.mxu1 %vm1209_vm4, %v23352_v15 }
 0x87e   : > { %19761 = vmatpush3.bf16.msra.mxu1 %v20891_v24  ;;  %19768 = vmatprep.mubr.msk.bf16.mxu1 %vm22748_vm0, %v22747_v2  ;;  %v20912_v24 = vld [vmem:[#allocation3 + $0x28] sm:$0xff]  }
 0x87f   : > { %19762 = vmatprep.subr.bf16.mxu1 %v22747_v2 }
 0x882   : > { %19763 = vmatpush3.bf16.msra.mxu1 %v20892_v34  ;;  %v20913_v34 = vld [vmem:[#allocation3] sm:$0xff]  }
 0x883   : > { %19764 = vmatprep.subr.bf16.mxu1 %v22747_v2 }
 0x886   : > { %19765 = vmatpush3.bf16.msra.mxu1 %v20893_v30 }
 0x887   : > { %19766 = vmatprep.subr.bf16.mxu1 %v22747_v2 }
 0x88a   : > { %19767 = vmatpush3.bf16.msra.mxu1 %v20894_v35 }
 0x88b   : > { %19784 = vmatprep.subr.bf16.mxu1 %v22747_v2 }
 0x88d   : > { %19769 = vmatmul.mubr.msk.bf16.vlgmr.msra.gmra.mxu1 %vm1209_vm4, %v23383_v38 }
 0x88e   : > { %19785 = vmatpush3.bf16.msra.mxu1 %v20895_v37  ;;  %19792 = vmatprep.mubr.msk.bf16.mxu1 %vm22748_vm0, %v22747_v2 }
 0x88f   : > { %19786 = vmatprep.subr.bf16.mxu1 %v22747_v2 }
 0x892   : > { %19787 = vmatpush3.bf16.msra.mxu1 %v20896_v32 }
 0x893   : > { %19788 = vmatprep.subr.bf16.mxu1 %v22747_v2 }
 0x896   : > { %19789 = vmatpush3.bf16.msra.mxu1 %v20897_v39 }
 0x897   : > { %19790 = vmatprep.subr.bf16.mxu1 %v22747_v2 }
 0x89a   : > { %19791 = vmatpush3.bf16.msra.mxu1 %v20898_v40  ;;  %v17333_v40 = vld [vmem:[%s24867_s27 + $0x2] ss:$0 sm:$0xff] }
 0x89b   : > { %19808 = vmatprep.subr.bf16.mxu1 %v22747_v2 }
 0x89d   : > { %19793 = vmatmul.mubr.msk.bf16.vlgmr.msra.gmra.mxu1 %vm1209_vm4, %v23238_v45 }
 0x89e   : > { %19816 = vmatprep.mubr.msk.bf16.mxu1 %vm22748_vm0, %v22747_v2  ;;  %19809 = vmatpush3.bf16.msra.mxu1 %v20907_v19 }
 0x89f   : > { %19810 = vmatprep.subr.bf16.mxu1 %v22747_v2 }
 0x8a2   : > { %19811 = vmatpush3.bf16.msra.mxu1 %v20909_v21 }
 0x8a3   : > { %19812 = vmatprep.subr.bf16.mxu1 %v22747_v2 }
 0x8a6   : > { %19813 = vmatpush3.bf16.msra.mxu1 %v20911_v23 }
 0x8a7   : > { %19814 = vmatprep.subr.bf16.mxu1 %v22747_v2 }
 0x8aa   : > { %19815 = vmatpush3.bf16.msra.mxu1 %v20913_v34 }
 0x8ab   : > { %19832 = vmatprep.subr.bf16.mxu1 %v22747_v2 }
 0x92d   : > { %v3223_v41 = vpop.f32.mrf.mxu1  ;;  %v3295_v42 = vpop.f32.mrf.mxu0 }
 0x92e   : > { %v3373_v54 = vpack.c.bf16 %v3295_v42, %v3223_v41 }
 0x92f   : > { %v19726_v31 = vpop.f32.mrf.mxu1  ;;  %v19738_v43 = vpop.f32.mrf.mxu0 }
 0x931   : > { %v3226_v44 = vpop.f32.mrf.mxu1  ;;  %v3298_v46 = vpop.f32.mrf.mxu0 }
 0x933   : > { %v19727_v48 = vpop.f32.mrf.mxu1  ;;  %v19739_v50 = vpop.f32.mrf.mxu0 }
 0x93d   : > { %v3367_v51 = vpop.f32.mrf.mxu1 }
 0x93e   : > { %v3374_v52 = vpack.c.bf16 %v3367_v51, %v3367_v51 }
 0x93f   : > { %v19750_v53 = vpop.f32.mrf.mxu1 }
 0x940   : > { %v3376_v55 = vsel %vm2109_vm7, %v3374_v52, 0  ;;  %20701 = vmatprep.subr.msk.bf16.mxu0 %vm2109_vm7, %v3374_v52  ;;  %v20915_v52 = vld [vmem:[#allocation3 + $0x58] sm:$0xff]  }
 0x941   : > { %v3370_v45 = vpop.f32.mrf.mxu1  ;;  %19753 = vmatpush3.bf16.msra.mxu0 %v3376_v55  ;;  %v20917_v55 = vld [vmem:[#allocation3 + $0x48] sm:$0xff]  }
 0x942   : > { %19754 = vmatprep.subr.bf16.mxu0 %v3373_v54  ;;  %v20918_v45 = vld [vmem:[#allocation3 + $0x40] sm:$0xff]  }
 0x943   : > { %v19751_v56 = vpop.f32.mrf.mxu1 }
 0x944   : > { %v20919_v56 = vld [vmem:[#allocation3 + $0x78] sm:$0xff]  }
 0x945   : > { %19755 = vmatpush3.bf16.msra.mxu0 %v3373_v54  ;;  %v20916_v54 = vld [vmem:[#allocation3 + $0x50] sm:$0xff]  }
 0x946   : > { %19772 = vmatprep.subr.bf16.mxu0 %v22747_v2 }
 0x948   : > { %19757 = vmatmul.mubr.msk.bf16.vlgmr.msra.gmra.mxu0 %vm2102_vm6, %v23180_v49 }
 0x949   : > { %19773 = vmatpush3.bf16.msra.mxu0 %v20899_v57  ;;  %19780 = vmatprep.mubr.msk.bf16.mxu0 %vm22748_vm0, %v22747_v2  ;;  %v20920_v57 = vld [vmem:[#allocation3 + $0x70] sm:$0xff]  }
 0x94a   : > { %19774 = vmatprep.subr.bf16.mxu0 %v22747_v2 }
 0x94d   : > { %v3498_v59 = vpop.f32.mrf.mxu1  ;;  %19775 = vmatpush3.bf16.msra.mxu0 %v20900_v58  ;;  %v20922_v58 = vld [vmem:[#allocation3 + $0x60] sm:$0xff]  }
 0x94e   : > { %19776 = vmatprep.subr.bf16.mxu0 %v22747_v2  ;;  %v3662_v17 = vpack.c.bf16 %v3498_v59, %v3498_v59  ;;  %v20923_v59 = vld [vmem:[#allocation3 + $0x98] sm:$0xff]  }
 0x94f   : > { %v19770_v60 = vpop.f32.mrf.mxu1 }
 0x950   : > { %v20924_v60 = vld [vmem:[#allocation3 + $0x90] sm:$0xff]  }
 0x951   : > { %v3501_v61 = vpop.f32.mrf.mxu1  ;;  %19777 = vmatpush3.bf16.msra.mxu0 %v20901_v3  ;;  %v20932_v3 = vld [vmem:[#allocation3 + $0x110] sm:$0xff]  }
 0x952   : > { %19778 = vmatprep.subr.bf16.mxu0 %v22747_v2  ;;  %v20925_v61 = vld [vmem:[#allocation3 + $0x88] sm:$0xff]  }
 0x953   : > { %v19771_v62 = vpop.f32.mrf.mxu1 }
 0x954   : > { %v20926_v62 = vld [vmem:[#allocation3 + $0x80] sm:$0xff]  }
 0x955   : > { %19779 = vmatpush3.bf16.msra.mxu0 %v20902_v4  ;;  %v20933_v4 = vld [vmem:[#allocation3 + $0x108] sm:$0xff]  }
 0x956   : > { %19796 = vmatprep.subr.bf16.mxu0 %v22747_v2 }
 0x95d   : > { %v3647_v12 = vpop.f32.mrf.mxu1 }
 0x95f   : > { %v19794_v63 = vpop.f32.mrf.mxu1 }
 0x960   : > { %v20928_v63 = vld [vmem:[#allocation3 + $0x130] sm:$0xff]  }
 0x961   : > { %v3650_v0 = vpop.f32.mrf.mxu1 }
 0x963   : > { %v19795_v49 = vpop.f32.mrf.mxu1 }
 0x964   : > { %v20930_v49 = vld [vmem:[#allocation3 + $0x120] sm:$0xff]  }
 0xa08   : > { %v19758_v5 = vpop.f32.mrf.mxu0 }
 0xa0a   : > { %v3412_v6 = vpop.f32.mrf.mxu0 }
 0xa0b   : > { %v3427_v9 = vmax.f32 %v3412_v6, %v19758_v5  ;;  %v20934_v5 = vld [vmem:[#allocation3 + $0x100] sm:$0xff]  }
 0xa0c   : > { %v19759_v7 = vpop.f32.mrf.mxu0 }
 0xa0e   : > { %v3415_v8 = vpop.f32.mrf.mxu0 }
 0xa0f   : > { %v3428_v10 = vmax.f32 %v3415_v8, %v19759_v7 }
 0xa11   : > { %v3520_v13 = vpack.c.bf16 %v3428_v10, %v3427_v9 }
 0xa13   : > { %19781 = vmatmul.mubr.msk.bf16.vlgmr.msra.gmra.mxu0 %vm1209_vm4, %v3520_v13 }
 0xa14   : > { %19797 = vmatpush3.bf16.msra.mxu0 %v20903_v11  ;;  %19804 = vmatprep.mubr.msk.bf16.mxu0 %vm22748_vm0, %v22747_v2 }
 0xa15   : > { %19798 = vmatprep.subr.bf16.mxu0 %v22747_v2 }
 0xa18   : > { %19799 = vmatpush3.bf16.msra.mxu0 %v20904_v14 }
 0xa19   : > { %19800 = vmatprep.subr.bf16.mxu0 %v22747_v2 }
 0xa1c   : > { %19801 = vmatpush3.bf16.msra.mxu0 %v20905_v29 }
 0xa1d   : > { %19802 = vmatprep.subr.bf16.mxu0 %v22747_v2 }
 0xa20   : > { %19803 = vmatpush3.bf16.msra.mxu0 %v20906_v16 }
 0xa21   : > { %19820 = vmatprep.subr.bf16.mxu0 %v22747_v2 }
 0xa23   : > { %19805 = vmatmul.mubr.msk.bf16.vlgmr.msra.gmra.mxu0 %vm1209_vm4, %v3662_v17 }
 0xa24   : > { %19828 = vmatprep.mubr.msk.bf16.mxu0 %vm22748_vm0, %v22747_v2  ;;  %19821 = vmatpush3.bf16.msra.mxu0 %v20908_v20 }
 0xa25   : > { %19822 = vmatprep.subr.bf16.mxu0 %v22747_v2 }
 0xa28   : > { %19823 = vmatpush3.bf16.msra.mxu0 %v20910_v22 }
 0xa29   : > { %19824 = vmatprep.subr.bf16.mxu0 %v22747_v2 }
 0xa2c   : > { %19825 = vmatpush3.bf16.msra.mxu0 %v20912_v24  ;;  %v20935_v24 = vld [vmem:[#allocation3 + $0xd8] sm:$0xff]  }
 0xa2d   : > { %19826 = vmatprep.subr.bf16.mxu0 %v22747_v2 }
 0xa30   : > { %19827 = vmatpush3.bf16.msra.mxu0 %v20914_v25 }
 0xad3   : > { %v3582_v28 = vpop.f32.mrf.mxu0 }
 0xad4   : > { %v3648_v37 = vadd.f32 %v3647_v12, %v3582_v28  ;;  %v20927_v12 = vld [vmem:[#allocation3 + $0x138] sm:$0xff]   ;;  %v20936_v28 = vld [vmem:[#allocation3 + $0xd0] sm:$0xff]  }
 0xad5   : > { %v19782_v30 = vpop.f32.mrf.mxu0 }
 0xad7   : > { %v3585_v33 = vpop.f32.mrf.mxu0 }
 0xad8   : > { %v3651_v32 = vadd.f32 %v3650_v0, %v3585_v33  ;;  %v20929_v0 = vld [vmem:[#allocation3 + $0x128] sm:$0xff]  }
 0xad9   : > { %v19783_v35 = vpop.f32.mrf.mxu0 }
 0xae3   : > { %v3724_v36 = vpop.f32.mrf.mxu0 }
 0xae4   : > { %v3733_v39 = vrot.slane %v3724_v36, %v23231_v27  ;;  %v20937_v36 = vld [vmem:[#allocation3 + $0xc8] sm:$0xff]  }
 0xae5   : > { %v19806_v41 = vpop.f32.mrf.mxu0 }
 0xae6   : > { %v3734_v42 = vadd.f32 %v3733_v39, %v3648_v37  ;;  %v3735_v31 = vadd.f32 %v3733_v39, %v3651_v32  ;;  %v20938_v39 = vld [vmem:[#allocation3 + $0xc0] sm:$0xff]  }
 0xae7   : > { %v3727_v43 = vpop.f32.mrf.mxu0 }
 0xae8   : > { %v3744_v44 = vadd.f32 %v17333_v40, %v3734_v42  ;;  %v3745_v46 = vadd.f32 %v17333_v40, %v3735_v31  ;;  %v20939_v42 = vld [vmem:[#allocation3 + $0xb8] sm:$0xff]  }
 0xae9   : > { %v19807_v48 = vpop.f32.mrf.mxu0 }
 0xaea   : > { %v3746_v50 = vmax.f32 %v3744_v44, 0.0  ;;  %v3747_v51 = vmax.f32 %v3745_v46, 0.0 }
 0xaec   : > { %v23439_v53 = vpack.c.bf16 %v3747_v51, %v3746_v50  ;;  %v20940_v50 = vld [vmem:[#allocation3 + $0xb0] sm:$0xff]   ;;  %v20941_v51 = vld [vmem:[#allocation3 + $0xa8] sm:$0xff]  }
 0xaee   : > { %19817 = vmatmul.mubr.msk.bf16.vlgmr.msra.gmra.mxu1 %vm1209_vm4, %v23439_v53  ;;  %19829 = vmatmul.mubr.msk.bf16.vlgmr.msra.gmra.mxu0 %vm1209_vm4, %v23439_v53 }
 0xaef   : > { %19833 = vmatpush3.bf16.msra.mxu1 %v20915_v52  ;;  %19840 = vmatprep.mubr.msk.bf16.mxu1 %vm22748_vm0, %v22747_v2  ;;  %v20942_v52 = vld [vmem:[#allocation3 + $0xa0] sm:$0xff]  }
 0xaf0   : > { %19834 = vmatprep.subr.bf16.mxu1 %v22747_v2  ;;  %19850 = vmatprep.mubr.msk.bf16.mxu0 %vm1413_vm5, %v23249_v47  ;;  %v20921_v47 = vld [vmem:[#allocation3 + $0x68] sm:$0xff]  }
 0xaf3   : > { %19835 = vmatpush3.bf16.msra.mxu1 %v20916_v54  ;;  %v20948_v54 = vld [vmem:[#allocation3 + $0x1b8] sm:$0xff]  }
 0xaf4   : > { %19836 = vmatprep.subr.bf16.mxu1 %v22747_v2 }
 0xaf7   : > { %19837 = vmatpush3.bf16.msra.mxu1 %v20917_v55  ;;  %v20950_v55 = vld [vmem:[#allocation3 + $0x1b0] sm:$0xff]  }
 0xaf8   : > { %19838 = vmatprep.subr.bf16.mxu1 %v22747_v2 }
 0xafb   : > { %19839 = vmatpush3.bf16.msra.mxu1 %v20918_v45  ;;  %v20952_v45 = vld [vmem:[#allocation3 + $0x1a8] sm:$0xff]  }
 0xafc   : > { %19854 = vmatprep.subr.bf16.mxu1 %v22747_v2 }
 0xafe   : > { %19841 = vmatmul.mubr.msk.bf16.vlgmr.msra.gmra.mxu1 %vm1209_vm4, %v23439_v53 }
 0xaff   : > { %19855 = vmatpush3.bf16.msra.mxu1 %v20919_v56  ;;  %19862 = vmatprep.mubr.msk.bf16.mxu1 %vm22748_vm0, %v22747_v2  ;;  %v20954_v56 = vld [vmem:[#allocation3 + $0x1a0] sm:$0xff]  }
 0xb00   : > { %19856 = vmatprep.subr.bf16.mxu1 %v22747_v2 }
 0xb03   : > { %19857 = vmatpush3.bf16.msra.mxu1 %v20920_v57  ;;  %v20956_v57 = vld [vmem:[#allocation3 + $0x198] sm:$0xff]  }
 0xb04   : > { %19858 = vmatprep.subr.bf16.mxu1 %v22747_v2 }
 0xb07   : > { %19859 = vmatpush3.bf16.msra.mxu1 %v20921_v47  ;;  %v20958_v47 = vld [vmem:[#allocation3 + $0x190] sm:$0xff]  }
 0xb08   : > { %19860 = vmatprep.subr.bf16.mxu1 %v22747_v2 }
 0xb0b   : > { %19861 = vmatpush3.bf16.msra.mxu1 %v20922_v58 }
 0xb0c   : > { %19886 = vmatprep.subr.bf16.mxu1 %v22747_v2 }
 0xb0e   : > { %19863 = vmatmul.mubr.msk.bf16.vlgmr.msra.gmra.mxu1 %vm1209_vm4, %v23439_v53 }
 0xb0f   : > { %19887 = vmatpush3.bf16.msra.mxu1 %v20923_v59  ;;  %19894 = vmatprep.mubr.msk.bf16.mxu1 %vm22748_vm0, %v22747_v2 }
 0xb10   : > { %19888 = vmatprep.subr.bf16.mxu1 %v22747_v2 }
 0xb13   : > { %19889 = vmatpush3.bf16.msra.mxu1 %v20924_v60 }
 0xb14   : > { %19890 = vmatprep.subr.bf16.mxu1 %v22747_v2 }
 0xb17   : > { %19891 = vmatpush3.bf16.msra.mxu1 %v20925_v61 }
 0xb18   : > { %19892 = vmatprep.subr.bf16.mxu1 %v22747_v2 }
 0xb1b   : > { %19893 = vmatpush3.bf16.msra.mxu1 %v20926_v62 }
 0xb1c   : > { %19898 = vmatprep.subr.bf16.mxu1 %v22747_v2 }
 0xb1e   : > { %19895 = vmatmul.mubr.msk.bf16.vlgmr.msra.gmra.mxu1 %vm1209_vm4, %v23352_v15  ;;  %v20931_v15 = vld [vmem:[#allocation3 + $0x118] sm:$0xff]  }
 0xb1f   : > { %19914 = vmatprep.mubr.msk.bf16.mxu1 %vm22748_vm0, %v22747_v2  ;;  %19899 = vmatpush3.bf16.msra.mxu1 %v20927_v12 }
 0xb20   : > { %19900 = vmatprep.subr.bf16.mxu1 %v22747_v2 }
 0xb23   : > { %19901 = vmatpush3.bf16.msra.mxu1 %v20928_v63 }
 0xb24   : > { %19902 = vmatprep.subr.bf16.mxu1 %v22747_v2 }
 0xb27   : > { %19903 = vmatpush3.bf16.msra.mxu1 %v20929_v0  ;;  %v20943_v0 = vld [vmem:[#allocation3 + $0xf8] sm:$0xff]  }
 0xb28   : > { %19904 = vmatprep.subr.bf16.mxu1 %v22747_v2 }
 0xb2b   : > { %19905 = vmatpush3.bf16.msra.mxu1 %v20930_v49 }
 0xb2c   : > { %19906 = vmatprep.subr.bf16.mxu1 %v22747_v2 }
 0xb2f   : > { %19907 = vmatpush3.bf16.msra.mxu1 %v20931_v15  ;;  %v20944_v15 = vld [vmem:[#allocation3 + $0xf0] sm:$0xff]  }
 0xb30   : > { %19908 = vmatprep.subr.bf16.mxu1 %v22747_v2 }
 0xb33   : > { %19909 = vmatpush3.bf16.msra.mxu1 %v20932_v3 }
 0xb34   : > { %19910 = vmatprep.subr.bf16.mxu1 %v22747_v2 }
 0xb37   : > { %19911 = vmatpush3.bf16.msra.mxu1 %v20933_v4 }
 0xb38   : > { %19912 = vmatprep.subr.bf16.mxu1 %v22747_v2 }
 0xb3b   : > { %19913 = vmatpush3.bf16.msra.mxu1 %v20934_v5  ;;  %v20945_v5 = vld [vmem:[#allocation3 + $0xe8] sm:$0xff]  }
 0xb3c   : > { %19950 = vmatprep.subr.bf16.mxu1 %v22747_v2 }
 0xbae   : > { %v3818_v6 = vpop.f32.mrf.mxu1  ;;  %v3891_v7 = vpop.f32.mrf.mxu0 }
 0xbb0   : > { %v19818_v8 = vpop.f32.mrf.mxu1  ;;  %v19830_v9 = vpop.f32.mrf.mxu0 }
 0xbb1   : > { %v20946_v8 = vld [vmem:[#allocation3 + $0xe0] sm:$0xff]   ;;  %v20947_v9 = vld [vmem:[#allocation3 + $0x178] sm:$0xff]  }
 0xbb2   : > { %v3821_v10 = vpop.f32.mrf.mxu1  ;;  %v3894_v11 = vpop.f32.mrf.mxu0 }
 0xbb3   : > { %v3972_v21 = vpack.c.bf16 %v3894_v11, %v3891_v7  ;;  %v3971_v22 = vpack.c.bf16 %v3821_v10, %v3818_v6  ;;  %v20949_v10 = vld [vmem:[#allocation3 + $0x170] sm:$0xff]   ;;  %v20951_v11 = vld [vmem:[#allocation3 + $0x168] sm:$0xff]  }
 0xbb4   : > { %v19819_v13 = vpop.f32.mrf.mxu1  ;;  %v19831_v14 = vpop.f32.mrf.mxu0 }
 0xbb5   : > { %v20953_v13 = vld [vmem:[#allocation3 + $0x160] sm:$0xff]   ;;  %v20955_v14 = vld [vmem:[#allocation3 + $0x158] sm:$0xff]  }
 0xbbe   : > { %v3964_v29 = vpop.f32.mrf.mxu1 }
 0xbc0   : > { %v19842_v16 = vpop.f32.mrf.mxu1 }
 0xbc1   : > { %v20960_v16 = vld [vmem:[#allocation3 + $0x188] sm:$0xff]  }
 0xbc2   : > { %v3967_v17 = vpop.f32.mrf.mxu1 }
 0xbc3   : > { %v3973_v19 = vpack.c.bf16 %v3967_v17, %v3964_v29  ;;  %v20959_v29 = vld [vmem:[#allocation3 + $0x148] sm:$0xff]   ;;  %v20961_v17 = vld [vmem:[#allocation3 + $0x140] sm:$0xff]  }
 0xbc4   : > { %v19843_v20 = vpop.f32.mrf.mxu1 }
 0xbc5   : > { %19844 = vmatprep.subr.bf16.mxu0 %v3973_v19 }
 0xbc6   : > { %19845 = vmatpush3.bf16.msra.mxu0 %v3973_v19  ;;  %v20962_v19 = vld [vmem:[#allocation3 + $0x180] sm:$0xff]  }
 0xbc7   : > { %19846 = vmatprep.subr.bf16.mxu0 %v3972_v21 }
 0xbca   : > { %19847 = vmatpush3.bf16.msra.mxu0 %v3972_v21  ;;  %v17369_v21 = vld [vmem:[%s24868_s11] ss:$0 sm:$0xff] }
 0xbcb   : > { %19848 = vmatprep.subr.bf16.mxu0 %v3971_v22 }
 0xbce   : > { %19849 = vmatpush3.bf16.msra.mxu0 %v3971_v22  ;;  %v4092_v23 = vpop.f32.mrf.mxu1 }
 0xbcf   : > { %19866 = vmatprep.subr.bf16.mxu0 %v22747_v2 }
 0xbd0   : > { %v19864_v34 = vpop.f32.mrf.mxu1 }
 0xbd1   : > { %19851 = vmatmul.mubr.msk.bf16.vlgmr.msra.gmra.mxu0 %vm1413_vm5, %v23301_v18 }
 0xbd2   : > { %v4095_v25 = vpop.f32.mrf.mxu1  ;;  %19867 = vmatpush3.bf16.msra.mxu0 %v20935_v24  ;;  %19882 = vmatprep.mubr.msk.bf16.mxu0 %vm22748_vm0, %v22747_v2 }
 0xbd3   : > { %v4099_v30 = vmax.f32 %v4092_v23, %v4095_v25  ;;  %19868 = vmatprep.subr.bf16.mxu0 %v22747_v2 }
 0xbd4   : > { %v19865_v33 = vpop.f32.mrf.mxu1 }
 0xbd5   : > { %v4100_v35 = vrot.slane %v4099_v30, 4 }
 0xbd6   : > { %19869 = vmatpush3.bf16.msra.mxu0 %v20936_v28 }
 0xbd7   : > { %v4101_v37 = vmax.f32 %v4099_v30, %v4100_v35  ;;  %19870 = vmatprep.subr.bf16.mxu0 %v22747_v2  ;;  %v20963_v30 = vld [vmem:[#allocation3 + $0x1f8] sm:$0xff]   ;;  %v20964_v35 = vld [vmem:[#allocation3 + $0x1f0] sm:$0xff]  }
 0xbd9   : > { %v4102_v32 = vrot.slane %v4101_v37, 2 }
 0xbda   : > { %19871 = vmatpush3.bf16.msra.mxu0 %v20937_v36  ;;  %v22597_v36 = vld [vmem:[%s22985_s23] sm:$0xff]  }
 0xbdb   : > { %v4103_v18 = vmax.f32 %v4101_v37, %v4102_v32  ;;  %19872 = vmatprep.subr.bf16.mxu0 %v22747_v2  ;;  %v20965_v37 = vld [vmem:[#allocation3 + $0x1e8] sm:$0xff]  }
 0xbdd   : > { %v4104_v40 = vrot.slane %v4103_v18, 1 }
 0xbde   : > { %v23489_v41 = vpop.f32.mrf.mxu1  ;;  %19873 = vmatpush3.bf16.msra.mxu0 %v20938_v39 }
 0xbdf   : > { %v4105_v31 = vmax.f32 %v4103_v18, %v4104_v40  ;;  %19874 = vmatprep.subr.bf16.mxu0 %v22747_v2  ;;  %v20966_v18 = vld [vmem:[#allocation3 + $0x1e0] sm:$0xff]  }
 0xbe0   : > { %v19896_v43 = vpop.f32.mrf.mxu1 }
 0xbe1   : > { %v4316_v44 = vpack.c.bf16 %v4105_v31, %v4105_v31  ;;  %v20968_v31 = vld [vmem:[#allocation3 + $0x1d0] sm:$0xff]   ;;  %v20969_v43 = vld [vmem:[#allocation3 + $0x1c8] sm:$0xff]  }
 0xbe2   : > { %v4280_v46 = vpop.f32.mrf.mxu1  ;;  %19875 = vmatpush3.bf16.msra.mxu0 %v20939_v42  ;;  %v20967_v42 = vld [vmem:[#allocation3 + $0x1d8] sm:$0xff]  }
 0xbe3   : > { %19915 = vmatmul.mubr.bf16.vlgmr.msra.gmra.mxu1 %v4316_v44  ;;  %19876 = vmatprep.subr.bf16.mxu0 %v22747_v2  ;;  %v20970_v44 = vld [vmem:[#allocation3 + $0x1c0] sm:$0xff]   ;;  %v20983_v46 = vld [vmem:[#allocation3 + $0x298] sm:$0xff]  }
 0xbe4   : > { %v19897_v48 = vpop.f32.mrf.mxu1  ;;  %19966 = vmatprep.mubr.msk.bf16.mxu1 %vm22748_vm0, %v22747_v2  ;;  %19951 = vmatpush3.bf16.msra.mxu1 %v20948_v54  ;;  %v20988_v54 = vld [vmem:[#allocation3 + $0x270] sm:$0xff]  }
 0xbe5   : > { %19952 = vmatprep.subr.bf16.mxu1 %v22747_v2  ;;  %v20984_v48 = vld [vmem:[#allocation3 + $0x290] sm:$0xff]  }
 0xbe6   : > { %19877 = vmatpush3.bf16.msra.mxu0 %v20940_v50  ;;  %v20985_v50 = vld [vmem:[#allocation3 + $0x288] sm:$0xff]  }
 0xbe7   : > { %19878 = vmatprep.subr.bf16.mxu0 %v22747_v2 }
 0xbe8   : > { %19953 = vmatpush3.bf16.msra.mxu1 %v20950_v55 }
 0xbe9   : > { %19954 = vmatprep.subr.bf16.mxu1 %v22747_v2 }
 0xbea   : > { %19879 = vmatpush3.bf16.msra.mxu0 %v20941_v51  ;;  %v20986_v51 = vld [vmem:[#allocation3 + $0x280] sm:$0xff]  }
 0xbeb   : > { %19880 = vmatprep.subr.bf16.mxu0 %v22747_v2 }
 0xbec   : > { %19955 = vmatpush3.bf16.msra.mxu1 %v20952_v45 }
 0xbed   : > { %19956 = vmatprep.subr.bf16.mxu1 %v22747_v2 }
 0xbee   : > { %19881 = vmatpush3.bf16.msra.mxu0 %v20942_v52  ;;  %v20987_v52 = vld [vmem:[#allocation3 + $0x278] sm:$0xff]  }
 0xbef   : > { %19918 = vmatprep.subr.bf16.mxu0 %v22747_v2 }
 0xbf0   : > { %19957 = vmatpush3.bf16.msra.mxu1 %v20954_v56 }
 0xbf1   : > { %19958 = vmatprep.subr.bf16.mxu1 %v22747_v2 }
 0xbf4   : > { %19959 = vmatpush3.bf16.msra.mxu1 %v20956_v57 }
 0xbf5   : > { %19960 = vmatprep.subr.bf16.mxu1 %v22747_v2 }
 0xbf8   : > { %19961 = vmatpush3.bf16.msra.mxu1 %v20958_v47 }
 0xbf9   : > { %19962 = vmatprep.subr.bf16.mxu1 %v22747_v2 }
 0xbfc   : > { %19963 = vmatpush3.bf16.msra.mxu1 %v20960_v16 }
 0xbfd   : > { %19964 = vmatprep.subr.bf16.mxu1 %v22747_v2 }
 0xc00   : > { %19965 = vmatpush3.bf16.msra.mxu1 %v20962_v19 }
 0xc91   : > { %v19852_v58 = vpop.f32.mrf.mxu0 }
 0xc93   : > { %v4008_v59 = vpop.f32.mrf.mxu0 }
 0xc95   : > { %v19853_v60 = vpop.f32.mrf.mxu0 }
 0xc97   : > { %v4011_v61 = vpop.f32.mrf.mxu0 }
 0xc98   : > { %v4023_v62 = vmax.f32 %v4008_v59, %v4011_v61 }
 0xc9a   : > { %v4024_v12 = vmax.f32 %v4023_v62, %v19852_v58 }
 0xc9c   : > { %v4025_v63 = vmax.f32 %v4024_v12, %v19853_v60 }
 0xc9e   : > { %v4130_v49 = vpack.c.bf16 %v4025_v63, %v4025_v63 }
 0xca0   : > { %19883 = vmatmul.mubr.bf16.vlgmr.msra.gmra.mxu0 %v4130_v49 }
 0xca1   : > { %19919 = vmatpush3.bf16.msra.mxu0 %v20943_v0  ;;  %19926 = vmatprep.mubr.msk.bf16.mxu0 %vm22748_vm0, %v22747_v2 }
 0xca2   : > { %19920 = vmatprep.subr.bf16.mxu0 %v22747_v2 }
 0xca3   : > { %v23507_v3 = vpop.f32.mrf.mxu1 }
 0xca5   : > { %19921 = vmatpush3.bf16.msra.mxu0 %v20944_v15  ;;  %v19916_v4 = vpop.f32.mrf.mxu1 }
 0xca6   : > { %19922 = vmatprep.subr.bf16.mxu0 %v22747_v2  ;;  %v20971_v4 = vld [vmem:[#allocation3 + $0x238] sm:$0xff]  }
 0xca7   : > { %v4402_v6 = vpop.f32.mrf.mxu1 }
 0xca8   : > { %v20972_v6 = vld [vmem:[#allocation3 + $0x230] sm:$0xff]  }
 0xca9   : > { %19923 = vmatpush3.bf16.msra.mxu0 %v20945_v5  ;;  %v19917_v7 = vpop.f32.mrf.mxu1  ;;  %v22598_v5 = vld [vmem:[%s22985_s23 + $0x8] sm:$0xff]  }
 0xcaa   : > { %19924 = vmatprep.subr.bf16.mxu0 %v22747_v2  ;;  %v20973_v7 = vld [vmem:[#allocation3 + $0x228] sm:$0xff]  }
 0xcad   : > { %19925 = vmatpush3.bf16.msra.mxu0 %v20946_v8  ;;  %v20974_v8 = vld [vmem:[#allocation3 + $0x220] sm:$0xff]  }
 0xcae   : > { %19930 = vmatprep.subr.bf16.mxu0 %v22747_v2 }
 0xcb0   : > { %19927 = vmatmul.mubr.msk.bf16.vlgmr.msra.gmra.mxu0 %vm1209_vm4, %v23383_v38  ;;  %v20957_v38 = vld [vmem:[#allocation3 + $0x150] sm:$0xff]  }
 0xcb1   : > { %19931 = vmatpush3.bf16.msra.mxu0 %v20947_v9  ;;  %19946 = vmatprep.mubr.msk.bf16.mxu0 %vm22748_vm0, %v22747_v2  ;;  %v20975_v9 = vld [vmem:[#allocation3 + $0x218] sm:$0xff]  }
 0xcb2   : > { %19932 = vmatprep.subr.bf16.mxu0 %v22747_v2 }
 0xcb5   : > { %19933 = vmatpush3.bf16.msra.mxu0 %v20949_v10  ;;  %v20976_v10 = vld [vmem:[#allocation3 + $0x210] sm:$0xff]  }
 0xcb6   : > { %19934 = vmatprep.subr.bf16.mxu0 %v22747_v2 }
 0xcb9   : > { %19935 = vmatpush3.bf16.msra.mxu0 %v20951_v11 }
 0xcba   : > { %19936 = vmatprep.subr.bf16.mxu0 %v22747_v2 }
 0xcbd   : > { %19937 = vmatpush3.bf16.msra.mxu0 %v20953_v13  ;;  %v17383_v13 = vld [vmem:[%s24868_s11 + $0x1] sm:$0x1] }
 0xcbe   : > { %19938 = vmatprep.subr.bf16.mxu0 %v22747_v2 }
 0xcc1   : > { %19939 = vmatpush3.bf16.msra.mxu0 %v20955_v14  ;;  %v20977_v14 = vld [vmem:[#allocation3 + $0x208] sm:$0xff]  }
 0xcc2   : > { %19940 = vmatprep.subr.bf16.mxu0 %v22747_v2 }
 0xcc5   : > { %19941 = vmatpush3.bf16.msra.mxu0 %v20957_v38 }
 0xcc6   : > { %19942 = vmatprep.subr.bf16.mxu0 %v22747_v2 }
 0xcc9   : > { %19943 = vmatpush3.bf16.msra.mxu0 %v20959_v29  ;;  %v20978_v29 = vld [vmem:[#allocation3 + $0x200] sm:$0xff]  }
 0xcca   : > { %19944 = vmatprep.subr.bf16.mxu0 %v22747_v2 }
 0xccd   : > { %19945 = vmatpush3.bf16.msra.mxu0 %v20961_v17  ;;  %v20979_v17 = vld [vmem:[#allocation3 + $0x258] sm:$0xff]  }
 0xcce   : > { %19970 = vmatprep.subr.bf16.mxu0 %v22747_v2 }
 0xd60   : > { %v4213_v20 = vpop.f32.mrf.mxu0 }
 0xd61   : > { %v4278_v22 = vadd.f32 %v23489_v41, %v4213_v20  ;;  %v20981_v20 = vld [vmem:[#allocation3 + $0x248] sm:$0xff]  }
 0xd62   : > { %v19884_v23 = vpop.f32.mrf.mxu0 }
 0xd63   : > { %v4290_v24 = vadd.f32 %v17369_v21, %v4278_v22  ;;  %v20982_v21 = vld [vmem:[#allocation3 + $0x240] sm:$0xff]   ;;  %v20989_v22 = vld [vmem:[#allocation3 + $0x268] sm:$0xff]  }
 0xd64   : > { %v4216_v34 = vpop.f32.mrf.mxu0  ;;  %v20990_v23 = vld [vmem:[#allocation3 + $0x260] sm:$0xff]  }
 0xd65   : > { %v4291_v25 = vmax.f32 %v4290_v24, 0.0 }
 0xd66   : > { %v19885_v28 = vpop.f32.mrf.mxu0 }
 0xd67   : > { %v23527_v33 = vpack.c.bf16 %v4291_v25, %v4291_v25 }
 0xd69   : > { %19947 = vmatmul.mubr.bf16.vlgmr.msra.gmra.mxu0 %v23527_v33  ;;  %19967 = vmatmul.mubr.bf16.vlgmr.msra.gmra.mxu1 %v23527_v33 }
 0xd6a   : > { %19971 = vmatpush3.bf16.msra.mxu0 %v20963_v30  ;;  %19986 = vmatprep.mubr.msk.bf16.mxu0 %vm22748_vm0, %v22747_v2 }
 0xd6b   : > { %19972 = vmatprep.subr.bf16.mxu0 %v22747_v2  ;;  %19994 = vmatprep.mubr.msk.bf16.mxu1 %vm2102_vm6, %v22597_v36  ;;  %v20991_v36 = vld [vmem:[#allocation3 + $0x2d8] sm:$0xff]  }
 0xd6e   : > { %19973 = vmatpush3.bf16.msra.mxu0 %v20964_v35 }
 0xd6f   : > { %19974 = vmatprep.subr.bf16.mxu0 %v22747_v2 }
 0xd70   : > { %v23537_v32 = vpop.f32.mrf.mxu0 }
 0xd71   : > { %v4464_v11 = vadd.f32 %v23537_v32, %v23507_v3  ;;  %v20980_v3 = vld [vmem:[#allocation3 + $0x250] sm:$0xff]   ;;  %v20993_v32 = vld [vmem:[#allocation3 + $0x2c8] sm:$0xff]  }
 0xd72   : > { %v19928_v39 = vpop.f32.mrf.mxu0  ;;  %19975 = vmatpush3.bf16.msra.mxu0 %v20965_v37 }
 0xd73   : > { %19976 = vmatprep.subr.bf16.mxu0 %v22747_v2  ;;  %v4471_v38 = vadd.f32 %v17383_v13, %v4464_v11  ;;  %v20994_v39 = vld [vmem:[#allocation3 + $0x2c0] sm:$0xff]  }
 0xd74   : > { %v4466_v40 = vpop.f32.mrf.mxu0  ;;  %v21029_v11 = vld [vmem:[#allocation5 + $0x20] ss:$8 sps:$4 sm:$0xff]  }
 0xd75   : > { %v4472_v16 = vmax.f32 %v4471_v38, 0.0  ;;  %v20996_v40 = vld [vmem:[#allocation3 + $0x2b0] sm:$0xff]   ;;  %v21032_v13 = vld [vmem:[#allocation5 + $0xa0] ss:$8 sps:$4 sm:$0xff]  }
 0xd76   : > { %v19929_v41 = vpop.f32.mrf.mxu0  ;;  %19977 = vmatpush3.bf16.msra.mxu0 %v20966_v18  ;;  %v20995_v18 = vld [vmem:[#allocation3 + $0x2b8] sm:$0xff]  }
 0xd77   : > { %19978 = vmatprep.subr.bf16.mxu0 %v22747_v2  ;;  %v23571_v19 = vpack.c.bf16 %v4472_v16, %v4472_v16  ;;  %v21035_v38 = vld [vmem:[#allocation5 + $0x10] ss:$8 sps:$4 sm:$0xff]  }
 0xd78   : > { %v21038_v16 = vld [vmem:[#allocation5 + $0x90] ss:$8 sps:$4 sm:$0xff]  }
 0xd7a   : > { %19979 = vmatpush3.bf16.msra.mxu0 %v20967_v42  ;;  %v20997_v42 = vld [vmem:[#allocation3 + $0x2a8] sm:$0xff]  }
 0xd7b   : > { %19980 = vmatprep.subr.bf16.mxu0 %v22747_v2 }
 0xd7e   : > { %19981 = vmatpush3.bf16.msra.mxu0 %v20968_v31 }
 0xd7f   : > { %19982 = vmatprep.subr.bf16.mxu0 %v22747_v2 }
 0xd82   : > { %19983 = vmatpush3.bf16.msra.mxu0 %v20969_v43 }
 0xd83   : > { %19984 = vmatprep.subr.bf16.mxu0 %v22747_v2 }
 0xd86   : > { %19985 = vmatpush3.bf16.msra.mxu0 %v20970_v44  ;;  %v20998_v44 = vld [vmem:[#allocation3 + $0x2a0] sm:$0xff]  }
 0xd87   : > { %20018 = vmatprep.subr.bf16.mxu0 %v22747_v2 }
 0xd89   : > { %19987 = vmatmul.mubr.bf16.vlgmr.msra.gmra.mxu0 %v23527_v33 }
 0xd8a   : > { %20034 = vmatprep.mubr.msk.bf16.mxu0 %vm22748_vm0, %v22747_v2  ;;  %20019 = vmatpush3.bf16.msra.mxu0 %v20983_v46 }
 0xd8b   : > { %20020 = vmatprep.subr.bf16.mxu0 %v22747_v2 }
 0xd8e   : > { %20021 = vmatpush3.bf16.msra.mxu0 %v20984_v48 }
 0xd8f   : > { %20022 = vmatprep.subr.bf16.mxu0 %v22747_v2 }
 0xd92   : > { %20023 = vmatpush3.bf16.msra.mxu0 %v20985_v50 }
 0xd93   : > { %20024 = vmatprep.subr.bf16.mxu0 %v22747_v2 }
 0xd96   : > { %20025 = vmatpush3.bf16.msra.mxu0 %v20986_v51 }
 0xd97   : > { %20026 = vmatprep.subr.bf16.mxu0 %v22747_v2 }
 0xd9a   : > { %20027 = vmatpush3.bf16.msra.mxu0 %v20987_v52 }
 0xd9b   : > { %20028 = vmatprep.subr.bf16.mxu0 %v22747_v2 }
 0xd9e   : > { %20029 = vmatpush3.bf16.msra.mxu0 %v20988_v54 }
 0xd9f   : > { %20030 = vmatprep.subr.bf16.mxu0 %v22747_v2 }
 0xda2   : > { %20031 = vmatpush3.bf16.msra.mxu0 %v20989_v22  ;;  %v21049_v22 = vld [vmem:[#allocation5 + $0x174] ss:$8 sps:$4 sm:$0xff]  }
 0xda3   : > { %20032 = vmatprep.subr.bf16.mxu0 %v22747_v2 }
 0xda6   : > { %20033 = vmatpush3.bf16.msra.mxu0 %v20990_v23 }
 0xda7   : > { %20050 = vmatprep.subr.bf16.mxu0 %v22747_v2 }
 0xe29   : > { %v4573_v55 = vpop.f32.mrf.mxu0  ;;  %v4677_v45 = vpop.f32.mrf.mxu1 }
 0xe2a   : > { %v4787_v63 = vpack.c.bf16 %v4677_v45, %v4573_v55  ;;  %v20999_v55 = vld [vmem:[#allocation5 + $0x70] ss:$8 sps:$4 sm:$0xff]   ;;  %v21001_v45 = vld [vmem:[#allocation5 + $0x74] ss:$8 sps:$4 sm:$0xff]  }
 0xe2b   : > { %v19948_v56 = vpop.f32.mrf.mxu0  ;;  %v19968_v57 = vpop.f32.mrf.mxu1 }
 0xe2c   : > { %v21002_v56 = vld [vmem:[#allocation5 + $0xf0] ss:$8 sps:$4 sm:$0xff]   ;;  %v21004_v57 = vld [vmem:[#allocation5 + $0xf4] ss:$8 sps:$4 sm:$0xff]  }
 0xe2d   : > { %v4576_v47 = vpop.f32.mrf.mxu0  ;;  %v4680_v58 = vpop.f32.mrf.mxu1 }
 0xe2e   : > { %v21007_v47 = vld [vmem:[#allocation5 + $0x64] ss:$8 sps:$4 sm:$0xff]  }
 0xe2f   : > { %v19949_v59 = vpop.f32.mrf.mxu0  ;;  %v19969_v60 = vpop.f32.mrf.mxu1  ;;  %v21010_v58 = vld [vmem:[#allocation5 + $0xe4] ss:$8 sps:$4 sm:$0xff]  }
 0xe30   : > { %v21005_v59 = vld [vmem:[#allocation5 + $0x60] ss:$8 sps:$4 sm:$0xff]  }
 0xe31   : > { %v21008_v60 = vld [vmem:[#allocation5 + $0xe0] ss:$8 sps:$4 sm:$0xff]  }
 0xe49   : > { %v4781_v61 = vpop.f32.mrf.mxu0 }
 0xe4a   : > { %v4788_v62 = vpack.c.bf16 %v4781_v61, %v4781_v61  ;;  %v21013_v61 = vld [vmem:[#allocation5 + $0x54] ss:$8 sps:$4 sm:$0xff]  }
 0xe4b   : > { %v19988_v12 = vpop.f32.mrf.mxu0 }
 0xe4c   : > { %v4790_v0 = vsel %vm2109_vm7, %v4788_v62, 0  ;;  %20702 = vmatprep.subr.msk.bf16.mxu1 %vm2109_vm7, %v4788_v62  ;;  %v21016_v62 = vld [vmem:[#allocation5 + $0xd4] ss:$8 sps:$4 sm:$0xff]   ;;  %v21011_v12 = vld [vmem:[#allocation5 + $0x50] ss:$8 sps:$4 sm:$0xff]  }
 0xe4d   : > { %v4784_v49 = vpop.f32.mrf.mxu0  ;;  %19991 = vmatpush3.bf16.msra.mxu1 %v4790_v0  ;;  %v21019_v0 = vld [vmem:[#allocation5 + $0x44] ss:$8 sps:$4 sm:$0xff]  }
 0xe4e   : > { %19992 = vmatprep.subr.bf16.mxu1 %v4787_v63  ;;  %v21022_v49 = vld [vmem:[#allocation5 + $0xc4] ss:$8 sps:$4 sm:$0xff]  }
 0xe4f   : > { %v19989_v15 = vpop.f32.mrf.mxu0 }
 0xe50   : > { %v21017_v15 = vld [vmem:[#allocation5 + $0x40] ss:$8 sps:$4 sm:$0xff]  }
 0xe51   : > { %19993 = vmatpush3.bf16.msra.mxu1 %v4787_v63  ;;  %v21014_v63 = vld [vmem:[#allocation5 + $0xd0] ss:$8 sps:$4 sm:$0xff]  }
 0xe52   : > { %19998 = vmatprep.subr.bf16.mxu1 %v22747_v2 }
 0xe54   : > { %19995 = vmatmul.mubr.msk.bf16.vlgmr.msra.gmra.mxu1 %vm2102_vm6, %v22598_v5  ;;  %v21025_v5 = vld [vmem:[#allocation5 + $0x34] ss:$8 sps:$4 sm:$0xff]  }
 0xe55   : > { %19999 = vmatpush3.bf16.msra.mxu1 %v20971_v4  ;;  %20014 = vmatprep.mubr.msk.bf16.mxu1 %vm22748_vm0, %v22747_v2  ;;  %v21020_v4 = vld [vmem:[#allocation5 + $0xc0] ss:$8 sps:$4 sm:$0xff]  }
 0xe56   : > { %20000 = vmatprep.subr.bf16.mxu1 %v22747_v2 }
 0xe59   : > { %20001 = vmatpush3.bf16.msra.mxu1 %v20972_v6  ;;  %v21028_v6 = vld [vmem:[#allocation5 + $0xb4] ss:$8 sps:$4 sm:$0xff]  }
 0xe5a   : > { %20002 = vmatprep.subr.bf16.mxu1 %v22747_v2 }
 0xe5d   : > { %20003 = vmatpush3.bf16.msra.mxu1 %v20973_v7  ;;  %v21023_v7 = vld [vmem:[#allocation5 + $0x30] ss:$8 sps:$4 sm:$0xff]  }
 0xe5e   : > { %20004 = vmatprep.subr.bf16.mxu1 %v22747_v2 }
 0xe61   : > { %20005 = vmatpush3.bf16.msra.mxu1 %v20974_v8  ;;  %v21026_v8 = vld [vmem:[#allocation5 + $0xb0] ss:$8 sps:$4 sm:$0xff]  }
 0xe62   : > { %20006 = vmatprep.subr.bf16.mxu1 %v22747_v2 }
 0xe65   : > { %20007 = vmatpush3.bf16.msra.mxu1 %v20975_v9  ;;  %v21031_v9 = vld [vmem:[#allocation5 + $0x24] ss:$8 sps:$4 sm:$0xff]  }
 0xe66   : > { %20008 = vmatprep.subr.bf16.mxu1 %v22747_v2 }
 0xe69   : > { %20009 = vmatpush3.bf16.msra.mxu1 %v20976_v10  ;;  %v21034_v10 = vld [vmem:[#allocation5 + $0xa4] ss:$8 sps:$4 sm:$0xff]  }
 0xe6a   : > { %20010 = vmatprep.subr.bf16.mxu1 %v22747_v2 }
 0xe6d   : > { %20011 = vmatpush3.bf16.msra.mxu1 %v20977_v14  ;;  %v21037_v14 = vld [vmem:[#allocation5 + $0x14] ss:$8 sps:$4 sm:$0xff]  }
 0xe6e   : > { %20012 = vmatprep.subr.bf16.mxu1 %v22747_v2 }
 0xe71   : > { %20013 = vmatpush3.bf16.msra.mxu1 %v20978_v29  ;;  %v21040_v29 = vld [vmem:[#allocation5 + $0x94] ss:$8 sps:$4 sm:$0xff]  }
 0xe72   : > { %20038 = vmatprep.subr.bf16.mxu1 %v22747_v2 }
 0xe74   : > { %20015 = vmatmul.mubr.bf16.vlgmr.msra.gmra.mxu1 %v23571_v19 }
 0xe75   : > { %20039 = vmatpush3.bf16.msra.mxu1 %v20979_v17  ;;  %20046 = vmatprep.mubr.msk.bf16.mxu1 %vm22748_vm0, %v22747_v2  ;;  %v21043_v17 = vld [vmem:[#allocation5 + $0x4] ss:$8 sps:$4 sm:$0xff]  }
 0xe76   : > { %20040 = vmatprep.subr.bf16.mxu1 %v22747_v2 }
 0xe79   : > { %20041 = vmatpush3.bf16.msra.mxu1 %v20980_v3  ;;  %v21041_v3 = vld [vmem:[#allocation5] ss:$8 sps:$4 sm:$0xff]  }
 0xe7a   : > { %20042 = vmatprep.subr.bf16.mxu1 %v22747_v2 }
 0xe7d   : > { %20043 = vmatpush3.bf16.msra.mxu1 %v20981_v20  ;;  %v21046_v20 = vld [vmem:[#allocation5 + $0x84] ss:$8 sps:$4 sm:$0xff]  }
 0xe7e   : > { %20044 = vmatprep.subr.bf16.mxu1 %v22747_v2 }
 0xe81   : > { %20045 = vmatpush3.bf16.msra.mxu1 %v20982_v21  ;;  %v21044_v21 = vld [vmem:[#allocation5 + $0x80] ss:$8 sps:$4 sm:$0xff]  }
 0xe82   : > { %5346 = vmatprep.subr.bf16.mxu1 %v21001_v45  ;;  %v21061_v45 = vld [vmem:[#allocation5 + $0x134] ss:$8 sps:$4 sm:$0xff]  }
 0xe84   : > { %20047 = vmatmul.mubr.msk.bf16.vlgmr.msra.gmra.mxu1 %vm1209_vm4, %v23439_v53  ;;  %v20992_v53 = vld [vmem:[#allocation3 + $0x2d0] sm:$0xff]  }
 0xe85   : > { %5378 = vmatprep.mubr.bf16.mxu1 %v22746_v1  ;;  %5347 = vmatpush1.bf16.msra.mxu1 %v20999_v55  ;;  %v21056_v55 = vld [vmem:[#allocation5 + $0x140] ss:$8 sps:$4 sm:$0xff]  }
 0xe86   : > { %5348 = vmatprep.subr.bf16.mxu1 %v21007_v47  ;;  %v21062_v47 = vld [vmem:[#allocation5 + $0x120] ss:$8 sps:$4 sm:$0xff]  }
 0xe89   : > { %5349 = vmatpush1.bf16.msra.mxu1 %v21005_v59  ;;  %v21065_v59 = vld [vmem:[#allocation5 + $0x110] ss:$8 sps:$4 sm:$0xff]  }
 0xe8a   : > { %5350 = vmatprep.subr.bf16.mxu1 %v21013_v61  ;;  %v21068_v61 = vld [vmem:[#allocation5 + $0x100] ss:$8 sps:$4 sm:$0xff]  }
 0xe8d   : > { %5351 = vmatpush1.bf16.msra.mxu1 %v21011_v12  ;;  %v21071_v12 = vld [vmem:[#allocation5 + $0x1f0] ss:$8 sps:$4 sm:$0xff]  }
 0xe8e   : > { %5352 = vmatprep.subr.bf16.mxu1 %v21019_v0  ;;  %v21074_v0 = vld [vmem:[#allocation5 + $0x1e0] ss:$8 sps:$4 sm:$0xff]  }
 0xe91   : > { %5353 = vmatpush1.bf16.msra.mxu1 %v21017_v15  ;;  %v21077_v15 = vld [vmem:[#allocation5 + $0x1d0] ss:$8 sps:$4 sm:$0xff]  }
 0xe92   : > { %5354 = vmatprep.subr.bf16.mxu1 %v21025_v5  ;;  %v21080_v5 = vld [vmem:[#allocation5 + $0x1c0] ss:$8 sps:$4 sm:$0xff]  }
 0xe95   : > { %5355 = vmatpush1.bf16.msra.mxu1 %v21023_v7  ;;  %v21083_v7 = vld [vmem:[#allocation5 + $0x1b0] ss:$8 sps:$4 sm:$0xff]  }
 0xe96   : > { %5356 = vmatprep.subr.bf16.mxu1 %v21031_v9  ;;  %v21086_v9 = vld [vmem:[#allocation5 + $0x1a0] ss:$8 sps:$4 sm:$0xff]  }
 0xe99   : > { %5357 = vmatpush1.bf16.msra.mxu1 %v21029_v11  ;;  %v21089_v11 = vld [vmem:[#allocation5 + $0x190] ss:$8 sps:$4 sm:$0xff]  }
 0xe9a   : > { %5358 = vmatprep.subr.bf16.mxu1 %v21037_v14  ;;  %v21092_v14 = vld [vmem:[#allocation5 + $0x180] ss:$8 sps:$4 sm:$0xff]  }
 0xe9d   : > { %5359 = vmatpush1.bf16.msra.mxu1 %v21035_v38  ;;  %v21097_v38 = vld [vmem:[#allocation5 + $0x274] ss:$8 sps:$4 sm:$0xff]  }
 0xe9e   : > { %5360 = vmatprep.subr.bf16.mxu1 %v21043_v17  ;;  %v21098_v17 = vld [vmem:[#allocation5 + $0x260] ss:$8 sps:$4 sm:$0xff]  }
 0xea1   : > { %5361 = vmatpush1.bf16.msra.mxu1 %v21041_v3  ;;  %v21103_v3 = vld [vmem:[#allocation5 + $0x254] ss:$8 sps:$4 sm:$0xff]  }
 0xea2   : > { %5624 = vmatprep.subr.bf16.mxu1 %v21049_v22  ;;  %v21104_v22 = vld [vmem:[#allocation5 + $0x240] ss:$8 sps:$4 sm:$0xff]  }
 0xf14   : > { %v19996_v24 = vpop.f32.mrf.mxu1 }
 0xf16   : > { %v4826_v34 = vpop.f32.mrf.mxu1 }
 0xf17   : > { %v4841_v30 = vmax.f32 %v4826_v34, %v19996_v24 }
 0xf18   : > { %v19997_v25 = vpop.f32.mrf.mxu1 }
 0xf1a   : > { %v4829_v28 = vpop.f32.mrf.mxu1 }
 0xf1b   : > { %v4842_v35 = vmax.f32 %v4829_v28, %v19997_v25 }
 0xf1d   : > { %v4971_v37 = vpack.c.bf16 %v4842_v35, %v4841_v30 }
 0xf1f   : > { %20035 = vmatmul.mubr.bf16.vlgmr.msra.gmra.mxu0 %v4971_v37  ;;  %v17440_v37 = vld [vmem:[%s24868_s11 + $0x2] ss:$0 sm:$0xff] }
 0xf20   : > { %20051 = vmatpush3.bf16.msra.mxu0 %v20991_v36  ;;  %20066 = vmatprep.mubr.msk.bf16.mxu0 %vm22748_vm0, %v22747_v2 }
 0xf21   : > { %20052 = vmatprep.subr.bf16.mxu0 %v22747_v2 }
 0xf24   : > { %20053 = vmatpush3.bf16.msra.mxu0 %v20992_v53 }
 0xf25   : > { %20054 = vmatprep.subr.bf16.mxu0 %v22747_v2 }
 0xf28   : > { %20055 = vmatpush3.bf16.msra.mxu0 %v20993_v32 }
 0xf29   : > { %20056 = vmatprep.subr.bf16.mxu0 %v22747_v2 }
 0xf2c   : > { %20057 = vmatpush3.bf16.msra.mxu0 %v20994_v39 }
 0xf2d   : > { %20058 = vmatprep.subr.bf16.mxu0 %v22747_v2 }
 0xf30   : > { %20059 = vmatpush3.bf16.msra.mxu0 %v20995_v18 }
 0xf31   : > { %20060 = vmatprep.subr.bf16.mxu0 %v22747_v2 }
 0xf34   : > { %20061 = vmatpush3.bf16.msra.mxu0 %v20996_v40  ;;  %v4941_v41 = vpop.f32.mrf.mxu1 }
 0xf35   : > { %20062 = vmatprep.subr.bf16.mxu0 %v22747_v2  ;;  %v5142_v48 = vpack.c.bf16 %v4941_v41, %v4941_v41 }
 0xf36   : > { %v20016_v31 = vpop.f32.mrf.mxu1 }
 0xf38   : > { %20063 = vmatpush3.bf16.msra.mxu0 %v20997_v42  ;;  %v4944_v43 = vpop.f32.mrf.mxu1 }
 0xf39   : > { %20064 = vmatprep.subr.bf16.mxu0 %v22747_v2 }
 0xf3a   : > { %v20017_v46 = vpop.f32.mrf.mxu1 }
 0xf3c   : > { %20065 = vmatpush3.bf16.msra.mxu0 %v20998_v44  ;;  %v21047_v44 = vld [vmem:[#allocation5 + $0x170] ss:$8 sps:$4 sm:$0xff]  }
 0xf3d   : > { %5485 = vmatprep.subr.bf16.mxu0 %v21004_v57  ;;  %v21064_v57 = vld [vmem:[#allocation5 + $0x124] ss:$8 sps:$4 sm:$0xff]  }
 0xf3f   : > { %20067 = vmatmul.mubr.bf16.vlgmr.msra.gmra.mxu0 %v5142_v48  ;;  %v21052_v48 = vld [vmem:[#allocation5 + $0x164] ss:$8 sps:$4 sm:$0xff]  }
 0xf40   : > { %5517 = vmatprep.mubr.bf16.mxu0 %v22746_v1  ;;  %5486 = vmatpush1.bf16.msra.mxu0 %v21002_v56  ;;  %v21059_v56 = vld [vmem:[#allocation5 + $0x130] ss:$8 sps:$4 sm:$0xff]  }
 0xf41   : > { %5487 = vmatprep.subr.bf16.mxu0 %v21010_v58  ;;  %v21067_v58 = vld [vmem:[#allocation5 + $0x114] ss:$8 sps:$4 sm:$0xff]  }
 0xf44   : > { %v23595_v50 = vpop.f32.mrf.mxu1  ;;  %5488 = vmatpush1.bf16.msra.mxu0 %v21008_v60  ;;  %v21070_v60 = vld [vmem:[#allocation5 + $0x104] ss:$8 sps:$4 sm:$0xff]  }
 0xf45   : > { %5489 = vmatprep.subr.bf16.mxu0 %v21016_v62  ;;  %v21073_v62 = vld [vmem:[#allocation5 + $0x1f4] ss:$8 sps:$4 sm:$0xff]  }
 0xf46   : > { %v20048_v51 = vpop.f32.mrf.mxu1 }
 0xf47   : > { %v21055_v51 = vld [vmem:[#allocation5 + $0x154] ss:$8 sps:$4 sm:$0xff]  }
 0xf48   : > { %v23597_v52 = vpop.f32.mrf.mxu1  ;;  %5490 = vmatpush1.bf16.msra.mxu0 %v21014_v63  ;;  %v21076_v63 = vld [vmem:[#allocation5 + $0x1e4] ss:$8 sps:$4 sm:$0xff]  }
 0xf49   : > { %5491 = vmatprep.subr.bf16.mxu0 %v21022_v49  ;;  %v21079_v49 = vld [vmem:[#allocation5 + $0x1d4] ss:$8 sps:$4 sm:$0xff]  }
 0xf4a   : > { %v20049_v54 = vpop.f32.mrf.mxu1 }
 0xf4b   : > { %v21058_v54 = vld [vmem:[#allocation5 + $0x144] ss:$8 sps:$4 sm:$0xff]  }
 0xf4c   : > { %5492 = vmatpush1.bf16.msra.mxu0 %v21020_v4  ;;  %v21082_v4 = vld [vmem:[#allocation5 + $0x1c4] ss:$8 sps:$4 sm:$0xff]  }
 0xf4d   : > { %5493 = vmatprep.subr.bf16.mxu0 %v21028_v6  ;;  %v21085_v6 = vld [vmem:[#allocation5 + $0x1b4] ss:$8 sps:$4 sm:$0xff]  }
 0xf50   : > { %5494 = vmatpush1.bf16.msra.mxu0 %v21026_v8  ;;  %v21088_v8 = vld [vmem:[#allocation5 + $0x1a4] ss:$8 sps:$4 sm:$0xff]  }
 0xf51   : > { %5495 = vmatprep.subr.bf16.mxu0 %v21034_v10  ;;  %v21091_v10 = vld [vmem:[#allocation5 + $0x194] ss:$8 sps:$4 sm:$0xff]  }
 0xf54   : > { %5496 = vmatpush1.bf16.msra.mxu0 %v21032_v13  ;;  %v21094_v13 = vld [vmem:[#allocation5 + $0x184] ss:$8 sps:$4 sm:$0xff]  }
 0xf55   : > { %5497 = vmatprep.subr.bf16.mxu0 %v21040_v29  ;;  %v21095_v29 = vld [vmem:[#allocation5 + $0x270] ss:$8 sps:$4 sm:$0xff]  }
 0xf58   : > { %5498 = vmatpush1.bf16.msra.mxu0 %v21038_v16  ;;  %v21100_v16 = vld [vmem:[#allocation5 + $0x264] ss:$8 sps:$4 sm:$0xff]  }
 0xf59   : > { %5499 = vmatprep.subr.bf16.mxu0 %v21046_v20  ;;  %v21101_v20 = vld [vmem:[#allocation5 + $0x250] ss:$8 sps:$4 sm:$0xff]  }
 0xf5c   : > { %5500 = vmatpush1.bf16.msra.mxu0 %v21044_v21  ;;  %v21106_v21 = vld [vmem:[#allocation5 + $0x244] ss:$8 sps:$4 sm:$0xff]  }
 0xfdf   : > { %v5054_v23 = vpop.f32.mrf.mxu0 }
 0xfe0   : > { %v5120_v30 = vadd.f32 %v23595_v50, %v5054_v23  ;;  %v21050_v50 = vld [vmem:[#allocation5 + $0x160] ss:$8 sps:$4 sm:$0xff]   ;;  %v21109_v23 = vld [vmem:[#allocation5 + $0x234] ss:$8 sps:$4 sm:$0xff]  }
 0xfe1   : > { %v20036_v24 = vpop.f32.mrf.mxu0 }
 0xfe2   : > { %v21107_v24 = vld [vmem:[#allocation5 + $0x230] ss:$8 sps:$4 sm:$0xff]  }
 0xfe3   : > { %v5057_v34 = vpop.f32.mrf.mxu0 }
 0xfe4   : > { %v5123_v35 = vadd.f32 %v23597_v52, %v5057_v34  ;;  %v21053_v52 = vld [vmem:[#allocation5 + $0x150] ss:$8 sps:$4 sm:$0xff]   ;;  %v21112_v34 = vld [vmem:[#allocation5 + $0x224] ss:$8 sps:$4 sm:$0xff]  }
 0xfe5   : > { %v20037_v25 = vpop.f32.mrf.mxu0 }
 0xfe6   : > { %v21110_v25 = vld [vmem:[#allocation5 + $0x220] ss:$8 sps:$4 sm:$0xff]  }
 0xfff   : > { %v5225_v28 = vpop.f32.mrf.mxu0 }
0x1000   : > { %v5234_v36 = vrot.slane %v5225_v28, %v23231_v27  ;;  %v21115_v28 = vld [vmem:[#allocation5 + $0x214] ss:$8 sps:$4 sm:$0xff]  }
0x1001   : > { %v20068_v53 = vpop.f32.mrf.mxu0 }
0x1002   : > { %v5235_v32 = vadd.f32 %v5234_v36, %v5120_v30  ;;  %v5236_v39 = vadd.f32 %v5234_v36, %v5123_v35  ;;  %v21113_v30 = vld [vmem:[#allocation5 + $0x210] ss:$8 sps:$4 sm:$0xff]   ;;  %v21118_v35 = vld [vmem:[#allocation5 + $0x204] ss:$8 sps:$4 sm:$0xff]   ;;  %v21116_v36 = vld [vmem:[#allocation5 + $0x200] ss:$8 sps:$4 sm:$0xff]  }
0x1003   : > { %v5228_v18 = vpop.f32.mrf.mxu0  ;;  %v21119_v53 = vld [vmem:[#allocation5 + $0x470] ss:$8 sps:$4 sm:$0xff]  }
0x1004   : > { %v5245_v40 = vadd.f32 %v17440_v37, %v5235_v32  ;;  %v5246_v41 = vadd.f32 %v17440_v37, %v5236_v39  ;;  %v21121_v37 = vld [vmem:[#allocation5 + $0x474] ss:$8 sps:$4 sm:$0xff]   ;;  %v21124_v32 = vld [vmem:[#allocation5 + $0x464] ss:$8 sps:$4 sm:$0xff]   ;;  %v21122_v39 = vld [vmem:[#allocation5 + $0x460] ss:$8 sps:$4 sm:$0xff]  }
0x1005   : > { %v20069_v42 = vpop.f32.mrf.mxu0  ;;  %v21127_v18 = vld [vmem:[#allocation5 + $0x454] ss:$8 sps:$4 sm:$0xff]  }
0x1006   : > { %v5247_v31 = vmax.f32 %v5245_v40, 0.0  ;;  %v5248_v43 = vmax.f32 %v5246_v41, 0.0  ;;  %v21125_v40 = vld [vmem:[#allocation5 + $0x450] ss:$8 sps:$4 sm:$0xff]   ;;  %v21130_v41 = vld [vmem:[#allocation5 + $0x444] ss:$8 sps:$4 sm:$0xff]  }
0x1007   : > { %v21128_v42 = vld [vmem:[#allocation5 + $0x440] ss:$8 sps:$4 sm:$0xff]  }
0x1008   : > { %v23603_v46 = vpack.c.bf16 %v5248_v43, %v5247_v31  ;;  %v21133_v31 = vld [vmem:[#allocation5 + $0x434] ss:$8 sps:$4 sm:$0xff]   ;;  %v21131_v43 = vld [vmem:[#allocation5 + $0x430] ss:$8 sps:$4 sm:$0xff]  }
0x100a   : > { %5379 = vmatmul.mubr.bf16.vlgmr.msra.gmra.mxu1 %v23603_v46  ;;  %5518 = vmatmul.mubr.bf16.vlgmr.msra.gmra.mxu0 %v23603_v46 }
0x100b   : > { %5625 = vmatpush1.bf16.msra.mxu1 %v21047_v44  ;;  %5656 = vmatprep.mubr.bf16.mxu1 %v22746_v1  ;;  %v21136_v44 = vld [vmem:[#allocation5 + $0x424] ss:$8 sps:$4 sm:$0xff]  }
0x100c   : > { %5626 = vmatprep.subr.bf16.mxu1 %v21052_v48  ;;  %5705 = vmatprep.mubr.bf16.mxu0 %v22746_v1  ;;  %v21134_v48 = vld [vmem:[#allocation5 + $0x420] ss:$8 sps:$4 sm:$0xff]  }
0x100f   : > { %5627 = vmatpush1.bf16.msra.mxu1 %v21050_v50  ;;  %v21137_v50 = vld [vmem:[#allocation5 + $0x410] ss:$8 sps:$4 sm:$0xff]  }
0x1010   : > { %5628 = vmatprep.subr.bf16.mxu1 %v21055_v51  ;;  %v21142_v51 = vld [vmem:[#allocation5 + $0x404] ss:$8 sps:$4 sm:$0xff]  }
0x1013   : > { %5629 = vmatpush1.bf16.msra.mxu1 %v21053_v52  ;;  %v21140_v52 = vld [vmem:[#allocation5 + $0x400] ss:$8 sps:$4 sm:$0xff]  }
0x1014   : > { %5630 = vmatprep.subr.bf16.mxu1 %v21058_v54  ;;  %v21145_v54 = vld [vmem:[#allocation5 + $0x4f4] ss:$8 sps:$4 sm:$0xff]  }
0x1017   : > { %5631 = vmatpush1.bf16.msra.mxu1 %v21056_v55  ;;  %v21143_v55 = vld [vmem:[#allocation5 + $0x4f0] ss:$8 sps:$4 sm:$0xff]  }
0x1018   : > { %5632 = vmatprep.subr.bf16.mxu1 %v21061_v45  ;;  %v21148_v45 = vld [vmem:[#allocation5 + $0x4e4] ss:$8 sps:$4 sm:$0xff]  }
0x101b   : > { %5633 = vmatpush1.bf16.msra.mxu1 %v21059_v56  ;;  %v21146_v56 = vld [vmem:[#allocation5 + $0x4e0] ss:$8 sps:$4 sm:$0xff]  }
0x101c   : > { %5634 = vmatprep.subr.bf16.mxu1 %v21064_v57  ;;  %v21151_v57 = vld [vmem:[#allocation5 + $0x4d4] ss:$8 sps:$4 sm:$0xff]  }
0x101f   : > { %5635 = vmatpush1.bf16.msra.mxu1 %v21062_v47  ;;  %v21149_v47 = vld [vmem:[#allocation5 + $0x4d0] ss:$8 sps:$4 sm:$0xff]  }
0x1020   : > { %5636 = vmatprep.subr.bf16.mxu1 %v21067_v58  ;;  %v21154_v58 = vld [vmem:[#allocation5 + $0x4c4] ss:$8 sps:$4 sm:$0xff]  }
0x1023   : > { %5637 = vmatpush1.bf16.msra.mxu1 %v21065_v59  ;;  %v21152_v59 = vld [vmem:[#allocation5 + $0x4c0] ss:$8 sps:$4 sm:$0xff]  }
0x1024   : > { %5638 = vmatprep.subr.bf16.mxu1 %v21070_v60  ;;  %v21157_v60 = vld [vmem:[#allocation5 + $0x4b4] ss:$8 sps:$4 sm:$0xff]  }
0x1027   : > { %5639 = vmatpush1.bf16.msra.mxu1 %v21068_v61  ;;  %v21155_v61 = vld [vmem:[#allocation5 + $0x4b0] ss:$8 sps:$4 sm:$0xff]  }
0x1028   : > { %5828 = vmatprep.subr.bf16.mxu1 %v21073_v62  ;;  %v21160_v62 = vld [vmem:[#allocation5 + $0x4a4] ss:$8 sps:$4 sm:$0xff]  }
0x102a   : > { %5657 = vmatmul.mubr.bf16.vlgmr.msra.gmra.mxu1 %v23603_v46 }
0x102b   : > { %5829 = vmatpush1.bf16.msra.mxu1 %v21071_v12  ;;  %5860 = vmatprep.mubr.bf16.mxu1 %v22746_v1  ;;  %v21158_v12 = vld [vmem:[#allocation5 + $0x4a0] ss:$8 sps:$4 sm:$0xff]  }
0x102c   : > { %5830 = vmatprep.subr.bf16.mxu1 %v21076_v63  ;;  %v21163_v63 = vld [vmem:[#allocation5 + $0x494] ss:$8 sps:$4 sm:$0xff]  }
0x102f   : > { %5831 = vmatpush1.bf16.msra.mxu1 %v21074_v0  ;;  %v21161_v0 = vld [vmem:[#allocation5 + $0x490] ss:$8 sps:$4 sm:$0xff]  }
0x1030   : > { %5832 = vmatprep.subr.bf16.mxu1 %v21079_v49  ;;  %v21166_v49 = vld [vmem:[#allocation5 + $0x484] ss:$8 sps:$4 sm:$0xff]  }
0x1033   : > { %5833 = vmatpush1.bf16.msra.mxu1 %v21077_v15  ;;  %v21164_v15 = vld [vmem:[#allocation5 + $0x480] ss:$8 sps:$4 sm:$0xff]  }
0x1034   : > { %5834 = vmatprep.subr.bf16.mxu1 %v21082_v4 }
0x1037   : > { %5835 = vmatpush1.bf16.msra.mxu1 %v21080_v5 }
0x1038   : > { %5836 = vmatprep.subr.bf16.mxu1 %v21085_v6 }
0x103b   : > { %5837 = vmatpush1.bf16.msra.mxu1 %v21083_v7 }
0x103c   : > { %5838 = vmatprep.subr.bf16.mxu1 %v21088_v8 }
0x103f   : > { %5839 = vmatpush1.bf16.msra.mxu1 %v21086_v9 }
0x1040   : > { %5840 = vmatprep.subr.bf16.mxu1 %v21091_v10 }
0x1043   : > { %5841 = vmatpush1.bf16.msra.mxu1 %v21089_v11 }
0x1044   : > { %5842 = vmatprep.subr.bf16.mxu1 %v21094_v13 }
0x1047   : > { %5843 = vmatpush1.bf16.msra.mxu1 %v21092_v14 }
0x1048   : > { %6216 = vmatprep.subr.bf16.mxu1 %v21097_v38 }
0x104a   : > { %5861 = vmatmul.mubr.bf16.vlgmr.msra.gmra.mxu1 %v23603_v46 }
0x104b   : > { %6217 = vmatpush1.bf16.msra.mxu1 %v21095_v29  ;;  %6248 = vmatprep.mubr.bf16.mxu1 %v22746_v1 }
0x104c   : > { %6218 = vmatprep.subr.bf16.mxu1 %v21100_v16 }
0x104f   : > { %6219 = vmatpush1.bf16.msra.mxu1 %v21098_v17 }
0x1050   : > { %6220 = vmatprep.subr.bf16.mxu1 %v21103_v3 }
0x1053   : > { %6221 = vmatpush1.bf16.msra.mxu1 %v21101_v20 }
0x1054   : > { %6222 = vmatprep.subr.bf16.mxu1 %v21106_v21 }
0x1057   : > { %6223 = vmatpush1.bf16.msra.mxu1 %v21104_v22  ;;  %v21169_v22 = vld [vmem:[#allocation5 + $0x2f4] ss:$8 sps:$4 sm:$0xff]  }
0x1058   : > { %6224 = vmatprep.subr.bf16.mxu1 %v21109_v23 }
0x105b   : > { %6225 = vmatpush1.bf16.msra.mxu1 %v21107_v24  ;;  %v21167_v24 = vld [vmem:[#allocation5 + $0x2f0] ss:$8 sps:$4 sm:$0xff]  }
0x105c   : > { %6226 = vmatprep.subr.bf16.mxu1 %v21112_v34  ;;  %v21172_v34 = vld [vmem:[#allocation5 + $0x2e4] ss:$8 sps:$4 sm:$0xff]  }
0x105f   : > { %6227 = vmatpush1.bf16.msra.mxu1 %v21110_v25  ;;  %v22599_v25 = vld [vmem:[%s22981_s18] sm:$0xff]  }
0x1060   : > { %6228 = vmatprep.subr.bf16.mxu1 %v21115_v28  ;;  %v21170_v28 = vld [vmem:[#allocation5 + $0x2e0] ss:$8 sps:$4 sm:$0xff]  }
0x1063   : > { %6229 = vmatpush1.bf16.msra.mxu1 %v21113_v30  ;;  %v21175_v30 = vld [vmem:[#allocation5 + $0x2d4] ss:$8 sps:$4 sm:$0xff]  }
0x1064   : > { %6230 = vmatprep.subr.bf16.mxu1 %v21118_v35  ;;  %v21173_v35 = vld [vmem:[#allocation5 + $0x2d0] ss:$8 sps:$4 sm:$0xff]  }
0x1067   : > { %6231 = vmatpush1.bf16.msra.mxu1 %v21116_v36  ;;  %v21178_v36 = vld [vmem:[#allocation5 + $0x2c4] ss:$8 sps:$4 sm:$0xff]  }
0x1068   : > { %6483 = vmatprep.subr.bf16.mxu1 %v21121_v37  ;;  %v22600_v37 = vld [vmem:[%s22981_s18 + $0x8] sm:$0xff]  }
0x106a   : > { %6249 = vmatmul.mubr.bf16.vlgmr.msra.gmra.mxu1 %v23527_v33  ;;  %v21139_v33 = vld [vmem:[#allocation5 + $0x414] ss:$8 sps:$4 sm:$0xff]  }
0x106b   : > { %6484 = vmatpush1.bf16.msra.mxu1 %v21119_v53  ;;  %v21176_v53 = vld [vmem:[#allocation5 + $0x2c0] ss:$8 sps:$4 sm:$0xff]  }
0x106c   : > { %6485 = vmatprep.subr.bf16.mxu1 %v21124_v32  ;;  %v21181_v32 = vld [vmem:[#allocation5 + $0x2b4] ss:$8 sps:$4 sm:$0xff]  }
0x106f   : > { %6486 = vmatpush1.bf16.msra.mxu1 %v21122_v39 }
0x1070   : > { %6487 = vmatprep.subr.bf16.mxu1 %v21127_v18 }
0x1073   : > { %6488 = vmatpush1.bf16.msra.mxu1 %v21125_v40  ;;  %v21179_v40 = vld [vmem:[#allocation5 + $0x2b0] ss:$8 sps:$4 sm:$0xff]  }
0x1074   : > { %6489 = vmatprep.subr.bf16.mxu1 %v21130_v41  ;;  %v21184_v41 = vld [vmem:[#allocation5 + $0x2a4] ss:$8 sps:$4 sm:$0xff]  }
0x1077   : > { %6490 = vmatpush1.bf16.msra.mxu1 %v21128_v42 }
0x1078   : > { %6491 = vmatprep.subr.bf16.mxu1 %v21133_v31 }
0x107b   : > { %6492 = vmatpush1.bf16.msra.mxu1 %v21131_v43 }
0x107c   : > { %6493 = vmatprep.subr.bf16.mxu1 %v21136_v44  ;;  %v21182_v44 = vld [vmem:[#allocation5 + $0x2a0] ss:$8 sps:$4 sm:$0xff]  }
0x107f   : > { %6494 = vmatpush1.bf16.msra.mxu1 %v21134_v48 }
0x1080   : > { %6495 = vmatprep.subr.bf16.mxu1 %v21139_v33 }
0x1083   : > { %6496 = vmatpush1.bf16.msra.mxu1 %v21137_v50  ;;  %v21187_v50 = vld [vmem:[#allocation5 + $0x294] ss:$8 sps:$4 sm:$0xff]  }
0x1084   : > { %6497 = vmatprep.subr.bf16.mxu1 %v21142_v51 }
0x1087   : > { %6498 = vmatpush1.bf16.msra.mxu1 %v21140_v52 }
0x1088   : > { %6499 = vmatprep.subr.bf16.mxu1 %v21145_v54  ;;  %v21185_v54 = vld [vmem:[#allocation5 + $0x290] ss:$8 sps:$4 sm:$0xff]  }
0x108b   : > { %6500 = vmatpush2.bf16.msra.mxu1 %v21143_v55 }
0x108c   : > { %6501 = vmatprep.subr.bf16.mxu1 %v21148_v45 }
0x108f   : > { %6502 = vmatpush2.bf16.msra.mxu1 %v21146_v56  ;;  %v21190_v56 = vld [vmem:[#allocation5 + $0x284] ss:$8 sps:$4 sm:$0xff]  }
0x1090   : > { %6503 = vmatprep.subr.bf16.mxu1 %v21151_v57 }
0x1093   : > { %6504 = vmatpush2.bf16.msra.mxu1 %v21149_v47 }
0x1094   : > { %6505 = vmatprep.subr.bf16.mxu1 %v21154_v58  ;;  %v21188_v58 = vld [vmem:[#allocation5 + $0x280] ss:$8 sps:$4 sm:$0xff]  }
0x1097   : > { %6506 = vmatpush2.bf16.msra.mxu1 %v21152_v59 }
0x1098   : > { %6507 = vmatprep.subr.bf16.mxu1 %v21157_v60 }
0x109b   : > { %6508 = vmatpush2.bf16.msra.mxu1 %v21155_v61  ;;  %v21193_v61 = vld [vmem:[#allocation5 + $0x374] ss:$8 sps:$4 sm:$0xff]  }
0x109c   : > { %6509 = vmatprep.subr.bf16.mxu1 %v21160_v62 }
0x109f   : > { %6510 = vmatpush2.bf16.msra.mxu1 %v21158_v12 }
0x10a0   : > { %6511 = vmatprep.subr.bf16.mxu1 %v21163_v63  ;;  %v21191_v63 = vld [vmem:[#allocation5 + $0x370] ss:$8 sps:$4 sm:$0xff]  }
0x10a3   : > { %6512 = vmatpush2.bf16.msra.mxu1 %v21161_v0 }
0x10a4   : > { %6513 = vmatprep.subr.bf16.mxu1 %v21166_v49  ;;  %v21196_v49 = vld [vmem:[#allocation5 + $0x364] ss:$8 sps:$4 sm:$0xff]  }
0x10a7   : > { %6514 = vmatpush2.bf16.msra.mxu1 %v21164_v15 }
0x10ca   : > { %v5380_v4 = vpop.f32.mrf.mxu1  ;;  %v5519_v6 = vpop.f32.mrf.mxu0 }
0x10cc   : > { %v5382_v5 = vpop.f32.mrf.mxu1  ;;  %v5521_v8 = vpop.f32.mrf.mxu0 }
0x10ce   : > { %v5384_v7 = vpop.f32.mrf.mxu1  ;;  %v5523_v11 = vpop.f32.mrf.mxu0 }
0x10cf   : > { %v5669_v20 = vpack.c.bf16 %v5523_v11, %v5519_v6  ;;  %v5667_v23 = vpack.c.bf16 %v5384_v7, %v5380_v4  ;;  %v21199_v6 = vld [vmem:[#allocation5 + $0x354] ss:$8 sps:$4 sm:$0xff]   ;;  %v21197_v7 = vld [vmem:[#allocation5 + $0x350] ss:$8 sps:$4 sm:$0xff]  }
0x10d0   : > { %v5386_v9 = vpop.f32.mrf.mxu1  ;;  %v5525_v38 = vpop.f32.mrf.mxu0 }
0x10d1   : > { %v5670_v3 = vpack.c.bf16 %v5525_v38, %v5521_v8  ;;  %v5668_v21 = vpack.c.bf16 %v5386_v9, %v5382_v5  ;;  %v21194_v5 = vld [vmem:[#allocation5 + $0x360] ss:$8 sps:$4 sm:$0xff]   ;;  %v21202_v8 = vld [vmem:[#allocation5 + $0x344] ss:$8 sps:$4 sm:$0xff]   ;;  %v21205_v38 = vld [vmem:[#allocation5 + $0x334] ss:$8 sps:$4 sm:$0xff]  }
0x10d2   : > { %v21200_v9 = vld [vmem:[#allocation5 + $0x340] ss:$8 sps:$4 sm:$0xff]  }
0x10ea   : > { %v5658_v10 = vpop.f32.mrf.mxu1 }
0x10ec   : > { %v5660_v13 = vpop.f32.mrf.mxu1 }
0x10ee   : > { %v5662_v14 = vpop.f32.mrf.mxu1 }
0x10ef   : > { %v5671_v17 = vpack.c.bf16 %v5662_v14, %v5658_v10 }
0x10f0   : > { %v5664_v29 = vpop.f32.mrf.mxu1 }
0x10f1   : > { %v5672_v16 = vpack.c.bf16 %v5664_v29, %v5660_v13  ;;  %v21203_v29 = vld [vmem:[#allocation5 + $0x330] ss:$8 sps:$4 sm:$0xff]  }
0x10f3   : > { %5683 = vmatprep.subr.bf16.mxu0 %v5672_v16  ;;  %v21208_v16 = vld [vmem:[#allocation5 + $0x324] ss:$8 sps:$4 sm:$0xff]  }
0x10f4   : > { %5684 = vmatpush1.bf16.msra.mxu0 %v5671_v17  ;;  %v21206_v17 = vld [vmem:[#allocation5 + $0x320] ss:$8 sps:$4 sm:$0xff]  }
0x10f5   : > { %5685 = vmatprep.subr.bf16.mxu0 %v5670_v3  ;;  %v21211_v3 = vld [vmem:[#allocation5 + $0x314] ss:$8 sps:$4 sm:$0xff]  }
0x10f8   : > { %5686 = vmatpush1.bf16.msra.mxu0 %v5669_v20  ;;  %v21209_v20 = vld [vmem:[#allocation5 + $0x310] ss:$8 sps:$4 sm:$0xff]  }
0x10f9   : > { %5687 = vmatprep.subr.bf16.mxu0 %v5668_v21  ;;  %v21214_v21 = vld [vmem:[#allocation5 + $0x304] ss:$8 sps:$4 sm:$0xff]  }
0x10fc   : > { %5688 = vmatpush1.bf16.msra.mxu0 %v5667_v23  ;;  %v21217_v23 = vld [vmem:[#allocation5 + $0x3f4] ss:$8 sps:$4 sm:$0xff]  }
0x10fd   : > { %6095 = vmatprep.subr.bf16.mxu0 %v21169_v22  ;;  %v21212_v22 = vld [vmem:[#allocation5 + $0x300] ss:$8 sps:$4 sm:$0xff]  }
0x10ff   : > { %17489 = vmatmul.mubr.msk.bf16.vlgmr.msra.gmra.mxu0 %vm1413_vm5, %v22599_v25  ;;  %v21248_v25 = vld [vmem:[#allocation5 + $0x660] ss:$8 sps:$4 sm:$0xff]  }
0x1100   : > { %5715 = vmatprep.mubr.bf16.mxu0 %v22746_v1  ;;  %6096 = vmatpush1.bf16.msra.mxu0 %v21167_v24  ;;  %v21242_v24 = vld [vmem:[#allocation5 + $0x670] ss:$8 sps:$4 sm:$0xff]  }
0x1101   : > { %6097 = vmatprep.subr.bf16.mxu0 %v21172_v34  ;;  %v21244_v34 = vld [vmem:[#allocation5 + $0x674] ss:$8 sps:$4 sm:$0xff]  }
0x1102   : > { %7091 = vmatprep.subr.bf16.mxu1 %v21244_v34 }
0x1104   : > { %6098 = vmatpush1.bf16.msra.mxu0 %v21170_v28  ;;  %v21250_v28 = vld [vmem:[#allocation5 + $0x664] ss:$8 sps:$4 sm:$0xff]  }
0x1105   : > { %6099 = vmatprep.subr.bf16.mxu0 %v21175_v30  ;;  %v21254_v30 = vld [vmem:[#allocation5 + $0x650] ss:$8 sps:$4 sm:$0xff]  }
0x1107   : > { %17490 = vmatmul.mubr.msk.bf16.gmra.mxu0 %vm1413_vm5, %v22600_v37  ;;  %v21262_v37 = vld [vmem:[#allocation5 + $0x644] ss:$8 sps:$4 sm:$0xff]  }
0x1108   : > { %6100 = vmatpush1.bf16.msra.mxu0 %v21173_v35  ;;  %v21256_v35 = vld [vmem:[#allocation5 + $0x654] ss:$8 sps:$4 sm:$0xff]  }
0x1109   : > { %6101 = vmatprep.subr.bf16.mxu0 %v21178_v36  ;;  %v21260_v36 = vld [vmem:[#allocation5 + $0x640] ss:$8 sps:$4 sm:$0xff]  }
0x110a   : > { %v5862_v39 = vpop.f32.mrf.mxu1 }
0x110c   : > { %v5864_v18 = vpop.f32.mrf.mxu1  ;;  %6102 = vmatpush1.bf16.msra.mxu0 %v21176_v53  ;;  %v21266_v53 = vld [vmem:[#allocation5 + $0x630] ss:$8 sps:$4 sm:$0xff]  }
0x110d   : > { %6103 = vmatprep.subr.bf16.mxu0 %v21181_v32  ;;  %v21268_v32 = vld [vmem:[#allocation5 + $0x634] ss:$8 sps:$4 sm:$0xff]  }
0x110e   : > { %v5866_v42 = vpop.f32.mrf.mxu1 }
0x110f   : > { %v5871_v31 = vmax.f32 %v5862_v39, %v5866_v42  ;;  %v21272_v39 = vld [vmem:[#allocation5 + $0x620] ss:$8 sps:$4 sm:$0xff]  }
0x1110   : > { %v5868_v43 = vpop.f32.mrf.mxu1  ;;  %6104 = vmatpush1.bf16.msra.mxu0 %v21179_v40  ;;  %v21278_v40 = vld [vmem:[#allocation5 + $0x610] ss:$8 sps:$4 sm:$0xff]   ;;  %v21284_v42 = vld [vmem:[#allocation5 + $0x600] ss:$8 sps:$4 sm:$0xff]  }
0x1111   : > { %v5872_v48 = vrot.slane %v5871_v31, 4  ;;  %v5878_v33 = vmax.f32 %v5864_v18, %v5868_v43  ;;  %6105 = vmatprep.subr.bf16.mxu0 %v21184_v41  ;;  %v21274_v18 = vld [vmem:[#allocation5 + $0x624] ss:$8 sps:$4 sm:$0xff]   ;;  %v21280_v41 = vld [vmem:[#allocation5 + $0x614] ss:$8 sps:$4 sm:$0xff]  }
0x1112   : > { %v21290_v43 = vld [vmem:[#allocation5 + $0x6f0] ss:$8 sps:$4 sm:$0xff]  }
0x1113   : > { %v5873_v51 = vmax.f32 %v5871_v31, %v5872_v48  ;;  %v5879_v52 = vrot.slane %v5878_v33, 4  ;;  %v21286_v31 = vld [vmem:[#allocation5 + $0x604] ss:$8 sps:$4 sm:$0xff]   ;;  %v21296_v48 = vld [vmem:[#allocation5 + $0x6e0] ss:$8 sps:$4 sm:$0xff]  }
0x1114   : > { %6106 = vmatpush1.bf16.msra.mxu0 %v21182_v44  ;;  %v21292_v44 = vld [vmem:[#allocation5 + $0x6f4] ss:$8 sps:$4 sm:$0xff]  }
0x1115   : > { %v5874_v55 = vrot.slane %v5873_v51, 2  ;;  %v5880_v45 = vmax.f32 %v5878_v33, %v5879_v52  ;;  %6107 = vmatprep.subr.bf16.mxu0 %v21187_v50  ;;  %v21298_v33 = vld [vmem:[#allocation5 + $0x6e4] ss:$8 sps:$4 sm:$0xff]   ;;  %v21302_v50 = vld [vmem:[#allocation5 + $0x6d0] ss:$8 sps:$4 sm:$0xff]  }
0x1116   : > { %v21308_v52 = vld [vmem:[#allocation5 + $0x6c0] ss:$8 sps:$4 sm:$0xff]  }
0x1117   : > { %v5875_v57 = vmax.f32 %v5873_v51, %v5874_v55  ;;  %v5881_v47 = vrot.slane %v5880_v45, 2  ;;  %v21304_v51 = vld [vmem:[#allocation5 + $0x6d4] ss:$8 sps:$4 sm:$0xff]   ;;  %v21314_v55 = vld [vmem:[#allocation5 + $0x6b0] ss:$8 sps:$4 sm:$0xff]  }
0x1118   : > { %6108 = vmatpush1.bf16.msra.mxu0 %v21185_v54  ;;  %v21310_v54 = vld [vmem:[#allocation5 + $0x6c4] ss:$8 sps:$4 sm:$0xff]  }
0x1119   : > { %v5876_v59 = vrot.slane %v5875_v57, 1  ;;  %v5882_v60 = vmax.f32 %v5880_v45, %v5881_v47  ;;  %6109 = vmatprep.subr.bf16.mxu0 %v21190_v56  ;;  %v21316_v45 = vld [vmem:[#allocation5 + $0x6b4] ss:$8 sps:$4 sm:$0xff]  }
0x111b   : > { %v5883_v62 = vrot.slane %v5882_v60, 1  ;;  %v5877_v12 = vmax.f32 %v5875_v57, %v5876_v59 }
0x111c   : > { %6110 = vmatpush1.bf16.msra.mxu0 %v21188_v58 }
0x111d   : > { %v5884_v0 = vmax.f32 %v5882_v60, %v5883_v62  ;;  %6111 = vmatprep.subr.bf16.mxu0 %v21193_v61  ;;  %v6321_v4 = vpack.c.bf16 %v5877_v12, %v5877_v12 }
0x111f   : > { %v6322_v15 = vpack.c.bf16 %v5884_v0, %v5884_v0 }
0x1120   : > { %6112 = vmatpush2.bf16.msra.mxu0 %v21191_v63 }
0x1121   : > { %6515 = vmatprep.mubr.bf16.mxu1 %v6322_v15  ;;  %6113 = vmatprep.subr.bf16.mxu0 %v21196_v49 }
0x1122   : > { %6516 = vmatmul.mubr.bf16.vlgmr.msra.gmra.mxu1 %v6321_v4 }
0x1123   : > { %7092 = vmatpush1.bf16.msra.mxu1 %v21242_v24 }
0x1124   : > { %6114 = vmatpush2.bf16.msra.mxu0 %v21194_v5  ;;  %7093 = vmatprep.subr.bf16.mxu1 %v21250_v28  ;;  %v21238_v28 = vld [vmem:[#allocation5 + $0x384] ss:$8 sps:$4 sm:$0xff]  }
0x1125   : > { %6115 = vmatprep.subr.bf16.mxu0 %v21199_v6  ;;  %v21215_v6 = vld [vmem:[#allocation5 + $0x3f0] ss:$8 sps:$4 sm:$0xff]  }
0x1127   : > { %7094 = vmatpush1.bf16.msra.mxu1 %v21248_v25  ;;  %v21233_v25 = vld [vmem:[#allocation5 + $0x390] ss:$8 sps:$4 sm:$0xff]  }
0x1128   : > { %6116 = vmatpush2.bf16.msra.mxu0 %v21197_v7  ;;  %7095 = vmatprep.subr.bf16.mxu1 %v21256_v35  ;;  %v21241_v35 = vld [vmem:[#allocation5 + $0x574] ss:$8 sps:$4 sm:$0xff]  }
0x1129   : > { %6117 = vmatprep.subr.bf16.mxu0 %v21202_v8  ;;  %v21220_v8 = vld [vmem:[#allocation5 + $0x3e4] ss:$8 sps:$4 sm:$0xff]  }
0x112a   : > { %v23619_v10 = vpop.f32.mrf.mxu1 }
0x112b   : > { %7096 = vmatpush1.bf16.msra.mxu1 %v21254_v30  ;;  %v21236_v30 = vld [vmem:[#allocation5 + $0x380] ss:$8 sps:$4 sm:$0xff]  }
0x112c   : > { %v23621_v11 = vpop.f32.mrf.mxu1  ;;  %6118 = vmatpush2.bf16.msra.mxu0 %v21200_v9  ;;  %7097 = vmatprep.subr.bf16.mxu1 %v21262_v37  ;;  %v21218_v9 = vld [vmem:[#allocation5 + $0x3e0] ss:$8 sps:$4 sm:$0xff]   ;;  %v21247_v37 = vld [vmem:[#allocation5 + $0x564] ss:$8 sps:$4 sm:$0xff]  }
0x112d   : > { %6119 = vmatprep.subr.bf16.mxu0 %v21205_v38  ;;  %v21226_v38 = vld [vmem:[#allocation5 + $0x3c4] ss:$8 sps:$4 sm:$0xff]  }
0x112e   : > { %v6254_v13 = vpop.f32.mrf.mxu1 }
0x112f   : > { %7098 = vmatpush1.bf16.msra.mxu1 %v21260_v36  ;;  %v21223_v13 = vld [vmem:[#allocation5 + $0x3d4] ss:$8 sps:$4 sm:$0xff]   ;;  %v21239_v36 = vld [vmem:[#allocation5 + $0x570] ss:$8 sps:$4 sm:$0xff]  }
0x1130   : > { %v6255_v14 = vpop.f32.mrf.mxu1  ;;  %6120 = vmatpush2.bf16.msra.mxu0 %v21203_v29  ;;  %7099 = vmatprep.subr.bf16.mxu1 %v21268_v32  ;;  %v21224_v29 = vld [vmem:[#allocation5 + $0x3c0] ss:$8 sps:$4 sm:$0xff]   ;;  %v21253_v32 = vld [vmem:[#allocation5 + $0x554] ss:$8 sps:$4 sm:$0xff]  }
0x1131   : > { %6121 = vmatprep.subr.bf16.mxu0 %v21208_v16  ;;  %v21221_v14 = vld [vmem:[#allocation5 + $0x3d0] ss:$8 sps:$4 sm:$0xff]   ;;  %v21229_v16 = vld [vmem:[#allocation5 + $0x3b4] ss:$8 sps:$4 sm:$0xff]  }
0x1133   : > { %7100 = vmatpush1.bf16.msra.mxu1 %v21266_v53  ;;  %v21245_v53 = vld [vmem:[#allocation5 + $0x560] ss:$8 sps:$4 sm:$0xff]  }
0x1134   : > { %6122 = vmatpush2.bf16.msra.mxu0 %v21206_v17  ;;  %7101 = vmatprep.subr.bf16.mxu1 %v21274_v18  ;;  %v21227_v17 = vld [vmem:[#allocation5 + $0x3b0] ss:$8 sps:$4 sm:$0xff]   ;;  %v21259_v18 = vld [vmem:[#allocation5 + $0x544] ss:$8 sps:$4 sm:$0xff]  }
0x1135   : > { %6123 = vmatprep.subr.bf16.mxu0 %v21211_v3  ;;  %v21232_v3 = vld [vmem:[#allocation5 + $0x3a4] ss:$8 sps:$4 sm:$0xff]  }
0x1137   : > { %7102 = vmatpush1.bf16.msra.mxu1 %v21272_v39  ;;  %v21251_v39 = vld [vmem:[#allocation5 + $0x550] ss:$8 sps:$4 sm:$0xff]  }
0x1138   : > { %6124 = vmatpush2.bf16.msra.mxu0 %v21209_v20  ;;  %7103 = vmatprep.subr.bf16.mxu1 %v21280_v41  ;;  %v21265_v41 = vld [vmem:[#allocation5 + $0x534] ss:$8 sps:$4 sm:$0xff]  }
0x1139   : > { %6125 = vmatprep.subr.bf16.mxu0 %v21214_v21 }
0x113b   : > { %7104 = vmatpush1.bf16.msra.mxu1 %v21278_v40  ;;  %v21257_v40 = vld [vmem:[#allocation5 + $0x540] ss:$8 sps:$4 sm:$0xff]  }
0x113c   : > { %6126 = vmatpush2.bf16.msra.mxu0 %v21212_v22  ;;  %7105 = vmatprep.subr.bf16.mxu1 %v21286_v31  ;;  %v21230_v22 = vld [vmem:[#allocation5 + $0x3a0] ss:$8 sps:$4 sm:$0xff]   ;;  %v21271_v31 = vld [vmem:[#allocation5 + $0x524] ss:$8 sps:$4 sm:$0xff]  }
0x113d   : > { %6604 = vmatprep.subr.bf16.mxu0 %v21217_v23  ;;  %v21235_v23 = vld [vmem:[#allocation5 + $0x394] ss:$8 sps:$4 sm:$0xff]  }
0x113f   : > { %7106 = vmatpush1.bf16.msra.mxu1 %v21284_v42  ;;  %v21263_v42 = vld [vmem:[#allocation5 + $0x530] ss:$8 sps:$4 sm:$0xff]  }
0x1140   : > { %7107 = vmatprep.subr.bf16.mxu1 %v21292_v44  ;;  %v21275_v44 = vld [vmem:[#allocation5 + $0x510] ss:$8 sps:$4 sm:$0xff]  }
0x1143   : > { %7108 = vmatpush2.bf16.msra.mxu1 %v21290_v43  ;;  %v21269_v43 = vld [vmem:[#allocation5 + $0x520] ss:$8 sps:$4 sm:$0xff]  }
0x1144   : > { %7109 = vmatprep.subr.bf16.mxu1 %v21298_v33  ;;  %v21281_v33 = vld [vmem:[#allocation5 + $0x500] ss:$8 sps:$4 sm:$0xff]  }
0x1147   : > { %7110 = vmatpush2.bf16.msra.mxu1 %v21296_v48  ;;  %v21283_v48 = vld [vmem:[#allocation5 + $0x504] ss:$8 sps:$4 sm:$0xff]  }
0x1148   : > { %7111 = vmatprep.subr.bf16.mxu1 %v21304_v51  ;;  %v21287_v51 = vld [vmem:[#allocation5 + $0x5f0] ss:$8 sps:$4 sm:$0xff]  }
0x114b   : > { %7112 = vmatpush2.bf16.msra.mxu1 %v21302_v50  ;;  %v21289_v50 = vld [vmem:[#allocation5 + $0x5f4] ss:$8 sps:$4 sm:$0xff]  }
0x114c   : > { %7113 = vmatprep.subr.bf16.mxu1 %v21310_v54  ;;  %v21322_v54 = vld [vmem:[#allocation5 + $0x6a4] ss:$8 sps:$4 sm:$0xff]  }
0x114f   : > { %7114 = vmatpush2.bf16.msra.mxu1 %v21308_v52  ;;  %v21295_v52 = vld [vmem:[#allocation5 + $0x5e4] ss:$8 sps:$4 sm:$0xff]  }
0x1150   : > { %7115 = vmatprep.subr.bf16.mxu1 %v21316_v45  ;;  %v21293_v45 = vld [vmem:[#allocation5 + $0x5e0] ss:$8 sps:$4 sm:$0xff]  }
0x1153   : > { %7116 = vmatpush2.bf16.msra.mxu1 %v21314_v55  ;;  %v21320_v55 = vld [vmem:[#allocation5 + $0x6a0] ss:$8 sps:$4 sm:$0xff]  }
0x1154   : > { %7117 = vmatprep.subr.bf16.mxu1 %v21322_v54  ;;  %v21362_v54 = vld [vmem:[#allocation5 + $0x7e0] ss:$8 sps:$4 sm:$0xff]  }
0x1157   : > { %7118 = vmatpush2.bf16.msra.mxu1 %v21320_v55  ;;  %v21367_v55 = vld [vmem:[#allocation5 + $0x7d4] ss:$8 sps:$4 sm:$0xff]  }
0x11bf   : > { %v5707_v56 = vpop.f32.mrf.mxu0 }
0x11c1   : > { %v5709_v57 = vpop.f32.mrf.mxu0 }
0x11c3   : > { %v5711_v47 = vpop.f32.mrf.mxu0 }
0x11c4   : > { %v5726_v60 = vmax.f32 %v5707_v56, %v5711_v47  ;;  %v21301_v56 = vld [vmem:[#allocation5 + $0x5d4] ss:$8 sps:$4 sm:$0xff]   ;;  %v21326_v47 = vld [vmem:[#allocation5 + $0x690] ss:$8 sps:$4 sm:$0xff]  }
0x11c5   : > { %v5713_v58 = vpop.f32.mrf.mxu0 }
0x11c6   : > { %v5727_v62 = vmax.f32 %v5709_v57, %v5713_v58  ;;  %v21328_v57 = vld [vmem:[#allocation5 + $0x694] ss:$8 sps:$4 sm:$0xff]   ;;  %v21299_v58 = vld [vmem:[#allocation5 + $0x5d0] ss:$8 sps:$4 sm:$0xff]  }
0x11c7   : > { %v5717_v59 = vpop.f32.mrf.mxu0  ;;  %7119 = vmatprep.subr.bf16.mxu1 %v21328_v57  ;;  %v21368_v57 = vld [vmem:[#allocation5 + $0x7c0] ss:$8 sps:$4 sm:$0xff]  }
0x11c8   : > { %v5728_v12 = vmax.f32 %v5726_v60, %v5717_v59  ;;  %v21307_v59 = vld [vmem:[#allocation5 + $0x5c4] ss:$8 sps:$4 sm:$0xff]   ;;  %7120 = vmatpush2.bf16.msra.mxu1 %v21326_v47  ;;  %v21373_v47 = vld [vmem:[#allocation5 + $0x7b4] ss:$8 sps:$4 sm:$0xff]  }
0x11c9   : > { %v5719_v61 = vpop.f32.mrf.mxu0  ;;  %v21334_v60 = vld [vmem:[#allocation5 + $0x684] ss:$8 sps:$4 sm:$0xff]  }
0x11ca   : > { %v5729_v0 = vmax.f32 %v5727_v62, %v5719_v61  ;;  %v21332_v61 = vld [vmem:[#allocation5 + $0x680] ss:$8 sps:$4 sm:$0xff]   ;;  %7121 = vmatprep.subr.bf16.mxu1 %v21334_v60 }
0x11cb   : > { %v5721_v63 = vpop.f32.mrf.mxu0  ;;  %v21305_v62 = vld [vmem:[#allocation5 + $0x5c0] ss:$8 sps:$4 sm:$0xff]  }
0x11cc   : > { %v5730_v49 = vmax.f32 %v5728_v12, %v5721_v63  ;;  %v21313_v12 = vld [vmem:[#allocation5 + $0x5b4] ss:$8 sps:$4 sm:$0xff]   ;;  %7122 = vmatpush2.bf16.msra.mxu1 %v21332_v61  ;;  %v21311_v63 = vld [vmem:[#allocation5 + $0x5b0] ss:$8 sps:$4 sm:$0xff]   ;;  %v21374_v60 = vld [vmem:[#allocation5 + $0x7a0] ss:$8 sps:$4 sm:$0xff]  }
0x11cd   : > { %v5723_v15 = vpop.f32.mrf.mxu0  ;;  %v21379_v61 = vld [vmem:[#allocation5 + $0x794] ss:$8 sps:$4 sm:$0xff]  }
0x11ce   : > { %v5731_v4 = vmax.f32 %v5729_v0, %v5723_v15  ;;  %v5933_v7 = vpack.c.bf16 %v5730_v49, %v5730_v49  ;;  %v21319_v0 = vld [vmem:[#allocation5 + $0x5a4] ss:$8 sps:$4 sm:$0xff]   ;;  %v21317_v49 = vld [vmem:[#allocation5 + $0x5a0] ss:$8 sps:$4 sm:$0xff]   ;;  %v21325_v15 = vld [vmem:[#allocation5 + $0x594] ss:$8 sps:$4 sm:$0xff]  }
0x11d0   : > { %v5934_v5 = vpack.c.bf16 %v5731_v4, %v5731_v4  ;;  %v21323_v4 = vld [vmem:[#allocation5 + $0x590] ss:$8 sps:$4 sm:$0xff]  }
0x11d2   : > { %6127 = vmatprep.mubr.bf16.mxu0 %v5934_v5  ;;  %v21331_v5 = vld [vmem:[#allocation5 + $0x584] ss:$8 sps:$4 sm:$0xff]  }
0x11d3   : > { %6128 = vmatmul.mubr.bf16.vlgmr.msra.gmra.mxu0 %v5933_v7  ;;  %v21337_v7 = vld [vmem:[#allocation5 + $0x774] ss:$8 sps:$4 sm:$0xff]  }
0x11d4   : > { %6605 = vmatpush1.bf16.msra.mxu0 %v21215_v6  ;;  %6636 = vmatprep.mubr.bf16.mxu0 %v22746_v1  ;;  %v21329_v6 = vld [vmem:[#allocation5 + $0x580] ss:$8 sps:$4 sm:$0xff]  }
0x11d5   : > { %6606 = vmatprep.subr.bf16.mxu0 %v21220_v8  ;;  %v6257_v8 = vld [vmem:[%s24869_s0] sm:$0x3] }
0x11d8   : > { %6607 = vmatpush1.bf16.msra.mxu0 %v21218_v9  ;;  %v23631_v9 = vsub.s32 1, %v23228_v26  ;;  %v21335_v26 = vld [vmem:[#allocation5 + $0x770] ss:$8 sps:$4 sm:$0xff]  }
0x11d9   : > { %6608 = vmatprep.subr.bf16.mxu0 %v21223_v13  ;;  %v6262_v13 = vrot.slane %v6257_v8, %v23231_v27 }
0x11dc   : > { %6609 = vmatpush1.bf16.msra.mxu0 %v21221_v14 }
0x11dd   : > { %6610 = vmatprep.subr.bf16.mxu0 %v21226_v38 }
0x11e0   : > { %6611 = vmatpush1.bf16.msra.mxu0 %v21224_v29  ;;  %v6266_v29 = vrot.slane %v6257_v8, %v23631_v9 }
0x11e1   : > { %6612 = vmatprep.subr.bf16.mxu0 %v21229_v16 }
0x11e2   : > { %v23624_v20 = vpop.f32.mrf.mxu1 }
0x11e4   : > { %6613 = vmatpush1.bf16.msra.mxu0 %v21227_v17  ;;  %v23626_v21 = vpop.f32.mrf.mxu1 }
0x11e5   : > { %6614 = vmatprep.subr.bf16.mxu0 %v21232_v3 }
0x11e6   : > { %v6521_v24 = vpop.f32.mrf.mxu1 }
0x11e8   : > { %6615 = vmatpush1.bf16.msra.mxu0 %v21230_v22  ;;  %v6522_v34 = vpop.f32.mrf.mxu1 }
0x11e9   : > { %6616 = vmatprep.subr.bf16.mxu0 %v21235_v23 }
0x11ec   : > { %6617 = vmatpush1.bf16.msra.mxu0 %v21233_v25 }
0x11ed   : > { %6618 = vmatprep.subr.bf16.mxu0 %v21238_v28 }
0x11f0   : > { %6619 = vmatpush1.bf16.msra.mxu0 %v21236_v30 }
0x11f1   : > { %6858 = vmatprep.subr.bf16.mxu0 %v21241_v35  ;;  %v21340_v35 = vld [vmem:[#allocation5 + $0x764] ss:$8 sps:$4 sm:$0xff]  }
0x11f3   : > { %6637 = vmatmul.mubr.bf16.vlgmr.msra.gmra.mxu0 %v23571_v19  ;;  %v21277_v19 = vld [vmem:[#allocation5 + $0x514] ss:$8 sps:$4 sm:$0xff]  }
0x11f4   : > { %6859 = vmatpush1.bf16.msra.mxu0 %v21239_v36  ;;  %v21341_v36 = vld [vmem:[#allocation5 + $0x750] ss:$8 sps:$4 sm:$0xff]  }
0x11f5   : > { %6860 = vmatprep.subr.bf16.mxu0 %v21247_v37  ;;  %v21346_v37 = vld [vmem:[#allocation5 + $0x744] ss:$8 sps:$4 sm:$0xff]  }
0x11f8   : > { %6861 = vmatpush1.bf16.msra.mxu0 %v21245_v53  ;;  %v21344_v53 = vld [vmem:[#allocation5 + $0x740] ss:$8 sps:$4 sm:$0xff]  }
0x11f9   : > { %6862 = vmatprep.subr.bf16.mxu0 %v21253_v32  ;;  %v21349_v32 = vld [vmem:[#allocation5 + $0x734] ss:$8 sps:$4 sm:$0xff]  }
0x11fc   : > { %6863 = vmatpush1.bf16.msra.mxu0 %v21251_v39  ;;  %v21347_v39 = vld [vmem:[#allocation5 + $0x730] ss:$8 sps:$4 sm:$0xff]  }
0x11fd   : > { %6864 = vmatprep.subr.bf16.mxu0 %v21259_v18  ;;  %v21352_v18 = vld [vmem:[#allocation5 + $0x724] ss:$8 sps:$4 sm:$0xff]  }
0x1200   : > { %6865 = vmatpush1.bf16.msra.mxu0 %v21257_v40  ;;  %v21350_v40 = vld [vmem:[#allocation5 + $0x720] ss:$8 sps:$4 sm:$0xff]  }
0x1201   : > { %6866 = vmatprep.subr.bf16.mxu0 %v21265_v41  ;;  %v21355_v41 = vld [vmem:[#allocation5 + $0x714] ss:$8 sps:$4 sm:$0xff]  }
0x1204   : > { %6867 = vmatpush1.bf16.msra.mxu0 %v21263_v42 }
0x1205   : > { %6868 = vmatprep.subr.bf16.mxu0 %v21271_v31  ;;  %v21353_v31 = vld [vmem:[#allocation5 + $0x710] ss:$8 sps:$4 sm:$0xff]  }
0x1208   : > { %6869 = vmatpush1.bf16.msra.mxu0 %v21269_v43 }
0x1209   : > { %6870 = vmatprep.subr.bf16.mxu0 %v21277_v19  ;;  %v21358_v19 = vld [vmem:[#allocation5 + $0x704] ss:$8 sps:$4 sm:$0xff]  }
0x120c   : > { %6871 = vmatpush1.bf16.msra.mxu0 %v21275_v44 }
0x120d   : > { %6872 = vmatprep.subr.bf16.mxu0 %v21283_v48  ;;  %v21356_v48 = vld [vmem:[#allocation5 + $0x700] ss:$8 sps:$4 sm:$0xff]  }
0x1210   : > { %6873 = vmatpush1.bf16.msra.mxu0 %v21281_v33 }
0x1211   : > { %6874 = vmatprep.subr.bf16.mxu0 %v21289_v50  ;;  %v21361_v50 = vld [vmem:[#allocation5 + $0x7f4] ss:$8 sps:$4 sm:$0xff]  }
0x1214   : > { %6875 = vmatpush2.bf16.msra.mxu0 %v21287_v51  ;;  %v21359_v51 = vld [vmem:[#allocation5 + $0x7f0] ss:$8 sps:$4 sm:$0xff]  }
0x1215   : > { %6876 = vmatprep.subr.bf16.mxu0 %v21295_v52  ;;  %v21364_v52 = vld [vmem:[#allocation5 + $0x7e4] ss:$8 sps:$4 sm:$0xff]  }
0x1218   : > { %6877 = vmatpush2.bf16.msra.mxu0 %v21293_v45  ;;  %v21365_v45 = vld [vmem:[#allocation5 + $0x7d0] ss:$8 sps:$4 sm:$0xff]  }
0x1219   : > { %6878 = vmatprep.subr.bf16.mxu0 %v21301_v56  ;;  %v21370_v56 = vld [vmem:[#allocation5 + $0x7c4] ss:$8 sps:$4 sm:$0xff]  }
0x121c   : > { %6879 = vmatpush2.bf16.msra.mxu0 %v21299_v58  ;;  %v21371_v58 = vld [vmem:[#allocation5 + $0x7b0] ss:$8 sps:$4 sm:$0xff]  }
0x121d   : > { %6880 = vmatprep.subr.bf16.mxu0 %v21307_v59  ;;  %v21376_v59 = vld [vmem:[#allocation5 + $0x7a4] ss:$8 sps:$4 sm:$0xff]  }
0x1220   : > { %6881 = vmatpush2.bf16.msra.mxu0 %v21305_v62  ;;  %v21377_v62 = vld [vmem:[#allocation5 + $0x790] ss:$8 sps:$4 sm:$0xff]  }
0x1221   : > { %6882 = vmatprep.subr.bf16.mxu0 %v21313_v12  ;;  %v21382_v12 = vld [vmem:[#allocation5 + $0x784] ss:$8 sps:$4 sm:$0xff]  }
0x1224   : > { %6883 = vmatpush2.bf16.msra.mxu0 %v21311_v63  ;;  %v21380_v63 = vld [vmem:[#allocation5 + $0x780] ss:$8 sps:$4 sm:$0xff]  }
0x1225   : > { %6884 = vmatprep.subr.bf16.mxu0 %v21319_v0 }
0x1228   : > { %6885 = vmatpush2.bf16.msra.mxu0 %v21317_v49 }
0x1229   : > { %6886 = vmatprep.subr.bf16.mxu0 %v21325_v15 }
0x122c   : > { %6887 = vmatpush2.bf16.msra.mxu0 %v21323_v4 }
0x122d   : > { %6888 = vmatprep.subr.bf16.mxu0 %v21331_v5 }
0x1230   : > { %6889 = vmatpush2.bf16.msra.mxu0 %v21329_v6 }
0x1231   : > { %7324 = vmatprep.subr.bf16.mxu0 %v21337_v7 }
0x1293   : > { %v6129_v14 = vpop.f32.mrf.mxu0 }
0x1294   : > { %v6251_v38 = vadd.f32 %v23619_v10, %v6129_v14  ;;  %v21338_v10 = vld [vmem:[#allocation5 + $0x760] ss:$8 sps:$4 sm:$0xff]  }
0x1295   : > { %v6131_v16 = vpop.f32.mrf.mxu0 }
0x1296   : > { %v6269_v17 = vadd.f32 %v6262_v13, %v6251_v38  ;;  %v6253_v3 = vadd.f32 %v23621_v11, %v6131_v16  ;;  %v21343_v11 = vld [vmem:[#allocation5 + $0x754] ss:$8 sps:$4 sm:$0xff]   ;;  %v21455_v38 = vld [vmem:[#allocation5 + $0x9f0] ss:$8 sps:$4 sm:$0xff]   ;;  %v21460_v16 = vld [vmem:[#allocation5 + $0x9e4] ss:$8 sps:$4 sm:$0xff]  }
0x1297   : > { %v6133_v22 = vpop.f32.mrf.mxu0 }
0x1298   : > { %v6270_v23 = vadd.f32 %v6266_v29, %v6253_v3  ;;  %v6271_v24 = vmax.f32 %v6269_v17, 0.0  ;;  %v21457_v29 = vld [vmem:[#allocation5 + $0x9f4] ss:$8 sps:$4 sm:$0xff]   ;;  %v21458_v17 = vld [vmem:[#allocation5 + $0x9e0] ss:$8 sps:$4 sm:$0xff]  }
0x1299   : > { %v6134_v34 = vpop.f32.mrf.mxu0  ;;  %v21463_v3 = vld [vmem:[#allocation5 + $0x9d4] ss:$8 sps:$4 sm:$0xff]   ;;  %v21461_v22 = vld [vmem:[#allocation5 + $0x9d0] ss:$8 sps:$4 sm:$0xff]  }
0x129a   : > { %v6272_v25 = vmax.f32 %v6270_v23, 0.0  ;;  %v23639_v30 = vpack.c.bf16 %v6271_v24, %v6271_v24  ;;  %v21466_v23 = vld [vmem:[#allocation5 + $0x9c4] ss:$8 sps:$4 sm:$0xff]   ;;  %v21464_v24 = vld [vmem:[#allocation5 + $0x9c0] ss:$8 sps:$4 sm:$0xff]  }
0x129b   : > { %v21469_v34 = vld [vmem:[#allocation5 + $0x9b4] ss:$8 sps:$4 sm:$0xff]  }
0x129c   : > { %v23637_v28 = vpack.c.bf16 %v6272_v25, %v6272_v25  ;;  %v21467_v25 = vld [vmem:[#allocation5 + $0x9b0] ss:$8 sps:$4 sm:$0xff]  }
0x129e   : > { %6890 = vmatprep.mubr.bf16.mxu0 %v23637_v28  ;;  %7123 = vmatprep.mubr.bf16.mxu1 %v23637_v28 }
0x129f   : > { %6891 = vmatmul.mubr.bf16.vlgmr.msra.gmra.mxu0 %v23639_v30  ;;  %7124 = vmatmul.mubr.bf16.vlgmr.msra.gmra.mxu1 %v23639_v30 }
0x12a0   : > { %7325 = vmatpush1.bf16.msra.mxu0 %v21335_v26  ;;  %7356 = vmatprep.mubr.bf16.mxu0 %v23637_v28  ;;  %v21472_v26 = vld [vmem:[#allocation5 + $0x9a4] ss:$8 sps:$4 sm:$0xff]  }
0x12a1   : > { %7326 = vmatprep.subr.bf16.mxu0 %v21340_v35  ;;  %7407 = vmatprep.mubr.bf16.mxu1 %v22746_v1 }
0x12a4   : > { %7327 = vmatpush1.bf16.msra.mxu0 %v21338_v10  ;;  %v21470_v10 = vld [vmem:[#allocation5 + $0x9a0] ss:$8 sps:$4 sm:$0xff]  }
0x12a5   : > { %7328 = vmatprep.subr.bf16.mxu0 %v21343_v11 }
0x12a8   : > { %7329 = vmatpush1.bf16.msra.mxu0 %v21341_v36  ;;  %v21475_v36 = vld [vmem:[#allocation5 + $0x994] ss:$8 sps:$4 sm:$0xff]  }
0x12a9   : > { %7330 = vmatprep.subr.bf16.mxu0 %v21346_v37 }
0x12ac   : > { %7331 = vmatpush1.bf16.msra.mxu0 %v21344_v53 }
0x12ad   : > { %7332 = vmatprep.subr.bf16.mxu0 %v21349_v32 }
0x12b0   : > { %7333 = vmatpush1.bf16.msra.mxu0 %v21347_v39  ;;  %v21473_v39 = vld [vmem:[#allocation5 + $0x990] ss:$8 sps:$4 sm:$0xff]  }
0x12b1   : > { %7334 = vmatprep.subr.bf16.mxu0 %v21352_v18 }
0x12b3   : > { %v23647_v42 = vpop.f32.mrf.mxu0 }
0x12b4   : > { %7335 = vmatpush1.bf16.msra.mxu0 %v21350_v40  ;;  %v21478_v40 = vld [vmem:[#allocation5 + $0x984] ss:$8 sps:$4 sm:$0xff]  }
0x12b5   : > { %v23649_v43 = vpop.f32.mrf.mxu0  ;;  %7336 = vmatprep.subr.bf16.mxu0 %v21355_v41 }
0x12b7   : > { %v6642_v44 = vpop.f32.mrf.mxu0 }
0x12b8   : > { %7337 = vmatpush1.bf16.msra.mxu0 %v21353_v31  ;;  %v23655_v31 = vld [vmem:[%s24869_s0 + $0x2] sm:$0x3]  ;;  %v6641_v44 = vadd.f32 %v23649_v43, %v23626_v21  ;;  %v21391_v43 = vld [vmem:[#allocation5 + $0x854] ss:$8 sps:$4 sm:$0xff]  }
0x12b9   : > { %v6643_v33 = vpop.f32.mrf.mxu0  ;;  %7338 = vmatprep.subr.bf16.mxu0 %v21358_v19  ;;  %v21385_v19 = vld [vmem:[#allocation5 + $0x874] ss:$8 sps:$4 sm:$0xff]   ;;  %v21386_v21 = vld [vmem:[#allocation5 + $0x860] ss:$8 sps:$4 sm:$0xff]  }
0x12ba   : > { %v21476_v33 = vld [vmem:[#allocation5 + $0x980] ss:$8 sps:$4 sm:$0xff]  }
0x12bc   : > { %7339 = vmatpush1.bf16.msra.mxu0 %v21356_v48  ;;  %v6655_v48 = vrot.slane %v23655_v31, %v23631_v9 }
0x12bd   : > { %7340 = vmatprep.subr.bf16.mxu0 %v21361_v50  ;;  %v21481_v50 = vld [vmem:[#allocation5 + $0xa74] ss:$8 sps:$4 sm:$0xff]  }
0x12c0   : > { %7341 = vmatpush2.bf16.msra.mxu0 %v21359_v51  ;;  %v21383_v51 = vld [vmem:[#allocation5 + $0x870] ss:$8 sps:$4 sm:$0xff]  }
0x12c1   : > { %7342 = vmatprep.subr.bf16.mxu0 %v21364_v52  ;;  %v21388_v52 = vld [vmem:[#allocation5 + $0x864] ss:$8 sps:$4 sm:$0xff]  }
0x12c4   : > { %7343 = vmatpush2.bf16.msra.mxu0 %v21362_v54  ;;  %v6659_v54 = vadd.f32 %v6655_v48, %v6641_v44  ;;  %v21439_v44 = vld [vmem:[#allocation5 + $0x954] ss:$8 sps:$4 sm:$0xff]   ;;  %v21491_v48 = vld [vmem:[#allocation5 + $0xa30] ss:$8 sps:$4 sm:$0xff]  }
0x12c5   : > { %7344 = vmatprep.subr.bf16.mxu0 %v21367_v55  ;;  %v21479_v55 = vld [vmem:[#allocation5 + $0xa70] ss:$8 sps:$4 sm:$0xff]  }
0x12c8   : > { %7345 = vmatpush2.bf16.msra.mxu0 %v21365_v45  ;;  %v22601_v45 = vld [vmem:[%s22985_s23] sm:$0xff]  }
0x12c9   : > { %7346 = vmatprep.subr.bf16.mxu0 %v21370_v56  ;;  %v21484_v56 = vld [vmem:[#allocation5 + $0xa64] ss:$8 sps:$4 sm:$0xff]  }
0x12cc   : > { %7347 = vmatpush2.bf16.msra.mxu0 %v21368_v57  ;;  %v6661_v57 = vmax.f32 %v6659_v54, 0.0  ;;  %v21440_v54 = vld [vmem:[#allocation5 + $0x940] ss:$8 sps:$4 sm:$0xff]  }
0x12cd   : > { %7348 = vmatprep.subr.bf16.mxu0 %v21373_v47  ;;  %v21482_v47 = vld [vmem:[#allocation5 + $0xa60] ss:$8 sps:$4 sm:$0xff]  }
0x12d0   : > { %7349 = vmatpush2.bf16.msra.mxu0 %v21371_v58  ;;  %v21487_v58 = vld [vmem:[#allocation5 + $0xa54] ss:$8 sps:$4 sm:$0xff]  }
0x12d1   : > { %7350 = vmatprep.subr.bf16.mxu0 %v21376_v59  ;;  %v21389_v59 = vld [vmem:[#allocation5 + $0x850] ss:$8 sps:$4 sm:$0xff]  }
0x12d4   : > { %7351 = vmatpush2.bf16.msra.mxu0 %v21374_v60  ;;  %v21394_v60 = vld [vmem:[#allocation5 + $0x844] ss:$8 sps:$4 sm:$0xff]  }
0x12d5   : > { %7352 = vmatprep.subr.bf16.mxu0 %v21379_v61  ;;  %v23664_v61 = vpack.c.bf16 %v6661_v57, %v6661_v57  ;;  %v21448_v57 = vld [vmem:[#allocation5 + $0x924] ss:$8 sps:$4 sm:$0xff]  }
0x12d8   : > { %7353 = vmatpush2.bf16.msra.mxu0 %v21377_v62  ;;  %v21485_v62 = vld [vmem:[#allocation5 + $0xa50] ss:$8 sps:$4 sm:$0xff]  }
0x12d9   : > { %7354 = vmatprep.subr.bf16.mxu0 %v21382_v12  ;;  %v22602_v12 = vld [vmem:[%s22985_s23 + $0x8] sm:$0xff]  }
0x12dc   : > { %7355 = vmatpush2.bf16.msra.mxu0 %v21380_v63  ;;  %v21490_v63 = vld [vmem:[#allocation5 + $0xa44] ss:$8 sps:$4 sm:$0xff]  }
0x12dd   : > { %7875 = vmatprep.subr.bf16.mxu0 %v21457_v29  ;;  %v21407_v29 = vld [vmem:[#allocation5 + $0x8f0] ss:$8 sps:$4 sm:$0xff]  }
0x12df   : > { %7357 = vmatmul.mubr.bf16.vlgmr.msra.gmra.mxu0 %v23639_v30 }
0x12e0   : > { %7876 = vmatpush1.bf16.msra.mxu0 %v21455_v38  ;;  %v21409_v38 = vld [vmem:[#allocation5 + $0x8f4] ss:$8 sps:$4 sm:$0xff]  }
0x12e1   : > { %7877 = vmatprep.subr.bf16.mxu0 %v21460_v16  ;;  %v21412_v16 = vld [vmem:[#allocation5 + $0x8e4] ss:$8 sps:$4 sm:$0xff]  }
0x12e4   : > { %7878 = vmatpush1.bf16.msra.mxu0 %v21458_v17  ;;  %v21410_v17 = vld [vmem:[#allocation5 + $0x8e0] ss:$8 sps:$4 sm:$0xff]  }
0x12e5   : > { %7879 = vmatprep.subr.bf16.mxu0 %v21463_v3  ;;  %v21415_v3 = vld [vmem:[#allocation5 + $0x8d4] ss:$8 sps:$4 sm:$0xff]  }
0x12e8   : > { %7880 = vmatpush1.bf16.msra.mxu0 %v21461_v22  ;;  %v21413_v22 = vld [vmem:[#allocation5 + $0x8d0] ss:$8 sps:$4 sm:$0xff]  }
0x12e9   : > { %7881 = vmatprep.subr.bf16.mxu0 %v21466_v23  ;;  %v21418_v23 = vld [vmem:[#allocation5 + $0x8c4] ss:$8 sps:$4 sm:$0xff]  }
0x12ec   : > { %7882 = vmatpush1.bf16.msra.mxu0 %v21464_v24  ;;  %v21416_v24 = vld [vmem:[#allocation5 + $0x8c0] ss:$8 sps:$4 sm:$0xff]  }
0x12ed   : > { %7883 = vmatprep.subr.bf16.mxu0 %v21469_v34  ;;  %v21421_v34 = vld [vmem:[#allocation5 + $0x8b4] ss:$8 sps:$4 sm:$0xff]  }
0x12f0   : > { %7884 = vmatpush1.bf16.msra.mxu0 %v21467_v25  ;;  %v21419_v25 = vld [vmem:[#allocation5 + $0x8b0] ss:$8 sps:$4 sm:$0xff]  }
0x12f1   : > { %7885 = vmatprep.subr.bf16.mxu0 %v21472_v26  ;;  %v21424_v26 = vld [vmem:[#allocation5 + $0x8a4] ss:$8 sps:$4 sm:$0xff]  }
0x12f4   : > { %7886 = vmatpush1.bf16.msra.mxu0 %v21470_v10  ;;  %v6639_v10 = vadd.f32 %v23647_v42, %v23624_v20  ;;  %v21436_v20 = vld [vmem:[#allocation5 + $0x964] ss:$8 sps:$4 sm:$0xff]   ;;  %v21434_v42 = vld [vmem:[#allocation5 + $0x960] ss:$8 sps:$4 sm:$0xff]  }
0x12f5   : > { %7887 = vmatprep.subr.bf16.mxu0 %v21475_v36  ;;  %v21427_v36 = vld [vmem:[#allocation5 + $0x894] ss:$8 sps:$4 sm:$0xff]  }
0x12f8   : > { %7888 = vmatpush1.bf16.msra.mxu0 %v21473_v39  ;;  %v21428_v39 = vld [vmem:[#allocation5 + $0x880] ss:$8 sps:$4 sm:$0xff]  }
0x12f9   : > { %7889 = vmatprep.subr.bf16.mxu0 %v21478_v40  ;;  %v21433_v40 = vld [vmem:[#allocation5 + $0x974] ss:$8 sps:$4 sm:$0xff]  }
0x12fc   : > { %7890 = vmatpush1.bf16.msra.mxu0 %v21476_v33  ;;  %v21437_v33 = vld [vmem:[#allocation5 + $0x950] ss:$8 sps:$4 sm:$0xff]  }
0x12fd   : > { %7891 = vmatprep.subr.bf16.mxu0 %v21481_v50  ;;  %v21496_v50 = vld [vmem:[#allocation5 + $0xa24] ss:$8 sps:$4 sm:$0xff]  }
0x1300   : > { %7892 = vmatpush2.bf16.msra.mxu0 %v21479_v55  ;;  %v21499_v55 = vld [vmem:[#allocation5 + $0xa14] ss:$8 sps:$4 sm:$0xff]  }
0x1301   : > { %7893 = vmatprep.subr.bf16.mxu0 %v21484_v56  ;;  %v21497_v56 = vld [vmem:[#allocation5 + $0xa10] ss:$8 sps:$4 sm:$0xff]  }
0x1304   : > { %7894 = vmatpush2.bf16.msra.mxu0 %v21482_v47  ;;  %v21500_v47 = vld [vmem:[#allocation5 + $0xa00] ss:$8 sps:$4 sm:$0xff]  }
0x1305   : > { %7895 = vmatprep.subr.bf16.mxu0 %v21487_v58  ;;  %v21446_v58 = vld [vmem:[#allocation5 + $0x920] ss:$8 sps:$4 sm:$0xff]  }
0x1308   : > { %7896 = vmatpush2.bf16.msra.mxu0 %v21485_v62  ;;  %v21449_v62 = vld [vmem:[#allocation5 + $0x910] ss:$8 sps:$4 sm:$0xff]  }
0x1309   : > { %7897 = vmatprep.subr.bf16.mxu0 %v21490_v63  ;;  %v21452_v63 = vld [vmem:[#allocation5 + $0x900] ss:$8 sps:$4 sm:$0xff]  }
0x135f   : > { %v6892_v0 = vpop.f32.mrf.mxu0  ;;  %v7125_v49 = vpop.f32.mrf.mxu1 }
0x1360   : > { %v7365_v15 = vpack.c.bf16 %v7125_v49, %v6892_v0  ;;  %v21392_v0 = vld [vmem:[#allocation5 + $0x840] ss:$8 sps:$4 sm:$0xff]   ;;  %v21397_v49 = vld [vmem:[#allocation5 + $0x834] ss:$8 sps:$4 sm:$0xff]  }
0x1361   : > { %v6894_v4 = vpop.f32.mrf.mxu0  ;;  %v7127_v5 = vpop.f32.mrf.mxu1 }
0x1362   : > { %v7366_v6 = vpack.c.bf16 %v7127_v5, %v6894_v4  ;;  %v21395_v4 = vld [vmem:[#allocation5 + $0x830] ss:$8 sps:$4 sm:$0xff]   ;;  %v21400_v5 = vld [vmem:[#allocation5 + $0x824] ss:$8 sps:$4 sm:$0xff]  }
0x1363   : > { %v6896_v7 = vpop.f32.mrf.mxu0  ;;  %v7129_v8 = vpop.f32.mrf.mxu1 }
0x1364   : > { %v21403_v7 = vld [vmem:[#allocation5 + $0x814] ss:$8 sps:$4 sm:$0xff]   ;;  %v21401_v8 = vld [vmem:[#allocation5 + $0x810] ss:$8 sps:$4 sm:$0xff]  }
0x1365   : > { %v6897_v13 = vpop.f32.mrf.mxu0  ;;  %v7130_v14 = vpop.f32.mrf.mxu1 }
0x1366   : > { %v21406_v13 = vld [vmem:[#allocation5 + $0x804] ss:$8 sps:$4 sm:$0xff]   ;;  %v21404_v14 = vld [vmem:[#allocation5 + $0x800] ss:$8 sps:$4 sm:$0xff]  }
0x139f   : > { %v7358_v35 = vpop.f32.mrf.mxu0 }
0x13a0   : > { %v7367_v11 = vpack.c.bf16 %v7358_v35, %v7358_v35  ;;  %v21422_v35 = vld [vmem:[#allocation5 + $0x8a0] ss:$8 sps:$4 sm:$0xff]  }
0x13a1   : > { %v7360_v37 = vpop.f32.mrf.mxu0 }
0x13a2   : > { %v7368_v53 = vpack.c.bf16 %v7360_v37, %v7360_v37  ;;  %v7370_v18 = vsel %vm2109_vm7, %v7367_v11, 0  ;;  %v6651_v11 = vrot.slane %v23655_v31, %v23231_v27  ;;  %v21425_v37 = vld [vmem:[#allocation5 + $0x890] ss:$8 sps:$4 sm:$0xff]   ;;  %v21493_v31 = vld [vmem:[#allocation5 + $0xa34] ss:$8 sps:$4 sm:$0xff]  }
0x13a3   : > { %v7362_v32 = vpop.f32.mrf.mxu0 }
0x13a4   : > { %17700 = vmatprep.subr.msk.bf16.mxu1 %vm2109_vm7, %v7368_v53  ;;  %v6658_v53 = vadd.f32 %v6651_v11, %v6639_v10  ;;  %v21430_v32 = vld [vmem:[#allocation5 + $0x884] ss:$8 sps:$4 sm:$0xff]   ;;  %v21518_v11 = vld [vmem:[#allocation5 + $0xaa0] ss:$8 sps:$4 sm:$0xff]  }
0x13a5   : > { %v7363_v41 = vpop.f32.mrf.mxu0  ;;  %7388 = vmatpush1.bf16.msra.mxu1 %v7370_v18  ;;  %v21520_v10 = vld [vmem:[#allocation5 + $0xaa4] ss:$8 sps:$4 sm:$0xff]  }
0x13a6   : > { %7389 = vmatprep.subr.bf16.mxu1 %v7366_v6  ;;  %v21398_v6 = vld [vmem:[#allocation5 + $0x820] ss:$8 sps:$4 sm:$0xff]   ;;  %v6660_v18 = vmax.f32 %v6658_v53, 0.0  ;;  %v21431_v41 = vld [vmem:[#allocation5 + $0x970] ss:$8 sps:$4 sm:$0xff]  }
0x13a7   : > { %v21526_v53 = vld [vmem:[#allocation5 + $0xa84] ss:$8 sps:$4 sm:$0xff]  }
0x13a9   : > { %7390 = vmatpush1.bf16.msra.mxu1 %v7365_v15  ;;  %v21488_v15 = vld [vmem:[#allocation5 + $0xa40] ss:$8 sps:$4 sm:$0xff]  }
0x13aa   : > { %7624 = vmatprep.subr.bf16.mxu1 %v21385_v19  ;;  %7898 = vmatpush2.bf16.msra.mxu0 %v21488_v15  ;;  %v23673_v19 = vpack.c.bf16 %v6660_v18, %v6660_v18  ;;  %v21527_v18 = vld [vmem:[#allocation5 + $0xb70] ss:$8 sps:$4 sm:$0xff]  }
0x13ab   : > { %7899 = vmatprep.subr.bf16.mxu0 %v21493_v31  ;;  %v21538_v31 = vld [vmem:[#allocation5 + $0xb44] ss:$8 sps:$4 sm:$0xff]  }
0x13ac   : > { %17701 = vmatmul.mubr.msk.bf16.vlgmr.msra.gmra.mxu1 %vm2102_vm6, %v22601_v45  ;;  %v21445_v45 = vld [vmem:[#allocation5 + $0x934] ss:$8 sps:$4 sm:$0xff]  }
0x13ad   : > { %7625 = vmatpush1.bf16.msra.mxu1 %v21383_v51  ;;  %7417 = vmatprep.mubr.bf16.mxu1 %v22746_v1  ;;  %v21442_v51 = vld [vmem:[#allocation5 + $0x944] ss:$8 sps:$4 sm:$0xff]  }
0x13ae   : > { %7626 = vmatprep.subr.bf16.mxu1 %v21388_v52  ;;  %7900 = vmatpush2.bf16.msra.mxu0 %v21491_v48  ;;  %v21494_v52 = vld [vmem:[#allocation5 + $0xa20] ss:$8 sps:$4 sm:$0xff]   ;;  %v21541_v48 = vld [vmem:[#allocation5 + $0xb34] ss:$8 sps:$4 sm:$0xff]  }
0x13af   : > { %7901 = vmatprep.subr.bf16.mxu0 %v21496_v50  ;;  %v21539_v50 = vld [vmem:[#allocation5 + $0xb30] ss:$8 sps:$4 sm:$0xff]  }
0x13b1   : > { %7627 = vmatpush1.bf16.msra.mxu1 %v21386_v21  ;;  %v21443_v21 = vld [vmem:[#allocation5 + $0x930] ss:$8 sps:$4 sm:$0xff]  }
0x13b2   : > { %7628 = vmatprep.subr.bf16.mxu1 %v21391_v43  ;;  %7902 = vmatpush2.bf16.msra.mxu0 %v21494_v52  ;;  %v21502_v43 = vld [vmem:[#allocation5 + $0xa04] ss:$8 sps:$4 sm:$0xff]  }
0x13b3   : > { %7903 = vmatprep.subr.bf16.mxu0 %v21499_v55  ;;  %v21544_v52 = vld [vmem:[#allocation5 + $0xb24] ss:$8 sps:$4 sm:$0xff]  }
0x13b4   : > { %17702 = vmatmul.mubr.msk.bf16.gmra.mxu1 %vm2102_vm6, %v22602_v12  ;;  %v21454_v12 = vld [vmem:[#allocation5 + $0x904] ss:$8 sps:$4 sm:$0xff]  }
0x13b5   : > { %7629 = vmatpush1.bf16.msra.mxu1 %v21389_v59  ;;  %7656 = vmatprep.mubr.bf16.mxu1 %v23664_v61  ;;  %v21505_v59 = vld [vmem:[#allocation5 + $0xaf4] ss:$8 sps:$4 sm:$0xff]  }
0x13b6   : > { %7630 = vmatprep.subr.bf16.mxu1 %v21394_v60  ;;  %7904 = vmatpush2.bf16.msra.mxu0 %v21497_v56  ;;  %v21451_v60 = vld [vmem:[#allocation5 + $0x914] ss:$8 sps:$4 sm:$0xff]  }
0x13b7   : > { %7905 = vmatprep.subr.bf16.mxu0 %v21502_v43  ;;  %v21545_v43 = vld [vmem:[#allocation5 + $0xb10] ss:$8 sps:$4 sm:$0xff]  }
0x13b9   : > { %7631 = vmatpush1.bf16.msra.mxu1 %v21392_v0 }
0x13ba   : > { %7632 = vmatprep.subr.bf16.mxu1 %v21397_v49  ;;  %7906 = vmatpush2.bf16.msra.mxu0 %v21500_v47  ;;  %v21548_v47 = vld [vmem:[#allocation5 + $0xb00] ss:$8 sps:$4 sm:$0xff]  }
0x13bb   : > { %8235 = vmatprep.subr.bf16.mxu0 %v21505_v59  ;;  %v21551_v59 = vld [vmem:[%s24870_s26 + $0x70] ss:$8 sps:$4 sm:$0xff]  }
0x13bd   : > { %7633 = vmatpush1.bf16.msra.mxu1 %v21395_v4 }
0x13be   : > { %7634 = vmatprep.subr.bf16.mxu1 %v21400_v5 }
0x13c1   : > { %7635 = vmatpush1.bf16.msra.mxu1 %v21398_v6 }
0x13c2   : > { %7636 = vmatprep.subr.bf16.mxu1 %v21403_v7 }
0x13c5   : > { %7637 = vmatpush1.bf16.msra.mxu1 %v21401_v8 }
0x13c6   : > { %7638 = vmatprep.subr.bf16.mxu1 %v21406_v13 }
0x13c9   : > { %7639 = vmatpush1.bf16.msra.mxu1 %v21404_v14 }
0x13ca   : > { %7640 = vmatprep.subr.bf16.mxu1 %v21409_v38 }
0x13cd   : > { %7641 = vmatpush2.bf16.msra.mxu1 %v21407_v29 }
0x13ce   : > { %7642 = vmatprep.subr.bf16.mxu1 %v21412_v16 }
0x13d1   : > { %7643 = vmatpush2.bf16.msra.mxu1 %v21410_v17  ;;  %v21503_v17 = vld [vmem:[#allocation5 + $0xaf0] ss:$8 sps:$4 sm:$0xff]  }
0x13d2   : > { %7644 = vmatprep.subr.bf16.mxu1 %v21415_v3 }
0x13d5   : > { %7645 = vmatpush2.bf16.msra.mxu1 %v21413_v22  ;;  %v21508_v22 = vld [vmem:[#allocation5 + $0xae4] ss:$8 sps:$4 sm:$0xff]  }
0x13d6   : > { %7646 = vmatprep.subr.bf16.mxu1 %v21418_v23  ;;  %v21511_v23 = vld [vmem:[#allocation5 + $0xad4] ss:$8 sps:$4 sm:$0xff]  }
0x13d9   : > { %7647 = vmatpush2.bf16.msra.mxu1 %v21416_v24  ;;  %v21509_v24 = vld [vmem:[#allocation5 + $0xad0] ss:$8 sps:$4 sm:$0xff]  }
0x13da   : > { %7648 = vmatprep.subr.bf16.mxu1 %v21421_v34  ;;  %v21514_v34 = vld [vmem:[#allocation5 + $0xac4] ss:$8 sps:$4 sm:$0xff]  }
0x13dd   : > { %7649 = vmatpush2.bf16.msra.mxu1 %v21419_v25  ;;  %v21512_v25 = vld [vmem:[#allocation5 + $0xac0] ss:$8 sps:$4 sm:$0xff]  }
0x13de   : > { %7650 = vmatprep.subr.bf16.mxu1 %v21424_v26  ;;  %v21517_v26 = vld [vmem:[#allocation5 + $0xab4] ss:$8 sps:$4 sm:$0xff]  }
0x13e1   : > { %7651 = vmatpush2.bf16.msra.mxu1 %v21422_v35  ;;  %v21515_v35 = vld [vmem:[#allocation5 + $0xab0] ss:$8 sps:$4 sm:$0xff]  }
0x13e2   : > { %7652 = vmatprep.subr.bf16.mxu1 %v21427_v36  ;;  %v21523_v36 = vld [vmem:[#allocation5 + $0xa94] ss:$8 sps:$4 sm:$0xff]  }
0x13e5   : > { %7653 = vmatpush2.bf16.msra.mxu1 %v21425_v37  ;;  %v21521_v37 = vld [vmem:[#allocation5 + $0xa90] ss:$8 sps:$4 sm:$0xff]  }
0x13e6   : > { %7654 = vmatprep.subr.bf16.mxu1 %v21430_v32  ;;  %v21524_v32 = vld [vmem:[#allocation5 + $0xa80] ss:$8 sps:$4 sm:$0xff]  }
0x13e9   : > { %7655 = vmatpush2.bf16.msra.mxu1 %v21428_v39  ;;  %v21529_v39 = vld [vmem:[#allocation5 + $0xb74] ss:$8 sps:$4 sm:$0xff]  }
0x13ea   : > { %7998 = vmatprep.subr.bf16.mxu1 %v21433_v40  ;;  %v21532_v40 = vld [vmem:[#allocation5 + $0xb64] ss:$8 sps:$4 sm:$0xff]  }
0x13ec   : > { %7657 = vmatmul.mubr.bf16.vlgmr.msra.gmra.mxu1 %v23673_v19 }
0x13ed   : > { %7999 = vmatpush1.bf16.msra.mxu1 %v21431_v41  ;;  %8030 = vmatprep.mubr.bf16.mxu1 %v22746_v1  ;;  %v21530_v41 = vld [vmem:[#allocation5 + $0xb60] ss:$8 sps:$4 sm:$0xff]  }
0x13ee   : > { %8000 = vmatprep.subr.bf16.mxu1 %v21436_v20  ;;  %v21535_v20 = vld [vmem:[#allocation5 + $0xb54] ss:$8 sps:$4 sm:$0xff]  }
0x13f1   : > { %8001 = vmatpush1.bf16.msra.mxu1 %v21434_v42  ;;  %v21533_v42 = vld [vmem:[#allocation5 + $0xb50] ss:$8 sps:$4 sm:$0xff]  }
0x13f2   : > { %8002 = vmatprep.subr.bf16.mxu1 %v21439_v44  ;;  %v21536_v44 = vld [vmem:[#allocation5 + $0xb40] ss:$8 sps:$4 sm:$0xff]  }
0x13f5   : > { %8003 = vmatpush1.bf16.msra.mxu1 %v21437_v33 }
0x13f6   : > { %8004 = vmatprep.subr.bf16.mxu1 %v21442_v51 }
0x13f9   : > { %8005 = vmatpush1.bf16.msra.mxu1 %v21440_v54 }
0x13fa   : > { %8006 = vmatprep.subr.bf16.mxu1 %v21445_v45  ;;  %v21542_v45 = vld [vmem:[#allocation5 + $0xb20] ss:$8 sps:$4 sm:$0xff]  }
0x13fd   : > { %8007 = vmatpush1.bf16.msra.mxu1 %v21443_v21  ;;  %v21547_v21 = vld [vmem:[#allocation5 + $0xb14] ss:$8 sps:$4 sm:$0xff]  }
0x13fe   : > { %8008 = vmatprep.subr.bf16.mxu1 %v21448_v57  ;;  %v21550_v57 = vld [vmem:[#allocation5 + $0xb04] ss:$8 sps:$4 sm:$0xff]  }
0x1401   : > { %8009 = vmatpush1.bf16.msra.mxu1 %v21446_v58 }
0x1402   : > { %8010 = vmatprep.subr.bf16.mxu1 %v21451_v60  ;;  %v21553_v60 = vld [vmem:[%s24870_s26 + $0x74] ss:$8 sps:$4 sm:$0xff]  }
0x1405   : > { %8011 = vmatpush1.bf16.msra.mxu1 %v21449_v62  ;;  %v21554_v62 = vld [vmem:[%s24870_s26 + $0x170] ss:$8 sps:$4 sm:$0xff]  }
0x1406   : > { %8012 = vmatprep.subr.bf16.mxu1 %v21454_v12  ;;  %v21556_v12 = vld [vmem:[%s24870_s26 + $0x174] ss:$8 sps:$4 sm:$0xff]  }
0x1409   : > { %8013 = vmatpush1.bf16.msra.mxu1 %v21452_v63  ;;  %v21559_v63 = vld [vmem:[%s24870_s26 + $0x64] ss:$8 sps:$4 sm:$0xff]  }
0x140a   : > { %8503 = vmatprep.subr.bf16.mxu1 %v21553_v60  ;;  %v21635_v60 = vld [vmem:[%s24870_s26 + $0x90] ss:$8 sps:$4 sm:$0xff]  }
0x140c   : > { %8031 = vmatmul.mubr.bf16.vlgmr.msra.gmra.mxu1 %v23603_v46  ;;  %v21506_v46 = vld [vmem:[#allocation5 + $0xae0] ss:$8 sps:$4 sm:$0xff]  }
0x140d   : > { %8504 = vmatpush1.bf16.msra.mxu1 %v21551_v59  ;;  %v21637_v59 = vld [vmem:[%s24870_s26 + $0x94] ss:$8 sps:$4 sm:$0xff]  }
0x140e   : > { %8505 = vmatprep.subr.bf16.mxu1 %v21559_v63  ;;  %v21643_v63 = vld [vmem:[%s24870_s26 + $0x84] ss:$8 sps:$4 sm:$0xff]  }
0x146c   : > { %v7409_v0 = vpop.f32.mrf.mxu1 }
0x146e   : > { %v7411_v49 = vpop.f32.mrf.mxu1 }
0x1470   : > { %v7413_v15 = vpop.f32.mrf.mxu1 }
0x1472   : > { %v7415_v4 = vpop.f32.mrf.mxu1 }
0x1474   : > { %v7419_v5 = vpop.f32.mrf.mxu1 }
0x1475   : > { %v7428_v29 = vmax.f32 %v7409_v0, %v7419_v5  ;;  %v21562_v0 = vld [vmem:[%s24870_s26 + $0x164] ss:$8 sps:$4 sm:$0xff]   ;;  %v21568_v5 = vld [vmem:[%s24870_s26 + $0x154] ss:$8 sps:$4 sm:$0xff]  }
0x1476   : > { %v7421_v6 = vpop.f32.mrf.mxu1 }
0x1477   : > { %v7429_v14 = vmax.f32 %v7411_v49, %v7421_v6  ;;  %v21557_v49 = vld [vmem:[%s24870_s26 + $0x60] ss:$8 sps:$4 sm:$0xff]   ;;  %v21563_v6 = vld [vmem:[%s24870_s26 + $0x50] ss:$8 sps:$4 sm:$0xff]  }
0x1478   : > { %v7423_v7 = vpop.f32.mrf.mxu1  ;;  %8506 = vmatpush1.bf16.msra.mxu1 %v21557_v49  ;;  %v21646_v49 = vld [vmem:[%s24870_s26 + $0x184] ss:$8 sps:$4 sm:$0xff]  }
0x1479   : > { %v7430_v8 = vmax.f32 %v7413_v15, %v7423_v7  ;;  %v21560_v15 = vld [vmem:[%s24870_s26 + $0x160] ss:$8 sps:$4 sm:$0xff]   ;;  %v21566_v7 = vld [vmem:[%s24870_s26 + $0x150] ss:$8 sps:$4 sm:$0xff]  }
0x147a   : > { %v7425_v13 = vpop.f32.mrf.mxu1 }
0x147b   : > { %v7431_v38 = vmax.f32 %v7415_v4, %v7425_v13  ;;  %v7713_v3 = vpack.c.bf16 %v7430_v8, %v7428_v29  ;;  %v21565_v4 = vld [vmem:[%s24870_s26 + $0x54] ss:$8 sps:$4 sm:$0xff]   ;;  %v21571_v8 = vld [vmem:[%s24870_s26 + $0x44] ss:$8 sps:$4 sm:$0xff]  }
0x147c   : > { %8507 = vmatprep.subr.bf16.mxu1 %v21565_v4  ;;  %v21574_v13 = vld [vmem:[%s24870_s26 + $0x144] ss:$8 sps:$4 sm:$0xff]   ;;  %v21577_v29 = vld [vmem:[%s24870_s26 + $0x34] ss:$8 sps:$4 sm:$0xff]  }
0x147d   : > { %v7714_v16 = vpack.c.bf16 %v7431_v38, %v7429_v14  ;;  %8508 = vmatpush1.bf16.msra.mxu1 %v21563_v6  ;;  %v21569_v14 = vld [vmem:[%s24870_s26 + $0x40] ss:$8 sps:$4 sm:$0xff]   ;;  %v21649_v4 = vld [vmem:[%s24870_s26 + $0x274] ss:$8 sps:$4 sm:$0xff]  }
0x147e   : > { %8509 = vmatprep.subr.bf16.mxu1 %v21571_v8  ;;  %v21572_v38 = vld [vmem:[%s24870_s26 + $0x140] ss:$8 sps:$4 sm:$0xff]  }
0x147f   : > { %7907 = vmatprep.mubr.bf16.mxu0 %v7714_v16  ;;  %v21580_v16 = vld [vmem:[%s24870_s26 + $0x134] ss:$8 sps:$4 sm:$0xff]  }
0x1480   : > { %7908 = vmatmul.mubr.bf16.vlgmr.msra.gmra.mxu0 %v7713_v3  ;;  %v21578_v3 = vld [vmem:[%s24870_s26 + $0x130] ss:$8 sps:$4 sm:$0xff]  }
0x1481   : > { %8236 = vmatpush1.bf16.msra.mxu0 %v21503_v17  ;;  %8510 = vmatpush1.bf16.msra.mxu1 %v21569_v14  ;;  %v21575_v17 = vld [vmem:[%s24870_s26 + $0x30] ss:$8 sps:$4 sm:$0xff]  }
0x1482   : > { %8237 = vmatprep.subr.bf16.mxu0 %v21508_v22  ;;  %8511 = vmatprep.subr.bf16.mxu1 %v21577_v29  ;;  %v21583_v22 = vld [vmem:[%s24870_s26 + $0x24] ss:$8 sps:$4 sm:$0xff]  }
0x1483   : > { %v17815_v29 = vld [vmem:[%s24869_s0 + $0x4] sm:$0x3]  ;;  %s24875_s0 = sld [smem:[#allocation21_spill]] }
0x1485   : > { %8238 = vmatpush1.bf16.msra.mxu0 %v21506_v46  ;;  %v21586_v46 = vld [vmem:[%s24870_s26 + $0x124] ss:$8 sps:$4 sm:$0xff]   ;;  %8512 = vmatpush1.bf16.msra.mxu1 %v21575_v17 }
0x1486   : > { %8239 = vmatprep.subr.bf16.mxu0 %v21511_v23  ;;  %v21581_v23 = vld [vmem:[%s24870_s26 + $0x20] ss:$8 sps:$4 sm:$0xff]   ;;  %8513 = vmatprep.subr.bf16.mxu1 %v21583_v22 }
0x1489   : > { %8240 = vmatpush1.bf16.msra.mxu0 %v21509_v24  ;;  %v21584_v24 = vld [vmem:[%s24870_s26 + $0x120] ss:$8 sps:$4 sm:$0xff]   ;;  %8514 = vmatpush1.bf16.msra.mxu1 %v21581_v23 }
0x148a   : > { %8241 = vmatprep.subr.bf16.mxu0 %v21514_v34  ;;  %v21589_v34 = vld [vmem:[%s24870_s26 + $0x14] ss:$8 sps:$4 sm:$0xff]  }
0x148b   : > { %8515 = vmatprep.subr.bf16.mxu1 %v21589_v34 }
0x148d   : > { %8242 = vmatpush1.bf16.msra.mxu0 %v21512_v25  ;;  %v21592_v25 = vld [vmem:[%s24870_s26 + $0x114] ss:$8 sps:$4 sm:$0xff]  }
0x148e   : > { %8243 = vmatprep.subr.bf16.mxu0 %v21517_v26  ;;  %v21587_v26 = vld [vmem:[%s24870_s26 + $0x10] ss:$8 sps:$4 sm:$0xff]  }
0x148f   : > { %8516 = vmatpush1.bf16.msra.mxu1 %v21587_v26 }
0x1491   : > { %8244 = vmatpush1.bf16.msra.mxu0 %v21515_v35  ;;  %v21590_v35 = vld [vmem:[%s24870_s26 + $0x110] ss:$8 sps:$4 sm:$0xff]  }
0x1492   : > { %8245 = vmatprep.subr.bf16.mxu0 %v21520_v10  ;;  %v21595_v10 = vld [vmem:[%s24870_s26 + $0x4] ss:$8 sps:$4 sm:$0xff]  }
0x1493   : > { %8517 = vmatprep.subr.bf16.mxu1 %v21595_v10 }
0x1495   : > { %8246 = vmatpush1.bf16.msra.mxu0 %v21518_v11  ;;  %v21598_v11 = vld [vmem:[%s24870_s26 + $0x104] ss:$8 sps:$4 sm:$0xff]  }
0x1496   : > { %8247 = vmatprep.subr.bf16.mxu0 %v21523_v36  ;;  %v21593_v36 = vld [vmem:[%s24870_s26] ss:$8 sps:$4 sm:$0xff]  }
0x1497   : > { %8518 = vmatpush1.bf16.msra.mxu1 %v21593_v36 }
0x1499   : > { %8248 = vmatpush1.bf16.msra.mxu0 %v21521_v37  ;;  %v21596_v37 = vld [vmem:[%s24870_s26 + $0x100] ss:$8 sps:$4 sm:$0xff]  }
0x149a   : > { %8249 = vmatprep.subr.bf16.mxu0 %v21526_v53  ;;  %v21601_v53 = vld [vmem:[%s24870_s26 + $0xf4] ss:$8 sps:$4 sm:$0xff]  }
0x149b   : > { %8519 = vmatprep.subr.bf16.mxu1 %v21601_v53 }
0x149d   : > { %8250 = vmatpush1.bf16.msra.mxu0 %v21524_v32  ;;  %v21604_v32 = vld [vmem:[%s24870_s26 + $0x1f4] ss:$8 sps:$4 sm:$0xff]  }
0x149e   : > { %8251 = vmatprep.subr.bf16.mxu0 %v21529_v39  ;;  %v21599_v39 = vld [vmem:[%s24870_s26 + $0xf0] ss:$8 sps:$4 sm:$0xff]  }
0x149f   : > { %8520 = vmatpush2.bf16.msra.mxu1 %v21599_v39 }
0x14a1   : > { %8252 = vmatpush2.bf16.msra.mxu0 %v21527_v18  ;;  %v21602_v18 = vld [vmem:[%s24870_s26 + $0x1f0] ss:$8 sps:$4 sm:$0xff]  }
0x14a2   : > { %8253 = vmatprep.subr.bf16.mxu0 %v21532_v40  ;;  %v21607_v40 = vld [vmem:[%s24870_s26 + $0xe4] ss:$8 sps:$4 sm:$0xff]  }
0x14a3   : > { %8521 = vmatprep.subr.bf16.mxu1 %v21607_v40 }
0x14a5   : > { %8254 = vmatpush2.bf16.msra.mxu0 %v21530_v41  ;;  %v21610_v41 = vld [vmem:[%s24870_s26 + $0x1e4] ss:$8 sps:$4 sm:$0xff]  }
0x14a6   : > { %8255 = vmatprep.subr.bf16.mxu0 %v21535_v20  ;;  %v21605_v20 = vld [vmem:[%s24870_s26 + $0xe0] ss:$8 sps:$4 sm:$0xff]  }
0x14a7   : > { %8522 = vmatpush2.bf16.msra.mxu1 %v21605_v20 }
0x14a9   : > { %8256 = vmatpush2.bf16.msra.mxu0 %v21533_v42  ;;  %v21608_v42 = vld [vmem:[%s24870_s26 + $0x1e0] ss:$8 sps:$4 sm:$0xff]  }
0x14aa   : > { %8257 = vmatprep.subr.bf16.mxu0 %v21538_v31  ;;  %v21613_v31 = vld [vmem:[%s24870_s26 + $0xd4] ss:$8 sps:$4 sm:$0xff]  }
0x14ab   : > { %8523 = vmatprep.subr.bf16.mxu1 %v21613_v31 }
0x14ac   : > { %v7658_v33 = vpop.f32.mrf.mxu1 }
0x14ad   : > { %8258 = vmatpush2.bf16.msra.mxu0 %v21536_v44  ;;  %v8073_v58 = vpack.c.bf16 %v7658_v33, %v7658_v33  ;;  %v21616_v44 = vld [vmem:[%s24870_s26 + $0x1d4] ss:$8 sps:$4 sm:$0xff]   ;;  %v21614_v33 = vld [vmem:[%s24870_s26 + $0x1d0] ss:$8 sps:$4 sm:$0xff]  }
0x14ae   : > { %v7660_v51 = vpop.f32.mrf.mxu1  ;;  %8259 = vmatprep.subr.bf16.mxu0 %v21541_v48  ;;  %v21611_v48 = vld [vmem:[%s24870_s26 + $0xd0] ss:$8 sps:$4 sm:$0xff]  }
0x14af   : > { %v8074_v54 = vpack.c.bf16 %v7660_v51, %v7660_v51  ;;  %v21622_v51 = vld [vmem:[%s24870_s26 + $0x1c4] ss:$8 sps:$4 sm:$0xff]   ;;  %8524 = vmatpush2.bf16.msra.mxu1 %v21611_v48 }
0x14b0   : > { %v7662_v55 = vpop.f32.mrf.mxu1 }
0x14b1   : > { %8260 = vmatpush2.bf16.msra.mxu0 %v21539_v50  ;;  %8267 = vmatprep.mubr.bf16.mxu0 %v8074_v54  ;;  %v21619_v50 = vld [vmem:[%s24870_s26 + $0xc4] ss:$8 sps:$4 sm:$0xff]   ;;  %v21620_v54 = vld [vmem:[%s24870_s26 + $0x1c0] ss:$8 sps:$4 sm:$0xff]   ;;  %v21625_v55 = vld [vmem:[%s24870_s26 + $0xb4] ss:$8 sps:$4 sm:$0xff]  }
0x14b2   : > { %v7663_v56 = vpop.f32.mrf.mxu1  ;;  %8261 = vmatprep.subr.bf16.mxu0 %v21544_v52  ;;  %v21617_v52 = vld [vmem:[%s24870_s26 + $0xc0] ss:$8 sps:$4 sm:$0xff]   ;;  %8525 = vmatprep.subr.bf16.mxu1 %v21619_v50 }
0x14b3   : > { %8526 = vmatpush2.bf16.msra.mxu1 %v21617_v52  ;;  %v21623_v56 = vld [vmem:[%s24870_s26 + $0xb0] ss:$8 sps:$4 sm:$0xff]   ;;  %v21650_v52 = vld [vmem:[%s24870_s26 + $0x260] ss:$8 sps:$4 sm:$0xff]  }
0x14b4   : > { %8527 = vmatprep.subr.bf16.mxu1 %v21625_v55  ;;  %v21653_v55 = vld [vmem:[%s24870_s26 + $0x250] ss:$8 sps:$4 sm:$0xff]  }
0x14b5   : > { %8262 = vmatpush2.bf16.msra.mxu0 %v21542_v45  ;;  %v21628_v45 = vld [vmem:[%s24870_s26 + $0x1b4] ss:$8 sps:$4 sm:$0xff]  }
0x14b6   : > { %8263 = vmatprep.subr.bf16.mxu0 %v21547_v21  ;;  %v21626_v21 = vld [vmem:[%s24870_s26 + $0x1b0] ss:$8 sps:$4 sm:$0xff]  }
0x14b7   : > { %8528 = vmatpush2.bf16.msra.mxu1 %v21623_v56  ;;  %v21656_v56 = vld [vmem:[%s24870_s26 + $0x240] ss:$8 sps:$4 sm:$0xff]  }
0x14b9   : > { %8264 = vmatpush2.bf16.msra.mxu0 %v21545_v43  ;;  %v21631_v43 = vld [vmem:[%s24870_s26 + $0xa4] ss:$8 sps:$4 sm:$0xff]  }
0x14ba   : > { %8265 = vmatprep.subr.bf16.mxu0 %v21550_v57  ;;  %v21629_v57 = vld [vmem:[%s24870_s26 + $0xa0] ss:$8 sps:$4 sm:$0xff]   ;;  %8529 = vmatprep.subr.bf16.mxu1 %v21631_v43  ;;  %v21659_v43 = vld [vmem:[%s24870_s26 + $0x230] ss:$8 sps:$4 sm:$0xff]  }
0x14bb   : > { %8530 = vmatpush2.bf16.msra.mxu1 %v21629_v57  ;;  %v21664_v57 = vld [vmem:[%s24870_s26 + $0x224] ss:$8 sps:$4 sm:$0xff]  }
0x14bc   : > { %8531 = vmatprep.subr.bf16.mxu1 %v21637_v59  ;;  %v21665_v59 = vld [vmem:[%s24870_s26 + $0x210] ss:$8 sps:$4 sm:$0xff]  }
0x14bd   : > { %8266 = vmatpush2.bf16.msra.mxu0 %v21548_v47  ;;  %v21634_v47 = vld [vmem:[%s24870_s26 + $0x1a4] ss:$8 sps:$4 sm:$0xff]  }
0x14be   : > { %8738 = vmatprep.subr.bf16.mxu0 %v21556_v12  ;;  %v21638_v12 = vld [vmem:[%s24870_s26 + $0x190] ss:$8 sps:$4 sm:$0xff]  }
0x14bf   : > { %8532 = vmatpush2.bf16.msra.mxu1 %v21635_v60  ;;  %v21670_v60 = vld [vmem:[%s24870_s26 + $0x204] ss:$8 sps:$4 sm:$0xff]  }
0x14c0   : > { %8268 = vmatmul.mubr.bf16.vlgmr.msra.gmra.mxu0 %v8073_v58  ;;  %v21632_v58 = vld [vmem:[%s24870_s26 + $0x1a0] ss:$8 sps:$4 sm:$0xff]   ;;  %8533 = vmatprep.subr.bf16.mxu1 %v21643_v63  ;;  %v21671_v63 = vld [vmem:[%s24870_s26 + $0x2f0] ss:$8 sps:$4 sm:$0xff]  }
0x14c1   : > { %8739 = vmatpush1.bf16.msra.mxu0 %v21554_v62  ;;  %v21640_v62 = vld [vmem:[%s24870_s26 + $0x194] ss:$8 sps:$4 sm:$0xff]  }
0x14c2   : > { %8740 = vmatprep.subr.bf16.mxu0 %v21562_v0  ;;  %v21641_v0 = vld [vmem:[%s24870_s26 + $0x80] ss:$8 sps:$4 sm:$0xff]  }
0x14c3   : > { %8534 = vmatpush2.bf16.msra.mxu1 %v21641_v0  ;;  %v21676_v0 = vld [vmem:[%s24870_s26 + $0x2e4] ss:$8 sps:$4 sm:$0xff]  }
0x14c4   : > { %8973 = vmatprep.subr.bf16.mxu1 %v21649_v4  ;;  %v21677_v4 = vld [vmem:[%s24870_s26 + $0x2d0] ss:$8 sps:$4 sm:$0xff]  }
0x14c5   : > { %8741 = vmatpush1.bf16.msra.mxu0 %v21560_v15  ;;  %v21644_v15 = vld [vmem:[%s24870_s26 + $0x180] ss:$8 sps:$4 sm:$0xff]  }
0x14c6   : > { %8742 = vmatprep.subr.bf16.mxu0 %v21568_v5 }
0x14c9   : > { %8743 = vmatpush1.bf16.msra.mxu0 %v21566_v7 }
0x14ca   : > { %8744 = vmatprep.subr.bf16.mxu0 %v21574_v13 }
0x14cc   : > { %v8032_v6 = vpop.f32.mrf.mxu1 }
0x14cd   : > { %8745 = vmatpush1.bf16.msra.mxu0 %v21572_v38 }
0x14ce   : > { %8746 = vmatprep.subr.bf16.mxu0 %v21580_v16  ;;  %v8034_v8 = vpop.f32.mrf.mxu1 }
0x14d0   : > { %v8036_v14 = vpop.f32.mrf.mxu1 }
0x14d1   : > { %8747 = vmatpush1.bf16.msra.mxu0 %v21578_v3 }
0x14d2   : > { %8748 = vmatprep.subr.bf16.mxu0 %v21586_v46  ;;  %v8294_v46 = vrot.slane %v17815_v29, %v23231_v27  ;;  %v8038_v23 = vpop.f32.mrf.mxu1 }
0x14d5   : > { %8749 = vmatpush1.bf16.msra.mxu0 %v21584_v24 }
0x14d6   : > { %8750 = vmatprep.subr.bf16.mxu0 %v21592_v25  ;;  %v8298_v25 = vrot.slane %v17815_v29, %v23631_v9  ;;  %v21689_v29 = vld [vmem:[%s24870_s26 + $0x290] ss:$8 sps:$4 sm:$0xff]  }
0x14d9   : > { %8751 = vmatpush1.bf16.msra.mxu0 %v21590_v35 }
0x14da   : > { %8752 = vmatprep.subr.bf16.mxu0 %v21598_v11 }
0x14dd   : > { %8753 = vmatpush1.bf16.msra.mxu0 %v21596_v37 }
0x14de   : > { %8754 = vmatprep.subr.bf16.mxu0 %v21604_v32 }
0x14e1   : > { %8755 = vmatpush2.bf16.msra.mxu0 %v21602_v18 }
0x14e2   : > { %8756 = vmatprep.subr.bf16.mxu0 %v21610_v41 }
0x14e5   : > { %8757 = vmatpush2.bf16.msra.mxu0 %v21608_v42 }
0x14e6   : > { %8758 = vmatprep.subr.bf16.mxu0 %v21616_v44 }
0x14e9   : > { %8759 = vmatpush2.bf16.msra.mxu0 %v21614_v33  ;;  %v21647_v33 = vld [vmem:[%s24870_s26 + $0x270] ss:$8 sps:$4 sm:$0xff]  }
0x14ea   : > { %8760 = vmatprep.subr.bf16.mxu0 %v21622_v51  ;;  %v21652_v51 = vld [vmem:[%s24870_s26 + $0x264] ss:$8 sps:$4 sm:$0xff]  }
0x14ed   : > { %8761 = vmatpush2.bf16.msra.mxu0 %v21620_v54  ;;  %v21655_v54 = vld [vmem:[%s24870_s26 + $0x254] ss:$8 sps:$4 sm:$0xff]  }
0x14ee   : > { %8762 = vmatprep.subr.bf16.mxu0 %v21628_v45  ;;  %v21658_v45 = vld [vmem:[%s24870_s26 + $0x244] ss:$8 sps:$4 sm:$0xff]  }
0x14f1   : > { %8763 = vmatpush2.bf16.msra.mxu0 %v21626_v21  ;;  %v21661_v21 = vld [vmem:[%s24870_s26 + $0x234] ss:$8 sps:$4 sm:$0xff]  }
0x14f2   : > { %8764 = vmatprep.subr.bf16.mxu0 %v21634_v47  ;;  %v21662_v47 = vld [vmem:[%s24870_s26 + $0x220] ss:$8 sps:$4 sm:$0xff]  }
0x14f5   : > { %8765 = vmatpush2.bf16.msra.mxu0 %v21632_v58  ;;  %v21667_v58 = vld [vmem:[%s24870_s26 + $0x214] ss:$8 sps:$4 sm:$0xff]  }
0x14f6   : > { %8766 = vmatprep.subr.bf16.mxu0 %v21640_v62  ;;  %v21668_v62 = vld [vmem:[%s24870_s26 + $0x200] ss:$8 sps:$4 sm:$0xff]  }
0x14f9   : > { %8767 = vmatpush2.bf16.msra.mxu0 %v21638_v12  ;;  %v21673_v12 = vld [vmem:[%s24870_s26 + $0x2f4] ss:$8 sps:$4 sm:$0xff]  }
0x14fa   : > { %8768 = vmatprep.subr.bf16.mxu0 %v21646_v49  ;;  %v21674_v49 = vld [vmem:[%s24870_s26 + $0x2e0] ss:$8 sps:$4 sm:$0xff]  }
0x14fd   : > { %8769 = vmatpush2.bf16.msra.mxu0 %v21644_v15  ;;  %v21679_v15 = vld [vmem:[%s24870_s26 + $0x2d4] ss:$8 sps:$4 sm:$0xff]  }
0x1540   : > { %v7909_v5 = vpop.f32.mrf.mxu0 }
0x1541   : > { %v8033_v17 = vadd.f32 %v8032_v6, %v7909_v5  ;;  %v21682_v5 = vld [vmem:[%s24870_s26 + $0x2c4] ss:$8 sps:$4 sm:$0xff]   ;;  %v21680_v6 = vld [vmem:[%s24870_s26 + $0x2c0] ss:$8 sps:$4 sm:$0xff]  }
0x1542   : > { %v7911_v7 = vpop.f32.mrf.mxu0 }
0x1543   : > { %v8035_v24 = vadd.f32 %v8034_v8, %v7911_v7  ;;  %v21685_v7 = vld [vmem:[%s24870_s26 + $0x2b4] ss:$8 sps:$4 sm:$0xff]   ;;  %v21683_v8 = vld [vmem:[%s24870_s26 + $0x2b0] ss:$8 sps:$4 sm:$0xff]  }
0x1544   : > { %v7913_v13 = vpop.f32.mrf.mxu0 }
0x1545   : > { %v8037_v3 = vadd.f32 %v8036_v14, %v7913_v13  ;;  %v21688_v13 = vld [vmem:[%s24870_s26 + $0x2a4] ss:$8 sps:$4 sm:$0xff]   ;;  %v21686_v14 = vld [vmem:[%s24870_s26 + $0x2a0] ss:$8 sps:$4 sm:$0xff]  }
0x1546   : > { %v7915_v38 = vpop.f32.mrf.mxu0 }
0x1547   : > { %v8039_v26 = vadd.f32 %v8038_v23, %v7915_v38  ;;  %v21691_v38 = vld [vmem:[%s24870_s26 + $0x294] ss:$8 sps:$4 sm:$0xff]   ;;  %v21698_v23 = vld [vmem:[%s24870_s26 + $0x360] ss:$8 sps:$4 sm:$0xff]  }
0x1580   : > { %v8269_v16 = vpop.f32.mrf.mxu0 }
0x1581   : > { %v8279_v22 = vrot.slane %v8269_v16, %v23231_v27  ;;  %v21694_v16 = vld [vmem:[%s24870_s26 + $0x284] ss:$8 sps:$4 sm:$0xff]  }
0x1582   : > { %v8271_v34 = vpop.f32.mrf.mxu0 }
0x1583   : > { %v8284_v35 = vadd.f32 %v8279_v22, %v8033_v17  ;;  %v8286_v10 = vadd.f32 %v8279_v22, %v8037_v3  ;;  %v8283_v11 = vrot.slane %v8271_v34, %v23231_v27  ;;  %v21692_v17 = vld [vmem:[%s24870_s26 + $0x280] ss:$8 sps:$4 sm:$0xff]   ;;  %v21697_v3 = vld [vmem:[%s24870_s26 + $0x374] ss:$8 sps:$4 sm:$0xff]   ;;  %v21695_v22 = vld [vmem:[%s24870_s26 + $0x370] ss:$8 sps:$4 sm:$0xff]  }
0x1584   : > { %v8273_v36 = vpop.f32.mrf.mxu0  ;;  %v21701_v34 = vld [vmem:[%s24870_s26 + $0x350] ss:$8 sps:$4 sm:$0xff]  }
0x1585   : > { %v8301_v37 = vadd.f32 %v8294_v46, %v8284_v35  ;;  %v8303_v53 = vadd.f32 %v8294_v46, %v8286_v10  ;;  %v8285_v32 = vadd.f32 %v8283_v11, %v8035_v24  ;;  %v8287_v39 = vadd.f32 %v8283_v11, %v8039_v26  ;;  %v21700_v46 = vld [vmem:[%s24870_s26 + $0x364] ss:$8 sps:$4 sm:$0xff]   ;;  %v21703_v24 = vld [vmem:[%s24870_s26 + $0x354] ss:$8 sps:$4 sm:$0xff]   ;;  %v21704_v26 = vld [vmem:[%s24870_s26 + $0x340] ss:$8 sps:$4 sm:$0xff]  }
0x1586   : > { %v8274_v18 = vpop.f32.mrf.mxu0  ;;  %v21709_v35 = vld [vmem:[%s24870_s26 + $0x334] ss:$8 sps:$4 sm:$0xff]   ;;  %v21707_v10 = vld [vmem:[%s24870_s26 + $0x330] ss:$8 sps:$4 sm:$0xff]   ;;  %v21712_v11 = vld [vmem:[%s24870_s26 + $0x324] ss:$8 sps:$4 sm:$0xff]  }
0x1587   : > { %v8302_v40 = vadd.f32 %v8298_v25, %v8285_v32  ;;  %v8304_v41 = vadd.f32 %v8298_v25, %v8287_v39  ;;  %v8305_v20 = vmax.f32 %v8301_v37, 0.0  ;;  %v8307_v42 = vmax.f32 %v8303_v53, 0.0  ;;  %v21706_v25 = vld [vmem:[%s24870_s26 + $0x344] ss:$8 sps:$4 sm:$0xff]   ;;  %v21710_v36 = vld [vmem:[%s24870_s26 + $0x320] ss:$8 sps:$4 sm:$0xff]  }
0x1588   : > { %v21715_v37 = vld [vmem:[%s24870_s26 + $0x314] ss:$8 sps:$4 sm:$0xff]   ;;  %v21713_v53 = vld [vmem:[%s24870_s26 + $0x310] ss:$8 sps:$4 sm:$0xff]   ;;  %v21718_v32 = vld [vmem:[%s24870_s26 + $0x304] ss:$8 sps:$4 sm:$0xff]  }
0x1589   : > { %v8306_v31 = vmax.f32 %v8302_v40, 0.0  ;;  %v8308_v44 = vmax.f32 %v8304_v41, 0.0  ;;  %v23751_v50 = vpack.c.bf16 %v8307_v42, %v8305_v20  ;;  %v21716_v39 = vld [vmem:[%s24870_s26 + $0x300] ss:$8 sps:$4 sm:$0xff]   ;;  %v21721_v18 = vld [vmem:[%s24870_s26 + $0x3f4] ss:$8 sps:$4 sm:$0xff]  }
0x158a   : > { %v21719_v40 = vld [vmem:[%s24870_s26 + $0x3f0] ss:$8 sps:$4 sm:$0xff]   ;;  %v21724_v41 = vld [vmem:[%s24870_s26 + $0x3e4] ss:$8 sps:$4 sm:$0xff]   ;;  %v21722_v20 = vld [vmem:[%s24870_s26 + $0x3e0] ss:$8 sps:$4 sm:$0xff]  }
0x158b   : > { %v23748_v48 = vpack.c.bf16 %v8308_v44, %v8306_v31  ;;  %v21727_v42 = vld [vmem:[%s24870_s26 + $0x3d4] ss:$8 sps:$4 sm:$0xff]   ;;  %v21725_v31 = vld [vmem:[%s24870_s26 + $0x3d0] ss:$8 sps:$4 sm:$0xff]   ;;  %v21730_v44 = vld [vmem:[%s24870_s26 + $0x3c4] ss:$8 sps:$4 sm:$0xff]  }
0x158d   : > { %8535 = vmatprep.mubr.bf16.mxu1 %v23748_v48  ;;  %8770 = vmatprep.mubr.bf16.mxu0 %v23748_v48 }
0x158e   : > { %8536 = vmatmul.mubr.bf16.vlgmr.msra.gmra.mxu1 %v23751_v50  ;;  %8771 = vmatmul.mubr.bf16.vlgmr.msra.gmra.mxu0 %v23751_v50 }
0x158f   : > { %8974 = vmatpush1.bf16.msra.mxu1 %v21647_v33  ;;  %9005 = vmatprep.mubr.bf16.mxu1 %v23748_v48  ;;  %v21728_v33 = vld [vmem:[%s24870_s26 + $0x3c0] ss:$8 sps:$4 sm:$0xff]  }
0x1590   : > { %8975 = vmatprep.subr.bf16.mxu1 %v21652_v51  ;;  %9054 = vmatprep.mubr.bf16.mxu0 %v22746_v1  ;;  %v21733_v51 = vld [vmem:[%s24870_s26 + $0x3b4] ss:$8 sps:$4 sm:$0xff]  }
0x1593   : > { %8976 = vmatpush1.bf16.msra.mxu1 %v21650_v52  ;;  %v21731_v52 = vld [vmem:[%s24870_s26 + $0x3b0] ss:$8 sps:$4 sm:$0xff]  }
0x1594   : > { %8977 = vmatprep.subr.bf16.mxu1 %v21655_v54  ;;  %v21736_v54 = vld [vmem:[%s24870_s26 + $0x3a4] ss:$8 sps:$4 sm:$0xff]  }
0x1597   : > { %8978 = vmatpush1.bf16.msra.mxu1 %v21653_v55  ;;  %v21734_v55 = vld [vmem:[%s24870_s26 + $0x3a0] ss:$8 sps:$4 sm:$0xff]  }
0x1598   : > { %8979 = vmatprep.subr.bf16.mxu1 %v21658_v45  ;;  %v21739_v45 = vld [vmem:[%s24870_s26 + $0x394] ss:$8 sps:$4 sm:$0xff]  }
0x159b   : > { %8980 = vmatpush1.bf16.msra.mxu1 %v21656_v56  ;;  %v21737_v56 = vld [vmem:[%s24870_s26 + $0x390] ss:$8 sps:$4 sm:$0xff]  }
0x159c   : > { %8981 = vmatprep.subr.bf16.mxu1 %v21661_v21  ;;  %v21742_v21 = vld [vmem:[%s24870_s26 + $0x384] ss:$8 sps:$4 sm:$0xff]  }
0x159f   : > { %8982 = vmatpush1.bf16.msra.mxu1 %v21659_v43  ;;  %v21740_v43 = vld [vmem:[%s24870_s26 + $0x380] ss:$8 sps:$4 sm:$0xff]  }
0x15a0   : > { %8983 = vmatprep.subr.bf16.mxu1 %v21664_v57  ;;  %v21745_v57 = vld [vmem:[%s24870_s26 + $0x474] ss:$8 sps:$4 sm:$0xff]  }
0x15a3   : > { %8984 = vmatpush1.bf16.msra.mxu1 %v21662_v47  ;;  %v21743_v47 = vld [vmem:[%s24870_s26 + $0x470] ss:$8 sps:$4 sm:$0xff]  }
0x15a4   : > { %8985 = vmatprep.subr.bf16.mxu1 %v21667_v58  ;;  %v21748_v58 = vld [vmem:[%s24870_s26 + $0x464] ss:$8 sps:$4 sm:$0xff]  }
0x15a7   : > { %8986 = vmatpush1.bf16.msra.mxu1 %v21665_v59  ;;  %v21746_v59 = vld [vmem:[%s24870_s26 + $0x460] ss:$8 sps:$4 sm:$0xff]  }
0x15a8   : > { %8987 = vmatprep.subr.bf16.mxu1 %v21670_v60  ;;  %v21751_v60 = vld [vmem:[%s24870_s26 + $0x454] ss:$8 sps:$4 sm:$0xff]  }
0x15ab   : > { %8988 = vmatpush1.bf16.msra.mxu1 %v21668_v62  ;;  %v21749_v62 = vld [vmem:[%s24870_s26 + $0x450] ss:$8 sps:$4 sm:$0xff]  }
0x15ac   : > { %8989 = vmatprep.subr.bf16.mxu1 %v21673_v12  ;;  %v21754_v12 = vld [vmem:[%s24870_s26 + $0x444] ss:$8 sps:$4 sm:$0xff]  }
0x15af   : > { %8990 = vmatpush2.bf16.msra.mxu1 %v21671_v63  ;;  %v21752_v63 = vld [vmem:[%s24870_s26 + $0x440] ss:$8 sps:$4 sm:$0xff]  }
0x15b0   : > { %8991 = vmatprep.subr.bf16.mxu1 %v21676_v0  ;;  %v21757_v0 = vld [vmem:[%s24870_s26 + $0x434] ss:$8 sps:$4 sm:$0xff]  }
0x15b3   : > { %8992 = vmatpush2.bf16.msra.mxu1 %v21674_v49  ;;  %v21755_v49 = vld [vmem:[%s24870_s26 + $0x430] ss:$8 sps:$4 sm:$0xff]  }
0x15b4   : > { %8993 = vmatprep.subr.bf16.mxu1 %v21679_v15  ;;  %v21758_v15 = vld [vmem:[%s24870_s26 + $0x420] ss:$8 sps:$4 sm:$0xff]  }
0x15b7   : > { %8994 = vmatpush2.bf16.msra.mxu1 %v21677_v4  ;;  %v21763_v4 = vld [vmem:[%s24870_s26 + $0x414] ss:$8 sps:$4 sm:$0xff]  }
0x15b8   : > { %8995 = vmatprep.subr.bf16.mxu1 %v21682_v5  ;;  %v21761_v5 = vld [vmem:[%s24870_s26 + $0x410] ss:$8 sps:$4 sm:$0xff]  }
0x15bb   : > { %8996 = vmatpush2.bf16.msra.mxu1 %v21680_v6  ;;  %v21766_v6 = vld [vmem:[%s24870_s26 + $0x404] ss:$8 sps:$4 sm:$0xff]  }
0x15bc   : > { %8997 = vmatprep.subr.bf16.mxu1 %v21685_v7  ;;  %v21764_v7 = vld [vmem:[%s24870_s26 + $0x400] ss:$8 sps:$4 sm:$0xff]  }
0x15bf   : > { %8998 = vmatpush2.bf16.msra.mxu1 %v21683_v8  ;;  %v21769_v8 = vld [vmem:[%s24870_s26 + $0x4f4] ss:$8 sps:$4 sm:$0xff]  }
0x15c0   : > { %8999 = vmatprep.subr.bf16.mxu1 %v21688_v13  ;;  %v21767_v13 = vld [vmem:[%s24870_s26 + $0x4f0] ss:$8 sps:$4 sm:$0xff]  }
0x15c3   : > { %9000 = vmatpush2.bf16.msra.mxu1 %v21686_v14  ;;  %v21772_v14 = vld [vmem:[%s24870_s26 + $0x4e4] ss:$8 sps:$4 sm:$0xff]  }
0x15c4   : > { %9001 = vmatprep.subr.bf16.mxu1 %v21691_v38  ;;  %v21770_v38 = vld [vmem:[%s24870_s26 + $0x4e0] ss:$8 sps:$4 sm:$0xff]  }
0x15c7   : > { %9002 = vmatpush2.bf16.msra.mxu1 %v21689_v29  ;;  %v21775_v29 = vld [vmem:[%s24870_s26 + $0x4d4] ss:$8 sps:$4 sm:$0xff]  }
0x15c8   : > { %9003 = vmatprep.subr.bf16.mxu1 %v21694_v16  ;;  %v21773_v16 = vld [vmem:[%s24870_s26 + $0x4d0] ss:$8 sps:$4 sm:$0xff]  }
0x15cb   : > { %9004 = vmatpush2.bf16.msra.mxu1 %v21692_v17  ;;  %v21778_v17 = vld [vmem:[%s24870_s26 + $0x4c4] ss:$8 sps:$4 sm:$0xff]  }
0x15cc   : > { %9273 = vmatprep.subr.bf16.mxu1 %v21697_v3  ;;  %v21776_v3 = vld [vmem:[%s24870_s26 + $0x4c0] ss:$8 sps:$4 sm:$0xff]  }
0x15ce   : > { %9006 = vmatmul.mubr.bf16.vlgmr.msra.gmra.mxu1 %v23751_v50 }
0x15cf   : > { %9274 = vmatpush1.bf16.msra.mxu1 %v21695_v22  ;;  %9305 = vmatprep.mubr.bf16.mxu1 %v23748_v48  ;;  %v21781_v22 = vld [vmem:[%s24870_s26 + $0x4b4] ss:$8 sps:$4 sm:$0xff]  }
0x15d0   : > { %9275 = vmatprep.subr.bf16.mxu1 %v21700_v46  ;;  %v21779_v46 = vld [vmem:[%s24870_s26 + $0x4b0] ss:$8 sps:$4 sm:$0xff]  }
0x15d3   : > { %9276 = vmatpush1.bf16.msra.mxu1 %v21698_v23  ;;  %v21784_v23 = vld [vmem:[%s24870_s26 + $0x4a4] ss:$8 sps:$4 sm:$0xff]  }
0x15d4   : > { %9277 = vmatprep.subr.bf16.mxu1 %v21703_v24  ;;  %v21782_v24 = vld [vmem:[%s24870_s26 + $0x4a0] ss:$8 sps:$4 sm:$0xff]  }
0x15d7   : > { %9278 = vmatpush1.bf16.msra.mxu1 %v21701_v34  ;;  %v21787_v34 = vld [vmem:[%s24870_s26 + $0x494] ss:$8 sps:$4 sm:$0xff]  }
0x15d8   : > { %9279 = vmatprep.subr.bf16.mxu1 %v21706_v25  ;;  %v21785_v25 = vld [vmem:[%s24870_s26 + $0x490] ss:$8 sps:$4 sm:$0xff]  }
0x15db   : > { %9280 = vmatpush1.bf16.msra.mxu1 %v21704_v26  ;;  %v21790_v26 = vld [vmem:[%s24870_s26 + $0x484] ss:$8 sps:$4 sm:$0xff]  }
0x15dc   : > { %9281 = vmatprep.subr.bf16.mxu1 %v21709_v35  ;;  %v21788_v35 = vld [vmem:[%s24870_s26 + $0x480] ss:$8 sps:$4 sm:$0xff]  }
0x15df   : > { %9282 = vmatpush1.bf16.msra.mxu1 %v21707_v10  ;;  %v21793_v10 = vld [vmem:[%s24870_s26 + $0x674] ss:$8 sps:$4 sm:$0xff]  }
0x15e0   : > { %9283 = vmatprep.subr.bf16.mxu1 %v21712_v11  ;;  %v21791_v11 = vld [vmem:[%s24870_s26 + $0x670] ss:$8 sps:$4 sm:$0xff]  }
0x15e3   : > { %9284 = vmatpush1.bf16.msra.mxu1 %v21710_v36  ;;  %v21796_v36 = vld [vmem:[%s24870_s26 + $0x664] ss:$8 sps:$4 sm:$0xff]  }
0x15e4   : > { %9285 = vmatprep.subr.bf16.mxu1 %v21715_v37  ;;  %v21794_v37 = vld [vmem:[%s24870_s26 + $0x660] ss:$8 sps:$4 sm:$0xff]  }
0x15e7   : > { %9286 = vmatpush1.bf16.msra.mxu1 %v21713_v53  ;;  %v21799_v53 = vld [vmem:[%s24870_s26 + $0x654] ss:$8 sps:$4 sm:$0xff]  }
0x15e8   : > { %9287 = vmatprep.subr.bf16.mxu1 %v21718_v32  ;;  %v21797_v32 = vld [vmem:[%s24870_s26 + $0x650] ss:$8 sps:$4 sm:$0xff]  }
0x15eb   : > { %9288 = vmatpush1.bf16.msra.mxu1 %v21716_v39  ;;  %v21802_v39 = vld [vmem:[%s24870_s26 + $0x644] ss:$8 sps:$4 sm:$0xff]  }
0x15ec   : > { %9289 = vmatprep.subr.bf16.mxu1 %v21721_v18  ;;  %v21800_v18 = vld [vmem:[%s24870_s26 + $0x640] ss:$8 sps:$4 sm:$0xff]  }
0x15ef   : > { %9290 = vmatpush2.bf16.msra.mxu1 %v21719_v40  ;;  %v21803_v40 = vld [vmem:[%s24870_s26 + $0x630] ss:$8 sps:$4 sm:$0xff]  }
0x15f0   : > { %9291 = vmatprep.subr.bf16.mxu1 %v21724_v41  ;;  %v21806_v41 = vld [vmem:[%s24870_s26 + $0x620] ss:$8 sps:$4 sm:$0xff]  }
0x15f3   : > { %9292 = vmatpush2.bf16.msra.mxu1 %v21722_v20  ;;  %v21811_v20 = vld [vmem:[%s24870_s26 + $0x614] ss:$8 sps:$4 sm:$0xff]  }
0x15f4   : > { %9293 = vmatprep.subr.bf16.mxu1 %v21727_v42  ;;  %v21809_v42 = vld [vmem:[%s24870_s26 + $0x610] ss:$8 sps:$4 sm:$0xff]  }
0x15f7   : > { %9294 = vmatpush2.bf16.msra.mxu1 %v21725_v31  ;;  %v21814_v31 = vld [vmem:[%s24870_s26 + $0x604] ss:$8 sps:$4 sm:$0xff]  }
0x15f8   : > { %9295 = vmatprep.subr.bf16.mxu1 %v21730_v44  ;;  %v21812_v44 = vld [vmem:[%s24870_s26 + $0x600] ss:$8 sps:$4 sm:$0xff]  }
0x15fb   : > { %9296 = vmatpush2.bf16.msra.mxu1 %v21728_v33  ;;  %v21817_v33 = vld [vmem:[%s24870_s26 + $0x6f4] ss:$8 sps:$4 sm:$0xff]  }
0x15fc   : > { %9297 = vmatprep.subr.bf16.mxu1 %v21733_v51  ;;  %v21815_v51 = vld [vmem:[%s24870_s26 + $0x6f0] ss:$8 sps:$4 sm:$0xff]  }
0x15ff   : > { %9298 = vmatpush2.bf16.msra.mxu1 %v21731_v52  ;;  %v21820_v52 = vld [vmem:[%s24870_s26 + $0x6e4] ss:$8 sps:$4 sm:$0xff]  }
0x1600   : > { %9299 = vmatprep.subr.bf16.mxu1 %v21736_v54  ;;  %v21818_v54 = vld [vmem:[%s24870_s26 + $0x6e0] ss:$8 sps:$4 sm:$0xff]  }
0x1603   : > { %9300 = vmatpush2.bf16.msra.mxu1 %v21734_v55  ;;  %v21823_v55 = vld [vmem:[%s24870_s26 + $0x6d4] ss:$8 sps:$4 sm:$0xff]  }
0x1604   : > { %9301 = vmatprep.subr.bf16.mxu1 %v21739_v45  ;;  %v21821_v45 = vld [vmem:[%s24870_s26 + $0x6d0] ss:$8 sps:$4 sm:$0xff]  }
0x1607   : > { %9302 = vmatpush2.bf16.msra.mxu1 %v21737_v56  ;;  %v21826_v56 = vld [vmem:[%s24870_s26 + $0x6c4] ss:$8 sps:$4 sm:$0xff]  }
0x1608   : > { %9303 = vmatprep.subr.bf16.mxu1 %v21742_v21  ;;  %v21824_v21 = vld [vmem:[%s24870_s26 + $0x6c0] ss:$8 sps:$4 sm:$0xff]  }
0x160b   : > { %9304 = vmatpush2.bf16.msra.mxu1 %v21740_v43  ;;  %v21829_v43 = vld [vmem:[%s24870_s26 + $0x6b4] ss:$8 sps:$4 sm:$0xff]  }
0x160c   : > { %9757 = vmatprep.subr.bf16.mxu1 %v21745_v57  ;;  %v21827_v57 = vld [vmem:[%s24870_s26 + $0x6b0] ss:$8 sps:$4 sm:$0xff]  }
0x160e   : > { %9306 = vmatmul.mubr.bf16.vlgmr.msra.gmra.mxu1 %v23751_v50 }
0x160f   : > { %9758 = vmatpush1.bf16.msra.mxu1 %v21743_v47  ;;  %9789 = vmatprep.mubr.bf16.mxu1 %v23637_v28  ;;  %v21760_v28 = vld [vmem:[%s24870_s26 + $0x424] ss:$8 sps:$4 sm:$0xff]  }
0x1610   : > { %9759 = vmatprep.subr.bf16.mxu1 %v21748_v58  ;;  %v21832_v47 = vld [vmem:[%s24870_s26 + $0x6a4] ss:$8 sps:$4 sm:$0xff]   ;;  %v21830_v58 = vld [vmem:[%s24870_s26 + $0x6a0] ss:$8 sps:$4 sm:$0xff]  }
0x1613   : > { %9760 = vmatpush1.bf16.msra.mxu1 %v21746_v59 }
0x1614   : > { %9761 = vmatprep.subr.bf16.mxu1 %v21751_v60  ;;  %v21835_v60 = vld [vmem:[%s24870_s26 + $0x694] ss:$8 sps:$4 sm:$0xff]  }
0x1617   : > { %9762 = vmatpush1.bf16.msra.mxu1 %v21749_v62  ;;  %v21833_v62 = vld [vmem:[%s24870_s26 + $0x690] ss:$8 sps:$4 sm:$0xff]  }
0x1618   : > { %9763 = vmatprep.subr.bf16.mxu1 %v21754_v12 }
0x161b   : > { %9764 = vmatpush1.bf16.msra.mxu1 %v21752_v63  ;;  %v21838_v63 = vld [vmem:[%s24870_s26 + $0x684] ss:$8 sps:$4 sm:$0xff]  }
0x161c   : > { %9765 = vmatprep.subr.bf16.mxu1 %v21757_v0  ;;  %v21836_v0 = vld [vmem:[%s24870_s26 + $0x680] ss:$8 sps:$4 sm:$0xff]  }
0x161f   : > { %9766 = vmatpush1.bf16.msra.mxu1 %v21755_v49 }
0x1620   : > { %9767 = vmatprep.subr.bf16.mxu1 %v21760_v28 }
0x1623   : > { %9768 = vmatpush1.bf16.msra.mxu1 %v21758_v15 }
0x1624   : > { %9769 = vmatprep.subr.bf16.mxu1 %v21763_v4 }
0x1627   : > { %9770 = vmatpush1.bf16.msra.mxu1 %v21761_v5 }
0x1628   : > { %9771 = vmatprep.subr.bf16.mxu1 %v21766_v6 }
0x162b   : > { %9772 = vmatpush1.bf16.msra.mxu1 %v21764_v7 }
0x162c   : > { %9773 = vmatprep.subr.bf16.mxu1 %v21769_v8 }
0x162f   : > { %9774 = vmatpush2.bf16.msra.mxu1 %v21767_v13 }
0x1630   : > { %9775 = vmatprep.subr.bf16.mxu1 %v21772_v14 }
0x1633   : > { %9776 = vmatpush2.bf16.msra.mxu1 %v21770_v38 }
0x1634   : > { %9777 = vmatprep.subr.bf16.mxu1 %v21775_v29 }
0x1637   : > { %9778 = vmatpush2.bf16.msra.mxu1 %v21773_v16 }
0x1638   : > { %9779 = vmatprep.subr.bf16.mxu1 %v21778_v17 }
0x163b   : > { %9780 = vmatpush2.bf16.msra.mxu1 %v21776_v3 }
0x163c   : > { %9781 = vmatprep.subr.bf16.mxu1 %v21781_v22 }
0x163f   : > { %9782 = vmatpush2.bf16.msra.mxu1 %v21779_v46  ;;  %v21839_v46 = vld [vmem:[%s24870_s26 + $0x570] ss:$8 sps:$4 sm:$0xff]  }
0x1640   : > { %9783 = vmatprep.subr.bf16.mxu1 %v21784_v23  ;;  %v21844_v23 = vld [vmem:[%s24870_s26 + $0x564] ss:$8 sps:$4 sm:$0xff]  }
0x1643   : > { %9784 = vmatpush2.bf16.msra.mxu1 %v21782_v24  ;;  %v22603_v24 = vld [vmem:[%s22981_s18] sm:$0xff]  }
0x1644   : > { %9785 = vmatprep.subr.bf16.mxu1 %v21787_v34  ;;  %v21842_v34 = vld [vmem:[%s24870_s26 + $0x560] ss:$8 sps:$4 sm:$0xff]  }
0x1647   : > { %9786 = vmatpush2.bf16.msra.mxu1 %v21785_v25  ;;  %v21847_v25 = vld [vmem:[%s24870_s26 + $0x554] ss:$8 sps:$4 sm:$0xff]  }
0x1648   : > { %9787 = vmatprep.subr.bf16.mxu1 %v21790_v26  ;;  %v21845_v26 = vld [vmem:[%s24870_s26 + $0x550] ss:$8 sps:$4 sm:$0xff]  }
0x164b   : > { %9788 = vmatpush2.bf16.msra.mxu1 %v21788_v35  ;;  %v21850_v35 = vld [vmem:[%s24870_s26 + $0x544] ss:$8 sps:$4 sm:$0xff]  }
0x164c   : > { %10241 = vmatprep.subr.bf16.mxu1 %v21793_v10  ;;  %v22604_v10 = vld [vmem:[%s22981_s18 + $0x8] sm:$0xff]  }
0x164e   : > { %9790 = vmatmul.mubr.bf16.vlgmr.msra.gmra.mxu1 %v23639_v30  ;;  %v21805_v30 = vld [vmem:[%s24870_s26 + $0x634] ss:$8 sps:$4 sm:$0xff]   ;;  %v8537_v59 = vpop.f32.mrf.mxu1  ;;  %v8772_v49 = vpop.f32.mrf.mxu0 }
0x164f   : > { %10242 = vmatpush1.bf16.msra.mxu1 %v21791_v11  ;;  %10273 = vmatprep.mubr.bf16.mxu1 %v23664_v61  ;;  %v21808_v61 = vld [vmem:[%s24870_s26 + $0x624] ss:$8 sps:$4 sm:$0xff]   ;;  %v21848_v11 = vld [vmem:[%s24870_s26 + $0x540] ss:$8 sps:$4 sm:$0xff]  }
0x1650   : > { %10243 = vmatprep.subr.bf16.mxu1 %v21796_v36  ;;  %v8539_v12 = vpop.f32.mrf.mxu1  ;;  %v8774_v15 = vpop.f32.mrf.mxu0  ;;  %v21853_v36 = vld [vmem:[%s24870_s26 + $0x534] ss:$8 sps:$4 sm:$0xff]  }
0x1652   : > { %v8541_v28 = vpop.f32.mrf.mxu1  ;;  %v8776_v6 = vpop.f32.mrf.mxu0 }
0x1653   : > { %10244 = vmatpush1.bf16.msra.mxu1 %v21794_v37  ;;  %v9018_v17 = vpack.c.bf16 %v8776_v6, %v8772_v49  ;;  %v9016_v22 = vpack.c.bf16 %v8541_v28, %v8537_v59  ;;  %v21851_v37 = vld [vmem:[%s24870_s26 + $0x530] ss:$8 sps:$4 sm:$0xff]   ;;  %v21886_v59 = vld [vmem:[%s24870_s26 + $0x584] ss:$8 sps:$4 sm:$0xff]  }
0x1654   : > { %10245 = vmatprep.subr.bf16.mxu1 %v21799_v53  ;;  %v8543_v4 = vpop.f32.mrf.mxu1  ;;  %v8778_v13 = vpop.f32.mrf.mxu0  ;;  %v21856_v53 = vld [vmem:[%s24870_s26 + $0x524] ss:$8 sps:$4 sm:$0xff]  }
0x1655   : > { %v9019_v16 = vpack.c.bf16 %v8778_v13, %v8774_v15  ;;  %v9017_v3 = vpack.c.bf16 %v8543_v4, %v8539_v12  ;;  %v21938_v15 = vld [vmem:[%s24870_s26 + $0x970] ss:$8 sps:$4 sm:$0xff]   ;;  %v21940_v4 = vld [vmem:[%s24870_s26 + $0x974] ss:$8 sps:$4 sm:$0xff]   ;;  %v21946_v6 = vld [vmem:[%s24870_s26 + $0x964] ss:$8 sps:$4 sm:$0xff]  }
0x1656   : > { %v21956_v13 = vld [vmem:[%s24870_s26 + $0x940] ss:$8 sps:$4 sm:$0xff]  }
0x1657   : > { %10246 = vmatpush1.bf16.msra.mxu1 %v21797_v32  ;;  %v21854_v32 = vld [vmem:[%s24870_s26 + $0x520] ss:$8 sps:$4 sm:$0xff]  }
0x1658   : > { %10247 = vmatprep.subr.bf16.mxu1 %v21802_v39  ;;  %v21859_v39 = vld [vmem:[%s24870_s26 + $0x514] ss:$8 sps:$4 sm:$0xff]  }
0x165b   : > { %10248 = vmatpush1.bf16.msra.mxu1 %v21800_v18  ;;  %v21857_v18 = vld [vmem:[%s24870_s26 + $0x510] ss:$8 sps:$4 sm:$0xff]  }
0x165c   : > { %10249 = vmatprep.subr.bf16.mxu1 %v21805_v30 }
0x165f   : > { %10250 = vmatpush1.bf16.msra.mxu1 %v21803_v40 }
0x1660   : > { %10251 = vmatprep.subr.bf16.mxu1 %v21808_v61  ;;  %v21860_v61 = vld [vmem:[%s24870_s26 + $0x500] ss:$8 sps:$4 sm:$0xff]  }
0x1663   : > { %10252 = vmatpush1.bf16.msra.mxu1 %v21806_v41  ;;  %v21862_v41 = vld [vmem:[%s24870_s26 + $0x504] ss:$8 sps:$4 sm:$0xff]  }
0x1664   : > { %10253 = vmatprep.subr.bf16.mxu1 %v21811_v20 }
0x1667   : > { %10254 = vmatpush1.bf16.msra.mxu1 %v21809_v42 }
0x1668   : > { %10255 = vmatprep.subr.bf16.mxu1 %v21814_v31  ;;  %v21863_v31 = vld [vmem:[%s24870_s26 + $0x5f0] ss:$8 sps:$4 sm:$0xff]  }
0x166b   : > { %10256 = vmatpush1.bf16.msra.mxu1 %v21812_v44  ;;  %v21865_v44 = vld [vmem:[%s24870_s26 + $0x5f4] ss:$8 sps:$4 sm:$0xff]  }
0x166c   : > { %10257 = vmatprep.subr.bf16.mxu1 %v21817_v33  ;;  %v21868_v33 = vld [vmem:[%s24870_s26 + $0x5e4] ss:$8 sps:$4 sm:$0xff]  }
0x166f   : > { %10258 = vmatpush2.bf16.msra.mxu1 %v21815_v51  ;;  %v21866_v51 = vld [vmem:[%s24870_s26 + $0x5e0] ss:$8 sps:$4 sm:$0xff]  }
0x1670   : > { %10259 = vmatprep.subr.bf16.mxu1 %v21820_v52  ;;  %v21871_v52 = vld [vmem:[%s24870_s26 + $0x5d4] ss:$8 sps:$4 sm:$0xff]  }
0x1673   : > { %10260 = vmatpush2.bf16.msra.mxu1 %v21818_v54  ;;  %v21869_v54 = vld [vmem:[%s24870_s26 + $0x5d0] ss:$8 sps:$4 sm:$0xff]  }
0x1674   : > { %10261 = vmatprep.subr.bf16.mxu1 %v21823_v55  ;;  %v21874_v55 = vld [vmem:[%s24870_s26 + $0x5c4] ss:$8 sps:$4 sm:$0xff]  }
0x1677   : > { %10262 = vmatpush2.bf16.msra.mxu1 %v21821_v45  ;;  %v21872_v45 = vld [vmem:[%s24870_s26 + $0x5c0] ss:$8 sps:$4 sm:$0xff]  }
0x1678   : > { %10263 = vmatprep.subr.bf16.mxu1 %v21826_v56  ;;  %v21877_v56 = vld [vmem:[%s24870_s26 + $0x5b4] ss:$8 sps:$4 sm:$0xff]  }
0x167b   : > { %10264 = vmatpush2.bf16.msra.mxu1 %v21824_v21  ;;  %v21875_v21 = vld [vmem:[%s24870_s26 + $0x5b0] ss:$8 sps:$4 sm:$0xff]  }
0x167c   : > { %10265 = vmatprep.subr.bf16.mxu1 %v21829_v43  ;;  %v21880_v43 = vld [vmem:[%s24870_s26 + $0x5a4] ss:$8 sps:$4 sm:$0xff]  }
0x167f   : > { %10266 = vmatpush2.bf16.msra.mxu1 %v21827_v57  ;;  %v21878_v57 = vld [vmem:[%s24870_s26 + $0x5a0] ss:$8 sps:$4 sm:$0xff]  }
0x1680   : > { %10267 = vmatprep.subr.bf16.mxu1 %v21832_v47  ;;  %v21883_v47 = vld [vmem:[%s24870_s26 + $0x594] ss:$8 sps:$4 sm:$0xff]  }
0x1683   : > { %10268 = vmatpush2.bf16.msra.mxu1 %v21830_v58  ;;  %v21881_v58 = vld [vmem:[%s24870_s26 + $0x590] ss:$8 sps:$4 sm:$0xff]  }
0x1684   : > { %10269 = vmatprep.subr.bf16.mxu1 %v21835_v60  ;;  %v21884_v60 = vld [vmem:[%s24870_s26 + $0x580] ss:$8 sps:$4 sm:$0xff]  }
0x1687   : > { %10270 = vmatpush2.bf16.msra.mxu1 %v21833_v62  ;;  %v21889_v62 = vld [vmem:[%s24870_s26 + $0x774] ss:$8 sps:$4 sm:$0xff]  }
0x1688   : > { %10271 = vmatprep.subr.bf16.mxu1 %v21838_v63 }
0x168b   : > { %10272 = vmatpush2.bf16.msra.mxu1 %v21836_v0 }
0x168c   : > { %10728 = vmatprep.subr.bf16.mxu1 %v21940_v4  ;;  %v21890_v4 = vld [vmem:[%s24870_s26 + $0x760] ss:$8 sps:$4 sm:$0xff]  }
0x168e   : > { %v9007_v5 = vpop.f32.mrf.mxu1  ;;  %10274 = vmatmul.mubr.bf16.vlgmr.msra.gmra.mxu1 %v23673_v19  ;;  %v21841_v19 = vld [vmem:[%s24870_s26 + $0x574] ss:$8 sps:$4 sm:$0xff]  }
0x168f   : > { %10729 = vmatpush1.bf16.msra.mxu1 %v21938_v15 }
0x1690   : > { %v9009_v7 = vpop.f32.mrf.mxu1  ;;  %10730 = vmatprep.subr.bf16.mxu1 %v21946_v6  ;;  %v21893_v6 = vld [vmem:[%s24870_s26 + $0x750] ss:$8 sps:$4 sm:$0xff]  }
0x1692   : > { %v9011_v8 = vpop.f32.mrf.mxu1 }
0x1693   : > { %v9020_v29 = vpack.c.bf16 %v9011_v8, %v9007_v5  ;;  %v21944_v5 = vld [vmem:[%s24870_s26 + $0x960] ss:$8 sps:$4 sm:$0xff]   ;;  %v21952_v8 = vld [vmem:[%s24870_s26 + $0x954] ss:$8 sps:$4 sm:$0xff]  }
0x1694   : > { %v9013_v14 = vpop.f32.mrf.mxu1  ;;  %10731 = vmatpush1.bf16.msra.mxu1 %v21944_v5  ;;  %v21895_v5 = vld [vmem:[%s24870_s26 + $0x754] ss:$8 sps:$4 sm:$0xff]  }
0x1695   : > { %v9021_v38 = vpack.c.bf16 %v9013_v14, %v9009_v7  ;;  %v21950_v7 = vld [vmem:[%s24870_s26 + $0x950] ss:$8 sps:$4 sm:$0xff]   ;;  %10732 = vmatprep.subr.bf16.mxu1 %v21952_v8  ;;  %v21958_v14 = vld [vmem:[%s24870_s26 + $0x944] ss:$8 sps:$4 sm:$0xff]   ;;  %v21896_v8 = vld [vmem:[%s24870_s26 + $0x740] ss:$8 sps:$4 sm:$0xff]  }
0x1697   : > { %9032 = vmatprep.subr.bf16.mxu0 %v9021_v38  ;;  %v21962_v38 = vld [vmem:[%s24870_s26 + $0x930] ss:$8 sps:$4 sm:$0xff]  }
0x1698   : > { %9033 = vmatpush1.bf16.msra.mxu0 %v9020_v29  ;;  %10733 = vmatpush1.bf16.msra.mxu1 %v21950_v7  ;;  %v21964_v29 = vld [vmem:[%s24870_s26 + $0x934] ss:$8 sps:$4 sm:$0xff]   ;;  %v21898_v7 = vld [vmem:[%s24870_s26 + $0x744] ss:$8 sps:$4 sm:$0xff]  }
0x1699   : > { %9034 = vmatprep.subr.bf16.mxu0 %v9019_v16  ;;  %10734 = vmatprep.subr.bf16.mxu1 %v21958_v14  ;;  %v21968_v16 = vld [vmem:[%s24870_s26 + $0x920] ss:$8 sps:$4 sm:$0xff]   ;;  %v21899_v14 = vld [vmem:[%s24870_s26 + $0x730] ss:$8 sps:$4 sm:$0xff]  }
0x169c   : > { %9035 = vmatpush1.bf16.msra.mxu0 %v9018_v17  ;;  %10735 = vmatpush1.bf16.msra.mxu1 %v21956_v13  ;;  %v21970_v17 = vld [vmem:[%s24870_s26 + $0x924] ss:$8 sps:$4 sm:$0xff]   ;;  %v21901_v13 = vld [vmem:[%s24870_s26 + $0x734] ss:$8 sps:$4 sm:$0xff]  }
0x169d   : > { %9036 = vmatprep.subr.bf16.mxu0 %v9017_v3  ;;  %10736 = vmatprep.subr.bf16.mxu1 %v21964_v29  ;;  %v21902_v29 = vld [vmem:[%s24870_s26 + $0x720] ss:$8 sps:$4 sm:$0xff]  }
0x16a0   : > { %9037 = vmatpush1.bf16.msra.mxu0 %v9016_v22  ;;  %10737 = vmatpush1.bf16.msra.mxu1 %v21962_v38  ;;  %v21974_v22 = vld [vmem:[%s24870_s26 + $0x910] ss:$8 sps:$4 sm:$0xff]   ;;  %v21904_v38 = vld [vmem:[%s24870_s26 + $0x724] ss:$8 sps:$4 sm:$0xff]  }
0x16a1   : > { %9556 = vmatprep.subr.bf16.mxu0 %v21841_v19  ;;  %10738 = vmatprep.subr.bf16.mxu1 %v21970_v17  ;;  %v21905_v17 = vld [vmem:[%s24870_s26 + $0x710] ss:$8 sps:$4 sm:$0xff]  }
0x16a3   : > { %17912 = vmatmul.mubr.msk.bf16.vlgmr.msra.gmra.mxu0 %vm1413_vm5, %v22603_v24 }
0x16a4   : > { %9064 = vmatprep.mubr.bf16.mxu0 %v22746_v1  ;;  %9557 = vmatpush1.bf16.msra.mxu0 %v21839_v46  ;;  %v21976_v46 = vld [vmem:[%s24870_s26 + $0x914] ss:$8 sps:$4 sm:$0xff]  }
0x16a5   : > { %9558 = vmatprep.subr.bf16.mxu0 %v21844_v23  ;;  %10739 = vmatpush1.bf16.msra.mxu1 %v21968_v16  ;;  %v21907_v16 = vld [vmem:[%s24870_s26 + $0x714] ss:$8 sps:$4 sm:$0xff]  }
0x16a6   : > { %10740 = vmatprep.subr.bf16.mxu1 %v21976_v46  ;;  %v21908_v46 = vld [vmem:[%s24870_s26 + $0x700] ss:$8 sps:$4 sm:$0xff]  }
0x16a8   : > { %9559 = vmatpush1.bf16.msra.mxu0 %v21842_v34  ;;  %v21980_v34 = vld [vmem:[%s24870_s26 + $0x900] ss:$8 sps:$4 sm:$0xff]  }
0x16a9   : > { %9560 = vmatprep.subr.bf16.mxu0 %v21847_v25  ;;  %10741 = vmatpush1.bf16.msra.mxu1 %v21974_v22  ;;  %v21982_v25 = vld [vmem:[%s24870_s26 + $0x904] ss:$8 sps:$4 sm:$0xff]  }
0x16aa   : > { %10742 = vmatprep.subr.bf16.mxu1 %v21982_v25  ;;  %v21910_v22 = vld [vmem:[%s24870_s26 + $0x704] ss:$8 sps:$4 sm:$0xff]   ;;  %v21914_v25 = vld [vmem:[%s24870_s26 + $0x7e0] ss:$8 sps:$4 sm:$0xff]  }
0x16ab   : > { %17913 = vmatmul.mubr.msk.bf16.gmra.mxu0 %vm1413_vm5, %v22604_v10 }
0x16ac   : > { %9561 = vmatpush1.bf16.msra.mxu0 %v21845_v26  ;;  %v21986_v26 = vld [vmem:[%s24870_s26 + $0x9f0] ss:$8 sps:$4 sm:$0xff]  }
0x16ad   : > { %9562 = vmatprep.subr.bf16.mxu0 %v21850_v35  ;;  %10743 = vmatpush1.bf16.msra.mxu1 %v21980_v34  ;;  %v21988_v35 = vld [vmem:[%s24870_s26 + $0x9f4] ss:$8 sps:$4 sm:$0xff]   ;;  %v21916_v34 = vld [vmem:[%s24870_s26 + $0x7e4] ss:$8 sps:$4 sm:$0xff]  }
0x16ae   : > { %10744 = vmatprep.subr.bf16.mxu1 %v21988_v35  ;;  %v21917_v35 = vld [vmem:[%s24870_s26 + $0x7d0] ss:$8 sps:$4 sm:$0xff]  }
0x16b0   : > { %9563 = vmatpush1.bf16.msra.mxu0 %v21848_v11  ;;  %v21992_v11 = vld [vmem:[%s24870_s26 + $0x9e0] ss:$8 sps:$4 sm:$0xff]  }
0x16b1   : > { %9564 = vmatprep.subr.bf16.mxu0 %v21853_v36  ;;  %10745 = vmatpush2.bf16.msra.mxu1 %v21986_v26  ;;  %v21994_v36 = vld [vmem:[%s24870_s26 + $0x9e4] ss:$8 sps:$4 sm:$0xff]   ;;  %v21919_v26 = vld [vmem:[%s24870_s26 + $0x7d4] ss:$8 sps:$4 sm:$0xff]  }
0x16b2   : > { %10746 = vmatprep.subr.bf16.mxu1 %v21994_v36  ;;  %v21920_v36 = vld [vmem:[%s24870_s26 + $0x7c0] ss:$8 sps:$4 sm:$0xff]  }
0x16b4   : > { %9565 = vmatpush1.bf16.msra.mxu0 %v21851_v37 }
0x16b5   : > { %9566 = vmatprep.subr.bf16.mxu0 %v21856_v53  ;;  %10747 = vmatpush2.bf16.msra.mxu1 %v21992_v11  ;;  %v21998_v53 = vld [vmem:[%s24870_s26 + $0x9d0] ss:$8 sps:$4 sm:$0xff]   ;;  %v21922_v11 = vld [vmem:[%s24870_s26 + $0x7c4] ss:$8 sps:$4 sm:$0xff]  }
0x16b8   : > { %9567 = vmatpush1.bf16.msra.mxu0 %v21854_v32  ;;  %v22000_v32 = vld [vmem:[%s24870_s26 + $0x9d4] ss:$8 sps:$4 sm:$0xff]  }
0x16b9   : > { %9568 = vmatprep.subr.bf16.mxu0 %v21859_v39  ;;  %10748 = vmatprep.subr.bf16.mxu1 %v22000_v32  ;;  %v21923_v32 = vld [vmem:[%s24870_s26 + $0x7b0] ss:$8 sps:$4 sm:$0xff]  }
0x16ba   : > { %10749 = vmatpush2.bf16.msra.mxu1 %v21998_v53  ;;  %v21925_v53 = vld [vmem:[%s24870_s26 + $0x7b4] ss:$8 sps:$4 sm:$0xff]  }
0x16bc   : > { %9569 = vmatpush1.bf16.msra.mxu0 %v21857_v18 }
0x16bd   : > { %9570 = vmatprep.subr.bf16.mxu0 %v21862_v41 }
0x16c0   : > { %9571 = vmatpush1.bf16.msra.mxu0 %v21860_v61  ;;  %v22006_v61 = vld [vmem:[%s24870_s26 + $0x9c4] ss:$8 sps:$4 sm:$0xff]  }
0x16c1   : > { %9572 = vmatprep.subr.bf16.mxu0 %v21865_v44  ;;  %10750 = vmatprep.subr.bf16.mxu1 %v22006_v61  ;;  %v22012_v44 = vld [vmem:[%s24870_s26 + $0x9b4] ss:$8 sps:$4 sm:$0xff]  }
0x16c4   : > { %9573 = vmatpush2.bf16.msra.mxu0 %v21863_v31  ;;  %v22010_v31 = vld [vmem:[%s24870_s26 + $0x9b0] ss:$8 sps:$4 sm:$0xff]  }
0x16c5   : > { %9574 = vmatprep.subr.bf16.mxu0 %v21868_v33 }
0x16c8   : > { %9575 = vmatpush2.bf16.msra.mxu0 %v21866_v51 }
0x16c9   : > { %9576 = vmatprep.subr.bf16.mxu0 %v21871_v52 }
0x16cc   : > { %9577 = vmatpush2.bf16.msra.mxu0 %v21869_v54 }
0x16cd   : > { %9578 = vmatprep.subr.bf16.mxu0 %v21874_v55 }
0x16ce   : > { %v9307_v30 = vpop.f32.mrf.mxu1 }
0x16d0   : > { %v23911_v40 = vpop.f32.mrf.mxu1  ;;  %9579 = vmatpush2.bf16.msra.mxu0 %v21872_v45 }
0x16d1   : > { %9580 = vmatprep.subr.bf16.mxu0 %v21877_v56 }
0x16d2   : > { %v9311_v20 = vpop.f32.mrf.mxu1 }
0x16d3   : > { %v23915_v42 = vmax.f32 %v9307_v30, %v9311_v20  ;;  %v22004_v30 = vld [vmem:[%s24870_s26 + $0x9c0] ss:$8 sps:$4 sm:$0xff]  }
0x16d4   : > { %9581 = vmatpush2.bf16.msra.mxu0 %v21875_v21  ;;  %v9313_v12 = vpop.f32.mrf.mxu1  ;;  %10751 = vmatpush2.bf16.msra.mxu1 %v22004_v30  ;;  %v21926_v30 = vld [vmem:[%s24870_s26 + $0x7a0] ss:$8 sps:$4 sm:$0xff]  }
0x16d5   : > { %9582 = vmatprep.subr.bf16.mxu0 %v21880_v43  ;;  %v9323_v10 = vmax.f32 %v23911_v40, %v9313_v12  ;;  %10752 = vmatprep.subr.bf16.mxu1 %v22012_v44  ;;  %v21887_v12 = vld [vmem:[%s24870_s26 + $0x770] ss:$8 sps:$4 sm:$0xff]  }
0x16d7   : > { %v9324_v37 = vrot.slane %v9323_v10, 4 }
0x16d8   : > { %9583 = vmatpush2.bf16.msra.mxu0 %v21878_v57  ;;  %10753 = vmatpush2.bf16.msra.mxu1 %v22010_v31  ;;  %v21932_v31 = vld [vmem:[%s24870_s26 + $0x780] ss:$8 sps:$4 sm:$0xff]  }
0x16d9   : > { %9584 = vmatprep.subr.bf16.mxu0 %v21883_v47  ;;  %v9325_v39 = vmax.f32 %v9323_v10, %v9324_v37  ;;  %v9317_v10 = vrot.slane %v23915_v42, 4 }
0x16db   : > { %v9326_v20 = vrot.slane %v9325_v39, 2  ;;  %v9318_v37 = vmax.f32 %v23915_v42, %v9317_v10  ;;  %v21929_v42 = vld [vmem:[%s24870_s26 + $0x790] ss:$8 sps:$4 sm:$0xff]   ;;  %v22025_v10 = vld [vmem:[%s24870_s26 + $0x880] ss:$8 sps:$4 sm:$0xff]  }
0x16dc   : > { %9585 = vmatpush2.bf16.msra.mxu0 %v21881_v58 }
0x16dd   : > { %9586 = vmatprep.subr.bf16.mxu0 %v21886_v59  ;;  %v9327_v51 = vmax.f32 %v9325_v39, %v9326_v20  ;;  %v9319_v39 = vrot.slane %v9318_v37, 2 }
0x16df   : > { %v9328_v56 = vrot.slane %v9327_v51, 1  ;;  %v9320_v61 = vmax.f32 %v9318_v37, %v9319_v39 }
0x16e0   : > { %9587 = vmatpush2.bf16.msra.mxu0 %v21884_v60 }
0x16e1   : > { %10040 = vmatprep.subr.bf16.mxu0 %v21889_v62  ;;  %v9329_v60 = vmax.f32 %v9327_v51, %v9328_v56  ;;  %v9321_v20 = vrot.slane %v9320_v61, 1  ;;  %v21935_v51 = vld [vmem:[%s24870_s26 + $0x870] ss:$8 sps:$4 sm:$0xff]   ;;  %v21941_v56 = vld [vmem:[%s24870_s26 + $0x860] ss:$8 sps:$4 sm:$0xff]  }
0x16e3   : > { %v9879_v15 = vpack.c.bf16 %v9329_v60, %v9329_v60  ;;  %v9322_v44 = vmax.f32 %v9320_v61, %v9321_v20  ;;  %v22028_v60 = vld [vmem:[%s24870_s26 + $0x980] ss:$8 sps:$4 sm:$0xff]  }
0x170e   : > { %v23934_v63 = vpop.f32.mrf.mxu1 }
0x1710   : > { %v23936_v0 = vpop.f32.mrf.mxu1 }
0x1712   : > { %v9795_v49 = vpop.f32.mrf.mxu1 }
0x1714   : > { %v9796_v28 = vpop.f32.mrf.mxu1 }
0x1715   : > { %v21892_v28 = vld [vmem:[%s24870_s26 + $0x764] ss:$8 sps:$4 sm:$0xff]  }
0x174e   : > { %v23950_v3 = vpop.f32.mrf.mxu1 }
0x1750   : > { %v23952_v19 = vpop.f32.mrf.mxu1 }
0x1752   : > { %v10279_v23 = vpop.f32.mrf.mxu1 }
0x1753   : > { %v21913_v23 = vld [vmem:[%s24870_s26 + $0x7f4] ss:$8 sps:$4 sm:$0xff]  }
0x1754   : > { %v10280_v24 = vpop.f32.mrf.mxu1 }
0x1755   : > { %v21911_v24 = vld [vmem:[%s24870_s26 + $0x7f0] ss:$8 sps:$4 sm:$0xff]  }
0x1763   : > { %v9056_v18 = vpop.f32.mrf.mxu0 }
0x1765   : > { %v9058_v41 = vpop.f32.mrf.mxu0 }
0x1767   : > { %v9060_v40 = vpop.f32.mrf.mxu0 }
0x1768   : > { %v9075_v54 = vmax.f32 %v9056_v18, %v9060_v40  ;;  %v21928_v18 = vld [vmem:[%s24870_s26 + $0x7a4] ss:$8 sps:$4 sm:$0xff]  }
0x1769   : > { %v9062_v33 = vpop.f32.mrf.mxu0  ;;  %v21934_v40 = vld [vmem:[%s24870_s26 + $0x784] ss:$8 sps:$4 sm:$0xff]  }
0x176a   : > { %v9076_v45 = vmax.f32 %v9058_v41, %v9062_v33  ;;  %v21931_v41 = vld [vmem:[%s24870_s26 + $0x794] ss:$8 sps:$4 sm:$0xff]  }
0x176b   : > { %v9066_v52 = vpop.f32.mrf.mxu0  ;;  %v21937_v33 = vld [vmem:[%s24870_s26 + $0x874] ss:$8 sps:$4 sm:$0xff]  }
0x176c   : > { %v9077_v21 = vmax.f32 %v9075_v54, %v9066_v52  ;;  %v9878_v52 = vpack.c.bf16 %v9322_v44, %v9322_v44  ;;  %v21943_v54 = vld [vmem:[%s24870_s26 + $0x864] ss:$8 sps:$4 sm:$0xff]  }
0x176d   : > { %v9068_v55 = vpop.f32.mrf.mxu0 }
0x176e   : > { %v9078_v57 = vmax.f32 %v9076_v45, %v9068_v55  ;;  %v22018_v55 = vld [vmem:[%s24870_s26 + $0x9a4] ss:$8 sps:$4 sm:$0xff]   ;;  %v22016_v45 = vld [vmem:[%s24870_s26 + $0x9a0] ss:$8 sps:$4 sm:$0xff]  }
0x176f   : > { %v9070_v43 = vpop.f32.mrf.mxu0  ;;  %10754 = vmatprep.subr.bf16.mxu1 %v22018_v55  ;;  %v22042_v55 = vld [vmem:[%s24870_s26 + $0xa44] ss:$8 sps:$4 sm:$0xff]  }
0x1770   : > { %v9079_v47 = vmax.f32 %v9077_v21, %v9070_v43  ;;  %v21949_v21 = vld [vmem:[%s24870_s26 + $0x854] ss:$8 sps:$4 sm:$0xff]   ;;  %10755 = vmatpush2.bf16.msra.mxu1 %v22016_v45  ;;  %v22040_v45 = vld [vmem:[%s24870_s26 + $0xa40] ss:$8 sps:$4 sm:$0xff]  }
0x1771   : > { %v9072_v58 = vpop.f32.mrf.mxu0  ;;  %v22024_v43 = vld [vmem:[%s24870_s26 + $0x994] ss:$8 sps:$4 sm:$0xff]  }
0x1772   : > { %v9080_v59 = vmax.f32 %v9078_v57, %v9072_v58  ;;  %v9394_v49 = vpack.c.bf16 %v9079_v47, %v9079_v47  ;;  %v22022_v57 = vld [vmem:[%s24870_s26 + $0x990] ss:$8 sps:$4 sm:$0xff]   ;;  %10756 = vmatprep.subr.bf16.mxu1 %v22024_v43  ;;  %v21955_v58 = vld [vmem:[%s24870_s26 + $0x844] ss:$8 sps:$4 sm:$0xff]  }
0x1773   : > { %v21947_v47 = vld [vmem:[%s24870_s26 + $0x850] ss:$8 sps:$4 sm:$0xff]   ;;  %v22048_v43 = vld [vmem:[%s24870_s26 + $0xa24] ss:$8 sps:$4 sm:$0xff]  }
0x1774   : > { %v9395_v62 = vpack.c.bf16 %v9080_v59, %v9080_v59  ;;  %10757 = vmatpush2.bf16.msra.mxu1 %v22022_v57  ;;  %v22030_v59 = vld [vmem:[%s24870_s26 + $0x984] ss:$8 sps:$4 sm:$0xff]   ;;  %v22046_v57 = vld [vmem:[%s24870_s26 + $0xa20] ss:$8 sps:$4 sm:$0xff]  }
0x1775   : > { %10758 = vmatprep.subr.bf16.mxu1 %v22030_v59  ;;  %v22054_v59 = vld [vmem:[%s24870_s26 + $0xa04] ss:$8 sps:$4 sm:$0xff]  }
0x1776   : > { %9588 = vmatprep.mubr.bf16.mxu0 %v9395_v62  ;;  %v21953_v62 = vld [vmem:[%s24870_s26 + $0x840] ss:$8 sps:$4 sm:$0xff]  }
0x1777   : > { %9589 = vmatmul.mubr.bf16.vlgmr.msra.gmra.mxu0 %v9394_v49  ;;  %v21959_v49 = vld [vmem:[%s24870_s26 + $0x830] ss:$8 sps:$4 sm:$0xff]  }
0x1778   : > { %10041 = vmatpush1.bf16.msra.mxu0 %v21887_v12  ;;  %10072 = vmatprep.mubr.bf16.mxu0 %v9879_v15  ;;  %v21961_v12 = vld [vmem:[%s24870_s26 + $0x834] ss:$8 sps:$4 sm:$0xff]   ;;  %v21965_v15 = vld [vmem:[%s24870_s26 + $0x820] ss:$8 sps:$4 sm:$0xff]  }
0x1779   : > { %10042 = vmatprep.subr.bf16.mxu0 %v21892_v28  ;;  %10759 = vmatpush2.bf16.msra.mxu1 %v22028_v60  ;;  %v21967_v28 = vld [vmem:[%s24870_s26 + $0x824] ss:$8 sps:$4 sm:$0xff]   ;;  %v22052_v60 = vld [vmem:[%s24870_s26 + $0xa00] ss:$8 sps:$4 sm:$0xff]  }
0x177c   : > { %10043 = vmatpush1.bf16.msra.mxu0 %v21890_v4  ;;  %v21973_v4 = vld [vmem:[%s24870_s26 + $0x814] ss:$8 sps:$4 sm:$0xff]  }
0x177d   : > { %10044 = vmatprep.subr.bf16.mxu0 %v21895_v5  ;;  %v21971_v5 = vld [vmem:[%s24870_s26 + $0x810] ss:$8 sps:$4 sm:$0xff]  }
0x1780   : > { %10045 = vmatpush1.bf16.msra.mxu0 %v21893_v6  ;;  %v21979_v6 = vld [vmem:[%s24870_s26 + $0x804] ss:$8 sps:$4 sm:$0xff]  }
0x1781   : > { %10046 = vmatprep.subr.bf16.mxu0 %v21898_v7  ;;  %v21977_v7 = vld [vmem:[%s24870_s26 + $0x800] ss:$8 sps:$4 sm:$0xff]  }
0x1784   : > { %10047 = vmatpush1.bf16.msra.mxu0 %v21896_v8  ;;  %v21985_v8 = vld [vmem:[%s24870_s26 + $0x8f4] ss:$8 sps:$4 sm:$0xff]  }
0x1785   : > { %10048 = vmatprep.subr.bf16.mxu0 %v21901_v13  ;;  %v21983_v13 = vld [vmem:[%s24870_s26 + $0x8f0] ss:$8 sps:$4 sm:$0xff]  }
0x1788   : > { %10049 = vmatpush1.bf16.msra.mxu0 %v21899_v14  ;;  %v21991_v14 = vld [vmem:[%s24870_s26 + $0x8e4] ss:$8 sps:$4 sm:$0xff]  }
0x1789   : > { %10050 = vmatprep.subr.bf16.mxu0 %v21904_v38  ;;  %v21989_v38 = vld [vmem:[%s24870_s26 + $0x8e0] ss:$8 sps:$4 sm:$0xff]  }
0x178c   : > { %10051 = vmatpush1.bf16.msra.mxu0 %v21902_v29  ;;  %v21997_v29 = vld [vmem:[%s24870_s26 + $0x8d4] ss:$8 sps:$4 sm:$0xff]  }
0x178d   : > { %10052 = vmatprep.subr.bf16.mxu0 %v21907_v16  ;;  %v21995_v16 = vld [vmem:[%s24870_s26 + $0x8d0] ss:$8 sps:$4 sm:$0xff]  }
0x1790   : > { %10053 = vmatpush1.bf16.msra.mxu0 %v21905_v17  ;;  %v22003_v17 = vld [vmem:[%s24870_s26 + $0x8c4] ss:$8 sps:$4 sm:$0xff]  }
0x1791   : > { %10054 = vmatprep.subr.bf16.mxu0 %v21910_v22  ;;  %v22001_v22 = vld [vmem:[%s24870_s26 + $0x8c0] ss:$8 sps:$4 sm:$0xff]  }
0x1794   : > { %10055 = vmatpush1.bf16.msra.mxu0 %v21908_v46  ;;  %v22009_v46 = vld [vmem:[%s24870_s26 + $0x8b4] ss:$8 sps:$4 sm:$0xff]  }
0x1795   : > { %10056 = vmatprep.subr.bf16.mxu0 %v21913_v23  ;;  %v22007_v23 = vld [vmem:[%s24870_s26 + $0x8b0] ss:$8 sps:$4 sm:$0xff]  }
0x1798   : > { %10057 = vmatpush2.bf16.msra.mxu0 %v21911_v24  ;;  %v22015_v24 = vld [vmem:[%s24870_s26 + $0x8a4] ss:$8 sps:$4 sm:$0xff]  }
0x1799   : > { %10058 = vmatprep.subr.bf16.mxu0 %v21916_v34  ;;  %v22013_v34 = vld [vmem:[%s24870_s26 + $0x8a0] ss:$8 sps:$4 sm:$0xff]  }
0x179c   : > { %10059 = vmatpush2.bf16.msra.mxu0 %v21914_v25  ;;  %v22021_v25 = vld [vmem:[%s24870_s26 + $0x894] ss:$8 sps:$4 sm:$0xff]  }
0x179d   : > { %10060 = vmatprep.subr.bf16.mxu0 %v21919_v26  ;;  %v22019_v26 = vld [vmem:[%s24870_s26 + $0x890] ss:$8 sps:$4 sm:$0xff]  }
0x17a0   : > { %10061 = vmatpush2.bf16.msra.mxu0 %v21917_v35  ;;  %v22027_v35 = vld [vmem:[%s24870_s26 + $0x884] ss:$8 sps:$4 sm:$0xff]  }
0x17a1   : > { %10062 = vmatprep.subr.bf16.mxu0 %v21922_v11  ;;  %v22033_v11 = vld [vmem:[%s24870_s26 + $0xa74] ss:$8 sps:$4 sm:$0xff]  }
0x17a4   : > { %10063 = vmatpush2.bf16.msra.mxu0 %v21920_v36  ;;  %v9798_v36 = vld [vmem:[%s24871_s1] sm:$0x3] }
0x17a5   : > { %10064 = vmatprep.subr.bf16.mxu0 %v21925_v53  ;;  %v9803_v37 = vrot.slane %v9798_v36, %v23231_v27  ;;  %v9807_v39 = vrot.slane %v9798_v36, %v23631_v9 }
0x17a8   : > { %10065 = vmatpush2.bf16.msra.mxu0 %v21923_v32 }
0x17a9   : > { %10066 = vmatprep.subr.bf16.mxu0 %v21928_v18 }
0x17ac   : > { %10067 = vmatpush2.bf16.msra.mxu0 %v21926_v30 }
0x17ad   : > { %10068 = vmatprep.subr.bf16.mxu0 %v21931_v41 }
0x17b0   : > { %10069 = vmatpush2.bf16.msra.mxu0 %v21929_v42 }
0x17b1   : > { %10070 = vmatprep.subr.bf16.mxu0 %v21934_v40 }
0x17b4   : > { %10071 = vmatpush2.bf16.msra.mxu0 %v21932_v31 }
0x17b5   : > { %10495 = vmatprep.subr.bf16.mxu0 %v21937_v33  ;;  %v22031_v33 = vld [vmem:[%s24870_s26 + $0xa70] ss:$8 sps:$4 sm:$0xff]  }
0x17b7   : > { %10073 = vmatmul.mubr.bf16.vlgmr.msra.gmra.mxu0 %v9878_v52  ;;  %v22039_v52 = vld [vmem:[%s24870_s26 + $0xa54] ss:$8 sps:$4 sm:$0xff]  }
0x17b8   : > { %10496 = vmatpush1.bf16.msra.mxu0 %v21935_v51 }
0x17b9   : > { %10497 = vmatprep.subr.bf16.mxu0 %v21943_v54  ;;  %v22037_v54 = vld [vmem:[%s24870_s26 + $0xa50] ss:$8 sps:$4 sm:$0xff]  }
0x17bc   : > { %10498 = vmatpush1.bf16.msra.mxu0 %v21941_v56  ;;  %v22045_v56 = vld [vmem:[%s24870_s26 + $0xa34] ss:$8 sps:$4 sm:$0xff]  }
0x17bd   : > { %10499 = vmatprep.subr.bf16.mxu0 %v21949_v21  ;;  %v22043_v21 = vld [vmem:[%s24870_s26 + $0xa30] ss:$8 sps:$4 sm:$0xff]  }
0x17c0   : > { %10500 = vmatpush1.bf16.msra.mxu0 %v21947_v47  ;;  %v22051_v47 = vld [vmem:[%s24870_s26 + $0xa14] ss:$8 sps:$4 sm:$0xff]  }
0x17c1   : > { %10501 = vmatprep.subr.bf16.mxu0 %v21955_v58  ;;  %v22049_v58 = vld [vmem:[%s24870_s26 + $0xa10] ss:$8 sps:$4 sm:$0xff]  }
0x17c4   : > { %10502 = vmatpush1.bf16.msra.mxu0 %v21953_v62  ;;  %v22057_v62 = vld [vmem:[%s24870_s26 + $0xaf4] ss:$8 sps:$4 sm:$0xff]  }
0x17c5   : > { %10503 = vmatprep.subr.bf16.mxu0 %v21961_v12  ;;  %v22055_v12 = vld [vmem:[%s24870_s26 + $0xaf0] ss:$8 sps:$4 sm:$0xff]  }
0x17c8   : > { %10504 = vmatpush1.bf16.msra.mxu0 %v21959_v49  ;;  %v22060_v49 = vld [vmem:[%s24870_s26 + $0xae4] ss:$8 sps:$4 sm:$0xff]  }
0x17c9   : > { %10505 = vmatprep.subr.bf16.mxu0 %v21967_v28  ;;  %v22058_v28 = vld [vmem:[%s24870_s26 + $0xae0] ss:$8 sps:$4 sm:$0xff]  }
0x17cc   : > { %10506 = vmatpush1.bf16.msra.mxu0 %v21965_v15  ;;  %v22063_v15 = vld [vmem:[%s24870_s26 + $0xad4] ss:$8 sps:$4 sm:$0xff]  }
0x17cd   : > { %10507 = vmatprep.subr.bf16.mxu0 %v21973_v4  ;;  %v22061_v4 = vld [vmem:[%s24870_s26 + $0xad0] ss:$8 sps:$4 sm:$0xff]  }
0x17d0   : > { %10508 = vmatpush1.bf16.msra.mxu0 %v21971_v5  ;;  %v22066_v5 = vld [vmem:[%s24870_s26 + $0xac4] ss:$8 sps:$4 sm:$0xff]  }
0x17d1   : > { %10509 = vmatprep.subr.bf16.mxu0 %v21979_v6  ;;  %v22064_v6 = vld [vmem:[%s24870_s26 + $0xac0] ss:$8 sps:$4 sm:$0xff]  }
0x17d4   : > { %10510 = vmatpush1.bf16.msra.mxu0 %v21977_v7  ;;  %v22069_v7 = vld [vmem:[%s24870_s26 + $0xab4] ss:$8 sps:$4 sm:$0xff]  }
0x17d5   : > { %10511 = vmatprep.subr.bf16.mxu0 %v21985_v8  ;;  %v22067_v8 = vld [vmem:[%s24870_s26 + $0xab0] ss:$8 sps:$4 sm:$0xff]  }
0x17d8   : > { %10512 = vmatpush2.bf16.msra.mxu0 %v21983_v13  ;;  %v22072_v13 = vld [vmem:[%s24870_s26 + $0xaa4] ss:$8 sps:$4 sm:$0xff]  }
0x17d9   : > { %10513 = vmatprep.subr.bf16.mxu0 %v21991_v14  ;;  %v22070_v14 = vld [vmem:[%s24870_s26 + $0xaa0] ss:$8 sps:$4 sm:$0xff]  }
0x17dc   : > { %10514 = vmatpush2.bf16.msra.mxu0 %v21989_v38  ;;  %v22075_v38 = vld [vmem:[%s24870_s26 + $0xa94] ss:$8 sps:$4 sm:$0xff]  }
0x17dd   : > { %10515 = vmatprep.subr.bf16.mxu0 %v21997_v29 }
0x17e0   : > { %10516 = vmatpush2.bf16.msra.mxu0 %v21995_v16  ;;  %v22073_v16 = vld [vmem:[%s24870_s26 + $0xa90] ss:$8 sps:$4 sm:$0xff]  }
0x17e1   : > { %10517 = vmatprep.subr.bf16.mxu0 %v22003_v17 }
0x17e4   : > { %10518 = vmatpush2.bf16.msra.mxu0 %v22001_v22  ;;  %v22078_v22 = vld [vmem:[%s24870_s26 + $0xa84] ss:$8 sps:$4 sm:$0xff]  }
0x17e5   : > { %10519 = vmatprep.subr.bf16.mxu0 %v22009_v46 }
0x17e8   : > { %10520 = vmatpush2.bf16.msra.mxu0 %v22007_v23  ;;  %v22076_v23 = vld [vmem:[%s24870_s26 + $0xa80] ss:$8 sps:$4 sm:$0xff]  }
0x17e9   : > { %10521 = vmatprep.subr.bf16.mxu0 %v22015_v24 }
0x17ec   : > { %10522 = vmatpush2.bf16.msra.mxu0 %v22013_v34 }
0x17ed   : > { %10523 = vmatprep.subr.bf16.mxu0 %v22021_v25 }
0x17f0   : > { %10524 = vmatpush2.bf16.msra.mxu0 %v22019_v26 }
0x17f1   : > { %10525 = vmatprep.subr.bf16.mxu0 %v22027_v35 }
0x17f4   : > { %10526 = vmatpush2.bf16.msra.mxu0 %v22025_v10 }
0x17f5   : > { %10961 = vmatprep.subr.bf16.mxu0 %v22033_v11 }
0x1837   : > { %v9590_v53 = vpop.f32.mrf.mxu0 }
0x1838   : > { %v9792_v32 = vadd.f32 %v23934_v63, %v9590_v53  ;;  %v22036_v63 = vld [vmem:[%s24870_s26 + $0xa64] ss:$8 sps:$4 sm:$0xff]  }
0x1839   : > { %v9592_v18 = vpop.f32.mrf.mxu0 }
0x183a   : > { %v9810_v30 = vadd.f32 %v9803_v37, %v9792_v32  ;;  %v9794_v61 = vadd.f32 %v23936_v0, %v9592_v18  ;;  %v22034_v0 = vld [vmem:[%s24870_s26 + $0xa60] ss:$8 sps:$4 sm:$0xff]  }
0x183b   : > { %v9594_v41 = vpop.f32.mrf.mxu0 }
0x183c   : > { %v9811_v42 = vadd.f32 %v9807_v39, %v9794_v61  ;;  %v9812_v20 = vmax.f32 %v9810_v30, 0.0 }
0x183d   : > { %v9595_v40 = vpop.f32.mrf.mxu0 }
0x183e   : > { %v9813_v31 = vmax.f32 %v9811_v42, 0.0  ;;  %v24049_v51 = vpack.c.bf16 %v9812_v20, %v9812_v20  ;;  %v24093_v40 = vld [vmem:[%s24871_s1 + $0x2] sm:$0x3] }
0x1840   : > { %v24046_v44 = vpack.c.bf16 %v9813_v31, %v9813_v31  ;;  %v22081_v31 = vld [vmem:[%s24870_s26 + $0xb74] ss:$8 sps:$4 sm:$0xff]  }
0x1842   : > { %10527 = vmatprep.mubr.bf16.mxu0 %v24046_v44  ;;  %10760 = vmatprep.mubr.bf16.mxu1 %v24046_v44 }
0x1843   : > { %10528 = vmatmul.mubr.bf16.vlgmr.msra.gmra.mxu0 %v24049_v51  ;;  %10761 = vmatmul.mubr.bf16.vlgmr.msra.gmra.mxu1 %v24049_v51 }
0x1844   : > { %10962 = vmatpush1.bf16.msra.mxu0 %v22031_v33  ;;  %10993 = vmatprep.mubr.bf16.mxu0 %v24046_v44 }
0x1845   : > { %10963 = vmatprep.subr.bf16.mxu0 %v22036_v63  ;;  %11044 = vmatprep.mubr.bf16.mxu1 %v22746_v1  ;;  %v10292_v63 = vrot.slane %v24093_v40, %v23631_v9 }
0x1848   : > { %10964 = vmatpush1.bf16.msra.mxu0 %v22034_v0  ;;  %v22079_v0 = vld [vmem:[%s24870_s26 + $0xb70] ss:$8 sps:$4 sm:$0xff]  }
0x1849   : > { %10965 = vmatprep.subr.bf16.mxu0 %v22039_v52  ;;  %v22084_v52 = vld [vmem:[%s24870_s26 + $0xb64] ss:$8 sps:$4 sm:$0xff]  }
0x184c   : > { %10966 = vmatpush1.bf16.msra.mxu0 %v22037_v54 }
0x184d   : > { %10967 = vmatprep.subr.bf16.mxu0 %v22042_v55  ;;  %v22605_v55 = vld [vmem:[%s22985_s23] sm:$0xff]  }
0x1850   : > { %10968 = vmatpush1.bf16.msra.mxu0 %v22040_v45  ;;  %v22175_v45 = vld [vmem:[%s24870_s26 + $0xd70] ss:$8 sps:$4 sm:$0xff]  }
0x1851   : > { %10969 = vmatprep.subr.bf16.mxu0 %v22045_v56  ;;  %v22177_v56 = vld [vmem:[%s24870_s26 + $0xd74] ss:$8 sps:$4 sm:$0xff]  }
0x1854   : > { %10970 = vmatpush1.bf16.msra.mxu0 %v22043_v21  ;;  %v22180_v21 = vld [vmem:[%s24870_s26 + $0xd64] ss:$8 sps:$4 sm:$0xff]  }
0x1855   : > { %10971 = vmatprep.subr.bf16.mxu0 %v22048_v43  ;;  %v22087_v43 = vld [vmem:[%s24870_s26 + $0xb54] ss:$8 sps:$4 sm:$0xff]  }
0x1858   : > { %10972 = vmatpush1.bf16.msra.mxu0 %v22046_v57 }
0x1859   : > { %10973 = vmatprep.subr.bf16.mxu0 %v22051_v47  ;;  %v22178_v47 = vld [vmem:[%s24870_s26 + $0xd60] ss:$8 sps:$4 sm:$0xff]  }
0x185c   : > { %10974 = vmatpush1.bf16.msra.mxu0 %v22049_v58  ;;  %v22183_v58 = vld [vmem:[%s24870_s26 + $0xd54] ss:$8 sps:$4 sm:$0xff]  }
0x185d   : > { %10975 = vmatprep.subr.bf16.mxu0 %v22054_v59  ;;  %v22085_v59 = vld [vmem:[%s24870_s26 + $0xb50] ss:$8 sps:$4 sm:$0xff]  }
0x1860   : > { %10976 = vmatpush1.bf16.msra.mxu0 %v22052_v60  ;;  %v22090_v60 = vld [vmem:[%s24870_s26 + $0xb44] ss:$8 sps:$4 sm:$0xff]  }
0x1861   : > { %10977 = vmatprep.subr.bf16.mxu0 %v22057_v62  ;;  %v22181_v62 = vld [vmem:[%s24870_s26 + $0xd50] ss:$8 sps:$4 sm:$0xff]  }
0x1864   : > { %10978 = vmatpush2.bf16.msra.mxu0 %v22055_v12  ;;  %v22606_v12 = vld [vmem:[%s22985_s23 + $0x8] sm:$0xff]  }
0x1865   : > { %10979 = vmatprep.subr.bf16.mxu0 %v22060_v49  ;;  %v22186_v49 = vld [vmem:[%s24870_s26 + $0xd44] ss:$8 sps:$4 sm:$0xff]  }
0x1868   : > { %10980 = vmatpush2.bf16.msra.mxu0 %v22058_v28  ;;  %v22088_v28 = vld [vmem:[%s24870_s26 + $0xb40] ss:$8 sps:$4 sm:$0xff]  }
0x1869   : > { %10981 = vmatprep.subr.bf16.mxu0 %v22063_v15  ;;  %v22093_v15 = vld [vmem:[%s24870_s26 + $0xb34] ss:$8 sps:$4 sm:$0xff]  }
0x186c   : > { %10982 = vmatpush2.bf16.msra.mxu0 %v22061_v4  ;;  %v22184_v4 = vld [vmem:[%s24870_s26 + $0xd40] ss:$8 sps:$4 sm:$0xff]  }
0x186d   : > { %10983 = vmatprep.subr.bf16.mxu0 %v22066_v5  ;;  %v22189_v5 = vld [vmem:[%s24870_s26 + $0xd34] ss:$8 sps:$4 sm:$0xff]  }
0x1870   : > { %10984 = vmatpush2.bf16.msra.mxu0 %v22064_v6  ;;  %v22091_v6 = vld [vmem:[%s24870_s26 + $0xb30] ss:$8 sps:$4 sm:$0xff]  }
0x1871   : > { %10985 = vmatprep.subr.bf16.mxu0 %v22069_v7  ;;  %v22096_v7 = vld [vmem:[%s24870_s26 + $0xb24] ss:$8 sps:$4 sm:$0xff]  }
0x1874   : > { %10986 = vmatpush2.bf16.msra.mxu0 %v22067_v8  ;;  %v22187_v8 = vld [vmem:[%s24870_s26 + $0xd30] ss:$8 sps:$4 sm:$0xff]  }
0x1875   : > { %10987 = vmatprep.subr.bf16.mxu0 %v22072_v13  ;;  %v22192_v13 = vld [vmem:[%s24870_s26 + $0xd24] ss:$8 sps:$4 sm:$0xff]  }
0x1877   : > { %v24084_v29 = vpop.f32.mrf.mxu0 }
0x1878   : > { %10988 = vmatpush2.bf16.msra.mxu0 %v22070_v14  ;;  %v22094_v14 = vld [vmem:[%s24870_s26 + $0xb20] ss:$8 sps:$4 sm:$0xff]  }
0x1879   : > { %v10076_v17 = vpop.f32.mrf.mxu0  ;;  %10989 = vmatprep.subr.bf16.mxu0 %v22075_v38  ;;  %v22099_v38 = vld [vmem:[%s24870_s26 + $0xb14] ss:$8 sps:$4 sm:$0xff]  }
0x187a   : > { %v10278_v33 = vadd.f32 %v23952_v19, %v10076_v17  ;;  %v22082_v19 = vld [vmem:[%s24870_s26 + $0xb60] ss:$8 sps:$4 sm:$0xff]   ;;  %v22195_v17 = vld [vmem:[%s24870_s26 + $0xd14] ss:$8 sps:$4 sm:$0xff]  }
0x187b   : > { %v10078_v46 = vpop.f32.mrf.mxu0 }
0x187c   : > { %10990 = vmatpush2.bf16.msra.mxu0 %v22073_v16  ;;  %v10296_v54 = vadd.f32 %v10292_v63, %v10278_v33  ;;  %v22190_v16 = vld [vmem:[%s24870_s26 + $0xd20] ss:$8 sps:$4 sm:$0xff]   ;;  %v22102_v46 = vld [vmem:[%s24870_s26 + $0xb04] ss:$8 sps:$4 sm:$0xff]   ;;  %v22115_v63 = vld [vmem:[%s24870_s26 + $0xbb0] ss:$8 sps:$4 sm:$0xff]  }
0x187d   : > { %v10079_v24 = vpop.f32.mrf.mxu0  ;;  %10991 = vmatprep.subr.bf16.mxu0 %v22078_v22  ;;  %v22097_v22 = vld [vmem:[%s24870_s26 + $0xb10] ss:$8 sps:$4 sm:$0xff]   ;;  %v22208_v33 = vld [vmem:[%s24870_s26 + $0xdc0] ss:$8 sps:$4 sm:$0xff]  }
0x187e   : > { %v10298_v57 = vmax.f32 %v10296_v54, 0.0  ;;  %v22198_v24 = vld [vmem:[%s24870_s26 + $0xd04] ss:$8 sps:$4 sm:$0xff]   ;;  %v10276_v54 = vadd.f32 %v23950_v3, %v24084_v29  ;;  %v22129_v3 = vld [vmem:[%s24870_s26 + $0xc74] ss:$8 sps:$4 sm:$0xff]  }
0x187f   : > { %v22127_v29 = vld [vmem:[%s24870_s26 + $0xc70] ss:$8 sps:$4 sm:$0xff]  }
0x1880   : > { %10992 = vmatpush2.bf16.msra.mxu0 %v22076_v23  ;;  %v22193_v23 = vld [vmem:[%s24870_s26 + $0xd10] ss:$8 sps:$4 sm:$0xff]  }
0x1881   : > { %11528 = vmatprep.subr.bf16.mxu0 %v22177_v56  ;;  %v22121_v56 = vld [vmem:[%s24870_s26 + $0xb90] ss:$8 sps:$4 sm:$0xff]  }
0x1883   : > { %10994 = vmatmul.mubr.bf16.vlgmr.msra.gmra.mxu0 %v24049_v51 }
0x1884   : > { %11529 = vmatpush1.bf16.msra.mxu0 %v22175_v45  ;;  %v22123_v45 = vld [vmem:[%s24870_s26 + $0xb94] ss:$8 sps:$4 sm:$0xff]  }
0x1885   : > { %11530 = vmatprep.subr.bf16.mxu0 %v22180_v21  ;;  %v22126_v21 = vld [vmem:[%s24870_s26 + $0xb84] ss:$8 sps:$4 sm:$0xff]  }
0x1888   : > { %11531 = vmatpush1.bf16.msra.mxu0 %v22178_v47  ;;  %v22132_v47 = vld [vmem:[%s24870_s26 + $0xc64] ss:$8 sps:$4 sm:$0xff]  }
0x1889   : > { %11532 = vmatprep.subr.bf16.mxu0 %v22183_v58  ;;  %v22130_v58 = vld [vmem:[%s24870_s26 + $0xc60] ss:$8 sps:$4 sm:$0xff]  }
0x188c   : > { %11533 = vmatpush1.bf16.msra.mxu0 %v22181_v62  ;;  %v22211_v62 = vld [vmem:[%s24870_s26 + $0xdb0] ss:$8 sps:$4 sm:$0xff]  }
0x188d   : > { %11534 = vmatprep.subr.bf16.mxu0 %v22186_v49  ;;  %v22216_v49 = vld [vmem:[%s24870_s26 + $0xda4] ss:$8 sps:$4 sm:$0xff]  }
0x1890   : > { %11535 = vmatpush1.bf16.msra.mxu0 %v22184_v4  ;;  %v22219_v4 = vld [vmem:[%s24870_s26 + $0xd94] ss:$8 sps:$4 sm:$0xff]  }
0x1891   : > { %11536 = vmatprep.subr.bf16.mxu0 %v22189_v5  ;;  %v22141_v5 = vld [vmem:[%s24870_s26 + $0xc34] ss:$8 sps:$4 sm:$0xff]  }
0x1894   : > { %11537 = vmatpush1.bf16.msra.mxu0 %v22187_v8  ;;  %v22222_v8 = vld [vmem:[%s24870_s26 + $0xd84] ss:$8 sps:$4 sm:$0xff]  }
0x1895   : > { %11538 = vmatprep.subr.bf16.mxu0 %v22192_v13  ;;  %v22144_v13 = vld [vmem:[%s24870_s26 + $0xc24] ss:$8 sps:$4 sm:$0xff]  }
0x1898   : > { %11539 = vmatpush1.bf16.msra.mxu0 %v22190_v16  ;;  %v22225_v16 = vld [vmem:[%s24870_s26 + $0xe74] ss:$8 sps:$4 sm:$0xff]  }
0x1899   : > { %11540 = vmatprep.subr.bf16.mxu0 %v22195_v17  ;;  %v22147_v17 = vld [vmem:[%s24870_s26 + $0xc14] ss:$8 sps:$4 sm:$0xff]  }
0x189c   : > { %11541 = vmatpush1.bf16.msra.mxu0 %v22193_v23  ;;  %v22148_v23 = vld [vmem:[%s24870_s26 + $0xc00] ss:$8 sps:$4 sm:$0xff]  }
0x189d   : > { %11542 = vmatprep.subr.bf16.mxu0 %v22198_v24  ;;  %v22153_v24 = vld [vmem:[%s24870_s26 + $0xcf4] ss:$8 sps:$4 sm:$0xff]  }
0x1903   : > { %v10529_v34 = vpop.f32.mrf.mxu0  ;;  %v10762_v25 = vpop.f32.mrf.mxu1 }
0x1904   : > { %v11002_v26 = vpack.c.bf16 %v10762_v25, %v10529_v34  ;;  %v22100_v34 = vld [vmem:[%s24870_s26 + $0xb00] ss:$8 sps:$4 sm:$0xff]   ;;  %v22105_v25 = vld [vmem:[%s24870_s26 + $0xbf4] ss:$8 sps:$4 sm:$0xff]  }
0x1905   : > { %v10531_v35 = vpop.f32.mrf.mxu0  ;;  %v10764_v10 = vpop.f32.mrf.mxu1 }
0x1906   : > { %v11003_v11 = vpack.c.bf16 %v10764_v10, %v10531_v35  ;;  %v22201_v35 = vld [vmem:[%s24870_s26 + $0xdf4] ss:$8 sps:$4 sm:$0xff]   ;;  %v22103_v10 = vld [vmem:[%s24870_s26 + $0xbf0] ss:$8 sps:$4 sm:$0xff]  }
0x1907   : > { %v10533_v36 = vpop.f32.mrf.mxu0  ;;  %v10766_v37 = vpop.f32.mrf.mxu1 }
0x1908   : > { %v22199_v36 = vld [vmem:[%s24870_s26 + $0xdf0] ss:$8 sps:$4 sm:$0xff]   ;;  %v22204_v37 = vld [vmem:[%s24870_s26 + $0xde4] ss:$8 sps:$4 sm:$0xff]  }
0x1909   : > { %v10534_v53 = vpop.f32.mrf.mxu0  ;;  %v10767_v32 = vpop.f32.mrf.mxu1 }
0x190a   : > { %v22106_v53 = vld [vmem:[%s24870_s26 + $0xbe0] ss:$8 sps:$4 sm:$0xff]   ;;  %v22111_v32 = vld [vmem:[%s24870_s26 + $0xbd4] ss:$8 sps:$4 sm:$0xff]  }
0x1943   : > { %v10995_v39 = vpop.f32.mrf.mxu0 }
0x1944   : > { %v11004_v18 = vpack.c.bf16 %v10995_v39, %v10995_v39  ;;  %v22202_v39 = vld [vmem:[%s24870_s26 + $0xde0] ss:$8 sps:$4 sm:$0xff]  }
0x1945   : > { %v10997_v30 = vpop.f32.mrf.mxu0 }
0x1946   : > { %v11005_v61 = vpack.c.bf16 %v10997_v30, %v10997_v30  ;;  %v11007_v42 = vsel %vm2109_vm7, %v11004_v18, 0  ;;  %v22207_v18 = vld [vmem:[%s24870_s26 + $0xdd4] ss:$8 sps:$4 sm:$0xff]   ;;  %v22109_v30 = vld [vmem:[%s24870_s26 + $0xbd0] ss:$8 sps:$4 sm:$0xff]  }
0x1947   : > { %v10999_v41 = vpop.f32.mrf.mxu0 }
0x1948   : > { %18171 = vmatprep.subr.msk.bf16.mxu1 %vm2109_vm7, %v11005_v61  ;;  %v22114_v61 = vld [vmem:[%s24870_s26 + $0xbc4] ss:$8 sps:$4 sm:$0xff]   ;;  %v22205_v41 = vld [vmem:[%s24870_s26 + $0xdd0] ss:$8 sps:$4 sm:$0xff]  }
0x1949   : > { %v11000_v20 = vpop.f32.mrf.mxu0  ;;  %11025 = vmatpush1.bf16.msra.mxu1 %v11007_v42  ;;  %v22210_v42 = vld [vmem:[%s24870_s26 + $0xdc4] ss:$8 sps:$4 sm:$0xff]  }
0x194a   : > { %11026 = vmatprep.subr.bf16.mxu1 %v11003_v11  ;;  %v22108_v11 = vld [vmem:[%s24870_s26 + $0xbe4] ss:$8 sps:$4 sm:$0xff]   ;;  %v22112_v20 = vld [vmem:[%s24870_s26 + $0xbc0] ss:$8 sps:$4 sm:$0xff]  }
0x194d   : > { %11027 = vmatpush1.bf16.msra.mxu1 %v11002_v26  ;;  %v22196_v26 = vld [vmem:[%s24870_s26 + $0xd00] ss:$8 sps:$4 sm:$0xff]  }
0x194e   : > { %11261 = vmatprep.subr.bf16.mxu1 %v22081_v31  ;;  %11543 = vmatpush1.bf16.msra.mxu0 %v22196_v26  ;;  %v22117_v31 = vld [vmem:[%s24870_s26 + $0xbb4] ss:$8 sps:$4 sm:$0xff]   ;;  %v22154_v26 = vld [vmem:[%s24870_s26 + $0xce0] ss:$8 sps:$4 sm:$0xff]  }
0x194f   : > { %11544 = vmatprep.subr.bf16.mxu0 %v22201_v35  ;;  %v22159_v35 = vld [vmem:[%s24870_s26 + $0xcd4] ss:$8 sps:$4 sm:$0xff]  }
0x1950   : > { %18172 = vmatmul.mubr.msk.bf16.vlgmr.msra.gmra.mxu1 %vm2102_vm6, %v22605_v55  ;;  %v10288_v55 = vrot.slane %v24093_v40, %v23231_v27 }
0x1951   : > { %11262 = vmatpush1.bf16.msra.mxu1 %v22079_v0  ;;  %11054 = vmatprep.mubr.bf16.mxu1 %v22746_v1  ;;  %v24113_v1 = vpack.c.bf16 %v10298_v57, %v10298_v57  ;;  %v22120_v0 = vld [vmem:[%s24870_s26 + $0xba4] ss:$8 sps:$4 sm:$0xff]  }
0x1952   : > { %11263 = vmatprep.subr.bf16.mxu1 %v22084_v52  ;;  %11545 = vmatpush2.bf16.msra.mxu0 %v22199_v36  ;;  %v22118_v52 = vld [vmem:[%s24870_s26 + $0xba0] ss:$8 sps:$4 sm:$0xff]  }
0x1953   : > { %11546 = vmatprep.subr.bf16.mxu0 %v22204_v37  ;;  %v22160_v36 = vld [vmem:[%s24870_s26 + $0xcc0] ss:$8 sps:$4 sm:$0xff]   ;;  %v22165_v37 = vld [vmem:[%s24870_s26 + $0xcb4] ss:$8 sps:$4 sm:$0xff]  }
0x1955   : > { %11264 = vmatpush1.bf16.msra.mxu1 %v22082_v19  ;;  %v10295_v19 = vadd.f32 %v10288_v55, %v10276_v54 }
0x1956   : > { %11265 = vmatprep.subr.bf16.mxu1 %v22087_v43  ;;  %11547 = vmatpush2.bf16.msra.mxu0 %v22202_v39  ;;  %v22124_v43 = vld [vmem:[%s24870_s26 + $0xb80] ss:$8 sps:$4 sm:$0xff]  }
0x1957   : > { %11548 = vmatprep.subr.bf16.mxu0 %v22207_v18  ;;  %v10297_v57 = vmax.f32 %v10295_v19, 0.0  ;;  %v22166_v39 = vld [vmem:[%s24870_s26 + $0xca0] ss:$8 sps:$4 sm:$0xff]   ;;  %v22171_v18 = vld [vmem:[%s24870_s26 + $0xc94] ss:$8 sps:$4 sm:$0xff]  }
0x1958   : > { %18173 = vmatmul.mubr.msk.bf16.gmra.mxu1 %vm2102_vm6, %v22606_v12  ;;  %v22133_v12 = vld [vmem:[%s24870_s26 + $0xc50] ss:$8 sps:$4 sm:$0xff]  }
0x1959   : > { %11266 = vmatpush1.bf16.msra.mxu1 %v22085_v59  ;;  %11293 = vmatprep.mubr.bf16.mxu1 %v24113_v1  ;;  %v24168_v40 = vpack.c.bf16 %v10297_v57, %v10297_v57  ;;  %v22213_v59 = vld [vmem:[%s24870_s26 + $0xdb4] ss:$8 sps:$4 sm:$0xff]   ;;  %v22228_v57 = vld [vmem:[%s24870_s26 + $0xe64] ss:$8 sps:$4 sm:$0xff]  }
0x195a   : > { %11267 = vmatprep.subr.bf16.mxu1 %v22090_v60  ;;  %11549 = vmatpush2.bf16.msra.mxu0 %v22205_v41  ;;  %v22135_v60 = vld [vmem:[%s24870_s26 + $0xc54] ss:$8 sps:$4 sm:$0xff]   ;;  %v22172_v41 = vld [vmem:[%s24870_s26 + $0xc80] ss:$8 sps:$4 sm:$0xff]  }
0x195b   : > { %11550 = vmatprep.subr.bf16.mxu0 %v22210_v42 }
0x195d   : > { %11268 = vmatpush1.bf16.msra.mxu1 %v22088_v28  ;;  %v22138_v28 = vld [vmem:[%s24870_s26 + $0xc44] ss:$8 sps:$4 sm:$0xff]  }
0x195e   : > { %11269 = vmatprep.subr.bf16.mxu1 %v22093_v15  ;;  %11551 = vmatpush2.bf16.msra.mxu0 %v22208_v33  ;;  %v22136_v15 = vld [vmem:[%s24870_s26 + $0xc40] ss:$8 sps:$4 sm:$0xff]  }
0x195f   : > { %11552 = vmatprep.subr.bf16.mxu0 %v22213_v59  ;;  %v22232_v59 = vld [vmem:[%s24870_s26 + $0xe40] ss:$8 sps:$4 sm:$0xff]  }
0x1961   : > { %11270 = vmatpush1.bf16.msra.mxu1 %v22091_v6  ;;  %v22217_v6 = vld [vmem:[%s24870_s26 + $0xd90] ss:$8 sps:$4 sm:$0xff]  }
0x1962   : > { %11271 = vmatprep.subr.bf16.mxu1 %v22096_v7  ;;  %11553 = vmatpush2.bf16.msra.mxu0 %v22211_v62  ;;  %v22139_v7 = vld [vmem:[%s24870_s26 + $0xc30] ss:$8 sps:$4 sm:$0xff]  }
0x1963   : > { %11554 = vmatprep.subr.bf16.mxu0 %v22216_v49  ;;  %v22235_v62 = vld [vmem:[%s24870_s26 + $0xe30] ss:$8 sps:$4 sm:$0xff]   ;;  %v22238_v49 = vld [vmem:[%s24870_s26 + $0xe20] ss:$8 sps:$4 sm:$0xff]  }
0x1965   : > { %11272 = vmatpush1.bf16.msra.mxu1 %v22094_v14  ;;  %v22220_v14 = vld [vmem:[%s24870_s26 + $0xd80] ss:$8 sps:$4 sm:$0xff]  }
0x1966   : > { %11273 = vmatprep.subr.bf16.mxu1 %v22099_v38  ;;  %v22142_v38 = vld [vmem:[%s24870_s26 + $0xc20] ss:$8 sps:$4 sm:$0xff]  }
0x1969   : > { %11274 = vmatpush1.bf16.msra.mxu1 %v22097_v22  ;;  %v22145_v22 = vld [vmem:[%s24870_s26 + $0xc10] ss:$8 sps:$4 sm:$0xff]  }
0x196a   : > { %11275 = vmatprep.subr.bf16.mxu1 %v22102_v46  ;;  %v22150_v46 = vld [vmem:[%s24870_s26 + $0xc04] ss:$8 sps:$4 sm:$0xff]  }
0x196d   : > { %11276 = vmatpush1.bf16.msra.mxu1 %v22100_v34  ;;  %v22151_v34 = vld [vmem:[%s24870_s26 + $0xcf0] ss:$8 sps:$4 sm:$0xff]  }
0x196e   : > { %11277 = vmatprep.subr.bf16.mxu1 %v22105_v25  ;;  %v22156_v25 = vld [vmem:[%s24870_s26 + $0xce4] ss:$8 sps:$4 sm:$0xff]  }
0x1971   : > { %11278 = vmatpush2.bf16.msra.mxu1 %v22103_v10  ;;  %v22157_v10 = vld [vmem:[%s24870_s26 + $0xcd0] ss:$8 sps:$4 sm:$0xff]  }
0x1972   : > { %11279 = vmatprep.subr.bf16.mxu1 %v22108_v11  ;;  %v22162_v11 = vld [vmem:[%s24870_s26 + $0xcc4] ss:$8 sps:$4 sm:$0xff]  }
0x1975   : > { %11280 = vmatpush2.bf16.msra.mxu1 %v22106_v53  ;;  %v22163_v53 = vld [vmem:[%s24870_s26 + $0xcb0] ss:$8 sps:$4 sm:$0xff]  }
0x1976   : > { %11281 = vmatprep.subr.bf16.mxu1 %v22111_v32  ;;  %v22168_v32 = vld [vmem:[%s24870_s26 + $0xca4] ss:$8 sps:$4 sm:$0xff]  }
0x1979   : > { %11282 = vmatpush2.bf16.msra.mxu1 %v22109_v30  ;;  %v22169_v30 = vld [vmem:[%s24870_s26 + $0xc90] ss:$8 sps:$4 sm:$0xff]  }
0x197a   : > { %11283 = vmatprep.subr.bf16.mxu1 %v22114_v61  ;;  %v22174_v61 = vld [vmem:[%s24870_s26 + $0xc84] ss:$8 sps:$4 sm:$0xff]  }
0x197d   : > { %11284 = vmatpush2.bf16.msra.mxu1 %v22112_v20 }
0x197e   : > { %11285 = vmatprep.subr.bf16.mxu1 %v22117_v31 }
0x1981   : > { %11286 = vmatpush2.bf16.msra.mxu1 %v22115_v63 }
0x1982   : > { %11287 = vmatprep.subr.bf16.mxu1 %v22120_v0 }
0x1985   : > { %11288 = vmatpush2.bf16.msra.mxu1 %v22118_v52 }
0x1986   : > { %11289 = vmatprep.subr.bf16.mxu1 %v22123_v45 }
0x1989   : > { %11290 = vmatpush2.bf16.msra.mxu1 %v22121_v56 }
0x198a   : > { %11291 = vmatprep.subr.bf16.mxu1 %v22126_v21 }
0x198d   : > { %11292 = vmatpush2.bf16.msra.mxu1 %v22124_v43 }
0x198e   : > { %11731 = vmatprep.subr.bf16.mxu1 %v22129_v3  ;;  %v22226_v3 = vld [vmem:[%s24870_s26 + $0xe60] ss:$8 sps:$4 sm:$0xff]  }
0x1990   : > { %11294 = vmatmul.mubr.bf16.vlgmr.msra.gmra.mxu1 %v24168_v40 }
0x1991   : > { %11732 = vmatpush1.bf16.msra.mxu1 %v22127_v29  ;;  %11763 = vmatprep.mubr.bf16.mxu1 %v23748_v48  ;;  %v22214_v48 = vld [vmem:[%s24870_s26 + $0xda0] ss:$8 sps:$4 sm:$0xff]   ;;  %v22231_v29 = vld [vmem:[%s24870_s26 + $0xe54] ss:$8 sps:$4 sm:$0xff]  }
0x1992   : > { %11733 = vmatprep.subr.bf16.mxu1 %v22132_v47  ;;  %11555 = vmatpush2.bf16.msra.mxu0 %v22214_v48  ;;  %v22229_v47 = vld [vmem:[%s24870_s26 + $0xe50] ss:$8 sps:$4 sm:$0xff]  }
0x1993   : > { %11556 = vmatprep.subr.bf16.mxu0 %v22219_v4  ;;  %v22241_v48 = vld [vmem:[%s24870_s26 + $0xe10] ss:$8 sps:$4 sm:$0xff]   ;;  %v22244_v4 = vld [vmem:[%s24870_s26 + $0xe00] ss:$8 sps:$4 sm:$0xff]  }
0x1995   : > { %11734 = vmatpush1.bf16.msra.mxu1 %v22130_v58  ;;  %v22234_v58 = vld [vmem:[%s24870_s26 + $0xe44] ss:$8 sps:$4 sm:$0xff]  }
0x1996   : > { %11735 = vmatprep.subr.bf16.mxu1 %v22135_v60  ;;  %11557 = vmatpush2.bf16.msra.mxu0 %v22217_v6  ;;  %v22237_v60 = vld [vmem:[%s24870_s26 + $0xe34] ss:$8 sps:$4 sm:$0xff]   ;;  %v22247_v6 = vld [vmem:[%s24870_s26 + $0xef0] ss:$8 sps:$4 sm:$0xff]  }
0x1997   : > { %11558 = vmatprep.subr.bf16.mxu0 %v22222_v8  ;;  %v22250_v8 = vld [vmem:[%s24870_s26 + $0xee0] ss:$8 sps:$4 sm:$0xff]  }
0x1999   : > { %11736 = vmatpush1.bf16.msra.mxu1 %v22133_v12  ;;  %v22240_v12 = vld [vmem:[%s24870_s26 + $0xe24] ss:$8 sps:$4 sm:$0xff]  }
0x199a   : > { %11737 = vmatprep.subr.bf16.mxu1 %v22138_v28  ;;  %11559 = vmatpush2.bf16.msra.mxu0 %v22220_v14  ;;  %v22243_v28 = vld [vmem:[%s24870_s26 + $0xe14] ss:$8 sps:$4 sm:$0xff]   ;;  %v22253_v14 = vld [vmem:[%s24870_s26 + $0xed0] ss:$8 sps:$4 sm:$0xff]  }
0x199b   : > { %11968 = vmatprep.subr.bf16.mxu0 %v22225_v16  ;;  %v22256_v16 = vld [vmem:[%s24870_s26 + $0xec0] ss:$8 sps:$4 sm:$0xff]  }
0x199d   : > { %11738 = vmatpush1.bf16.msra.mxu1 %v22136_v15  ;;  %v22246_v15 = vld [vmem:[%s24870_s26 + $0xe04] ss:$8 sps:$4 sm:$0xff]  }
0x199e   : > { %11739 = vmatprep.subr.bf16.mxu1 %v22141_v5  ;;  %v22249_v5 = vld [vmem:[%s24870_s26 + $0xef4] ss:$8 sps:$4 sm:$0xff]  }
0x19a1   : > { %11740 = vmatpush1.bf16.msra.mxu1 %v22139_v7  ;;  %v22252_v7 = vld [vmem:[%s24870_s26 + $0xee4] ss:$8 sps:$4 sm:$0xff]  }
0x19a2   : > { %11741 = vmatprep.subr.bf16.mxu1 %v22144_v13  ;;  %v22255_v13 = vld [vmem:[%s24870_s26 + $0xed4] ss:$8 sps:$4 sm:$0xff]  }
0x19a5   : > { %11742 = vmatpush1.bf16.msra.mxu1 %v22142_v38  ;;  %v22258_v38 = vld [vmem:[%s24870_s26 + $0xec4] ss:$8 sps:$4 sm:$0xff]  }
0x19a6   : > { %11743 = vmatprep.subr.bf16.mxu1 %v22147_v17  ;;  %v22261_v17 = vld [vmem:[%s24870_s26 + $0xeb4] ss:$8 sps:$4 sm:$0xff]  }
0x19a9   : > { %11744 = vmatpush1.bf16.msra.mxu1 %v22145_v22 }
0x19aa   : > { %11745 = vmatprep.subr.bf16.mxu1 %v22150_v46  ;;  %v22259_v46 = vld [vmem:[%s24870_s26 + $0xeb0] ss:$8 sps:$4 sm:$0xff]  }
0x19ad   : > { %11746 = vmatpush1.bf16.msra.mxu1 %v22148_v23 }
0x19ae   : > { %11747 = vmatprep.subr.bf16.mxu1 %v22153_v24  ;;  %v22264_v24 = vld [vmem:[%s24870_s26 + $0xea4] ss:$8 sps:$4 sm:$0xff]  }
0x19b1   : > { %11748 = vmatpush2.bf16.msra.mxu1 %v22151_v34 }
0x19b2   : > { %11749 = vmatprep.subr.bf16.mxu1 %v22156_v25 }
0x19b5   : > { %11750 = vmatpush2.bf16.msra.mxu1 %v22154_v26  ;;  %v22262_v26 = vld [vmem:[%s24870_s26 + $0xea0] ss:$8 sps:$4 sm:$0xff]  }
0x19b6   : > { %11751 = vmatprep.subr.bf16.mxu1 %v22159_v35 }
0x19b9   : > { %11752 = vmatpush2.bf16.msra.mxu1 %v22157_v10  ;;  %v22267_v10 = vld [vmem:[%s24870_s26 + $0xe94] ss:$8 sps:$4 sm:$0xff]  }
0x19ba   : > { %11753 = vmatprep.subr.bf16.mxu1 %v22162_v11  ;;  %v22265_v11 = vld [vmem:[%s24870_s26 + $0xe90] ss:$8 sps:$4 sm:$0xff]  }
0x19bd   : > { %11754 = vmatpush2.bf16.msra.mxu1 %v22160_v36  ;;  %v22270_v36 = vld [vmem:[%s24870_s26 + $0xe84] ss:$8 sps:$4 sm:$0xff]  }
0x19be   : > { %11755 = vmatprep.subr.bf16.mxu1 %v22165_v37  ;;  %v22268_v37 = vld [vmem:[%s24870_s26 + $0xe80] ss:$8 sps:$4 sm:$0xff]  }
0x19c1   : > { %11756 = vmatpush2.bf16.msra.mxu1 %v22163_v53 }
0x19c2   : > { %11757 = vmatprep.subr.bf16.mxu1 %v22168_v32  ;;  %v22271_v32 = vld [vmem:[#allocation7 + $0x78] sm:$0xff]  }
0x19c5   : > { %11758 = vmatpush2.bf16.msra.mxu1 %v22166_v39  ;;  %v22272_v39 = vld [vmem:[#allocation7 + $0x38] sm:$0xff]  }
0x19c6   : > { %11759 = vmatprep.subr.bf16.mxu1 %v22171_v18  ;;  %v22273_v18 = vld [vmem:[#allocation7 + $0xf8] sm:$0xff]  }
0x19c9   : > { %11760 = vmatpush2.bf16.msra.mxu1 %v22169_v30  ;;  %v22274_v30 = vld [vmem:[#allocation7 + $0xb8] sm:$0xff]  }
0x19ca   : > { %11761 = vmatprep.subr.bf16.mxu1 %v22174_v61  ;;  %v22275_v61 = vld [vmem:[#allocation7 + $0x70] sm:$0xff]  }
0x19cd   : > { %11762 = vmatpush2.bf16.msra.mxu1 %v22172_v41  ;;  %v22277_v41 = vld [vmem:[#allocation7 + $0xf0] sm:$0xff]  }
0x19ce   : > { %18969 = vmatprep.subr.bf16.mxu1 %v22271_v32 }
0x19d0   : > { %11764 = vmatmul.mubr.bf16.vlgmr.msra.gmra.mxu1 %v23751_v50  ;;  %v22223_v50 = vld [vmem:[%s24870_s26 + $0xe70] ss:$8 sps:$4 sm:$0xff]  }
0x19d1   : > { %18970 = vmatpush3.bf16.msra.mxu1 %v22272_v39 }
0x19d2   : > { %18971 = vmatprep.subr.bf16.mxu1 %v22275_v61 }
0x1a10   : > { %v11046_v42 = vpop.f32.mrf.mxu1 }
0x1a12   : > { %v11048_v20 = vpop.f32.mrf.mxu1 }
0x1a14   : > { %v11050_v31 = vpop.f32.mrf.mxu1 }
0x1a16   : > { %v11052_v33 = vpop.f32.mrf.mxu1 }
0x1a18   : > { %v11056_v63 = vpop.f32.mrf.mxu1 }
0x1a19   : > { %v11065_v19 = vmax.f32 %v11046_v42, %v11056_v63  ;;  %v22276_v42 = vld [vmem:[#allocation7 + $0x30] sm:$0xff]   ;;  %v22280_v63 = vld [vmem:[#allocation7 + $0x28] sm:$0xff]  }
0x1a1a   : > { %v11058_v0 = vpop.f32.mrf.mxu1  ;;  %18972 = vmatpush3.bf16.msra.mxu1 %v22276_v42 }
0x1a1b   : > { %v11066_v45 = vmax.f32 %v11048_v20, %v11058_v0  ;;  %v22278_v20 = vld [vmem:[#allocation7 + $0xb0] sm:$0xff]   ;;  %v22282_v0 = vld [vmem:[#allocation7 + $0xa8] sm:$0xff]  }
0x1a1c   : > { %v11060_v52 = vpop.f32.mrf.mxu1 }
0x1a1d   : > { %v11067_v54 = vmax.f32 %v11050_v31, %v11060_v52  ;;  %v22279_v31 = vld [vmem:[#allocation7 + $0x68] sm:$0xff]   ;;  %v22283_v52 = vld [vmem:[#allocation7 + $0x60] sm:$0xff]  }
0x1a1e   : > { %v11062_v55 = vpop.f32.mrf.mxu1  ;;  %18973 = vmatprep.subr.bf16.mxu1 %v22279_v31 }
0x1a1f   : > { %v11068_v56 = vmax.f32 %v11052_v33, %v11062_v55  ;;  %v11366_v43 = vpack.c.bf16 %v11067_v54, %v11065_v19  ;;  %v22281_v33 = vld [vmem:[#allocation7 + $0xe8] sm:$0xff]   ;;  %v22285_v54 = vld [vmem:[#allocation7 + $0xe0] sm:$0xff]   ;;  %18974 = vmatpush3.bf16.msra.mxu1 %v22280_v63  ;;  %v22289_v19 = vld [vmem:[#allocation7 + $0xd8] sm:$0xff]  }
0x1a20   : > { %v22284_v55 = vld [vmem:[#allocation7 + $0x20] sm:$0xff]   ;;  %18975 = vmatprep.subr.bf16.mxu1 %v22283_v52  ;;  %v22306_v52 = vld [vmem:[#allocation7 + $0x130] sm:$0xff]  }
0x1a21   : > { %v11367_v21 = vpack.c.bf16 %v11068_v56, %v11066_v45  ;;  %v22286_v45 = vld [vmem:[#allocation7 + $0xa0] sm:$0xff]   ;;  %v22287_v56 = vld [vmem:[#allocation7 + $0x58] sm:$0xff]  }
0x1a23   : > { %11560 = vmatprep.mubr.bf16.mxu0 %v11367_v21  ;;  %18976 = vmatpush3.bf16.msra.mxu1 %v22284_v55  ;;  %v22288_v21 = vld [vmem:[#allocation7 + $0x18] sm:$0xff]  }
0x1a24   : > { %11561 = vmatmul.mubr.bf16.vlgmr.msra.gmra.mxu0 %v11366_v43  ;;  %18977 = vmatprep.subr.bf16.mxu1 %v22287_v56  ;;  %v22291_v43 = vld [vmem:[#allocation7 + $0x50] sm:$0xff]   ;;  %v22607_v55 = vld [vmem:[%s22981_s18] sm:$0xff]  }
0x1a25   : > { %11969 = vmatpush1.bf16.msra.mxu0 %v22223_v50  ;;  %v22290_v50 = vld [vmem:[#allocation7 + $0x98] sm:$0xff]   ;;  %v22309_v56 = vld [vmem:[#allocation7 + $0x160] sm:$0xff]  }
0x1a26   : > { %11970 = vmatprep.subr.bf16.mxu0 %v22228_v57  ;;  %v22292_v57 = vld [vmem:[#allocation7 + $0x10] sm:$0xff]  }
0x1a27   : > { %18978 = vmatpush3.bf16.msra.mxu1 %v22288_v21  ;;  %v22311_v21 = vld [vmem:[#allocation7 + $0x158] sm:$0xff]  }
0x1a28   : > { %18979 = vmatprep.subr.bf16.mxu1 %v22291_v43  ;;  %v22313_v43 = vld [vmem:[#allocation7 + $0x150] sm:$0xff]  }
0x1a29   : > { %11971 = vmatpush1.bf16.msra.mxu0 %v22226_v3  ;;  %v22293_v3 = vld [vmem:[#allocation7 + $0xd0] sm:$0xff]  }
0x1a2a   : > { %11972 = vmatprep.subr.bf16.mxu0 %v22231_v29  ;;  %v22294_v29 = vld [vmem:[#allocation7 + $0x90] sm:$0xff]  }
0x1a2b   : > { %18980 = vmatpush3.bf16.msra.mxu1 %v22292_v57  ;;  %v22314_v57 = vld [vmem:[#allocation7 + $0x110] sm:$0xff]  }
0x1a2d   : > { %11973 = vmatpush1.bf16.msra.mxu0 %v22229_v47  ;;  %v22295_v47 = vld [vmem:[#allocation7 + $0x48] sm:$0xff]  }
0x1a2e   : > { %11974 = vmatprep.subr.bf16.mxu0 %v22234_v58  ;;  %v22296_v58 = vld [vmem:[#allocation7 + $0x8] sm:$0xff]   ;;  %18981 = vmatprep.subr.bf16.mxu1 %v22295_v47  ;;  %v22317_v47 = vld [vmem:[#allocation7 + $0x140] sm:$0xff]  }
0x1a2f   : > { %18982 = vmatpush3.bf16.msra.mxu1 %v22296_v58  ;;  %v22318_v58 = vld [vmem:[#allocation7 + $0x100] sm:$0xff]  }
0x1a31   : > { %11975 = vmatpush1.bf16.msra.mxu0 %v22232_v59  ;;  %v22297_v59 = vld [vmem:[#allocation7 + $0xc8] sm:$0xff]  }
0x1a32   : > { %11976 = vmatprep.subr.bf16.mxu0 %v22237_v60  ;;  %v22298_v60 = vld [vmem:[#allocation7 + $0x88] sm:$0xff]  }
0x1a35   : > { %11977 = vmatpush1.bf16.msra.mxu0 %v22235_v62  ;;  %v22299_v62 = vld [vmem:[#allocation7 + $0x40] sm:$0xff]  }
0x1a36   : > { %11978 = vmatprep.subr.bf16.mxu0 %v22240_v12  ;;  %v22300_v12 = vld [vmem:[#allocation7] sm:$0xff]   ;;  %18983 = vmatprep.subr.bf16.mxu1 %v22299_v62  ;;  %v22367_v62 = vld [vmem:[#allocation7 + $0x2b8] sm:$0xff]  }
0x1a37   : > { %18984 = vmatpush3.bf16.msra.mxu1 %v22300_v12 }
0x1a39   : > { %11979 = vmatpush1.bf16.msra.mxu0 %v22238_v49  ;;  %v22301_v49 = vld [vmem:[#allocation7 + $0xc0] sm:$0xff]  }
0x1a3a   : > { %11980 = vmatprep.subr.bf16.mxu0 %v22243_v28  ;;  %v22302_v28 = vld [vmem:[#allocation7 + $0x80] sm:$0xff]  }
0x1a3d   : > { %11981 = vmatpush1.bf16.msra.mxu0 %v22241_v48  ;;  %v22303_v48 = vld [vmem:[#allocation7 + $0x178] sm:$0xff]  }
0x1a3e   : > { %11982 = vmatprep.subr.bf16.mxu0 %v22246_v15  ;;  %19013 = vmatprep.subr.bf16.mxu1 %v22303_v48 }
0x1a41   : > { %11983 = vmatpush1.bf16.msra.mxu0 %v22244_v4 }
0x1a42   : > { %11984 = vmatprep.subr.bf16.mxu0 %v22249_v5 }
0x1a45   : > { %11985 = vmatpush2.bf16.msra.mxu0 %v22247_v6 }
0x1a46   : > { %11986 = vmatprep.subr.bf16.mxu0 %v22252_v7 }
0x1a49   : > { %11987 = vmatpush2.bf16.msra.mxu0 %v22250_v8 }
0x1a4a   : > { %11988 = vmatprep.subr.bf16.mxu0 %v22255_v13 }
0x1a4d   : > { %11989 = vmatpush2.bf16.msra.mxu0 %v22253_v14  ;;  %v18302_v14 = vld [vmem:[%s24871_s1 + $0x4] sm:$0x3] }
0x1a4e   : > { %11990 = vmatprep.subr.bf16.mxu0 %v22258_v38 }
0x1a50   : > { %v11295_v22 = vpop.f32.mrf.mxu1 }
0x1a51   : > { %11991 = vmatpush2.bf16.msra.mxu0 %v22256_v16  ;;  %v11806_v53 = vpack.c.bf16 %v11295_v22, %v11295_v22 }
0x1a52   : > { %v11297_v23 = vpop.f32.mrf.mxu1  ;;  %11992 = vmatprep.subr.bf16.mxu0 %v22261_v17 }
0x1a53   : > { %v11807_v34 = vpack.c.bf16 %v11297_v23, %v11297_v23 }
0x1a54   : > { %v11299_v25 = vpop.f32.mrf.mxu1 }
0x1a55   : > { %11993 = vmatpush2.bf16.msra.mxu0 %v22259_v46  ;;  %12000 = vmatprep.mubr.bf16.mxu0 %v11807_v34  ;;  %v12027_v46 = vrot.slane %v18302_v14, %v23231_v27  ;;  %v12031_v25 = vrot.slane %v18302_v14, %v23631_v9  ;;  %v22304_v9 = vld [vmem:[#allocation7 + $0x138] sm:$0xff]  }
0x1a56   : > { %v11300_v35 = vpop.f32.mrf.mxu1  ;;  %11994 = vmatprep.subr.bf16.mxu0 %v22264_v24 }
0x1a59   : > { %11995 = vmatpush2.bf16.msra.mxu0 %v22262_v26 }
0x1a5a   : > { %11996 = vmatprep.subr.bf16.mxu0 %v22267_v10 }
0x1a5d   : > { %11997 = vmatpush2.bf16.msra.mxu0 %v22265_v11 }
0x1a5e   : > { %11998 = vmatprep.subr.bf16.mxu0 %v22270_v36 }
0x1a61   : > { %11999 = vmatpush2.bf16.msra.mxu0 %v22268_v37 }
0x1a62   : > { %18991 = vmatprep.subr.bf16.mxu0 %v22273_v18 }
0x1a64   : > { %12001 = vmatmul.mubr.bf16.vlgmr.msra.gmra.mxu0 %v11806_v53 }
0x1a65   : > { %18992 = vmatpush3.bf16.msra.mxu0 %v22274_v30 }
0x1a66   : > { %18993 = vmatprep.subr.bf16.mxu0 %v22277_v41 }
0x1a69   : > { %18994 = vmatpush3.bf16.msra.mxu0 %v22278_v20 }
0x1a6a   : > { %18995 = vmatprep.subr.bf16.mxu0 %v22281_v33 }
0x1a6d   : > { %18996 = vmatpush3.bf16.msra.mxu0 %v22282_v0  ;;  %v22305_v0 = vld [vmem:[#allocation7 + $0x170] sm:$0xff]  }
0x1a6e   : > { %18997 = vmatprep.subr.bf16.mxu0 %v22285_v54  ;;  %v22307_v54 = vld [vmem:[#allocation7 + $0x168] sm:$0xff]  }
0x1a71   : > { %18998 = vmatpush3.bf16.msra.mxu0 %v22286_v45  ;;  %v22308_v45 = vld [vmem:[#allocation7 + $0x128] sm:$0xff]  }
0x1a72   : > { %18999 = vmatprep.subr.bf16.mxu0 %v22289_v19  ;;  %v22310_v19 = vld [vmem:[#allocation7 + $0x120] sm:$0xff]  }
0x1a75   : > { %19000 = vmatpush3.bf16.msra.mxu0 %v22290_v50  ;;  %v22312_v50 = vld [vmem:[#allocation7 + $0x118] sm:$0xff]  }
0x1a76   : > { %19001 = vmatprep.subr.bf16.mxu0 %v22293_v3  ;;  %v22315_v3 = vld [vmem:[#allocation7 + $0x148] sm:$0xff]  }
0x1a79   : > { %19002 = vmatpush3.bf16.msra.mxu0 %v22294_v29  ;;  %v22316_v29 = vld [vmem:[#allocation7 + $0x108] sm:$0xff]  }
0x1a7a   : > { %19003 = vmatprep.subr.bf16.mxu0 %v22297_v59 }
0x1a7d   : > { %19004 = vmatpush3.bf16.msra.mxu0 %v22298_v60 }
0x1a7e   : > { %19005 = vmatprep.subr.bf16.mxu0 %v22301_v49  ;;  %v22368_v49 = vld [vmem:[#allocation7 + $0x2b0] sm:$0xff]  }
0x1a81   : > { %19006 = vmatpush3.bf16.msra.mxu0 %v22302_v28 }
0x1a90   : > { %v11765_v4 = vpop.f32.mrf.mxu1 }
0x1a92   : > { %v11767_v6 = vpop.f32.mrf.mxu1 }
0x1a94   : > { %v11769_v8 = vpop.f32.mrf.mxu1 }
0x1a96   : > { %v11771_v23 = vpop.f32.mrf.mxu1 }
0x1ae4   : > { %v11562_v15 = vpop.f32.mrf.mxu0 }
0x1ae5   : > { %v11766_v16 = vadd.f32 %v11765_v4, %v11562_v15  ;;  %v22369_v15 = vld [vmem:[#allocation7 + $0x2a8] sm:$0xff]  }
0x1ae6   : > { %v11564_v5 = vpop.f32.mrf.mxu0 }
0x1ae7   : > { %v11768_v24 = vadd.f32 %v11767_v6, %v11564_v5 }
0x1ae8   : > { %v11566_v7 = vpop.f32.mrf.mxu0 }
0x1ae9   : > { %v11770_v17 = vadd.f32 %v11769_v8, %v11566_v7  ;;  %v22370_v7 = vld [vmem:[#allocation7 + $0x2a0] sm:$0xff]  }
0x1aea   : > { %v11568_v13 = vpop.f32.mrf.mxu0 }
0x1aeb   : > { %v11772_v26 = vadd.f32 %v11771_v23, %v11568_v13 }
0x1b24   : > { %v12002_v38 = vpop.f32.mrf.mxu0 }
0x1b25   : > { %v12012_v22 = vrot.slane %v12002_v38, %v23231_v27 }
0x1b26   : > { %v12004_v34 = vpop.f32.mrf.mxu0 }
0x1b27   : > { %v12017_v35 = vadd.f32 %v12012_v22, %v11766_v16  ;;  %v12019_v10 = vadd.f32 %v12012_v22, %v11770_v17  ;;  %v12016_v11 = vrot.slane %v12004_v34, %v23231_v27 }
0x1b28   : > { %v12006_v36 = vpop.f32.mrf.mxu0 }
0x1b29   : > { %v12034_v37 = vadd.f32 %v12027_v46, %v12017_v35  ;;  %v12036_v53 = vadd.f32 %v12027_v46, %v12019_v10  ;;  %v12018_v32 = vadd.f32 %v12016_v11, %v11768_v24  ;;  %v12020_v39 = vadd.f32 %v12016_v11, %v11772_v26  ;;  %v22319_v35 = vld [vmem:[#allocation7 + $0x1f8] sm:$0xff]   ;;  %v22321_v11 = vld [vmem:[#allocation7 + $0x1f0] sm:$0xff]   ;;  %v22608_v36 = vld [vmem:[%s22981_s18 + $0x8] sm:$0xff]  }
0x1b2a   : > { %v12007_v18 = vpop.f32.mrf.mxu0  ;;  %v22320_v10 = vld [vmem:[#allocation7 + $0x1b8] sm:$0xff]  }
0x1b2b   : > { %v12035_v30 = vadd.f32 %v12031_v25, %v12018_v32  ;;  %v12037_v61 = vadd.f32 %v12031_v25, %v12020_v39  ;;  %v12038_v41 = vmax.f32 %v12034_v37, 0.0  ;;  %v12040_v42 = vmax.f32 %v12036_v53, 0.0  ;;  %v22322_v37 = vld [vmem:[#allocation7 + $0x1b0] sm:$0xff]   ;;  %v22323_v53 = vld [vmem:[#allocation7 + $0x1e8] sm:$0xff]   ;;  %v22325_v39 = vld [vmem:[#allocation7 + $0x1e0] sm:$0xff]  }
0x1b2c   : > { %v22324_v32 = vld [vmem:[#allocation7 + $0x1a8] sm:$0xff]   ;;  %v22326_v18 = vld [vmem:[#allocation7 + $0x1a0] sm:$0xff]  }
0x1b2d   : > { %v12039_v20 = vmax.f32 %v12035_v30, 0.0  ;;  %v12041_v31 = vmax.f32 %v12037_v61, 0.0  ;;  %v24250_v63 = vpack.c.bf16 %v12040_v42, %v12038_v41  ;;  %v22327_v30 = vld [vmem:[#allocation7 + $0x1d8] sm:$0xff]   ;;  %v22329_v41 = vld [vmem:[#allocation7 + $0x1d0] sm:$0xff]  }
0x1b2e   : > { %v22328_v61 = vld [vmem:[#allocation7 + $0x198] sm:$0xff]   ;;  %v22330_v42 = vld [vmem:[#allocation7 + $0x190] sm:$0xff]  }
0x1b2f   : > { %v24248_v33 = vpack.c.bf16 %v12041_v31, %v12039_v20  ;;  %v22331_v20 = vld [vmem:[#allocation7 + $0x1c8] sm:$0xff]  }
0x1b30   : > { %v22332_v31 = vld [vmem:[#allocation7 + $0x188] sm:$0xff]  }
0x1b31   : > { %12204 = vmatprep.mubr.bf16.mxu1 %v24248_v33  ;;  %12373 = vmatprep.mubr.bf16.mxu0 %v24248_v33 }
0x1b32   : > { %12205 = vmatmul.mubr.bf16.vlgmr.msra.gmra.mxu1 %v24250_v63  ;;  %12374 = vmatmul.mubr.bf16.vlgmr.msra.gmra.mxu0 %v24250_v63 }
0x1b33   : > { %19014 = vmatpush3.bf16.msra.mxu1 %v22304_v9  ;;  %12542 = vmatprep.mubr.bf16.mxu1 %v24248_v33  ;;  %v22333_v9 = vld [vmem:[#allocation7 + $0x1c0] sm:$0xff]  }
0x1b34   : > { %19015 = vmatprep.subr.bf16.mxu1 %v22305_v0  ;;  %20076 = vmatprep.mubr.msk.bf16.mxu0 %vm1413_vm5, %v22607_v55  ;;  %v22334_v0 = vld [vmem:[#allocation7 + $0x180] sm:$0xff]   ;;  %v22337_v55 = vld [vmem:[#allocation7 + $0x270] sm:$0xff]  }
0x1b37   : > { %19016 = vmatpush3.bf16.msra.mxu1 %v22306_v52  ;;  %v22335_v52 = vld [vmem:[#allocation7 + $0x278] sm:$0xff]  }
0x1b38   : > { %19017 = vmatprep.subr.bf16.mxu1 %v22307_v54  ;;  %v22336_v54 = vld [vmem:[#allocation7 + $0x238] sm:$0xff]  }
0x1b3b   : > { %19018 = vmatpush3.bf16.msra.mxu1 %v22308_v45  ;;  %v22338_v45 = vld [vmem:[#allocation7 + $0x230] sm:$0xff]  }
0x1b3c   : > { %19019 = vmatprep.subr.bf16.mxu1 %v22309_v56  ;;  %v22339_v56 = vld [vmem:[#allocation7 + $0x268] sm:$0xff]  }
0x1b3f   : > { %19020 = vmatpush3.bf16.msra.mxu1 %v22310_v19  ;;  %v22340_v19 = vld [vmem:[#allocation7 + $0x228] sm:$0xff]  }
0x1b40   : > { %19021 = vmatprep.subr.bf16.mxu1 %v22311_v21  ;;  %v22341_v21 = vld [vmem:[#allocation7 + $0x260] sm:$0xff]  }
0x1b43   : > { %19022 = vmatpush3.bf16.msra.mxu1 %v22312_v50  ;;  %v22342_v50 = vld [vmem:[#allocation7 + $0x220] sm:$0xff]  }
0x1b44   : > { %19023 = vmatprep.subr.bf16.mxu1 %v22313_v43  ;;  %v22343_v43 = vld [vmem:[#allocation7 + $0x258] sm:$0xff]  }
0x1b47   : > { %19024 = vmatpush3.bf16.msra.mxu1 %v22314_v57  ;;  %v22344_v57 = vld [vmem:[#allocation7 + $0x218] sm:$0xff]  }
0x1b48   : > { %19025 = vmatprep.subr.bf16.mxu1 %v22315_v3  ;;  %v22345_v3 = vld [vmem:[#allocation7 + $0x250] sm:$0xff]  }
0x1b4b   : > { %19026 = vmatpush3.bf16.msra.mxu1 %v22316_v29  ;;  %v22346_v29 = vld [vmem:[#allocation7 + $0x210] sm:$0xff]  }
0x1b4c   : > { %19027 = vmatprep.subr.bf16.mxu1 %v22317_v47  ;;  %v22347_v47 = vld [vmem:[#allocation7 + $0x248] sm:$0xff]  }
0x1b4f   : > { %19028 = vmatpush3.bf16.msra.mxu1 %v22318_v58  ;;  %v22349_v58 = vld [vmem:[#allocation7 + $0x240] sm:$0xff]  }
0x1b50   : > { %20080 = vmatprep.subr.bf16.mxu1 %v22747_v2 }
0x1b52   : > { %12543 = vmatmul.mubr.bf16.vlgmr.msra.gmra.mxu1 %v24250_v63 }
0x1b53   : > { %20096 = vmatprep.mubr.msk.bf16.mxu1 %vm22748_vm0, %v22747_v2  ;;  %20081 = vmatpush3.bf16.msra.mxu1 %v22367_v62  ;;  %v22352_v62 = vld [vmem:[#allocation7 + $0x2f8] sm:$0xff]  }
0x1b54   : > { %20082 = vmatprep.subr.bf16.mxu1 %v22747_v2 }
0x1b57   : > { %20083 = vmatpush3.bf16.msra.mxu1 %v22368_v49  ;;  %v22371_v49 = vld [vmem:[#allocation7 + $0x298] sm:$0xff]  }
0x1b58   : > { %20084 = vmatprep.subr.bf16.mxu1 %v22747_v2 }
0x1b5b   : > { %20085 = vmatpush3.bf16.msra.mxu1 %v22369_v15  ;;  %v22372_v15 = vld [vmem:[#allocation7 + $0x290] sm:$0xff]  }
0x1b5c   : > { %20086 = vmatprep.subr.bf16.mxu1 %v22747_v2 }
0x1b5f   : > { %20087 = vmatpush3.bf16.msra.mxu1 %v22370_v7  ;;  %v22374_v7 = vld [vmem:[#allocation7 + $0x280] sm:$0xff]  }
0x1b60   : > { %20088 = vmatprep.subr.bf16.mxu1 %v22747_v2 }
0x1b63   : > { %20089 = vmatpush3.bf16.msra.mxu1 %v22371_v49 }
0x1b64   : > { %20090 = vmatprep.subr.bf16.mxu1 %v22747_v2 }
0x1b67   : > { %20091 = vmatpush3.bf16.msra.mxu1 %v22372_v15  ;;  %v22393_v15 = vld [vmem:[#allocation7 + $0x390] sm:$0xff]  }
0x1b68   : > { %20092 = vmatprep.subr.bf16.mxu1 %v22747_v2 }
0x1bf2   : > { %v18985_v59 = vpop.f32.mrf.mxu1  ;;  %v19007_v12 = vpop.f32.mrf.mxu0 }
0x1bf4   : > { %v18986_v60 = vpop.f32.mrf.mxu1  ;;  %v19008_v48 = vpop.f32.mrf.mxu0 }
0x1bf5   : > { %v19009_v46 = vadd.f32 %v19008_v48, %v19007_v12  ;;  %v18987_v25 = vadd.f32 %v18986_v60, %v18985_v59  ;;  %v22350_v59 = vld [vmem:[#allocation7 + $0x200] sm:$0xff]   ;;  %v22351_v60 = vld [vmem:[#allocation7 + $0x338] sm:$0xff]   ;;  %v22353_v12 = vld [vmem:[#allocation7 + $0x330] sm:$0xff]  }
0x1bf6   : > { %v18988_v28 = vpop.f32.mrf.mxu1  ;;  %v19010_v5 = vpop.f32.mrf.mxu0  ;;  %v22355_v48 = vld [vmem:[#allocation7 + $0x328] sm:$0xff]  }
0x1bf8   : > { %v18989_v4 = vpop.f32.mrf.mxu1  ;;  %v19011_v13 = vpop.f32.mrf.mxu0 }
0x1bf9   : > { %v19012_v16 = vadd.f32 %v19011_v13, %v19010_v5  ;;  %v18990_v24 = vadd.f32 %v18989_v4, %v18988_v28  ;;  %v22354_v28 = vld [vmem:[#allocation7 + $0x2f0] sm:$0xff]   ;;  %v22356_v4 = vld [vmem:[#allocation7 + $0x2e8] sm:$0xff]   ;;  %v22357_v5 = vld [vmem:[#allocation7 + $0x320] sm:$0xff]  }
0x1bfa   : > { %v22361_v13 = vld [vmem:[#allocation7 + $0x310] sm:$0xff]  }
0x1bfb   : > { %v12552_v34 = vpack.c.bf16 %v19012_v16, %v19009_v46  ;;  %v12551_v26 = vpack.c.bf16 %v18990_v24, %v18987_v25  ;;  %v22364_v16 = vld [vmem:[#allocation7 + $0x2c8] sm:$0xff]   ;;  %v22384_v46 = vld [vmem:[#allocation7 + $0x3f8] sm:$0xff]  }
0x1bfc   : > { %v22388_v24 = vld [vmem:[#allocation7 + $0x3e8] sm:$0xff]   ;;  %v22392_v25 = vld [vmem:[#allocation7 + $0x3d8] sm:$0xff]  }
0x1c12   : > { %v19029_v6 = vpop.f32.mrf.mxu1 }
0x1c14   : > { %v19030_v8 = vpop.f32.mrf.mxu1 }
0x1c15   : > { %v19031_v17 = vadd.f32 %v19030_v8, %v19029_v6  ;;  %v22373_v6 = vld [vmem:[#allocation7 + $0x288] sm:$0xff]   ;;  %v22360_v8 = vld [vmem:[#allocation7 + $0x2d8] sm:$0xff]  }
0x1c16   : > { %v19032_v14 = vpop.f32.mrf.mxu1  ;;  %20093 = vmatpush3.bf16.msra.mxu1 %v22373_v6  ;;  %v22397_v6 = vld [vmem:[#allocation7 + $0x380] sm:$0xff]  }
0x1c17   : > { %20094 = vmatprep.subr.bf16.mxu1 %v22747_v2 }
0x1c18   : > { %v19033_v38 = vpop.f32.mrf.mxu1 }
0x1c19   : > { %v19034_v22 = vadd.f32 %v19033_v38, %v19032_v14  ;;  %v22362_v14 = vld [vmem:[#allocation7 + $0x2d0] sm:$0xff]   ;;  %v22363_v38 = vld [vmem:[#allocation7 + $0x308] sm:$0xff]  }
0x1c1a   : > { %20095 = vmatpush3.bf16.msra.mxu1 %v22374_v7 }
0x1c1b   : > { %v12553_v23 = vpack.c.bf16 %v19034_v22, %v19031_v17  ;;  %20100 = vmatprep.subr.bf16.mxu1 %v22747_v2  ;;  %v22365_v17 = vld [vmem:[#allocation7 + $0x300] sm:$0xff]  }
0x1c1c   : > { %v22366_v22 = vld [vmem:[#allocation7 + $0x2c0] sm:$0xff]  }
0x1c1d   : > { %20070 = vmatprep.subr.bf16.mxu0 %v12553_v23 }
0x1c1e   : > { %20071 = vmatpush3.bf16.msra.mxu0 %v12553_v23  ;;  %v22386_v23 = vld [vmem:[#allocation7 + $0x3f0] sm:$0xff]  }
0x1c1f   : > { %20072 = vmatprep.subr.bf16.mxu0 %v12552_v34 }
0x1c22   : > { %20073 = vmatpush3.bf16.msra.mxu0 %v12552_v34  ;;  %v22390_v34 = vld [vmem:[#allocation7 + $0x3e0] sm:$0xff]  }
0x1c23   : > { %20074 = vmatprep.subr.bf16.mxu0 %v12551_v26 }
0x1c26   : > { %20075 = vmatpush3.bf16.msra.mxu0 %v12551_v26 }
0x1c27   : > { %19040 = vmatprep.subr.bf16.mxu0 %v22319_v35 }
0x1c29   : > { %20077 = vmatmul.mubr.msk.bf16.vlgmr.msra.gmra.mxu0 %vm1413_vm5, %v22608_v36 }
0x1c2a   : > { %19041 = vmatpush3.bf16.msra.mxu0 %v22320_v10  ;;  %12766 = vmatprep.mubr.bf16.mxu0 %v24248_v33 }
0x1c2b   : > { %19042 = vmatprep.subr.bf16.mxu0 %v22321_v11 }
0x1c2e   : > { %19043 = vmatpush3.bf16.msra.mxu0 %v22322_v37 }
0x1c2f   : > { %19044 = vmatprep.subr.bf16.mxu0 %v22323_v53 }
0x1c32   : > { %19045 = vmatpush3.bf16.msra.mxu0 %v22324_v32  ;;  %v22375_v32 = vld [vmem:[#allocation7 + $0x378] sm:$0xff]  }
0x1c33   : > { %19046 = vmatprep.subr.bf16.mxu0 %v22325_v39 }
0x1c36   : > { %19047 = vmatpush3.bf16.msra.mxu0 %v22326_v18  ;;  %v22376_v18 = vld [vmem:[#allocation7 + $0x370] sm:$0xff]  }
0x1c37   : > { %19048 = vmatprep.subr.bf16.mxu0 %v22327_v30  ;;  %v22377_v30 = vld [vmem:[#allocation7 + $0x368] sm:$0xff]  }
0x1c3a   : > { %19049 = vmatpush3.bf16.msra.mxu0 %v22328_v61  ;;  %v22378_v61 = vld [vmem:[#allocation7 + $0x360] sm:$0xff]  }
0x1c3b   : > { %19050 = vmatprep.subr.bf16.mxu0 %v22329_v41  ;;  %v22379_v41 = vld [vmem:[#allocation7 + $0x358] sm:$0xff]  }
0x1c3e   : > { %19051 = vmatpush3.bf16.msra.mxu0 %v22330_v42 }
0x1c3f   : > { %19052 = vmatprep.subr.bf16.mxu0 %v22331_v20  ;;  %v22380_v20 = vld [vmem:[#allocation7 + $0x350] sm:$0xff]  }
0x1c42   : > { %19053 = vmatpush3.bf16.msra.mxu0 %v22332_v31 }
0x1c43   : > { %19054 = vmatprep.subr.bf16.mxu0 %v22333_v9 }
0x1c46   : > { %19055 = vmatpush3.bf16.msra.mxu0 %v22334_v0  ;;  %v22381_v0 = vld [vmem:[#allocation7 + $0x348] sm:$0xff]  }
0x1c47   : > { %19071 = vmatprep.subr.bf16.mxu0 %v22335_v52 }
0x1c49   : > { %12767 = vmatmul.mubr.bf16.vlgmr.msra.gmra.mxu0 %v24250_v63 }
0x1c4a   : > { %19072 = vmatpush3.bf16.msra.mxu0 %v22336_v54  ;;  %13047 = vmatprep.mubr.bf16.mxu0 %v24046_v44  ;;  %v22348_v44 = vld [vmem:[#allocation7 + $0x208] sm:$0xff]  }
0x1c4b   : > { %19073 = vmatprep.subr.bf16.mxu0 %v22337_v55 }
0x1c4e   : > { %19074 = vmatpush3.bf16.msra.mxu0 %v22338_v45  ;;  %v22382_v45 = vld [vmem:[#allocation7 + $0x340] sm:$0xff]  }
0x1c4f   : > { %19075 = vmatprep.subr.bf16.mxu0 %v22339_v56 }
0x1c52   : > { %19076 = vmatpush3.bf16.msra.mxu0 %v22340_v19 }
0x1c53   : > { %19077 = vmatprep.subr.bf16.mxu0 %v22341_v21 }
0x1c56   : > { %19078 = vmatpush3.bf16.msra.mxu0 %v22342_v50 }
0x1c57   : > { %19079 = vmatprep.subr.bf16.mxu0 %v22343_v43 }
0x1c5a   : > { %19080 = vmatpush3.bf16.msra.mxu0 %v22344_v57 }
0x1c5b   : > { %19081 = vmatprep.subr.bf16.mxu0 %v22345_v3 }
0x1c5e   : > { %19082 = vmatpush3.bf16.msra.mxu0 %v22346_v29  ;;  %v22383_v29 = vld [vmem:[#allocation7 + $0x3b8] sm:$0xff]  }
0x1c5f   : > { %19083 = vmatprep.subr.bf16.mxu0 %v22347_v47 }
0x1c62   : > { %19084 = vmatpush3.bf16.msra.mxu0 %v22348_v44  ;;  %v22385_v44 = vld [vmem:[#allocation7 + $0x3b0] sm:$0xff]  }
0x1c63   : > { %19085 = vmatprep.subr.bf16.mxu0 %v22349_v58  ;;  %v22387_v58 = vld [vmem:[#allocation7 + $0x3a8] sm:$0xff]  }
0x1c66   : > { %19086 = vmatpush3.bf16.msra.mxu0 %v22350_v59 }
0x1c67   : > { %19102 = vmatprep.subr.bf16.mxu0 %v22351_v60 }
0x1c69   : > { %13048 = vmatmul.mubr.bf16.vlgmr.msra.gmra.mxu0 %v24049_v51  ;;  %v22358_v51 = vld [vmem:[#allocation7 + $0x2e0] sm:$0xff]  }
0x1c6a   : > { %19103 = vmatpush3.bf16.msra.mxu0 %v22352_v62  ;;  %13329 = vmatprep.mubr.bf16.mxu0 %v24113_v1  ;;  %v22359_v1 = vld [vmem:[#allocation7 + $0x318] sm:$0xff]   ;;  %v22389_v62 = vld [vmem:[#allocation7 + $0x3a0] sm:$0xff]  }
0x1c6b   : > { %19104 = vmatprep.subr.bf16.mxu0 %v22353_v12 }
0x1c6e   : > { %19105 = vmatpush3.bf16.msra.mxu0 %v22354_v28 }
0x1c6f   : > { %19106 = vmatprep.subr.bf16.mxu0 %v22355_v48  ;;  %v22391_v48 = vld [vmem:[#allocation7 + $0x398] sm:$0xff]  }
0x1c72   : > { %19107 = vmatpush3.bf16.msra.mxu0 %v22356_v4  ;;  %v22395_v4 = vld [vmem:[#allocation7 + $0x388] sm:$0xff]  }
0x1c73   : > { %19108 = vmatprep.subr.bf16.mxu0 %v22357_v5  ;;  %v22396_v5 = vld [vmem:[#allocation7 + $0x3c8] sm:$0xff]  }
0x1c76   : > { %19109 = vmatpush3.bf16.msra.mxu0 %v22358_v51  ;;  %v22398_v51 = vld [vmem:[#allocation7 + $0x3c0] sm:$0xff]  }
0x1c77   : > { %19110 = vmatprep.subr.bf16.mxu0 %v22359_v1 }
0x1c7a   : > { %19111 = vmatpush3.bf16.msra.mxu0 %v22360_v8 }
0x1c7b   : > { %19112 = vmatprep.subr.bf16.mxu0 %v22361_v13 }
0x1c7e   : > { %19113 = vmatpush3.bf16.msra.mxu0 %v22362_v14 }
0x1c7f   : > { %19114 = vmatprep.subr.bf16.mxu0 %v22363_v38 }
0x1c82   : > { %19115 = vmatpush3.bf16.msra.mxu0 %v22364_v16  ;;  %v18393_v16 = vld [vmem:[%s24872_s28] ss:$0 sm:$0xff] }
0x1c83   : > { %19116 = vmatprep.subr.bf16.mxu0 %v22365_v17 }
0x1c86   : > { %19117 = vmatpush3.bf16.msra.mxu0 %v22366_v22 }
0x1c87   : > { %20140 = vmatprep.subr.bf16.mxu0 %v22747_v2 }
0x1c89   : > { %13330 = vmatmul.mubr.bf16.vlgmr.msra.gmra.mxu0 %v24168_v40  ;;  %v22394_v40 = vld [vmem:[#allocation7 + $0x3d0] sm:$0xff]  }
0x1c8a   : > { %20156 = vmatprep.mubr.msk.bf16.mxu0 %vm22748_vm0, %v22747_v2  ;;  %20141 = vmatpush3.bf16.msra.mxu0 %v22384_v46 }
0x1c8b   : > { %20142 = vmatprep.subr.bf16.mxu0 %v22747_v2 }
0x1c8e   : > { %20143 = vmatpush3.bf16.msra.mxu0 %v22386_v23 }
0x1c8f   : > { %20144 = vmatprep.subr.bf16.mxu0 %v22747_v2 }
0x1c92   : > { %20145 = vmatpush3.bf16.msra.mxu0 %v22388_v24 }
0x1c93   : > { %20146 = vmatprep.subr.bf16.mxu0 %v22747_v2 }
0x1c96   : > { %20147 = vmatpush3.bf16.msra.mxu0 %v22390_v34 }
0x1c97   : > { %20148 = vmatprep.subr.bf16.mxu0 %v22747_v2 }
0x1c9a   : > { %20149 = vmatpush3.bf16.msra.mxu0 %v22392_v25  ;;  %v22399_v25 = vld [vmem:[#allocation7 + $0x438] sm:$0xff]  }
0x1c9b   : > { %20150 = vmatprep.subr.bf16.mxu0 %v22747_v2 }
0x1c9e   : > { %20151 = vmatpush3.bf16.msra.mxu0 %v22394_v40 }
0x1c9f   : > { %20152 = vmatprep.subr.bf16.mxu0 %v22747_v2 }
0x1ca2   : > { %20153 = vmatpush3.bf16.msra.mxu0 %v22396_v5  ;;  %v22413_v5 = vld [vmem:[#allocation7 + $0x448] sm:$0xff]  }
0x1ca3   : > { %20154 = vmatprep.subr.bf16.mxu0 %v22747_v2 }
0x1ca6   : > { %20155 = vmatpush3.bf16.msra.mxu0 %v22398_v51  ;;  %v22414_v51 = vld [vmem:[#allocation7 + $0x440] sm:$0xff]  }
0x1ce9   : > { %v20078_v26 = vpop.f32.mrf.mxu0 }
0x1ceb   : > { %v12588_v35 = vpop.f32.mrf.mxu0 }
0x1ced   : > { %v20079_v10 = vpop.f32.mrf.mxu0 }
0x1cef   : > { %v12591_v11 = vpop.f32.mrf.mxu0 }
0x1cf0   : > { %v12603_v36 = vmax.f32 %v12588_v35, %v12591_v11  ;;  %v24318_v35 = vld [vmem:[%s22985_s23] sm:$0xff]  }
0x1cf1   : > { %v22402_v11 = vld [vmem:[#allocation7 + $0x420] sm:$0xff]  }
0x1cf2   : > { %v12604_v37 = vmax.f32 %v12603_v36, %v20078_v26  ;;  %v22400_v26 = vld [vmem:[#allocation7 + $0x430] sm:$0xff]   ;;  %v22403_v36 = vld [vmem:[#allocation7 + $0x418] sm:$0xff]  }
0x1cf4   : > { %v12605_v53 = vmax.f32 %v12604_v37, %v20079_v10  ;;  %v22401_v10 = vld [vmem:[#allocation7 + $0x428] sm:$0xff]   ;;  %v22404_v37 = vld [vmem:[#allocation7 + $0x410] sm:$0xff]  }
0x1cf6   : > { %v12830_v39 = vpack.c.bf16 %v12605_v53, %v12605_v53  ;;  %v22405_v53 = vld [vmem:[#allocation7 + $0x408] sm:$0xff]  }
0x1cf8   : > { %20097 = vmatmul.mubr.bf16.vlgmr.msra.gmra.mxu1 %v12830_v39 }
0x1cf9   : > { %20101 = vmatpush3.bf16.msra.mxu1 %v22375_v32  ;;  %20116 = vmatprep.mubr.msk.bf16.mxu1 %vm22748_vm0, %v22747_v2  ;;  %v22406_v32 = vld [vmem:[#allocation7 + $0x400] sm:$0xff]  }
0x1cfa   : > { %20102 = vmatprep.subr.bf16.mxu1 %v22747_v2 }
0x1cfd   : > { %20103 = vmatpush3.bf16.msra.mxu1 %v22376_v18 }
0x1cfe   : > { %20104 = vmatprep.subr.bf16.mxu1 %v22747_v2 }
0x1d01   : > { %20105 = vmatpush3.bf16.msra.mxu1 %v22377_v30 }
0x1d02   : > { %20106 = vmatprep.subr.bf16.mxu1 %v22747_v2 }
0x1d05   : > { %20107 = vmatpush3.bf16.msra.mxu1 %v22378_v61 }
0x1d06   : > { %20108 = vmatprep.subr.bf16.mxu1 %v22747_v2 }
0x1d09   : > { %v19056_v42 = vpop.f32.mrf.mxu0  ;;  %20109 = vmatpush3.bf16.msra.mxu1 %v22379_v41 }
0x1d0a   : > { %20110 = vmatprep.subr.bf16.mxu1 %v22747_v2 }
0x1d0b   : > { %v19057_v31 = vpop.f32.mrf.mxu0 }
0x1d0c   : > { %v19058_v54 = vadd.f32 %v19057_v31, %v19056_v42  ;;  %v22431_v42 = vld [vmem:[#allocation7 + $0x538] sm:$0xff]   ;;  %v22433_v31 = vld [vmem:[#allocation7 + $0x528] sm:$0xff]  }
0x1d0d   : > { %v19059_v9 = vpop.f32.mrf.mxu0  ;;  %20111 = vmatpush3.bf16.msra.mxu1 %v22380_v20  ;;  %v22432_v20 = vld [vmem:[#allocation7 + $0x530] sm:$0xff]  }
0x1d0e   : > { %20112 = vmatprep.subr.bf16.mxu1 %v22747_v2 }
0x1d0f   : > { %v19060_v52 = vpop.f32.mrf.mxu0 }
0x1d10   : > { %v19061_v55 = vadd.f32 %v19060_v52, %v19059_v9  ;;  %v22434_v9 = vld [vmem:[#allocation7 + $0x520] sm:$0xff]   ;;  %v22436_v52 = vld [vmem:[#allocation7 + $0x510] sm:$0xff]  }
0x1d11   : > { %20113 = vmatpush3.bf16.msra.mxu1 %v22381_v0  ;;  %v22435_v0 = vld [vmem:[#allocation7 + $0x518] sm:$0xff]  }
0x1d12   : > { %v12775_v56 = vmax.f32 %v19058_v54, %v19061_v55  ;;  %20114 = vmatprep.subr.bf16.mxu1 %v22747_v2 }
0x1d14   : > { %v12776_v19 = vrot.slane %v12775_v56, 4 }
0x1d15   : > { %20115 = vmatpush3.bf16.msra.mxu1 %v22382_v45 }
0x1d16   : > { %v12777_v21 = vmax.f32 %v12775_v56, %v12776_v19  ;;  %20120 = vmatprep.subr.bf16.mxu1 %v22747_v2 }
0x1d18   : > { %v12778_v50 = vrot.slane %v12777_v21, 2 }
0x1d1a   : > { %v12779_v43 = vmax.f32 %v12777_v21, %v12778_v50 }
0x1d1c   : > { %v12780_v57 = vrot.slane %v12779_v43, 1 }
0x1d1e   : > { %v12781_v3 = vmax.f32 %v12779_v43, %v12780_v57 }
0x1d20   : > { %v13112_v47 = vpack.c.bf16 %v12781_v3, %v12781_v3 }
0x1d22   : > { %20117 = vmatmul.mubr.bf16.vlgmr.msra.gmra.mxu1 %v13112_v47 }
0x1d23   : > { %20121 = vmatpush3.bf16.msra.mxu1 %v22383_v29  ;;  %20136 = vmatprep.mubr.msk.bf16.mxu1 %vm22748_vm0, %v22747_v2 }
0x1d24   : > { %20122 = vmatprep.subr.bf16.mxu1 %v22747_v2 }
0x1d27   : > { %20123 = vmatpush3.bf16.msra.mxu1 %v22385_v44 }
0x1d28   : > { %20124 = vmatprep.subr.bf16.mxu1 %v22747_v2 }
0x1d29   : > { %v19087_v59 = vpop.f32.mrf.mxu0 }
0x1d2b   : > { %v19088_v60 = vpop.f32.mrf.mxu0  ;;  %20125 = vmatpush3.bf16.msra.mxu1 %v22387_v58 }
0x1d2c   : > { %v19089_v12 = vadd.f32 %v19088_v60, %v19087_v59  ;;  %20126 = vmatprep.subr.bf16.mxu1 %v22747_v2  ;;  %v22407_v60 = vld [vmem:[#allocation7 + $0x478] sm:$0xff]  }
0x1d2d   : > { %v19090_v49 = vpop.f32.mrf.mxu0 }
0x1d2e   : > { %v22409_v49 = vld [vmem:[#allocation7 + $0x468] sm:$0xff]  }
0x1d2f   : > { %v19091_v28 = vpop.f32.mrf.mxu0  ;;  %20127 = vmatpush3.bf16.msra.mxu1 %v22389_v62  ;;  %v24344_v62 = vld [vmem:[%s22985_s23 + $0x8] sm:$0xff]  }
0x1d30   : > { %20128 = vmatprep.subr.bf16.mxu1 %v22747_v2  ;;  %v22410_v28 = vld [vmem:[#allocation7 + $0x460] sm:$0xff]  }
0x1d33   : > { %20129 = vmatpush3.bf16.msra.mxu1 %v22391_v48  ;;  %v22411_v48 = vld [vmem:[#allocation7 + $0x458] sm:$0xff]  }
0x1d34   : > { %20130 = vmatprep.subr.bf16.mxu1 %v22747_v2 }
0x1d37   : > { %20131 = vmatpush3.bf16.msra.mxu1 %v22393_v15  ;;  %v22412_v15 = vld [vmem:[#allocation7 + $0x450] sm:$0xff]  }
0x1d38   : > { %20132 = vmatprep.subr.bf16.mxu1 %v22747_v2 }
0x1d3b   : > { %20133 = vmatpush3.bf16.msra.mxu1 %v22395_v4  ;;  %v18418_v4 = vld [vmem:[%s24872_s28 + $0x1] sm:$0x1] }
0x1d3c   : > { %20134 = vmatprep.subr.bf16.mxu1 %v22747_v2 }
0x1d3f   : > { %20135 = vmatpush3.bf16.msra.mxu1 %v22397_v6 }
0x1d40   : > { %20160 = vmatprep.subr.bf16.mxu1 %v22747_v2 }
0x1d49   : > { %v19118_v1 = vpop.f32.mrf.mxu0 }
0x1d4b   : > { %v19119_v7 = vpop.f32.mrf.mxu0 }
0x1d4c   : > { %v19120_v8 = vadd.f32 %v19119_v7, %v19118_v1  ;;  %v22415_v7 = vld [vmem:[#allocation7 + $0x4f8] sm:$0xff]  }
0x1d4d   : > { %v19121_v13 = vpop.f32.mrf.mxu0 }
0x1d4f   : > { %v19122_v14 = vpop.f32.mrf.mxu0 }
0x1d50   : > { %v22417_v14 = vld [vmem:[#allocation7 + $0x4f0] sm:$0xff]  }
0x1db8   : > { %v12913_v38 = vpop.f32.mrf.mxu1 }
0x1db9   : > { %v13050_v17 = vadd.f32 %v19089_v12, %v12913_v38  ;;  %v22408_v12 = vld [vmem:[#allocation7 + $0x470] sm:$0xff]  }
0x1dba   : > { %v20098_v22 = vpop.f32.mrf.mxu1  ;;  %v22418_v38 = vld [vmem:[#allocation7 + $0x4b0] sm:$0xff]  }
0x1dbb   : > { %v13062_v46 = vadd.f32 %v18393_v16, %v13050_v17  ;;  %v22419_v16 = vld [vmem:[#allocation7 + $0x4e8] sm:$0xff]   ;;  %v22421_v22 = vld [vmem:[#allocation7 + $0x4e0] sm:$0xff]  }
0x1dbc   : > { %v12916_v23 = vpop.f32.mrf.mxu1  ;;  %v22420_v17 = vld [vmem:[#allocation7 + $0x4a8] sm:$0xff]  }
0x1dbd   : > { %v13063_v24 = vmax.f32 %v13062_v46, 0.0  ;;  %v22422_v46 = vld [vmem:[#allocation7 + $0x4a0] sm:$0xff]   ;;  %v22423_v23 = vld [vmem:[#allocation7 + $0x4d8] sm:$0xff]  }
0x1dbe   : > { %v20099_v34 = vpop.f32.mrf.mxu1 }
0x1dbf   : > { %v24310_v40 = vpack.c.bf16 %v13063_v24, %v13063_v24  ;;  %v22424_v24 = vld [vmem:[#allocation7 + $0x498] sm:$0xff]   ;;  %v22425_v34 = vld [vmem:[#allocation7 + $0x4d0] sm:$0xff]  }
0x1dc1   : > { %20137 = vmatmul.mubr.bf16.vlgmr.msra.gmra.mxu1 %v24310_v40  ;;  %20157 = vmatmul.mubr.bf16.vlgmr.msra.gmra.mxu0 %v24310_v40 }
0x1dc2   : > { %20161 = vmatpush3.bf16.msra.mxu1 %v22399_v25  ;;  %20176 = vmatprep.mubr.msk.bf16.mxu1 %vm22748_vm0, %v22747_v2  ;;  %v22426_v25 = vld [vmem:[#allocation7 + $0x490] sm:$0xff]  }
0x1dc3   : > { %20162 = vmatprep.subr.bf16.mxu1 %v22747_v2  ;;  %20184 = vmatprep.mubr.msk.bf16.mxu0 %vm2102_vm6, %v24318_v35 }
0x1dc6   : > { %20163 = vmatpush3.bf16.msra.mxu1 %v22400_v26  ;;  %v22427_v26 = vld [vmem:[#allocation7 + $0x4c8] sm:$0xff]  }
0x1dc7   : > { %20164 = vmatprep.subr.bf16.mxu1 %v22747_v2 }
0x1dca   : > { %20165 = vmatpush3.bf16.msra.mxu1 %v22401_v10  ;;  %v22429_v10 = vld [vmem:[#allocation7 + $0x4c0] sm:$0xff]  }
0x1dcb   : > { %20166 = vmatprep.subr.bf16.mxu1 %v22747_v2 }
0x1dce   : > { %20167 = vmatpush3.bf16.msra.mxu1 %v22402_v11  ;;  %v22430_v11 = vld [vmem:[#allocation7 + $0x480] sm:$0xff]  }
0x1dcf   : > { %20168 = vmatprep.subr.bf16.mxu1 %v22747_v2 }
0x1dd2   : > { %20169 = vmatpush3.bf16.msra.mxu1 %v22403_v36  ;;  %v22437_v36 = vld [vmem:[#allocation7 + $0x508] sm:$0xff]  }
0x1dd3   : > { %20170 = vmatprep.subr.bf16.mxu1 %v22747_v2 }
0x1dd6   : > { %20171 = vmatpush3.bf16.msra.mxu1 %v22404_v37  ;;  %v22438_v37 = vld [vmem:[#allocation7 + $0x500] sm:$0xff]  }
0x1dd7   : > { %20172 = vmatprep.subr.bf16.mxu1 %v22747_v2 }
0x1dda   : > { %20173 = vmatpush3.bf16.msra.mxu1 %v22405_v53 }
0x1ddb   : > { %20174 = vmatprep.subr.bf16.mxu1 %v22747_v2 }
0x1dde   : > { %20175 = vmatpush3.bf16.msra.mxu1 %v22406_v32 }
0x1ddf   : > { %20208 = vmatprep.subr.bf16.mxu1 %v22747_v2 }
0x1de1   : > { %20177 = vmatmul.mubr.bf16.vlgmr.msra.gmra.mxu1 %v24310_v40 }
0x1de2   : > { %v13195_v39 = vpop.f32.mrf.mxu1  ;;  %20224 = vmatprep.mubr.msk.bf16.mxu1 %vm22748_vm0, %v22747_v2  ;;  %20209 = vmatpush3.bf16.msra.mxu1 %v22431_v42 }
0x1de3   : > { %v24332_v18 = vadd.f32 %v19120_v8, %v13195_v39  ;;  %20210 = vmatprep.subr.bf16.mxu1 %v22747_v2  ;;  %v22416_v8 = vld [vmem:[#allocation7 + $0x4b8] sm:$0xff]  }
0x1de4   : > { %v20118_v30 = vpop.f32.mrf.mxu1 }
0x1de5   : > { %v13339_v6 = vadd.f32 %v18418_v4, %v24332_v18  ;;  %v22462_v4 = vld [vmem:[%s24873_s22 + $0x40] sm:$0xff]  }
0x1de6   : > { %v13198_v61 = vpop.f32.mrf.mxu1  ;;  %20211 = vmatpush3.bf16.msra.mxu1 %v22432_v20  ;;  %v22441_v20 = vld [vmem:[#allocation7 + $0x568] sm:$0xff]  }
0x1de7   : > { %20212 = vmatprep.subr.bf16.mxu1 %v22747_v2  ;;  %v13340_v1 = vmax.f32 %v13339_v6, 0.0 }
0x1de8   : > { %v20119_v41 = vpop.f32.mrf.mxu1 }
0x1de9   : > { %v24359_v13 = vpack.c.bf16 %v13340_v1, %v13340_v1  ;;  %v22439_v41 = vld [vmem:[#allocation7 + $0x578] sm:$0xff]  }
0x1dea   : > { %20213 = vmatpush3.bf16.msra.mxu1 %v22433_v31  ;;  %v22442_v31 = vld [vmem:[#allocation7 + $0x560] sm:$0xff]  }
0x1deb   : > { %20214 = vmatprep.subr.bf16.mxu1 %v22747_v2 }
0x1dee   : > { %20215 = vmatpush3.bf16.msra.mxu1 %v22434_v9  ;;  %v22443_v9 = vld [vmem:[#allocation7 + $0x558] sm:$0xff]  }
0x1def   : > { %20216 = vmatprep.subr.bf16.mxu1 %v22747_v2 }
0x1df2   : > { %20217 = vmatpush3.bf16.msra.mxu1 %v22435_v0  ;;  %v22444_v0 = vld [vmem:[#allocation7 + $0x550] sm:$0xff]  }
0x1df3   : > { %20218 = vmatprep.subr.bf16.mxu1 %v22747_v2 }
0x1df6   : > { %20219 = vmatpush3.bf16.msra.mxu1 %v22436_v52 }
0x1df7   : > { %20220 = vmatprep.subr.bf16.mxu1 %v22747_v2 }
0x1dfa   : > { %20221 = vmatpush3.bf16.msra.mxu1 %v22437_v36 }
0x1dfb   : > { %20222 = vmatprep.subr.bf16.mxu1 %v22747_v2 }
0x1dfe   : > { %20223 = vmatpush3.bf16.msra.mxu1 %v22438_v37 }
0x1dff   : > { %20228 = vmatprep.subr.bf16.mxu1 %v22747_v2 }
0x1e81   : > { %v13441_v54 = vpop.f32.mrf.mxu1  ;;  %v13545_v55 = vpop.f32.mrf.mxu0 }
0x1e82   : > { %v13655_v47 = vpack.c.bf16 %v13545_v55, %v13441_v54  ;;  %v22445_v54 = vld [vmem:[#allocation7 + $0x548] sm:$0xff]  }
0x1e83   : > { %v20138_v45 = vpop.f32.mrf.mxu1  ;;  %v20158_v56 = vpop.f32.mrf.mxu0 }
0x1e84   : > { %v22446_v56 = vld [vmem:[#allocation7 + $0x540] sm:$0xff]  }
0x1e85   : > { %v13444_v19 = vpop.f32.mrf.mxu1  ;;  %v13548_v21 = vpop.f32.mrf.mxu0 }
0x1e87   : > { %v20139_v50 = vpop.f32.mrf.mxu1  ;;  %v20159_v43 = vpop.f32.mrf.mxu0 }
0x1e88   : > { %v22447_v50 = vld [vmem:[%s24873_s22 + $0x38] sm:$0xff]  }
0x1e89   : > { %v22448_v43 = vld [vmem:[%s24873_s22 + $0x78] sm:$0xff]  }
0x1ea1   : > { %v13649_v57 = vpop.f32.mrf.mxu1 }
0x1ea2   : > { %v13656_v3 = vpack.c.bf16 %v13649_v57, %v13649_v57  ;;  %v22449_v57 = vld [vmem:[%s24873_s22 + $0x30] sm:$0xff]  }
0x1ea3   : > { %v20178_v29 = vpop.f32.mrf.mxu1 }
0x1ea4   : > { %v13658_v44 = vsel %vm2109_vm7, %v13656_v3, 0  ;;  %20703 = vmatprep.subr.msk.bf16.mxu0 %vm2109_vm7, %v13656_v3  ;;  %v22450_v3 = vld [vmem:[%s24873_s22 + $0x70] sm:$0xff]   ;;  %v22451_v29 = vld [vmem:[%s24873_s22 + $0x28] sm:$0xff]  }
0x1ea5   : > { %v13652_v58 = vpop.f32.mrf.mxu1  ;;  %20181 = vmatpush3.bf16.msra.mxu0 %v13658_v44  ;;  %v22453_v44 = vld [vmem:[%s24873_s22 + $0x20] sm:$0xff]  }
0x1ea6   : > { %20182 = vmatprep.subr.bf16.mxu0 %v13655_v47  ;;  %v22454_v58 = vld [vmem:[%s24873_s22 + $0x60] sm:$0xff]  }
0x1ea7   : > { %v20179_v59 = vpop.f32.mrf.mxu1 }
0x1ea8   : > { %v22455_v59 = vld [vmem:[%s24873_s22 + $0x18] sm:$0xff]  }
0x1ea9   : > { %20183 = vmatpush3.bf16.msra.mxu0 %v13655_v47  ;;  %v22452_v47 = vld [vmem:[%s24873_s22 + $0x68] sm:$0xff]  }
0x1eaa   : > { %20188 = vmatprep.subr.bf16.mxu0 %v22747_v2 }
0x1eac   : > { %20185 = vmatmul.mubr.msk.bf16.vlgmr.msra.gmra.mxu0 %vm2102_vm6, %v24344_v62 }
0x1ead   : > { %20189 = vmatpush3.bf16.msra.mxu0 %v22407_v60  ;;  %20204 = vmatprep.mubr.msk.bf16.mxu0 %vm22748_vm0, %v22747_v2  ;;  %v22456_v60 = vld [vmem:[%s24873_s22 + $0x58] sm:$0xff]  }
0x1eae   : > { %20190 = vmatprep.subr.bf16.mxu0 %v22747_v2 }
0x1eb1   : > { %20191 = vmatpush3.bf16.msra.mxu0 %v22408_v12  ;;  %v22457_v12 = vld [vmem:[%s24873_s22 + $0x10] sm:$0xff]  }
0x1eb2   : > { %20192 = vmatprep.subr.bf16.mxu0 %v22747_v2 }
0x1eb5   : > { %20193 = vmatpush3.bf16.msra.mxu0 %v22409_v49  ;;  %v22458_v49 = vld [vmem:[%s24873_s22 + $0x50] sm:$0xff]  }
0x1eb6   : > { %20194 = vmatprep.subr.bf16.mxu0 %v22747_v2 }
0x1eb9   : > { %20195 = vmatpush3.bf16.msra.mxu0 %v22410_v28  ;;  %v22459_v28 = vld [vmem:[%s24873_s22 + $0x8] sm:$0xff]  }
0x1eba   : > { %20196 = vmatprep.subr.bf16.mxu0 %v22747_v2 }
0x1ebd   : > { %20197 = vmatpush3.bf16.msra.mxu0 %v22411_v48  ;;  %v22460_v48 = vld [vmem:[%s24873_s22 + $0x48] sm:$0xff]  }
0x1ebe   : > { %20198 = vmatprep.subr.bf16.mxu0 %v22747_v2 }
0x1ec1   : > { %20199 = vmatpush3.bf16.msra.mxu0 %v22412_v15  ;;  %v22461_v15 = vld [vmem:[%s24873_s22] sm:$0xff]  }
0x1ec2   : > { %20200 = vmatprep.subr.bf16.mxu0 %v22747_v2 }
0x1ec5   : > { %20201 = vmatpush3.bf16.msra.mxu0 %v22413_v5 }
0x1ec6   : > { %20202 = vmatprep.subr.bf16.mxu0 %v22747_v2 }
0x1ec9   : > { %20203 = vmatpush3.bf16.msra.mxu0 %v22414_v51 }
0x1eca   : > { %19173 = vmatprep.subr.bf16.mxu0 %v22415_v7 }
0x1ecc   : > { %20205 = vmatmul.mubr.bf16.vlgmr.msra.gmra.mxu0 %v24359_v13 }
0x1ecd   : > { %19174 = vmatpush3.bf16.msra.mxu0 %v22416_v8  ;;  %14081 = vmatprep.mubr.bf16.mxu0 %v24248_v33  ;;  %v22428_v33 = vld [vmem:[#allocation7 + $0x488] sm:$0xff]  }
0x1ece   : > { %19175 = vmatprep.subr.bf16.mxu0 %v22417_v14 }
0x1ed1   : > { %19176 = vmatpush3.bf16.msra.mxu0 %v22418_v38 }
0x1ed2   : > { %19177 = vmatprep.subr.bf16.mxu0 %v22419_v16 }
0x1ed5   : > { %19178 = vmatpush3.bf16.msra.mxu0 %v22420_v17 }
0x1ed6   : > { %19179 = vmatprep.subr.bf16.mxu0 %v22421_v22 }
0x1ed9   : > { %19180 = vmatpush3.bf16.msra.mxu0 %v22422_v46 }
0x1eda   : > { %19181 = vmatprep.subr.bf16.mxu0 %v22423_v23 }
0x1edd   : > { %19182 = vmatpush3.bf16.msra.mxu0 %v22424_v24 }
0x1ede   : > { %19183 = vmatprep.subr.bf16.mxu0 %v22425_v34  ;;  %v18486_v34 = vld [vmem:[%s24872_s28 + $0x2] ss:$0 sm:$0xff] }
0x1ee1   : > { %19184 = vmatpush3.bf16.msra.mxu0 %v22426_v25 }
0x1ee2   : > { %19185 = vmatprep.subr.bf16.mxu0 %v22427_v26 }
0x1ee5   : > { %19186 = vmatpush3.bf16.msra.mxu0 %v22428_v33 }
0x1ee6   : > { %19187 = vmatprep.subr.bf16.mxu0 %v22429_v10 }
0x1ee9   : > { %19188 = vmatpush3.bf16.msra.mxu0 %v22430_v11 }
0x1eea   : > { %20248 = vmatprep.subr.bf16.mxu0 %v22747_v2 }
0x1eec   : > { %14082 = vmatmul.mubr.bf16.vlgmr.msra.gmra.mxu0 %v24250_v63  ;;  %v22440_v63 = vld [vmem:[#allocation7 + $0x570] sm:$0xff]  }
0x1eed   : > { %20264 = vmatprep.mubr.msk.bf16.mxu0 %vm22748_vm0, %v22747_v2  ;;  %20249 = vmatpush3.bf16.msra.mxu0 %v22447_v50 }
0x1eee   : > { %20250 = vmatprep.subr.bf16.mxu0 %v22747_v2 }
0x1ef1   : > { %20251 = vmatpush3.bf16.msra.mxu0 %v22449_v57 }
0x1ef2   : > { %20252 = vmatprep.subr.bf16.mxu0 %v22747_v2 }
0x1ef5   : > { %20253 = vmatpush3.bf16.msra.mxu0 %v22451_v29 }
0x1ef6   : > { %20254 = vmatprep.subr.bf16.mxu0 %v22747_v2 }
0x1ef9   : > { %20255 = vmatpush3.bf16.msra.mxu0 %v22453_v44 }
0x1efa   : > { %20256 = vmatprep.subr.bf16.mxu0 %v22747_v2 }
0x1efd   : > { %20257 = vmatpush3.bf16.msra.mxu0 %v22455_v59  ;;  %v22471_v59 = vld [vmem:[%s24873_s22 + $0xf8] sm:$0xff]  }
0x1efe   : > { %20258 = vmatprep.subr.bf16.mxu0 %v22747_v2 }
0x1f01   : > { %20259 = vmatpush3.bf16.msra.mxu0 %v22457_v12  ;;  %v22472_v12 = vld [vmem:[%s24873_s22 + $0xf0] sm:$0xff]  }
0x1f02   : > { %20260 = vmatprep.subr.bf16.mxu0 %v22747_v2 }
0x1f05   : > { %20261 = vmatpush3.bf16.msra.mxu0 %v22459_v28  ;;  %v22474_v28 = vld [vmem:[%s24873_s22 + $0xe0] sm:$0xff]  }
0x1f06   : > { %20262 = vmatprep.subr.bf16.mxu0 %v22747_v2 }
0x1f09   : > { %20263 = vmatpush3.bf16.msra.mxu0 %v22461_v15  ;;  %v22476_v15 = vld [vmem:[%s24873_s22 + $0xd0] sm:$0xff]  }
0x1f0a   : > { %20288 = vmatprep.subr.bf16.mxu0 %v22747_v2 }
0x1f6c   : > { %v20186_v53 = vpop.f32.mrf.mxu0 }
0x1f6e   : > { %v13694_v32 = vpop.f32.mrf.mxu0 }
0x1f6f   : > { %v13709_v30 = vmax.f32 %v13694_v32, %v20186_v53 }
0x1f70   : > { %v20187_v39 = vpop.f32.mrf.mxu0 }
0x1f72   : > { %v13697_v18 = vpop.f32.mrf.mxu0 }
0x1f73   : > { %v13710_v61 = vmax.f32 %v13697_v18, %v20187_v39  ;;  %v22463_v39 = vld [vmem:[%s24873_s22 + $0xb8] sm:$0xff]  }
0x1f75   : > { %v13863_v42 = vpack.c.bf16 %v13710_v61, %v13709_v30  ;;  %v22464_v30 = vld [vmem:[%s24873_s22 + $0xb0] sm:$0xff]   ;;  %v24424_v61 = vld [vmem:[%s22981_s18] sm:$0xff]  }
0x1f77   : > { %20225 = vmatmul.mubr.bf16.vlgmr.msra.gmra.mxu1 %v13863_v42  ;;  %v22466_v42 = vld [vmem:[%s24873_s22 + $0xa0] sm:$0xff]  }
0x1f78   : > { %20229 = vmatpush3.bf16.msra.mxu1 %v22439_v41  ;;  %20244 = vmatprep.mubr.msk.bf16.mxu1 %vm22748_vm0, %v22747_v2  ;;  %v22465_v41 = vld [vmem:[%s24873_s22 + $0xa8] sm:$0xff]  }
0x1f79   : > { %20230 = vmatprep.subr.bf16.mxu1 %v22747_v2 }
0x1f7c   : > { %20231 = vmatpush3.bf16.msra.mxu1 %v22440_v63  ;;  %v22467_v63 = vld [vmem:[%s24873_s22 + $0x98] sm:$0xff]  }
0x1f7d   : > { %20232 = vmatprep.subr.bf16.mxu1 %v22747_v2 }
0x1f80   : > { %20233 = vmatpush3.bf16.msra.mxu1 %v22441_v20  ;;  %v22468_v20 = vld [vmem:[%s24873_s22 + $0x90] sm:$0xff]  }
0x1f81   : > { %20234 = vmatprep.subr.bf16.mxu1 %v22747_v2 }
0x1f84   : > { %20235 = vmatpush3.bf16.msra.mxu1 %v22442_v31  ;;  %v22469_v31 = vld [vmem:[%s24873_s22 + $0x88] sm:$0xff]  }
0x1f85   : > { %20236 = vmatprep.subr.bf16.mxu1 %v22747_v2 }
0x1f88   : > { %20237 = vmatpush3.bf16.msra.mxu1 %v22443_v9  ;;  %v22470_v9 = vld [vmem:[%s24873_s22 + $0x80] sm:$0xff]  }
0x1f89   : > { %20238 = vmatprep.subr.bf16.mxu1 %v22747_v2 }
0x1f8c   : > { %20239 = vmatpush3.bf16.msra.mxu1 %v22444_v0  ;;  %v13809_v52 = vpop.f32.mrf.mxu0  ;;  %v22479_v0 = vld [vmem:[%s24873_s22 + $0x158] sm:$0xff]  }
0x1f8d   : > { %20240 = vmatprep.subr.bf16.mxu1 %v22747_v2  ;;  %v14106_v21 = vpack.c.bf16 %v13809_v52, %v13809_v52 }
0x1f8e   : > { %v20206_v55 = vpop.f32.mrf.mxu0 }
0x1f90   : > { %20241 = vmatpush3.bf16.msra.mxu1 %v22445_v54  ;;  %v13812_v45 = vpop.f32.mrf.mxu0 }
0x1f91   : > { %20242 = vmatprep.subr.bf16.mxu1 %v22747_v2 }
0x1f92   : > { %v20207_v19 = vpop.f32.mrf.mxu0 }
0x1f94   : > { %20243 = vmatpush3.bf16.msra.mxu1 %v22446_v56 }
0x1f95   : > { %20268 = vmatprep.subr.bf16.mxu1 %v22747_v2 }
0x1f97   : > { %20245 = vmatmul.mubr.bf16.vlgmr.msra.gmra.mxu1 %v14106_v21 }
0x1f98   : > { %20284 = vmatprep.mubr.msk.bf16.mxu1 %vm22748_vm0, %v22747_v2  ;;  %20269 = vmatpush3.bf16.msra.mxu1 %v22448_v43 }
0x1f99   : > { %20270 = vmatprep.subr.bf16.mxu1 %v22747_v2 }
0x1f9c   : > { %20271 = vmatpush3.bf16.msra.mxu1 %v22450_v3 }
0x1f9d   : > { %20272 = vmatprep.subr.bf16.mxu1 %v22747_v2 }
0x1fa0   : > { %20273 = vmatpush3.bf16.msra.mxu1 %v22452_v47 }
0x1fa1   : > { %20274 = vmatprep.subr.bf16.mxu1 %v22747_v2 }
0x1fa4   : > { %20275 = vmatpush3.bf16.msra.mxu1 %v22454_v58 }
0x1fa5   : > { %20276 = vmatprep.subr.bf16.mxu1 %v22747_v2 }
0x1fa8   : > { %20277 = vmatpush3.bf16.msra.mxu1 %v22456_v60  ;;  %v24449_v60 = vld [vmem:[%s22981_s18 + $0x8] sm:$0xff]   ;;  %s24874_s18 = sld [smem:[#allocation20_spill]] }
0x1fa9   : > { %20278 = vmatprep.subr.bf16.mxu1 %v22747_v2 }
0x1fac   : > { %20279 = vmatpush3.bf16.msra.mxu1 %v22458_v49  ;;  %v19189_v7 = vpop.f32.mrf.mxu0  ;;  %v22473_v49 = vld [vmem:[%s24873_s22 + $0xe8] sm:$0xff]  }
0x1fad   : > { %20280 = vmatprep.subr.bf16.mxu1 %v22747_v2 }
0x1fae   : > { %v19190_v8 = vpop.f32.mrf.mxu0 }
0x1faf   : > { %v19191_v16 = vadd.f32 %v19190_v8, %v19189_v7  ;;  %v22489_v7 = vld [vmem:[%s24873_s22 + $0x1b8] sm:$0xff]   ;;  %v22491_v8 = vld [vmem:[%s24873_s22 + $0x1b0] sm:$0xff]  }
0x1fb0   : > { %20281 = vmatpush3.bf16.msra.mxu1 %v22460_v48  ;;  %v19192_v14 = vpop.f32.mrf.mxu0  ;;  %v22475_v48 = vld [vmem:[%s24873_s22 + $0xd8] sm:$0xff]  }
0x1fb1   : > { %20282 = vmatprep.subr.bf16.mxu1 %v22747_v2 }
0x1fb2   : > { %v19193_v38 = vpop.f32.mrf.mxu0 }
0x1fb3   : > { %v19194_v17 = vadd.f32 %v19193_v38, %v19192_v14  ;;  %v22493_v14 = vld [vmem:[%s24873_s22 + $0x1a8] sm:$0xff]   ;;  %v22494_v38 = vld [vmem:[%s24873_s22 + $0x1a0] sm:$0xff]  }
0x1fb4   : > { %20283 = vmatpush3.bf16.msra.mxu1 %v22462_v4  ;;  %v22477_v4 = vld [vmem:[%s24873_s22 + $0xc8] sm:$0xff]  }
0x2037   : > { %v13946_v5 = vpop.f32.mrf.mxu1 }
0x2038   : > { %v14084_v46 = vadd.f32 %v19191_v16, %v13946_v5  ;;  %v22478_v5 = vld [vmem:[%s24873_s22 + $0xc0] sm:$0xff]  }
0x2039   : > { %v20226_v6 = vpop.f32.mrf.mxu1 }
0x203a   : > { %v22480_v6 = vld [vmem:[%s24873_s22 + $0x150] sm:$0xff]  }
0x203b   : > { %v13949_v51 = vpop.f32.mrf.mxu1 }
0x203c   : > { %v14087_v23 = vadd.f32 %v19194_v17, %v13949_v51  ;;  %v22481_v51 = vld [vmem:[%s24873_s22 + $0x148] sm:$0xff]  }
0x203d   : > { %v20227_v1 = vpop.f32.mrf.mxu1 }
0x203e   : > { %v22482_v1 = vld [vmem:[%s24873_s22 + $0x140] sm:$0xff]  }
0x2057   : > { %v14189_v22 = vpop.f32.mrf.mxu1 }
0x2058   : > { %v14198_v24 = vrot.slane %v14189_v22, %v23231_v27 }
0x2059   : > { %v20246_v25 = vpop.f32.mrf.mxu1 }
0x205a   : > { %v14199_v26 = vadd.f32 %v14198_v24, %v14084_v46  ;;  %v14200_v33 = vadd.f32 %v14198_v24, %v14087_v23  ;;  %v22483_v25 = vld [vmem:[%s24873_s22 + $0x138] sm:$0xff]  }
0x205b   : > { %v14192_v10 = vpop.f32.mrf.mxu1 }
0x205c   : > { %v14209_v11 = vadd.f32 %v18486_v34, %v14199_v26  ;;  %v14210_v36 = vadd.f32 %v18486_v34, %v14200_v33  ;;  %v22484_v33 = vld [vmem:[%s24873_s22 + $0x130] sm:$0xff]   ;;  %v22485_v10 = vld [vmem:[%s24873_s22 + $0x128] sm:$0xff]  }
0x205d   : > { %v20247_v37 = vpop.f32.mrf.mxu1 }
0x205e   : > { %v14211_v53 = vmax.f32 %v14209_v11, 0.0  ;;  %v14212_v32 = vmax.f32 %v14210_v36, 0.0  ;;  %v22486_v11 = vld [vmem:[%s24873_s22 + $0x120] sm:$0xff]   ;;  %v22487_v36 = vld [vmem:[%s24873_s22 + $0x118] sm:$0xff]  }
0x2060   : > { %v24415_v18 = vpack.c.bf16 %v14212_v32, %v14211_v53  ;;  %v22488_v53 = vld [vmem:[%s24873_s22 + $0x110] sm:$0xff]  }
0x2062   : > { %20265 = vmatmul.mubr.bf16.vlgmr.msra.gmra.mxu0 %v24415_v18  ;;  %20285 = vmatmul.mubr.bf16.vlgmr.msra.gmra.mxu1 %v24415_v18 }
0x2063   : > { %20289 = vmatpush3.bf16.msra.mxu0 %v22463_v39  ;;  %20304 = vmatprep.mubr.msk.bf16.mxu0 %vm22748_vm0, %v22747_v2 }
0x2064   : > { %20290 = vmatprep.subr.bf16.mxu0 %v22747_v2  ;;  %20314 = vmatprep.mubr.msk.bf16.mxu1 %vm1413_vm5, %v24424_v61 }
0x2067   : > { %20291 = vmatpush3.bf16.msra.mxu0 %v22464_v30  ;;  %v22490_v30 = vld [vmem:[%s24873_s22 + $0x108] sm:$0xff]  }
0x2068   : > { %20292 = vmatprep.subr.bf16.mxu0 %v22747_v2 }
0x206b   : > { %20293 = vmatpush3.bf16.msra.mxu0 %v22465_v41 }
0x206c   : > { %20294 = vmatprep.subr.bf16.mxu0 %v22747_v2 }
0x206f   : > { %20295 = vmatpush3.bf16.msra.mxu0 %v22466_v42 }
0x2070   : > { %20296 = vmatprep.subr.bf16.mxu0 %v22747_v2 }
0x2073   : > { %20297 = vmatpush3.bf16.msra.mxu0 %v22467_v63 }
0x2074   : > { %20298 = vmatprep.subr.bf16.mxu0 %v22747_v2 }
0x2077   : > { %20299 = vmatpush3.bf16.msra.mxu0 %v22468_v20 }
0x2078   : > { %20300 = vmatprep.subr.bf16.mxu0 %v22747_v2 }
0x207b   : > { %20301 = vmatpush3.bf16.msra.mxu0 %v22469_v31 }
0x207c   : > { %20302 = vmatprep.subr.bf16.mxu0 %v22747_v2 }
0x207f   : > { %20303 = vmatpush3.bf16.msra.mxu0 %v22470_v9  ;;  %v22492_v9 = vld [vmem:[%s24873_s22 + $0x100] sm:$0xff]  }
0x2080   : > { %20338 = vmatprep.subr.bf16.mxu0 %v22747_v2 }
0x2082   : > { %20305 = vmatmul.mubr.bf16.vlgmr.msra.gmra.mxu0 %v24415_v18 }
0x2083   : > { %20346 = vmatprep.mubr.msk.bf16.mxu0 %vm22748_vm0, %v22747_v2  ;;  %20339 = vmatpush3.bf16.msra.mxu0 %v22479_v0 }
0x2084   : > { %20340 = vmatprep.subr.bf16.mxu0 %v22747_v2 }
0x2087   : > { %20341 = vmatpush3.bf16.msra.mxu0 %v22480_v6 }
0x2088   : > { %20342 = vmatprep.subr.bf16.mxu0 %v22747_v2 }
0x208b   : > { %20343 = vmatpush3.bf16.msra.mxu0 %v22481_v51  ;;  %v18534_v51 = vld [vmem:[%s24874_s18] ss:$0 sm:$0xff] }
0x208c   : > { %20344 = vmatprep.subr.bf16.mxu0 %v22747_v2 }
0x208f   : > { %20345 = vmatpush3.bf16.msra.mxu0 %v22482_v1 }
0x2090   : > { %20350 = vmatprep.subr.bf16.mxu0 %v22747_v2 }
0x2122   : > { %v14312_v52 = vpop.f32.mrf.mxu0  ;;  %v14417_v54 = vpop.f32.mrf.mxu1 }
0x2124   : > { %v20266_v55 = vpop.f32.mrf.mxu0  ;;  %v20286_v45 = vpop.f32.mrf.mxu1 }
0x2126   : > { %v14315_v56 = vpop.f32.mrf.mxu0  ;;  %v14420_v19 = vpop.f32.mrf.mxu1 }
0x2127   : > { %v14530_v44 = vpack.c.bf16 %v14420_v19, %v14417_v54  ;;  %v14529_v58 = vpack.c.bf16 %v14315_v56, %v14312_v52  ;;  %v22495_v56 = vld [vmem:[%s24873_s22 + $0x198] sm:$0xff]  }
0x2128   : > { %v20267_v21 = vpop.f32.mrf.mxu0  ;;  %v20287_v50 = vpop.f32.mrf.mxu1 }
0x2129   : > { %v22496_v21 = vld [vmem:[%s24873_s22 + $0x190] sm:$0xff]   ;;  %v22498_v50 = vld [vmem:[%s24873_s22 + $0x180] sm:$0xff]  }
0x2142   : > { %v14522_v43 = vpop.f32.mrf.mxu0 }
0x2144   : > { %v20306_v57 = vpop.f32.mrf.mxu0 }
0x2145   : > { %v22500_v57 = vld [vmem:[%s24873_s22 + $0x170] sm:$0xff]  }
0x2146   : > { %v14525_v3 = vpop.f32.mrf.mxu0 }
0x2147   : > { %v14531_v29 = vpack.c.bf16 %v14525_v3, %v14522_v43  ;;  %v22499_v43 = vld [vmem:[%s24873_s22 + $0x178] sm:$0xff]   ;;  %v22501_v3 = vld [vmem:[%s24873_s22 + $0x168] sm:$0xff]  }
0x2148   : > { %v20307_v47 = vpop.f32.mrf.mxu0 }
0x2149   : > { %20308 = vmatprep.subr.bf16.mxu1 %v14531_v29  ;;  %v22503_v47 = vld [vmem:[%s24873_s22 + $0x1d8] sm:$0xff]  }
0x214a   : > { %20309 = vmatpush3.bf16.msra.mxu1 %v14531_v29  ;;  %v22502_v29 = vld [vmem:[%s24873_s22 + $0x160] sm:$0xff]  }
0x214b   : > { %20310 = vmatprep.subr.bf16.mxu1 %v14530_v44 }
0x214e   : > { %20311 = vmatpush3.bf16.msra.mxu1 %v14530_v44  ;;  %v22504_v44 = vld [vmem:[%s24873_s22 + $0x218] sm:$0xff]  }
0x214f   : > { %20312 = vmatprep.subr.bf16.mxu1 %v14529_v58 }
0x2152   : > { %20313 = vmatpush3.bf16.msra.mxu1 %v14529_v58  ;;  %v22505_v58 = vld [vmem:[%s24873_s22 + $0x1d0] sm:$0xff]  }
0x2153   : > { %20318 = vmatprep.subr.bf16.mxu1 %v22747_v2 }
0x2155   : > { %20315 = vmatmul.mubr.msk.bf16.vlgmr.msra.gmra.mxu1 %vm1413_vm5, %v24449_v60 }
0x2156   : > { %20319 = vmatpush3.bf16.msra.mxu1 %v22471_v59  ;;  %20334 = vmatprep.mubr.msk.bf16.mxu1 %vm22748_vm0, %v22747_v2  ;;  %v22506_v59 = vld [vmem:[%s24873_s22 + $0x210] sm:$0xff]  }
0x2157   : > { %20320 = vmatprep.subr.bf16.mxu1 %v22747_v2 }
0x215a   : > { %20321 = vmatpush3.bf16.msra.mxu1 %v22472_v12  ;;  %v22508_v12 = vld [vmem:[%s24873_s22 + $0x208] sm:$0xff]  }
0x215b   : > { %20322 = vmatprep.subr.bf16.mxu1 %v22747_v2 }
0x215e   : > { %20323 = vmatpush3.bf16.msra.mxu1 %v22473_v49  ;;  %v22509_v49 = vld [vmem:[%s24873_s22 + $0x1c0] sm:$0xff]  }
0x215f   : > { %20324 = vmatprep.subr.bf16.mxu1 %v22747_v2 }
0x2162   : > { %20325 = vmatpush3.bf16.msra.mxu1 %v22474_v28  ;;  %v22510_v28 = vld [vmem:[%s24873_s22 + $0x200] sm:$0xff]  }
0x2163   : > { %20326 = vmatprep.subr.bf16.mxu1 %v22747_v2 }
0x2166   : > { %20327 = vmatpush3.bf16.msra.mxu1 %v22475_v48 }
0x2167   : > { %20328 = vmatprep.subr.bf16.mxu1 %v22747_v2 }
0x216a   : > { %20329 = vmatpush3.bf16.msra.mxu1 %v22476_v15 }
0x216b   : > { %20330 = vmatprep.subr.bf16.mxu1 %v22747_v2 }
0x216e   : > { %20331 = vmatpush3.bf16.msra.mxu1 %v22477_v4 }
0x216f   : > { %20332 = vmatprep.subr.bf16.mxu1 %v22747_v2 }
0x2172   : > { %20333 = vmatpush3.bf16.msra.mxu1 %v22478_v5 }
0x2173   : > { %20370 = vmatprep.subr.bf16.mxu1 %v22747_v2 }
0x2175   : > { %20335 = vmatmul.mubr.bf16.vlgmr.msra.gmra.mxu1 %v24415_v18 }
0x2176   : > { %20378 = vmatprep.mubr.msk.bf16.mxu1 %vm22748_vm0, %v22747_v2  ;;  %20371 = vmatpush3.bf16.msra.mxu1 %v22489_v7 }
0x2177   : > { %20372 = vmatprep.subr.bf16.mxu1 %v22747_v2 }
0x217a   : > { %20373 = vmatpush3.bf16.msra.mxu1 %v22491_v8 }
0x217b   : > { %20374 = vmatprep.subr.bf16.mxu1 %v22747_v2 }
0x217e   : > { %20375 = vmatpush3.bf16.msra.mxu1 %v22493_v14 }
0x217f   : > { %20376 = vmatprep.subr.bf16.mxu1 %v22747_v2 }
0x2182   : > { %20377 = vmatpush3.bf16.msra.mxu1 %v22494_v38 }
0x2183   : > { %20382 = vmatprep.subr.bf16.mxu1 %v22747_v2 }
0x2215   : > { %v20316_v16 = vpop.f32.mrf.mxu1 }
0x2217   : > { %v14566_v17 = vpop.f32.mrf.mxu1 }
0x2219   : > { %v20317_v22 = vpop.f32.mrf.mxu1 }
0x221b   : > { %v14569_v46 = vpop.f32.mrf.mxu1 }
0x221c   : > { %v14581_v23 = vmax.f32 %v14566_v17, %v14569_v46  ;;  %v22511_v17 = vld [vmem:[%s24873_s22 + $0x1f8] sm:$0xff]  }
0x221e   : > { %v14582_v24 = vmax.f32 %v14581_v23, %v20316_v16  ;;  %v22515_v23 = vld [vmem:[%s24873_s22 + $0x238] sm:$0xff]  }
0x2220   : > { %v14583_v34 = vmax.f32 %v14582_v24, %v20317_v22 }
0x2222   : > { %v14722_v26 = vpack.c.bf16 %v14583_v34, %v14583_v34  ;;  %v22512_v34 = vld [vmem:[%s24873_s22 + $0x1f0] sm:$0xff]  }
0x2224   : > { %20347 = vmatmul.mubr.msk.bf16.vlgmr.msra.gmra.mxu0 %vm1209_vm4, %v14722_v26  ;;  %v22516_v26 = vld [vmem:[%s24873_s22 + $0x230] sm:$0xff]  }
0x2225   : > { %20351 = vmatpush3.bf16.msra.mxu0 %v22483_v25  ;;  %20366 = vmatprep.mubr.msk.bf16.mxu0 %vm22748_vm0, %v22747_v2 }
0x2226   : > { %20352 = vmatprep.subr.bf16.mxu0 %v22747_v2 }
0x2229   : > { %20353 = vmatpush3.bf16.msra.mxu0 %v22484_v33 }
0x222a   : > { %20354 = vmatprep.subr.bf16.mxu0 %v22747_v2 }
0x222d   : > { %20355 = vmatpush3.bf16.msra.mxu0 %v22485_v10  ;;  %v22513_v10 = vld [vmem:[%s24873_s22 + $0x1e8] sm:$0xff]  }
0x222e   : > { %20356 = vmatprep.subr.bf16.mxu0 %v22747_v2 }
0x2231   : > { %20357 = vmatpush3.bf16.msra.mxu0 %v22486_v11  ;;  %v22517_v11 = vld [vmem:[%s24873_s22 + $0x228] sm:$0xff]  }
0x2232   : > { %20358 = vmatprep.subr.bf16.mxu0 %v22747_v2 }
0x2235   : > { %20359 = vmatpush3.bf16.msra.mxu0 %v22487_v36  ;;  %v14682_v37 = vpop.f32.mrf.mxu1  ;;  %v22514_v36 = vld [vmem:[%s24873_s22 + $0x1e0] sm:$0xff]  }
0x2236   : > { %20360 = vmatprep.subr.bf16.mxu0 %v22747_v2  ;;  %v14689_v41 = vsel %vm1209_vm4, %v14682_v37, -inf  ;;  %v22518_v37 = vld [vmem:[%s24873_s22 + $0x220] sm:$0xff]  }
0x2237   : > { %v20336_v32 = vpop.f32.mrf.mxu1 }
0x2238   : > { %v18548_v32 = vld [vmem:[%s24874_s18 + $0x1] sm:$0x1] }
0x2239   : > { %20361 = vmatpush3.bf16.msra.mxu0 %v22488_v53  ;;  %v14685_v39 = vpop.f32.mrf.mxu1 }
0x223a   : > { %v14690_v42 = vsel %vm1209_vm4, %v14685_v39, -inf  ;;  %20362 = vmatprep.subr.bf16.mxu0 %v22747_v2 }
0x223b   : > { %v14691_v63 = vmax.f32 %v14689_v41, %v14690_v42  ;;  %v20337_v20 = vpop.f32.mrf.mxu1 }
0x223d   : > { %v14692_v31 = vrot.slane %v14691_v63, 4  ;;  %20363 = vmatpush3.bf16.msra.mxu0 %v22490_v30 }
0x223e   : > { %20364 = vmatprep.subr.bf16.mxu0 %v22747_v2 }
0x223f   : > { %v14693_v0 = vmax.f32 %v14691_v63, %v14692_v31  ;;  %v22519_v31 = vld [vmem:[%s24873_s22 + $0x278] sm:$0xff]  }
0x2241   : > { %v14694_v52 = vrot.slane %v14693_v0, 2  ;;  %20365 = vmatpush3.bf16.msra.mxu0 %v22492_v9 }
0x2242   : > { %20402 = vmatprep.subr.bf16.mxu0 %v22747_v2 }
0x2243   : > { %v14695_v54 = vmax.f32 %v14693_v0, %v14694_v52  ;;  %v22521_v0 = vld [vmem:[%s24873_s22 + $0x268] sm:$0xff]   ;;  %v22522_v52 = vld [vmem:[%s24873_s22 + $0x260] sm:$0xff]  }
0x2244   : > { %20367 = vmatmul.mubr.bf16.vlgmr.msra.gmra.mxu0 %v24310_v40  ;;  %v22497_v40 = vld [vmem:[%s24873_s22 + $0x188] sm:$0xff]  }
0x2245   : > { %v14696_v55 = vrot.slane %v14695_v54, 1  ;;  %20410 = vmatprep.mubr.msk.bf16.mxu0 %vm22748_vm0, %v22747_v2  ;;  %20403 = vmatpush3.bf16.msra.mxu0 %v22503_v47 }
0x2246   : > { %20404 = vmatprep.subr.bf16.mxu0 %v22747_v2 }
0x2247   : > { %v14697_v45 = vmax.f32 %v14695_v54, %v14696_v55  ;;  %v22523_v54 = vld [vmem:[%s24873_s22 + $0x258] sm:$0xff]   ;;  %v22524_v55 = vld [vmem:[%s24873_s22 + $0x250] sm:$0xff]  }
0x2249   : > { %v14911_v19 = vpack.c.bf16 %v14697_v45, %v14697_v45  ;;  %20405 = vmatpush3.bf16.msra.mxu0 %v22505_v58  ;;  %v22525_v45 = vld [vmem:[%s24873_s22 + $0x248] sm:$0xff]  }
0x224a   : > { %20406 = vmatprep.subr.bf16.mxu0 %v22747_v2 }
0x224b   : > { %20379 = vmatmul.mubr.msk.bf16.vlgmr.msra.gmra.mxu1 %vm1209_vm4, %v14911_v19 }
0x224c   : > { %20383 = vmatpush3.bf16.msra.mxu1 %v22495_v56  ;;  %20398 = vmatprep.mubr.msk.bf16.mxu1 %vm22748_vm0, %v22747_v2  ;;  %v22526_v56 = vld [vmem:[%s24873_s22 + $0x240] sm:$0xff]  }
0x224d   : > { %20384 = vmatprep.subr.bf16.mxu1 %v22747_v2 }
0x2250   : > { %20385 = vmatpush3.bf16.msra.mxu1 %v22496_v21 }
0x2251   : > { %20386 = vmatprep.subr.bf16.mxu1 %v22747_v2 }
0x2254   : > { %20387 = vmatpush3.bf16.msra.mxu1 %v22497_v40 }
0x2255   : > { %20388 = vmatprep.subr.bf16.mxu1 %v22747_v2 }
0x2258   : > { %20389 = vmatpush3.bf16.msra.mxu1 %v22498_v50 }
0x2259   : > { %20390 = vmatprep.subr.bf16.mxu1 %v22747_v2 }
0x225c   : > { %20391 = vmatpush3.bf16.msra.mxu1 %v22499_v43 }
0x225d   : > { %20392 = vmatprep.subr.bf16.mxu1 %v22747_v2 }
0x2260   : > { %20393 = vmatpush3.bf16.msra.mxu1 %v22500_v57 }
0x2261   : > { %20394 = vmatprep.subr.bf16.mxu1 %v22747_v2 }
0x2264   : > { %20395 = vmatpush3.bf16.msra.mxu1 %v22501_v3 }
0x2265   : > { %20396 = vmatprep.subr.bf16.mxu1 %v22747_v2 }
0x2268   : > { %20397 = vmatpush3.bf16.msra.mxu1 %v22502_v29 }
0x2269   : > { %20426 = vmatprep.subr.bf16.mxu1 %v22747_v2 }
0x226b   : > { %20399 = vmatmul.mubr.bf16.vlgmr.msra.gmra.mxu1 %v24359_v13  ;;  %v22507_v13 = vld [vmem:[%s24873_s22 + $0x1c8] sm:$0xff]  }
0x226c   : > { %20427 = vmatpush3.bf16.msra.mxu1 %v22504_v44  ;;  %20434 = vmatprep.mubr.msk.bf16.mxu1 %vm22748_vm0, %v22747_v2 }
0x226d   : > { %20428 = vmatprep.subr.bf16.mxu1 %v22747_v2  ;;  %20407 = vmatpush3.bf16.msra.mxu0 %v22507_v13 }
0x226e   : > { %20408 = vmatprep.subr.bf16.mxu0 %v22747_v2 }
0x2270   : > { %20429 = vmatpush3.bf16.msra.mxu1 %v22506_v59 }
0x2271   : > { %20430 = vmatprep.subr.bf16.mxu1 %v22747_v2  ;;  %20409 = vmatpush3.bf16.msra.mxu0 %v22509_v49 }
0x2272   : > { %20414 = vmatprep.subr.bf16.mxu0 %v22747_v2 }
0x2274   : > { %20431 = vmatpush3.bf16.msra.mxu1 %v22508_v12  ;;  %v22527_v12 = vld [vmem:[%s24873_s22 + $0x298] sm:$0xff]  }
0x2275   : > { %20432 = vmatprep.subr.bf16.mxu1 %v22747_v2 }
0x2278   : > { %20433 = vmatpush3.bf16.msra.mxu1 %v22510_v28  ;;  %v22528_v28 = vld [vmem:[%s24873_s22 + $0x290] sm:$0xff]  }
0x2279   : > { %20446 = vmatprep.subr.bf16.mxu1 %v22747_v2 }
0x22e4   : > { %v14784_v48 = vpop.f32.mrf.mxu0 }
0x22e6   : > { %v20348_v15 = vpop.f32.mrf.mxu0 }
0x22e8   : > { %v14787_v4 = vpop.f32.mrf.mxu0 }
0x22ea   : > { %v20349_v5 = vpop.f32.mrf.mxu0 }
0x2304   : > { %v14872_v6 = vpop.f32.mrf.mxu0 }
0x2305   : > { %v14873_v1 = vadd.f32 %v14872_v6, %v14784_v48 }
0x2306   : > { %v20368_v7 = vpop.f32.mrf.mxu0 }
0x2307   : > { %v14885_v8 = vadd.f32 %v18534_v51, %v14873_v1  ;;  %v22529_v7 = vld [vmem:[%s24873_s22 + $0x288] sm:$0xff]  }
0x2308   : > { %v14875_v14 = vpop.f32.mrf.mxu0 }
0x2309   : > { %v14886_v38 = vmax.f32 %v14885_v8, 0.0  ;;  %v22530_v8 = vld [vmem:[%s24873_s22 + $0x280] sm:$0xff]  }
0x230a   : > { %v20369_v16 = vpop.f32.mrf.mxu0 }
0x230b   : > { %v24551_v22 = vpack.c.bf16 %v14886_v38, %v14886_v38  ;;  %v14973_v46 = vpop.f32.mrf.mxu1 }
0x230d   : > { %20411 = vmatmul.mubr.msk.bf16.vlgmr.msra.gmra.mxu0 %vm1209_vm4, %v24551_v22  ;;  %20435 = vmatmul.mubr.msk.bf16.vlgmr.msra.gmra.mxu1 %vm1209_vm4, %v24551_v22  ;;  %v20380_v24 = vpop.f32.mrf.mxu1 }
0x230e   : > { %20415 = vmatpush3.bf16.msra.mxu0 %v22511_v17  ;;  %20422 = vmatprep.mubr.msk.bf16.mxu0 %vm22748_vm0, %v22747_v2  ;;  %v22531_v24 = vld [vmem:[%s24873_s22 + $0x2b8] sm:$0xff]  }
0x230f   : > { %v14976_v25 = vpop.f32.mrf.mxu1  ;;  %20416 = vmatprep.subr.bf16.mxu0 %v22747_v2  ;;  %20447 = vmatpush3.bf16.msra.mxu1 %v22515_v23 }
0x2310   : > { %20448 = vmatprep.subr.bf16.mxu1 %v22747_v2  ;;  %20454 = vmatprep.mubr.msk.bf16.mxu1 %vm22748_vm0, %v22747_v2  ;;  %v22532_v25 = vld [vmem:[%s24873_s22 + $0x2b0] sm:$0xff]  }
0x2311   : > { %v20381_v33 = vpop.f32.mrf.mxu1 }
0x2312   : > { %20417 = vmatpush3.bf16.msra.mxu0 %v22512_v34  ;;  %v22534_v33 = vld [vmem:[%s24873_s22 + $0x2a0] sm:$0xff]  }
0x2313   : > { %20418 = vmatprep.subr.bf16.mxu0 %v22747_v2  ;;  %20449 = vmatpush3.bf16.msra.mxu1 %v22516_v26  ;;  %v22533_v26 = vld [vmem:[%s24873_s22 + $0x2a8] sm:$0xff]  }
0x2314   : > { %20450 = vmatprep.subr.bf16.mxu1 %v22747_v2 }
0x2316   : > { %20419 = vmatpush3.bf16.msra.mxu0 %v22513_v10 }
0x2317   : > { %20420 = vmatprep.subr.bf16.mxu0 %v22747_v2  ;;  %20451 = vmatpush3.bf16.msra.mxu1 %v22517_v11  ;;  %v22535_v11 = vld [vmem:[%s24875_s0 + $0x18] sm:$0xff]  }
0x2318   : > { %20452 = vmatprep.subr.bf16.mxu1 %v22747_v2 }
0x231a   : > { %20421 = vmatpush3.bf16.msra.mxu0 %v22514_v36  ;;  %v22536_v36 = vld [vmem:[%s24875_s0 + $0x38] sm:$0xff]  }
0x231b   : > { %20453 = vmatpush3.bf16.msra.mxu1 %v22518_v37  ;;  %v22537_v37 = vld [vmem:[%s24875_s0 + $0x10] sm:$0xff]  }
0x231c   : > { %20470 = vmatprep.subr.bf16.mxu1 %v22747_v2 }
0x231d   : > { %20423 = vmatmul.mubr.msk.bf16.vlgmr.msra.gmra.mxu0 %vm1209_vm4, %v24551_v22 }
0x231e   : > { %20442 = vmatprep.mubr.msk.bf16.mxu0 %vm2102_vm6, %v24318_v35  ;;  %v22520_v35 = vld [vmem:[%s24873_s22 + $0x270] sm:$0xff]  }
0x232b   : > { %v15061_v53 = vpop.f32.mrf.mxu1 }
0x232c   : > { %v15062_v39 = vadd.f32 %v15061_v53, %v14973_v46  ;;  %v22538_v53 = vld [vmem:[%s24875_s0 + $0x30] sm:$0xff]  }
0x232d   : > { %v20400_v30 = vpop.f32.mrf.mxu1 }
0x232e   : > { %v15069_v41 = vadd.f32 %v18548_v32, %v15062_v39  ;;  %v22539_v32 = vld [vmem:[%s24875_s0 + $0x8] sm:$0xff]   ;;  %v22541_v30 = vld [vmem:[%s24875_s0] sm:$0xff]  }
0x232f   : > { %v15064_v42 = vpop.f32.mrf.mxu1  ;;  %v22540_v39 = vld [vmem:[%s24875_s0 + $0x28] sm:$0xff]  }
0x2330   : > { %v15070_v63 = vmax.f32 %v15069_v41, 0.0  ;;  %v22542_v41 = vld [vmem:[%s24875_s0 + $0x20] sm:$0xff]  }
0x2331   : > { %v20401_v20 = vpop.f32.mrf.mxu1 }
0x2332   : > { %v24581_v9 = vpack.c.bf16 %v15070_v63, %v15070_v63 }
0x2334   : > { %20455 = vmatmul.mubr.msk.bf16.vlgmr.msra.gmra.mxu1 %vm1209_vm4, %v24581_v9 }
0x2335   : > { %20471 = vmatpush3.bf16.msra.mxu1 %v22519_v31  ;;  %20486 = vmatprep.mubr.msk.bf16.mxu1 %vm22748_vm0, %v22747_v2 }
0x2336   : > { %20472 = vmatprep.subr.bf16.mxu1 %v22747_v2 }
0x2339   : > { %20473 = vmatpush3.bf16.msra.mxu1 %v22520_v35 }
0x233a   : > { %20474 = vmatprep.subr.bf16.mxu1 %v22747_v2 }
0x233d   : > { %20475 = vmatpush3.bf16.msra.mxu1 %v22521_v0 }
0x233e   : > { %20476 = vmatprep.subr.bf16.mxu1 %v22747_v2 }
0x2341   : > { %20477 = vmatpush3.bf16.msra.mxu1 %v22522_v52 }
0x2342   : > { %20478 = vmatprep.subr.bf16.mxu1 %v22747_v2 }
0x2345   : > { %20479 = vmatpush3.bf16.msra.mxu1 %v22523_v54 }
0x2346   : > { %20480 = vmatprep.subr.bf16.mxu1 %v22747_v2 }
0x2349   : > { %20481 = vmatpush3.bf16.msra.mxu1 %v22524_v55  ;;  %v18590_v55 = vld [vmem:[%s24874_s18 + $0x2] ss:$0 sm:$0xff] }
0x234a   : > { %20482 = vmatprep.subr.bf16.mxu1 %v22747_v2 }
0x234d   : > { %20483 = vmatpush3.bf16.msra.mxu1 %v22525_v45 }
0x234e   : > { %20484 = vmatprep.subr.bf16.mxu1 %v22747_v2 }
0x2351   : > { %20485 = vmatpush3.bf16.msra.mxu1 %v22526_v56 }
0x2352   : > { %20514 = vmatprep.subr.bf16.mxu1 %v22747_v2 }
0x2354   : > { %20487 = vmatmul.mubr.bf16.vlgmr.msra.gmra.mxu1 %v24415_v18 }
0x2355   : > { %20522 = vmatprep.mubr.msk.bf16.mxu1 %vm22748_vm0, %v22747_v2  ;;  %20515 = vmatpush3.bf16.msra.mxu1 %v22536_v36 }
0x2356   : > { %20516 = vmatprep.subr.bf16.mxu1 %v22747_v2 }
0x2359   : > { %20517 = vmatpush3.bf16.msra.mxu1 %v22538_v53 }
0x235a   : > { %20518 = vmatprep.subr.bf16.mxu1 %v22747_v2 }
0x235d   : > { %20519 = vmatpush3.bf16.msra.mxu1 %v22540_v39 }
0x235e   : > { %20520 = vmatprep.subr.bf16.mxu1 %v22747_v2 }
0x2361   : > { %20521 = vmatpush3.bf16.msra.mxu1 %v22542_v41 }
0x23cd   : > { %v15142_v19 = vpop.f32.mrf.mxu0  ;;  %v15286_v21 = vpop.f32.mrf.mxu1 }
0x23ce   : > { %v15293_v40 = vpack.c.bf16 %v15286_v21, %v15286_v21 }
0x23cf   : > { %v20412_v50 = vpop.f32.mrf.mxu0  ;;  %v20436_v43 = vpop.f32.mrf.mxu1 }
0x23d0   : > { %v15295_v57 = vsel %vm2109_vm7, %v15293_v40, 0  ;;  %20704 = vmatprep.subr.msk.bf16.mxu0 %vm2109_vm7, %v15293_v40 }
0x23d1   : > { %v15145_v3 = vpop.f32.mrf.mxu0  ;;  %v15289_v29 = vpop.f32.mrf.mxu1  ;;  %20439 = vmatpush3.bf16.msra.mxu0 %v15295_v57 }
0x23d2   : > { %v22543_v29 = vld [vmem:[%s24875_s0 + $0x58] sm:$0xff]  }
0x23d3   : > { %v20413_v47 = vpop.f32.mrf.mxu0  ;;  %v20437_v44 = vpop.f32.mrf.mxu1 }
0x23d4   : > { %v22544_v44 = vld [vmem:[%s24875_s0 + $0x50] sm:$0xff]  }
0x23dd   : > { %v15214_v18 = vpop.f32.mrf.mxu0 }
0x23de   : > { %v15292_v58 = vpack.c.bf16 %v15214_v18, %v15142_v19  ;;  %v22545_v18 = vld [vmem:[%s24875_s0 + $0x48] sm:$0xff]  }
0x23df   : > { %v20424_v59 = vpop.f32.mrf.mxu0 }
0x23e0   : > { %20440 = vmatprep.subr.bf16.mxu0 %v15292_v58  ;;  %v22547_v59 = vld [vmem:[%s24875_s0 + $0x78] sm:$0xff]  }
0x23e1   : > { %v15217_v13 = vpop.f32.mrf.mxu0  ;;  %20441 = vmatpush3.bf16.msra.mxu0 %v15292_v58  ;;  %v22546_v58 = vld [vmem:[%s24875_s0 + $0x40] sm:$0xff]  }
0x23e2   : > { %20458 = vmatprep.subr.bf16.mxu0 %v22747_v2  ;;  %v22549_v13 = vld [vmem:[%s24875_s0 + $0x68] sm:$0xff]  }
0x23e3   : > { %v20425_v49 = vpop.f32.mrf.mxu0 }
0x23e4   : > { %20443 = vmatmul.mubr.msk.bf16.vlgmr.msra.gmra.mxu0 %vm2102_vm6, %v24344_v62  ;;  %v22551_v49 = vld [vmem:[%s24875_s0 + $0x98] sm:$0xff]  }
0x23e5   : > { %20459 = vmatpush3.bf16.msra.mxu0 %v22527_v12  ;;  %20466 = vmatprep.mubr.msk.bf16.mxu0 %vm22748_vm0, %v22747_v2  ;;  %v22550_v12 = vld [vmem:[%s24875_s0 + $0x60] sm:$0xff]  }
0x23e6   : > { %20460 = vmatprep.subr.bf16.mxu0 %v22747_v2 }
0x23e9   : > { %20461 = vmatpush3.bf16.msra.mxu0 %v22528_v28  ;;  %v22552_v28 = vld [vmem:[%s24875_s0 + $0x90] sm:$0xff]  }
0x23ea   : > { %20462 = vmatprep.subr.bf16.mxu0 %v22747_v2 }
0x23ed   : > { %20463 = vmatpush3.bf16.msra.mxu0 %v22529_v7 }
0x23ee   : > { %20464 = vmatprep.subr.bf16.mxu0 %v22747_v2 }
0x23f1   : > { %20465 = vmatpush3.bf16.msra.mxu0 %v22530_v8 }
0x23f2   : > { %20490 = vmatprep.subr.bf16.mxu0 %v22747_v2 }
0x23f4   : > { %v15417_v48 = vpop.f32.mrf.mxu1 }
0x23f5   : > { %v15613_v10 = vpack.c.bf16 %v15417_v48, %v15417_v48  ;;  %v22553_v48 = vld [vmem:[%s24875_s0 + $0x88] sm:$0xff]  }
0x23f6   : > { %v20456_v15 = vpop.f32.mrf.mxu1 }
0x23f7   : > { %v22554_v15 = vld [vmem:[%s24875_s0 + $0x80] sm:$0xff]  }
0x23f8   : > { %v15420_v4 = vpop.f32.mrf.mxu1 }
0x23f9   : > { %v22555_v4 = vld [vmem:[%s24875_s0 + $0xd8] sm:$0xff]  }
0x23fa   : > { %v20457_v5 = vpop.f32.mrf.mxu1 }
0x23fb   : > { %v22556_v5 = vld [vmem:[%s24875_s0 + $0xd0] sm:$0xff]  }
0x2414   : > { %v15598_v6 = vpop.f32.mrf.mxu1 }
0x2416   : > { %v20488_v51 = vpop.f32.mrf.mxu1 }
0x2417   : > { %v22558_v51 = vld [vmem:[%s24875_s0 + $0xc0] sm:$0xff]  }
0x2418   : > { %v15601_v1 = vpop.f32.mrf.mxu1 }
0x241a   : > { %v20489_v62 = vpop.f32.mrf.mxu1 }
0x24a4   : > { %v20444_v14 = vpop.f32.mrf.mxu0 }
0x24a6   : > { %v15331_v38 = vpop.f32.mrf.mxu0 }
0x24a7   : > { %v15346_v46 = vmax.f32 %v15331_v38, %v20444_v14 }
0x24a8   : > { %v20445_v16 = vpop.f32.mrf.mxu0 }
0x24aa   : > { %v15334_v17 = vpop.f32.mrf.mxu0 }
0x24ab   : > { %v15347_v23 = vmax.f32 %v15334_v17, %v20445_v16 }
0x24ad   : > { %v15447_v34 = vpack.c.bf16 %v15347_v23, %v15346_v46 }
0x24af   : > { %20467 = vmatmul.mubr.msk.bf16.vlgmr.msra.gmra.mxu0 %vm1209_vm4, %v15447_v34 }
0x24b0   : > { %20491 = vmatpush3.bf16.msra.mxu0 %v22531_v24  ;;  %20498 = vmatprep.mubr.msk.bf16.mxu0 %vm22748_vm0, %v22747_v2 }
0x24b1   : > { %20492 = vmatprep.subr.bf16.mxu0 %v22747_v2 }
0x24b4   : > { %20493 = vmatpush3.bf16.msra.mxu0 %v22532_v25 }
0x24b5   : > { %20494 = vmatprep.subr.bf16.mxu0 %v22747_v2 }
0x24b8   : > { %20495 = vmatpush3.bf16.msra.mxu0 %v22533_v26 }
0x24b9   : > { %20496 = vmatprep.subr.bf16.mxu0 %v22747_v2 }
0x24bc   : > { %20497 = vmatpush3.bf16.msra.mxu0 %v22534_v33  ;;  %v22559_v33 = vld [vmem:[%s24875_s0 + $0xb8] sm:$0xff]  }
0x24bd   : > { %20502 = vmatprep.subr.bf16.mxu0 %v22747_v2 }
0x24bf   : > { %20499 = vmatmul.mubr.msk.bf16.vlgmr.msra.gmra.mxu0 %vm1209_vm4, %v15613_v10 }
0x24c0   : > { %20510 = vmatprep.mubr.msk.bf16.mxu0 %vm22748_vm0, %v22747_v2  ;;  %20503 = vmatpush3.bf16.msra.mxu0 %v22535_v11 }
0x24c1   : > { %20504 = vmatprep.subr.bf16.mxu0 %v22747_v2 }
0x24c4   : > { %20505 = vmatpush3.bf16.msra.mxu0 %v22537_v37 }
0x24c5   : > { %20506 = vmatprep.subr.bf16.mxu0 %v22747_v2 }
0x24c8   : > { %20507 = vmatpush3.bf16.msra.mxu0 %v22539_v32 }
0x24c9   : > { %20508 = vmatprep.subr.bf16.mxu0 %v22747_v2 }
0x24cc   : > { %20509 = vmatpush3.bf16.msra.mxu0 %v22541_v30 }
0x24cd   : > { %20526 = vmatprep.subr.bf16.mxu0 %v22747_v2 }
0x256f   : > { %v15509_v42 = vpop.f32.mrf.mxu0 }
0x2570   : > { %v15599_v0 = vadd.f32 %v15598_v6, %v15509_v42  ;;  %v22557_v6 = vld [vmem:[%s24875_s0 + $0xc8] sm:$0xff]  }
0x2571   : > { %v20468_v63 = vpop.f32.mrf.mxu0 }
0x2573   : > { %v15512_v20 = vpop.f32.mrf.mxu0 }
0x2574   : > { %v15602_v52 = vadd.f32 %v15601_v1, %v15512_v20 }
0x2575   : > { %v20469_v31 = vpop.f32.mrf.mxu0 }
0x257f   : > { %v15675_v35 = vpop.f32.mrf.mxu0 }
0x2580   : > { %v15684_v54 = vrot.slane %v15675_v35, %v23231_v27  ;;  %v22560_v35 = vld [vmem:[%s24875_s0 + $0xb0] sm:$0xff]  }
0x2581   : > { %v20500_v45 = vpop.f32.mrf.mxu0 }
0x2582   : > { %v15685_v56 = vadd.f32 %v15684_v54, %v15599_v0  ;;  %v15686_v19 = vadd.f32 %v15684_v54, %v15602_v52  ;;  %v22561_v0 = vld [vmem:[%s24875_s0 + $0xa8] sm:$0xff]   ;;  %v22562_v52 = vld [vmem:[%s24875_s0 + $0xa0] sm:$0xff]   ;;  %v22568_v54 = vld [vmem:[%s24875_s0 + $0x138] sm:$0xff]  }
0x2583   : > { %v15678_v21 = vpop.f32.mrf.mxu0 }
0x2584   : > { %v15695_v40 = vadd.f32 %v18590_v55, %v15685_v56  ;;  %v15696_v50 = vadd.f32 %v18590_v55, %v15686_v19  ;;  %v22570_v55 = vld [vmem:[%s24875_s0 + $0x130] sm:$0xff]  }
0x2585   : > { %v20501_v43 = vpop.f32.mrf.mxu0 }
0x2586   : > { %v15697_v57 = vmax.f32 %v15695_v40, 0.0  ;;  %v15698_v3 = vmax.f32 %v15696_v50, 0.0 }
0x2588   : > { %v24652_v47 = vpack.c.bf16 %v15698_v3, %v15697_v57 }
0x258a   : > { %20511 = vmatmul.mubr.msk.bf16.vlgmr.msra.gmra.mxu0 %vm1209_vm4, %v24652_v47  ;;  %20523 = vmatmul.mubr.msk.bf16.vlgmr.msra.gmra.mxu1 %vm1209_vm4, %v24652_v47 }
0x258b   : > { %20527 = vmatpush3.bf16.msra.mxu0 %v22543_v29  ;;  %20534 = vmatprep.mubr.msk.bf16.mxu0 %vm22748_vm0, %v22747_v2  ;;  %v22563_v29 = vld [vmem:[%s24875_s0 + $0xf8] sm:$0xff]  }
0x258c   : > { %20528 = vmatprep.subr.bf16.mxu0 %v22747_v2  ;;  %20544 = vmatprep.mubr.msk.bf16.mxu1 %vm1413_vm5, %v24424_v61  ;;  %v22548_v61 = vld [vmem:[%s24875_s0 + $0x70] sm:$0xff]  }
0x258f   : > { %20529 = vmatpush3.bf16.msra.mxu0 %v22544_v44 }
0x2590   : > { %20530 = vmatprep.subr.bf16.mxu0 %v22747_v2 }
0x2593   : > { %20531 = vmatpush3.bf16.msra.mxu0 %v22545_v18 }
0x2594   : > { %20532 = vmatprep.subr.bf16.mxu0 %v22747_v2 }
0x2597   : > { %20533 = vmatpush3.bf16.msra.mxu0 %v22546_v58  ;;  %v22564_v58 = vld [vmem:[%s24875_s0 + $0xf0] sm:$0xff]  }
0x2598   : > { %20548 = vmatprep.subr.bf16.mxu0 %v22747_v2 }
0x259a   : > { %20535 = vmatmul.mubr.msk.bf16.vlgmr.msra.gmra.mxu0 %vm1209_vm4, %v24652_v47 }
0x259b   : > { %20549 = vmatpush3.bf16.msra.mxu0 %v22547_v59  ;;  %20556 = vmatprep.mubr.msk.bf16.mxu0 %vm22748_vm0, %v22747_v2 }
0x259c   : > { %20550 = vmatprep.subr.bf16.mxu0 %v22747_v2 }
0x259f   : > { %20551 = vmatpush3.bf16.msra.mxu0 %v22548_v61  ;;  %v22565_v61 = vld [vmem:[%s24875_s0 + $0xe8] sm:$0xff]  }
0x25a0   : > { %20552 = vmatprep.subr.bf16.mxu0 %v22747_v2 }
0x25a3   : > { %20553 = vmatpush3.bf16.msra.mxu0 %v22549_v13 }
0x25a4   : > { %20554 = vmatprep.subr.bf16.mxu0 %v22747_v2 }
0x25a7   : > { %20555 = vmatpush3.bf16.msra.mxu0 %v22550_v12  ;;  %v22566_v12 = vld [vmem:[%s24875_s0 + $0xe0] sm:$0xff]  }
0x25a8   : > { %20572 = vmatprep.subr.bf16.mxu0 %v22747_v2 }
0x25aa   : > { %20557 = vmatmul.mubr.msk.bf16.vlgmr.msra.gmra.mxu0 %vm1209_vm4, %v24652_v47 }
0x25ab   : > { %20573 = vmatpush3.bf16.msra.mxu0 %v22551_v49  ;;  %20580 = vmatprep.mubr.msk.bf16.mxu0 %vm22748_vm0, %v22747_v2 }
0x25ac   : > { %20574 = vmatprep.subr.bf16.mxu0 %v22747_v2 }
0x25af   : > { %20575 = vmatpush3.bf16.msra.mxu0 %v22552_v28  ;;  %v22567_v28 = vld [vmem:[%s24875_s0 + $0x118] sm:$0xff]  }
0x25b0   : > { %20576 = vmatprep.subr.bf16.mxu0 %v22747_v2 }
0x25b3   : > { %20577 = vmatpush3.bf16.msra.mxu0 %v22553_v48 }
0x25b4   : > { %20578 = vmatprep.subr.bf16.mxu0 %v22747_v2 }
0x25b7   : > { %20579 = vmatpush3.bf16.msra.mxu0 %v22554_v15  ;;  %v22569_v15 = vld [vmem:[%s24875_s0 + $0x110] sm:$0xff]  }
0x25b8   : > { %20596 = vmatprep.subr.bf16.mxu0 %v22747_v2 }
0x25ba   : > { %20581 = vmatmul.mubr.msk.bf16.vlgmr.msra.gmra.mxu0 %vm1209_vm4, %v24551_v22 }
0x25bb   : > { %20597 = vmatpush3.bf16.msra.mxu0 %v22555_v4  ;;  %20604 = vmatprep.mubr.msk.bf16.mxu0 %vm22748_vm0, %v22747_v2  ;;  %v22571_v4 = vld [vmem:[%s24875_s0 + $0x108] sm:$0xff]  }
0x25bc   : > { %20598 = vmatprep.subr.bf16.mxu0 %v22747_v2 }
0x25bf   : > { %20599 = vmatpush3.bf16.msra.mxu0 %v22556_v5  ;;  %v22572_v5 = vld [vmem:[%s24875_s0 + $0x128] sm:$0xff]  }
0x25c0   : > { %20600 = vmatprep.subr.bf16.mxu0 %v22747_v2 }
0x25c3   : > { %20601 = vmatpush3.bf16.msra.mxu0 %v22557_v6  ;;  %v22573_v6 = vld [vmem:[%s24875_s0 + $0x100] sm:$0xff]  }
0x25c4   : > { %20602 = vmatprep.subr.bf16.mxu0 %v22747_v2 }
0x25c7   : > { %20603 = vmatpush3.bf16.msra.mxu0 %v22558_v51  ;;  %v22574_v51 = vld [vmem:[%s24875_s0 + $0x120] sm:$0xff]  }
0x25c8   : > { %20620 = vmatprep.subr.bf16.mxu0 %v22747_v2 }
0x25ca   : > { %20605 = vmatmul.mubr.msk.bf16.vlgmr.msra.gmra.mxu0 %vm1209_vm4, %v24581_v9 }
0x25cb   : > { %20628 = vmatprep.mubr.msk.bf16.mxu0 %vm22748_vm0, %v22747_v2  ;;  %20621 = vmatpush3.bf16.msra.mxu0 %v22568_v54 }
0x25cc   : > { %20622 = vmatprep.subr.bf16.mxu0 %v22747_v2 }
0x25cf   : > { %20623 = vmatpush3.bf16.msra.mxu0 %v22570_v55 }
0x25d0   : > { %20624 = vmatprep.subr.bf16.mxu0 %v22747_v2 }
0x25d3   : > { %20625 = vmatpush3.bf16.msra.mxu0 %v22572_v5 }
0x25d4   : > { %20626 = vmatprep.subr.bf16.mxu0 %v22747_v2 }
0x25d7   : > { %20627 = vmatpush3.bf16.msra.mxu0 %v22574_v51  ;;  %v22593_v51 = vld [vmem:[%s24875_s0 + $0x1c8] sm:$0xff]  }
0x264a   : > { %v15769_v22 = vpop.f32.mrf.mxu0  ;;  %v15842_v1 = vpop.f32.mrf.mxu1 }
0x264c   : > { %v20512_v62 = vpop.f32.mrf.mxu0  ;;  %v20524_v7 = vpop.f32.mrf.mxu1 }
0x264e   : > { %v15772_v8 = vpop.f32.mrf.mxu0  ;;  %v15845_v14 = vpop.f32.mrf.mxu1 }
0x264f   : > { %v15923_v25 = vpack.c.bf16 %v15845_v14, %v15842_v1  ;;  %v15922_v9 = vpack.c.bf16 %v15772_v8, %v15769_v22  ;;  %v18623_v1 = vld [vmem:[%s22887_s12] ss:$0 sm:$0xff] }
0x2650   : > { %v20513_v38 = vpop.f32.mrf.mxu0  ;;  %v20525_v16 = vpop.f32.mrf.mxu1 }
0x265a   : > { %v15915_v17 = vpop.f32.mrf.mxu0 }
0x265c   : > { %v20536_v46 = vpop.f32.mrf.mxu0 }
0x265e   : > { %v15918_v23 = vpop.f32.mrf.mxu0 }
0x265f   : > { %v15924_v24 = vpack.c.bf16 %v15918_v23, %v15915_v17  ;;  %v22575_v17 = vld [vmem:[%s24875_s0 + $0x158] sm:$0xff]   ;;  %v22576_v23 = vld [vmem:[%s24875_s0 + $0x150] sm:$0xff]  }
0x2660   : > { %v20537_v34 = vpop.f32.mrf.mxu0 }
0x2661   : > { %20538 = vmatprep.subr.bf16.mxu1 %v15924_v24  ;;  %v22577_v34 = vld [vmem:[%s24875_s0 + $0x148] sm:$0xff]  }
0x2662   : > { %20539 = vmatpush3.bf16.msra.mxu1 %v15924_v24  ;;  %v22613_v24 = vld [vmem:[%s22985_s23] sm:$0xff]  }
0x2663   : > { %20540 = vmatprep.subr.bf16.mxu1 %v15923_v25 }
0x2666   : > { %20541 = vmatpush3.bf16.msra.mxu1 %v15923_v25 }
0x2667   : > { %20542 = vmatprep.subr.bf16.mxu1 %v15922_v9 }
0x266a   : > { %20543 = vmatpush3.bf16.msra.mxu1 %v15922_v9  ;;  %v16043_v26 = vpop.f32.mrf.mxu0 }
0x266b   : > { %20560 = vmatprep.subr.bf16.mxu1 %v22747_v2  ;;  %v16050_v36 = vsel %vm1209_vm4, %v16043_v26, -inf  ;;  %v22578_v26 = vld [vmem:[%s24875_s0 + $0x140] sm:$0xff]  }
0x266c   : > { %v20558_v10 = vpop.f32.mrf.mxu0 }
0x266d   : > { %20545 = vmatmul.mubr.msk.bf16.vlgmr.msra.gmra.mxu1 %vm1413_vm5, %v24449_v60 }
0x266e   : > { %v16046_v11 = vpop.f32.mrf.mxu0  ;;  %20561 = vmatpush3.bf16.msra.mxu1 %v22559_v33  ;;  %20568 = vmatprep.mubr.msk.bf16.mxu1 %vm22748_vm0, %v22747_v2 }
0x266f   : > { %v16051_v37 = vsel %vm1209_vm4, %v16046_v11, -inf  ;;  %20562 = vmatprep.subr.bf16.mxu1 %v22747_v2  ;;  %v22587_v11 = vld [vmem:[%s24875_s0 + $0x1b8] sm:$0xff]  }
0x2670   : > { %v16052_v53 = vmax.f32 %v16050_v36, %v16051_v37  ;;  %v20559_v32 = vpop.f32.mrf.mxu0  ;;  %v22588_v36 = vld [vmem:[%s24875_s0 + $0x1b0] sm:$0xff]  }
0x2672   : > { %20563 = vmatpush3.bf16.msra.mxu1 %v22560_v35  ;;  %v16053_v21 = vrot.slane %v16052_v53, 4 }
0x2673   : > { %20564 = vmatprep.subr.bf16.mxu1 %v22747_v2 }
0x2674   : > { %v16054_v43 = vmax.f32 %v16052_v53, %v16053_v21 }
0x2676   : > { %20565 = vmatpush3.bf16.msra.mxu1 %v22561_v0  ;;  %v16055_v44 = vrot.slane %v16054_v43, 2 }
0x2677   : > { %20566 = vmatprep.subr.bf16.mxu1 %v22747_v2 }
0x2678   : > { %v16056_v59 = vmax.f32 %v16054_v43, %v16055_v44  ;;  %v22584_v44 = vld [vmem:[%s24875_s0 + $0x190] sm:$0xff]  }
0x267a   : > { %v24718_v39 = vpop.f32.mrf.mxu0  ;;  %20567 = vmatpush3.bf16.msra.mxu1 %v22562_v52  ;;  %v16057_v13 = vrot.slane %v16056_v59, 1 }
0x267b   : > { %20584 = vmatprep.subr.bf16.mxu1 %v22747_v2 }
0x267c   : > { %v20582_v30 = vpop.f32.mrf.mxu0  ;;  %v16058_v49 = vmax.f32 %v16056_v59, %v16057_v13  ;;  %v22589_v59 = vld [vmem:[%s24875_s0 + $0x1a8] sm:$0xff]  }
0x267e   : > { %v16204_v60 = vpop.f32.mrf.mxu0  ;;  %v16232_v48 = vpack.c.bf16 %v16058_v49, %v16058_v49 }
0x2680   : > { %v20583_v41 = vpop.f32.mrf.mxu0 }
0x268a   : > { %v24720_v42 = vpop.f32.mrf.mxu0 }
0x268c   : > { %v20606_v63 = vpop.f32.mrf.mxu0 }
0x268e   : > { %v16361_v20 = vpop.f32.mrf.mxu0 }
0x2690   : > { %v20607_v31 = vpop.f32.mrf.mxu0 }
0x272d   : > { %v20546_v45 = vpop.f32.mrf.mxu1 }
0x272f   : > { %v15959_v56 = vpop.f32.mrf.mxu1 }
0x2731   : > { %v20547_v19 = vpop.f32.mrf.mxu1 }
0x2733   : > { %v15962_v40 = vpop.f32.mrf.mxu1 }
0x2734   : > { %v15974_v50 = vmax.f32 %v15959_v56, %v15962_v40  ;;  %v22614_v56 = vld [vmem:[%s22985_s23 + $0x8] sm:$0xff]   ;;  %v18634_v40 = vld [vmem:[%s22887_s12 + $0x1] sm:$0x1]  ;;  %s24876_s23 = sshll.u32 %s24878_s15, 3 }
0x2736   : > { %v15975_v57 = vmax.f32 %v15974_v50, %v20546_v45  ;;  %v22579_v45 = vld [vmem:[%s24875_s0 + $0x178] sm:$0xff]   ;;  %v22581_v50 = vld [vmem:[%s24875_s0 + $0x168] sm:$0xff]  }
0x2738   : > { %v15976_v3 = vmax.f32 %v15975_v57, %v20547_v19  ;;  %v22580_v19 = vld [vmem:[%s24875_s0 + $0x170] sm:$0xff]   ;;  %v22582_v57 = vld [vmem:[%s24875_s0 + $0x160] sm:$0xff]  }
0x273a   : > { %v16075_v18 = vpack.c.bf16 %v15976_v3, %v15976_v3 }
0x273c   : > { %20569 = vmatmul.mubr.msk.bf16.vlgmr.msra.gmra.mxu1 %vm1209_vm4, %v16075_v18  ;;  %v22585_v18 = vld [vmem:[%s24875_s0 + $0x188] sm:$0xff]  }
0x273d   : > { %20585 = vmatpush3.bf16.msra.mxu1 %v22563_v29  ;;  %20592 = vmatprep.mubr.msk.bf16.mxu1 %vm22748_vm0, %v22747_v2  ;;  %v22583_v29 = vld [vmem:[%s24875_s0 + $0x198] sm:$0xff]  }
0x273e   : > { %20586 = vmatprep.subr.bf16.mxu1 %v22747_v2 }
0x2741   : > { %20587 = vmatpush3.bf16.msra.mxu1 %v22564_v58  ;;  %v22586_v58 = vld [vmem:[%s24875_s0 + $0x180] sm:$0xff]  }
0x2742   : > { %20588 = vmatprep.subr.bf16.mxu1 %v22747_v2 }
0x2745   : > { %20589 = vmatpush3.bf16.msra.mxu1 %v22565_v61  ;;  %v22590_v61 = vld [vmem:[%s24875_s0 + $0x1a0] sm:$0xff]  }
0x2746   : > { %20590 = vmatprep.subr.bf16.mxu1 %v22747_v2 }
0x2749   : > { %20591 = vmatpush3.bf16.msra.mxu1 %v22566_v12 }
0x274a   : > { %20608 = vmatprep.subr.bf16.mxu1 %v22747_v2 }
0x274c   : > { %20593 = vmatmul.mubr.msk.bf16.vlgmr.msra.gmra.mxu1 %vm1209_vm4, %v16232_v48 }
0x274d   : > { %20609 = vmatpush3.bf16.msra.mxu1 %v22567_v28  ;;  %20616 = vmatprep.mubr.msk.bf16.mxu1 %vm22748_vm0, %v22747_v2 }
0x274e   : > { %20610 = vmatprep.subr.bf16.mxu1 %v22747_v2 }
0x2751   : > { %20611 = vmatpush3.bf16.msra.mxu1 %v22569_v15 }
0x2752   : > { %20612 = vmatprep.subr.bf16.mxu1 %v22747_v2 }
0x2755   : > { %20613 = vmatpush3.bf16.msra.mxu1 %v22571_v4  ;;  %v22591_v4 = vld [vmem:[%s24875_s0 + $0x1d8] sm:$0xff]  }
0x2756   : > { %20614 = vmatprep.subr.bf16.mxu1 %v22747_v2 }
0x2759   : > { %20615 = vmatpush3.bf16.msra.mxu1 %v22573_v6 }
0x275a   : > { %20632 = vmatprep.subr.bf16.mxu1 %v22747_v2 }
0x27fc   : > { %v16137_v22 = vpop.f32.mrf.mxu1 }
0x27fd   : > { %v16202_v62 = vadd.f32 %v24718_v39, %v16137_v22 }
0x27fe   : > { %v20570_v7 = vpop.f32.mrf.mxu1 }
0x27ff   : > { %v16214_v8 = vadd.f32 %v18623_v1, %v16202_v62  ;;  %v22594_v62 = vld [vmem:[%s24875_s0 + $0x1c0] sm:$0xff]  }
0x2800   : > { %v16140_v14 = vpop.f32.mrf.mxu1 }
0x2801   : > { %v16215_v38 = vmax.f32 %v16214_v8, 0.0 }
0x2802   : > { %v20571_v16 = vpop.f32.mrf.mxu1 }
0x2803   : > { %v16368_v46 = vpack.c.bf16 %v16215_v38, %v16215_v38 }
0x2805   : > { %20617 = vmatmul.mubr.msk.bf16.vlgmr.msra.gmra.mxu1 %vm1209_vm4, %v16368_v46  ;;  %20629 = vmatmul.mubr.msk.bf16.vlgmr.msra.gmra.mxu0 %vm1209_vm4, %v16368_v46 }
0x2806   : > { %20633 = vmatpush3.bf16.msra.mxu1 %v22575_v17  ;;  %20640 = vmatprep.mubr.msk.bf16.mxu1 %vm22748_vm0, %v22747_v2 }
0x2807   : > { %20634 = vmatprep.subr.bf16.mxu1 %v22747_v2  ;;  %20648 = vmatprep.mubr.msk.bf16.mxu0 %vm2102_vm6, %v22613_v24 }
0x280a   : > { %20635 = vmatpush3.bf16.msra.mxu1 %v22576_v23 }
0x280b   : > { %20636 = vmatprep.subr.bf16.mxu1 %v22747_v2 }
0x280c   : > { %v16294_v25 = vpop.f32.mrf.mxu1 }
0x280d   : > { %v16359_v21 = vadd.f32 %v24720_v42, %v16294_v25 }
0x280e   : > { %v20594_v9 = vpop.f32.mrf.mxu1  ;;  %20637 = vmatpush3.bf16.msra.mxu1 %v22577_v34 }
0x280f   : > { %20638 = vmatprep.subr.bf16.mxu1 %v22747_v2  ;;  %v16366_v43 = vadd.f32 %v18634_v40, %v16359_v21 }
0x2810   : > { %v16297_v33 = vpop.f32.mrf.mxu1 }
0x2811   : > { %v16367_v3 = vmax.f32 %v16366_v43, 0.0  ;;  %v18673_v33 = vld [vmem:[%s22887_s12 + $0x2] ss:$0 sm:$0xff] }
0x2812   : > { %v20595_v10 = vpop.f32.mrf.mxu1  ;;  %20639 = vmatpush3.bf16.msra.mxu1 %v22578_v26 }
0x2813   : > { %20664 = vmatprep.subr.bf16.mxu1 %v22747_v2  ;;  %v16369_v42 = vpack.c.bf16 %v16367_v3, %v16367_v3 }
0x2815   : > { %20641 = vmatmul.mubr.msk.bf16.vlgmr.msra.gmra.mxu1 %vm1209_vm4, %v16368_v46 }
0x2816   : > { %20672 = vmatprep.mubr.msk.bf16.mxu1 %vm22748_vm0, %v22747_v2  ;;  %20665 = vmatpush3.bf16.msra.mxu1 %v22587_v11 }
0x2817   : > { %20666 = vmatprep.subr.bf16.mxu1 %v22747_v2 }
0x281a   : > { %20667 = vmatpush3.bf16.msra.mxu1 %v22588_v36 }
0x281b   : > { %20668 = vmatprep.subr.bf16.mxu1 %v22747_v2 }
0x281e   : > { %20669 = vmatpush3.bf16.msra.mxu1 %v22589_v59 }
0x281f   : > { %20670 = vmatprep.subr.bf16.mxu1 %v22747_v2 }
0x2822   : > { %20671 = vmatpush3.bf16.msra.mxu1 %v22590_v61 }
0x2823   : > { %20688 = vmatprep.subr.bf16.mxu1 %v22747_v2 }
0x28c5   : > { %v16439_v37 = vpop.f32.mrf.mxu1  ;;  %v16511_v53 = vpop.f32.mrf.mxu0 }
0x28c6   : > { %v16589_v0 = vpack.c.bf16 %v16511_v53, %v16439_v37  ;;  %v18674_v53 = vld [vmem:[%s22892_s6] ss:$0 sm:$0xff] }
0x28c7   : > { %v20618_v32 = vpop.f32.mrf.mxu1  ;;  %v20630_v39 = vpop.f32.mrf.mxu0 }
0x28c9   : > { %v16442_v30 = vpop.f32.mrf.mxu1  ;;  %v16514_v60 = vpop.f32.mrf.mxu0 }
0x28ca   : > { %v18675_v60 = vld [vmem:[#allocation2] ss:$0 sm:$0xff] }
0x28cb   : > { %v20619_v41 = vpop.f32.mrf.mxu1  ;;  %v20631_v63 = vpop.f32.mrf.mxu0 }
0x28d5   : > { %v16583_v20 = vpop.f32.mrf.mxu1 }
0x28d6   : > { %v16590_v31 = vpack.c.bf16 %v16583_v20, %v16583_v20 }
0x28d7   : > { %v20642_v35 = vpop.f32.mrf.mxu1 }
0x28d8   : > { %v16592_v52 = vsel %vm2109_vm7, %v16590_v31, 0  ;;  %20705 = vmatprep.subr.msk.bf16.mxu0 %vm2109_vm7, %v16590_v31 }
0x28d9   : > { %v16586_v54 = vpop.f32.mrf.mxu1  ;;  %20645 = vmatpush3.bf16.msra.mxu0 %v16592_v52 }
0x28da   : > { %20646 = vmatprep.subr.bf16.mxu0 %v16589_v0 }
0x28db   : > { %v20643_v55 = vpop.f32.mrf.mxu1 }
0x28dd   : > { %20647 = vmatpush3.bf16.msra.mxu0 %v16589_v0 }
0x28de   : > { %20652 = vmatprep.subr.bf16.mxu0 %v22747_v2 }
0x28e0   : > { %20649 = vmatmul.mubr.msk.bf16.vlgmr.msra.gmra.mxu0 %vm2102_vm6, %v22614_v56 }
0x28e1   : > { %20653 = vmatpush3.bf16.msra.mxu0 %v22579_v45  ;;  %20660 = vmatprep.mubr.msk.bf16.mxu0 %vm22748_vm0, %v22747_v2 }
0x28e2   : > { %20654 = vmatprep.subr.bf16.mxu0 %v22747_v2 }
0x28e5   : > { %20655 = vmatpush3.bf16.msra.mxu0 %v22580_v19 }
0x28e6   : > { %20656 = vmatprep.subr.bf16.mxu0 %v22747_v2 }
0x28e9   : > { %20657 = vmatpush3.bf16.msra.mxu0 %v22581_v50 }
0x28ea   : > { %20658 = vmatprep.subr.bf16.mxu0 %v22747_v2 }
0x28ed   : > { %20659 = vmatpush3.bf16.msra.mxu0 %v22582_v57 }
0x28ee   : > { %20676 = vmatprep.subr.bf16.mxu0 %v22747_v2 }
0x28f0   : > { %20661 = vmatmul.mubr.msk.bf16.vlgmr.msra.gmra.mxu0 %vm1209_vm4, %v16369_v42 }
0x28f1   : > { %20677 = vmatpush3.bf16.msra.mxu0 %v22583_v29  ;;  %20684 = vmatprep.mubr.msk.bf16.mxu0 %vm22748_vm0, %v22747_v2 }
0x28f2   : > { %20678 = vmatprep.subr.bf16.mxu0 %v22747_v2 }
0x28f5   : > { %20679 = vmatpush3.bf16.msra.mxu0 %v22584_v44 }
0x28f6   : > { %20680 = vmatprep.subr.bf16.mxu0 %v22747_v2 }
0x28f9   : > { %20681 = vmatpush3.bf16.msra.mxu0 %v22585_v18 }
0x28fa   : > { %20682 = vmatprep.subr.bf16.mxu0 %v22747_v2 }
0x28fd   : > { %20683 = vmatpush3.bf16.msra.mxu0 %v22586_v58 }
0x2900   : > { %20685 = vmatmul.mubr.msk.bf16.vlgmr.msra.gmra.mxu0 %vm1209_vm4, %v24652_v47  ;;  %v22592_v47 = vld [vmem:[%s24875_s0 + $0x1d0] sm:$0xff]   ;;  %s1017_s0 = scalar_lea.vmem %s22900_s8, %s24876_s23 }
0x29a0   : > { %v20650_v13 = vpop.f32.mrf.mxu0 }
0x29a2   : > { %v16628_v12 = vpop.f32.mrf.mxu0 }
0x29a3   : > { %v16643_v48 = vmax.f32 %v16628_v12, %v20650_v13 }
0x29a4   : > { %v20651_v49 = vpop.f32.mrf.mxu0 }
0x29a6   : > { %v16631_v28 = vpop.f32.mrf.mxu0 }
0x29a7   : > { %v16644_v15 = vmax.f32 %v16631_v28, %v20651_v49 }
0x29a9   : > { %v16736_v5 = vpack.c.bf16 %v16644_v15, %v16643_v48 }
0x29ab   : > { %20673 = vmatmul.mubr.msk.bf16.vlgmr.msra.gmra.mxu1 %vm1209_vm4, %v16736_v5 }
0x29ac   : > { %20689 = vmatpush3.bf16.msra.mxu1 %v22591_v4  ;;  %20696 = vmatprep.mubr.msk.bf16.mxu1 %vm22748_vm0, %v22747_v2 }
0x29ad   : > { %20690 = vmatprep.subr.bf16.mxu1 %v22747_v2 }
0x29b0   : > { %20691 = vmatpush3.bf16.msra.mxu1 %v22592_v47  ;;  %v16714_v6 = vpop.f32.mrf.mxu0 }
0x29b1   : > { %20692 = vmatprep.subr.bf16.mxu1 %v22747_v2  ;;  %v16876_v8 = vpack.c.bf16 %v16714_v6, %v16714_v6 }
0x29b2   : > { %v20662_v22 = vpop.f32.mrf.mxu0 }
0x29b4   : > { %20693 = vmatpush3.bf16.msra.mxu1 %v22593_v51  ;;  %v16717_v1 = vpop.f32.mrf.mxu0 }
0x29b5   : > { %20694 = vmatprep.subr.bf16.mxu1 %v22747_v2 }
0x29b6   : > { %v20663_v7 = vpop.f32.mrf.mxu0 }
0x29b8   : > { %20695 = vmatpush3.bf16.msra.mxu1 %v22594_v62 }
0x29bb   : > { %20697 = vmatmul.mubr.msk.bf16.vlgmr.msra.gmra.mxu1 %vm1209_vm4, %v16876_v8 }
0x29c0   : > { %v16862_v14 = vpop.f32.mrf.mxu0 }
0x29c2   : > { %v20686_v38 = vpop.f32.mrf.mxu0 }
0x29c4   : > { %v16865_v16 = vpop.f32.mrf.mxu0 }
0x29c6   : > { %v20687_v17 = vpop.f32.mrf.mxu0 }
0x2a6b   : > { %v16798_v46 = vpop.f32.mrf.mxu1 }
0x2a6c   : > { %v16863_v9 = vadd.f32 %v16862_v14, %v16798_v46 }
0x2a6d   : > { %v20674_v23 = vpop.f32.mrf.mxu1 }
0x2a6f   : > { %v16801_v24 = vpop.f32.mrf.mxu1 }
0x2a71   : > { %v20675_v34 = vpop.f32.mrf.mxu1 }
0x2a7b   : > { %v16938_v25 = vpop.f32.mrf.mxu1 }
0x2a7c   : > { %v16947_v2 = vrot.slane %v16938_v25, %v23231_v27  ;;  %v22615_v27 = vld [vmem:[%s22978_s16] sm:$0xff] }
0x2a7d   : > { %v20698_v26 = vpop.f32.mrf.mxu1 }
0x2a7e   : > { %v16948_v10 = vadd.f32 %v16947_v2, %v16863_v9 }
0x2a7f   : > { %v16941_v11 = vpop.f32.mrf.mxu1 }
0x2a80   : > { %v16957_v36 = vadd.f32 %v18673_v33, %v16948_v10 }
0x2a81   : > { %v20699_v37 = vpop.f32.mrf.mxu1 }
0x2a82   : > { %v16958_v32 = vmax.f32 %v16957_v36, 0.0 }
0x2a84   : > { %v16966_v39 = vmul.f32 %v18674_v53, %v16958_v32 }
0x2a86   : > { %v16967_v30 = vsel %vm1209_vm4, %v16966_v39, 0.0 }
0x2a87   : > { %16968 = vadd.xlane.f32.xlu1 %v16967_v30 }
0x2b10   : > { %v16969_v41 = vpop.xlane.xlu1 %16968 }
0x2b11   : > { %v16977_v63 = vadd.f32 %v18675_v60, %v16969_v41 }
0x2b13   : > { %v16978_v20 = vadd.f32 %v22615_v27, %v16977_v63 }
0x2b15   : > { %16980 = vst.msk [vmem:[%s1017_s0] sm:$0xff] %vm16979_vm8, %v16978_v20 }
0x2b16 PF: > { %s73_s7 = sadd.s32 1, %s22708_s7  }
0x2b17   : > { %p70_p2 = scmp.ge.s32.totalorder %s73_s7, 4  }
0x2b19   :  { %72 = sbr.rel (!%p70_p2) target bundleno = 52 (0x34), region = 236 }
0x2b1e   :  { %17000 = vsyncpa [#allocation4], 1 }
0x2b1f   :  { %17002 = vsyncpa [#allocation4 + $0x1], 1 }
0x2b20   :  { %17003 = vsyncpa [#allocation6], 1 }

</bundles_post_ra>
